<compile_context>
chip_gen: v6e
topology: v6e:2x2x1
jax: 0.10.0
libtpu: 0.0.40
codegen_flags: <defaults>
</compile_context>

<pallas_src>
import jax
import jax.numpy as jnp
from jax.experimental import pallas as pl
from jax.experimental.pallas import tpu as pltpu

SOS_token = 1


def _fused_greedy_kernel(seq_ref, emb_ref,
                         wif_ref, whf_ref, bif_ref, bhf_ref,
                         wib_ref, whb_ref, bib_ref, bhb_ref,
                         wdi_ref, wdh_ref, bdi_ref, bdh_ref,
                         wch_ref, wcc_ref, bcat_ref,
                         wout_ref, bout_ref,
                         tok_out_ref, score_out_ref,
                         x_scr, fwd_scr, bwd_scr, tok_scr):
    T, H = x_scr.shape
    V = wout_ref.shape[1]
    max_length = tok_out_ref.shape[0]

    # ------------- embedding gather for the source sequence (fused in-kernel) -------------
    for t in range(T):
        x_scr[pl.ds(t, 1), :] = emb_ref[pl.ds(seq_ref[t], 1), :]
    x = x_scr[...]                                                          # (T, H)

    # ------------- encoder: bidirectional single-layer GRU --------------------------------
    # x-path has no recurrent dependency -> hoist it to one (T, 3H) matmul per direction.
    gi_f = jnp.dot(x, wif_ref[...], preferred_element_type=jnp.float32) + bif_ref[...]
    gi_b = jnp.dot(x, wib_ref[...], preferred_element_type=jnp.float32) + bib_ref[...]

    whf = whf_ref[...]; bhf = bhf_ref[...]
    whb = whb_ref[...]; bhb = bhb_ref[...]

    def gru_step(gi_row, h, w_h, b_h):
        # PyTorch nn.GRU cell semantics, gate order (r, z, n); gi_row precomputed.
        gh = jnp.dot(h, w_h, preferred_element_type=jnp.float32) + b_h      # (1, 3H)
        r = jax.nn.sigmoid(gi_row[:, 0:H] + gh[:, 0:H])
        z = jax.nn.sigmoid(gi_row[:, H:2 * H] + gh[:, H:2 * H])
        n = jnp.tanh(gi_row[:, 2 * H:3 * H] + r * gh[:, 2 * H:3 * H])
        return (1.0 - z) * n + z * h

    h_f = jnp.zeros((1, H), jnp.float32)
    for t in range(T):                                                      # forward pass
        h_f = gru_step(gi_f[t:t + 1, :], h_f, whf, bhf)
        fwd_scr[pl.ds(t, 1), :] = h_f

    h_b = jnp.zeros((1, H), jnp.float32)
    for i in range(T):                                                      # backward pass
        t = T - 1 - i
        h_b = gru_step(gi_b[t:t + 1, :], h_b, whb, bhb)
        bwd_scr[pl.ds(t, 1), :] = h_b

    enc = fwd_scr[...] + bwd_scr[...]                                       # (T, H) fwd+bwd sum
    h_dec = h_f                                                             # encoder_hidden[:n_layers]

    # ------------- greedy decode loop (fully unrolled, no grid) ---------------------------
    wdi = wdi_ref[...]; wdh = wdh_ref[...]; bdi = bdi_ref[...]; bdh = bdh_ref[...]
    wch = wch_ref[...]; wcc = wcc_ref[...]; bcat = bcat_ref[...]
    wout = wout_ref[...]; bout = bout_ref[...]
    iota_v = jax.lax.broadcasted_iota(jnp.int32, (1, V), 1)

    tok_scr[0] = SOS_token
    for step in range(max_length):
        tok = tok_scr[0]
        xd = emb_ref[pl.ds(tok, 1), :]                                      # (1, H) embed lookup

        gi = jnp.dot(xd, wdi, preferred_element_type=jnp.float32) + bdi     # (1, 3H)
        gh = jnp.dot(h_dec, wdh, preferred_element_type=jnp.float32) + bdh
        r = jax.nn.sigmoid(gi[:, 0:H] + gh[:, 0:H])
        z = jax.nn.sigmoid(gi[:, H:2 * H] + gh[:, H:2 * H])
        n = jnp.tanh(gi[:, 2 * H:3 * H] + r * gh[:, 2 * H:3 * H])
        h_dec = (1.0 - z) * n + z * h_dec                                   # (1, H)

        # Luong "dot" attention over source positions.
        att_logits = jax.lax.dot_general(h_dec, enc, (((1,), (1,)), ((), ())),
                                         preferred_element_type=jnp.float32)   # (1, T)
        att = jax.nn.softmax(att_logits, axis=-1)
        context = jnp.dot(att, enc, preferred_element_type=jnp.float32)         # (1, H)

        # concat linear as two split matmuls (no lane-axis concatenation).
        concat_out = jnp.tanh(
            jnp.dot(h_dec, wch, preferred_element_type=jnp.float32)
            + jnp.dot(context, wcc, preferred_element_type=jnp.float32)
            + bcat)                                                              # (1, H)
        logits = (jnp.dot(concat_out, wout, preferred_element_type=jnp.float32)
                  + bout)                                                        # (1, V)

        # torch.max(softmax(logits), dim=1): argmax(probs) == argmax(logits) (first index);
        # winning probability == 1 / sum(exp(logits - max_logit)).
        m = jnp.max(logits, axis=-1, keepdims=True)                              # (1, 1)
        idx_v = jnp.min(jnp.where(logits == m, iota_v, V), axis=-1, keepdims=True)
        denom = jnp.sum(jnp.exp(logits - m), axis=-1, keepdims=True)             # (1, 1)
        best_prob = pl.reciprocal(denom, approx=True)                            # EUP, ~free

        best_idx = idx_v[0, 0]
        tok_scr[0] = best_idx
        tok_out_ref[step] = best_idx
        score_out_ref[step] = best_prob[0, 0]


# ----------------------------------------------------------------------------
# GreedySearchDecoder.forward equivalent: one pallas_call for the whole forward.
# ----------------------------------------------------------------------------
def greedy_search_decoder(params, input_seq, input_length, max_length):
    del input_length  # batch=1, full-length sequence: pack_padded_sequence is a no-op
    # TODO(synk): variable-length packing (pack_padded_sequence) not modeled for batch=1.
    V, H = params['embedding'].shape
    T = input_seq.shape[0]

    # Split the concat projection once at trace time: rows [:H] pair with the GRU output,
    # rows [H:] with the attention context (matches concatenate([h, context]) @ W_cat).
    wcat_h = params['W_cat'][:H, :]
    wcat_c = params['W_cat'][H:, :]

    smem_spec = pl.BlockSpec(memory_space=pltpu.MemorySpace.SMEM)
    vmem_spec = pl.BlockSpec(memory_space=pltpu.MemorySpace.VMEM)
    in_specs = [smem_spec] + [vmem_spec] * 18

    tokens, scores = pl.pallas_call(
        _fused_greedy_kernel,
        out_shape=(jax.ShapeDtypeStruct((max_length,), jnp.int32),
                   jax.ShapeDtypeStruct((max_length,), jnp.float32)),
        in_specs=in_specs,
        out_specs=(smem_spec, smem_spec),
        scratch_shapes=[pltpu.VMEM((T, H), jnp.float32),   # embedded source
                        pltpu.VMEM((T, H), jnp.float32),   # forward-direction outputs
                        pltpu.VMEM((T, H), jnp.float32),   # backward-direction outputs
                        pltpu.SMEM((1,), jnp.int32)],      # current token
    )(input_seq.astype(jnp.int32), params['embedding'],
      params['enc_wi_f'], params['enc_wh_f'], params['enc_bi_f'], params['enc_bh_f'],
      params['enc_wi_b'], params['enc_wh_b'], params['enc_bi_b'], params['enc_bh_b'],
      params['dec_wi'], params['dec_wh'], params['dec_bi'], params['dec_bh'],
      wcat_h, wcat_c, params['b_cat'], params['W_out'], params['b_out'])
    return tokens, scores


def init_params(key, V, H):
    k = float(1.0 / (H ** 0.5))
    keys = jax.random.split(key, 16)

    def u(kk, shape):
        return jax.random.uniform(kk, shape, jnp.float32, -k, k)

    return {
        'embedding': u(keys[0], (V, H)),
        # encoder bidirectional GRU (forward / backward directions)
        'enc_wi_f': u(keys[1], (H, 3 * H)), 'enc_wh_f': u(keys[2], (H, 3 * H)),
        'enc_bi_f': u(keys[3], (1, 3 * H)), 'enc_bh_f': u(keys[4], (1, 3 * H)),
        'enc_wi_b': u(keys[5], (H, 3 * H)), 'enc_wh_b': u(keys[6], (H, 3 * H)),
        'enc_bi_b': u(keys[7], (1, 3 * H)), 'enc_bh_b': u(keys[8], (1, 3 * H)),
        # decoder GRU
        'dec_wi': u(keys[9], (H, 3 * H)), 'dec_wh': u(keys[10], (H, 3 * H)),
        'dec_bi': u(keys[11], (1, 3 * H)), 'dec_bh': u(keys[12], (1, 3 * H)),
        # decoder concat + output projections (stored as [in_features, out_features])
        'W_cat': u(keys[13], (2 * H, H)), 'b_cat': u(keys[14], (1, H)),
        'W_out': u(keys[15], (H, V)), 'b_out': jnp.zeros((1, V), jnp.float32),
    }


if __name__ == "__main__":
    V, H, T, MAX_LENGTH = 128, 32, 8, 10

    key = jax.random.PRNGKey(0)
    pkey, skey = jax.random.split(key)
    params = init_params(pkey, V, H)

    input_seq = jax.random.randint(skey, (T,), 0, V, dtype=jnp.int32)   # (seq_len,)
    input_length = jnp.array([T], dtype=jnp.int32)

    tokens, scores = greedy_search_decoder(params, input_seq, input_length, MAX_LENGTH)
    jax.block_until_ready((tokens, scores))

    assert tokens.shape == (MAX_LENGTH,) and tokens.dtype == jnp.int32
    assert scores.shape == (MAX_LENGTH,) and scores.dtype == jnp.float32
    assert bool(jnp.all(jnp.isfinite(scores)))
    assert bool(jnp.all((tokens >= 0) & (tokens < V)))
    print("KERNEL_OK")
</pallas_src>

<mosaic_0001>
module attributes {stable_mosaic.version = 11 : i64} {
  func.func @_fused_greedy_kernel(%arg0: memref<8xi32, #tpu.memory_space<smem>>, %arg1: memref<128x32xf32, #tpu.memory_space<vmem>>, %arg2: memref<32x96xf32, #tpu.memory_space<vmem>>, %arg3: memref<32x96xf32, #tpu.memory_space<vmem>>, %arg4: memref<1x96xf32, #tpu.memory_space<vmem>>, %arg5: memref<1x96xf32, #tpu.memory_space<vmem>>, %arg6: memref<32x96xf32, #tpu.memory_space<vmem>>, %arg7: memref<32x96xf32, #tpu.memory_space<vmem>>, %arg8: memref<1x96xf32, #tpu.memory_space<vmem>>, %arg9: memref<1x96xf32, #tpu.memory_space<vmem>>, %arg10: memref<32x96xf32, #tpu.memory_space<vmem>>, %arg11: memref<32x96xf32, #tpu.memory_space<vmem>>, %arg12: memref<1x96xf32, #tpu.memory_space<vmem>>, %arg13: memref<1x96xf32, #tpu.memory_space<vmem>>, %arg14: memref<32x32xf32, #tpu.memory_space<vmem>>, %arg15: memref<32x32xf32, #tpu.memory_space<vmem>>, %arg16: memref<1x32xf32, #tpu.memory_space<vmem>>, %arg17: memref<32x128xf32, #tpu.memory_space<vmem>>, %arg18: memref<1x128xf32, #tpu.memory_space<vmem>>, %arg19: memref<10xi32, #tpu.memory_space<smem>>, %arg20: memref<10xf32, #tpu.memory_space<smem>>, %arg21: memref<8x32xf32, #tpu.memory_space<vmem>>, %arg22: memref<8x32xf32, #tpu.memory_space<vmem>>, %arg23: memref<8x32xf32, #tpu.memory_space<vmem>>, %arg24: memref<1xi32, #tpu.memory_space<smem>>) attributes {dimension_semantics = [], scalar_prefetch = 0 : i64, scratch_operands = 4 : i64, tpu.core_type = #tpu.core_type<tc>} {
    %c0 = arith.constant 0 : index
    %0 = memref.load %arg0[%c0] : memref<8xi32, #tpu.memory_space<smem>>
    %1 = arith.index_cast %0 : i32 to index
    %c0_0 = arith.constant 0 : index
    %2 = vector.load %arg1[%1, %c0_0] : memref<128x32xf32, #tpu.memory_space<vmem>>, vector<1x32xf32>
    %c0_1 = arith.constant 0 : index
    %c0_2 = arith.constant 0 : index
    %3 = vector.load %arg21[%c0_1, %c0_2] : memref<8x32xf32, #tpu.memory_space<vmem>>, vector<1x32xf32>
    tpu.vector_store %arg21[%c0_1, %c0_2], %2 {strides = array<i32>} : memref<8x32xf32, #tpu.memory_space<vmem>>, vector<1x32xf32>,
    %c1 = arith.constant 1 : index
    %4 = memref.load %arg0[%c1] : memref<8xi32, #tpu.memory_space<smem>>
    %5 = arith.index_cast %4 : i32 to index
    %c0_3 = arith.constant 0 : index
    %6 = vector.load %arg1[%5, %c0_3] : memref<128x32xf32, #tpu.memory_space<vmem>>, vector<1x32xf32>
    %c1_4 = arith.constant 1 : index
    %c0_5 = arith.constant 0 : index
    %7 = vector.load %arg21[%c1_4, %c0_5] : memref<8x32xf32, #tpu.memory_space<vmem>>, vector<1x32xf32>
    tpu.vector_store %arg21[%c1_4, %c0_5], %6 {strides = array<i32>} : memref<8x32xf32, #tpu.memory_space<vmem>>, vector<1x32xf32>,
    %c2 = arith.constant 2 : index
    %8 = memref.load %arg0[%c2] : memref<8xi32, #tpu.memory_space<smem>>
    %9 = arith.index_cast %8 : i32 to index
    %c0_6 = arith.constant 0 : index
    %10 = vector.load %arg1[%9, %c0_6] : memref<128x32xf32, #tpu.memory_space<vmem>>, vector<1x32xf32>
    %c2_7 = arith.constant 2 : index
    %c0_8 = arith.constant 0 : index
    %11 = vector.load %arg21[%c2_7, %c0_8] : memref<8x32xf32, #tpu.memory_space<vmem>>, vector<1x32xf32>
    tpu.vector_store %arg21[%c2_7, %c0_8], %10 {strides = array<i32>} : memref<8x32xf32, #tpu.memory_space<vmem>>, vector<1x32xf32>,
    %c3 = arith.constant 3 : index
    %12 = memref.load %arg0[%c3] : memref<8xi32, #tpu.memory_space<smem>>
    %13 = arith.index_cast %12 : i32 to index
    %c0_9 = arith.constant 0 : index
    %14 = vector.load %arg1[%13, %c0_9] : memref<128x32xf32, #tpu.memory_space<vmem>>, vector<1x32xf32>
    %c3_10 = arith.constant 3 : index
    %c0_11 = arith.constant 0 : index
    %15 = vector.load %arg21[%c3_10, %c0_11] : memref<8x32xf32, #tpu.memory_space<vmem>>, vector<1x32xf32>
    tpu.vector_store %arg21[%c3_10, %c0_11], %14 {strides = array<i32>} : memref<8x32xf32, #tpu.memory_space<vmem>>, vector<1x32xf32>,
    %c4 = arith.constant 4 : index
    %16 = memref.load %arg0[%c4] : memref<8xi32, #tpu.memory_space<smem>>
    %17 = arith.index_cast %16 : i32 to index
    %c0_12 = arith.constant 0 : index
    %18 = vector.load %arg1[%17, %c0_12] : memref<128x32xf32, #tpu.memory_space<vmem>>, vector<1x32xf32>
    %c4_13 = arith.constant 4 : index
    %c0_14 = arith.constant 0 : index
    %19 = vector.load %arg21[%c4_13, %c0_14] : memref<8x32xf32, #tpu.memory_space<vmem>>, vector<1x32xf32>
    tpu.vector_store %arg21[%c4_13, %c0_14], %18 {strides = array<i32>} : memref<8x32xf32, #tpu.memory_space<vmem>>, vector<1x32xf32>,
    %c5 = arith.constant 5 : index
    %20 = memref.load %arg0[%c5] : memref<8xi32, #tpu.memory_space<smem>>
    %21 = arith.index_cast %20 : i32 to index
    %c0_15 = arith.constant 0 : index
    %22 = vector.load %arg1[%21, %c0_15] : memref<128x32xf32, #tpu.memory_space<vmem>>, vector<1x32xf32>
    %c5_16 = arith.constant 5 : index
    %c0_17 = arith.constant 0 : index
    %23 = vector.load %arg21[%c5_16, %c0_17] : memref<8x32xf32, #tpu.memory_space<vmem>>, vector<1x32xf32>
    tpu.vector_store %arg21[%c5_16, %c0_17], %22 {strides = array<i32>} : memref<8x32xf32, #tpu.memory_space<vmem>>, vector<1x32xf32>,
    %c6 = arith.constant 6 : index
    %24 = memref.load %arg0[%c6] : memref<8xi32, #tpu.memory_space<smem>>
    %25 = arith.index_cast %24 : i32 to index
    %c0_18 = arith.constant 0 : index
    %26 = vector.load %arg1[%25, %c0_18] : memref<128x32xf32, #tpu.memory_space<vmem>>, vector<1x32xf32>
    %c6_19 = arith.constant 6 : index
    %c0_20 = arith.constant 0 : index
    %27 = vector.load %arg21[%c6_19, %c0_20] : memref<8x32xf32, #tpu.memory_space<vmem>>, vector<1x32xf32>
    tpu.vector_store %arg21[%c6_19, %c0_20], %26 {strides = array<i32>} : memref<8x32xf32, #tpu.memory_space<vmem>>, vector<1x32xf32>,
    %c7 = arith.constant 7 : index
    %28 = memref.load %arg0[%c7] : memref<8xi32, #tpu.memory_space<smem>>
    %29 = arith.index_cast %28 : i32 to index
    %c0_21 = arith.constant 0 : index
    %30 = vector.load %arg1[%29, %c0_21] : memref<128x32xf32, #tpu.memory_space<vmem>>, vector<1x32xf32>
    %c7_22 = arith.constant 7 : index
    %c0_23 = arith.constant 0 : index
    %31 = vector.load %arg21[%c7_22, %c0_23] : memref<8x32xf32, #tpu.memory_space<vmem>>, vector<1x32xf32>
    tpu.vector_store %arg21[%c7_22, %c0_23], %30 {strides = array<i32>} : memref<8x32xf32, #tpu.memory_space<vmem>>, vector<1x32xf32>,
    %c0_24 = arith.constant 0 : index
    %c0_25 = arith.constant 0 : index
    %32 = vector.load %arg21[%c0_24, %c0_25] : memref<8x32xf32, #tpu.memory_space<vmem>>, vector<8x32xf32>
    %c0_26 = arith.constant 0 : index
    %c0_27 = arith.constant 0 : index
    %33 = vector.load %arg2[%c0_26, %c0_27] : memref<32x96xf32, #tpu.memory_space<vmem>>, vector<32x96xf32>
    %cst = arith.constant dense<0.000000e+00> : vector<8x96xf32>
    %34 = tpu.matmul %32, %33, %cst {dimension_numbers = #tpu.dot_dimension_numbers<[1], [0], [0], [1], [0, 0, 1, 1], [], []>} : vector<8x32xf32>, vector<32x96xf32>, vector<8x96xf32> -> vector<8x96xf32>
    %c0_28 = arith.constant 0 : index
    %c0_29 = arith.constant 0 : index
    %35 = vector.load %arg4[%c0_28, %c0_29] : memref<1x96xf32, #tpu.memory_space<vmem>>, vector<1x96xf32>
    %36 = vector.broadcast %35 : vector<1x96xf32> to vector<8x96xf32>
    %37 = arith.addf %34, %36 : vector<8x96xf32>
    %c0_30 = arith.constant 0 : index
    %c0_31 = arith.constant 0 : index
    %38 = vector.load %arg6[%c0_30, %c0_31] : memref<32x96xf32, #tpu.memory_space<vmem>>, vector<32x96xf32>
    %cst_32 = arith.constant dense<0.000000e+00> : vector<8x96xf32>
    %39 = tpu.matmul %32, %38, %cst_32 {dimension_numbers = #tpu.dot_dimension_numbers<[1], [0], [0], [1], [0, 0, 1, 1], [], []>} : vector<8x32xf32>, vector<32x96xf32>, vector<8x96xf32> -> vector<8x96xf32>
    %c0_33 = arith.constant 0 : index
    %c0_34 = arith.constant 0 : index
    %40 = vector.load %arg8[%c0_33, %c0_34] : memref<1x96xf32, #tpu.memory_space<vmem>>, vector<1x96xf32>
    %41 = vector.broadcast %40 : vector<1x96xf32> to vector<8x96xf32>
    %42 = arith.addf %39, %41 : vector<8x96xf32>
    %c0_35 = arith.constant 0 : index
    %c0_36 = arith.constant 0 : index
    %43 = vector.load %arg3[%c0_35, %c0_36] : memref<32x96xf32, #tpu.memory_space<vmem>>, vector<32x96xf32>
    %c0_37 = arith.constant 0 : index
    %c0_38 = arith.constant 0 : index
    %44 = vector.load %arg5[%c0_37, %c0_38] : memref<1x96xf32, #tpu.memory_space<vmem>>, vector<1x96xf32>
    %c0_39 = arith.constant 0 : index
    %c0_40 = arith.constant 0 : index
    %45 = vector.load %arg7[%c0_39, %c0_40] : memref<32x96xf32, #tpu.memory_space<vmem>>, vector<32x96xf32>
    %c0_41 = arith.constant 0 : index
    %c0_42 = arith.constant 0 : index
    %46 = vector.load %arg9[%c0_41, %c0_42] : memref<1x96xf32, #tpu.memory_space<vmem>>, vector<1x96xf32>
    %cst_43 = arith.constant 0.000000e+00 : f32
    %47 = vector.broadcast %cst_43 : f32 to vector<1x32xf32>
    %48 = vector.extract_strided_slice %37 {offsets = [0, 0], sizes = [1, 96], strides = [1, 1]} : vector<8x96xf32> to vector<1x96xf32>
    %cst_44 = arith.constant dense<0.000000e+00> : vector<1x96xf32>
    %49 = tpu.matmul %47, %43, %cst_44 {dimension_numbers = #tpu.dot_dimension_numbers<[1], [0], [0], [1], [0, 0, 1, 1], [], []>} : vector<1x32xf32>, vector<32x96xf32>, vector<1x96xf32> -> vector<1x96xf32>
    %50 = arith.addf %49, %44 : vector<1x96xf32>
    %51 = vector.extract_strided_slice %48 {offsets = [0, 0], sizes = [1, 32], strides = [1, 1]} : vector<1x96xf32> to vector<1x32xf32>
    %52 = vector.extract_strided_slice %50 {offsets = [0, 0], sizes = [1, 32], strides = [1, 1]} : vector<1x96xf32> to vector<1x32xf32>
    %53 = arith.addf %51, %52 : vector<1x32xf32>
    %54 = arith.negf %53 : vector<1x32xf32>
    %55 = math.exp %54 : vector<1x32xf32>
    %cst_45 = arith.constant 1.000000e+00 : f32
    %56 = vector.broadcast %cst_45 : f32 to vector<1x32xf32>
    %57 = arith.addf %56, %55 : vector<1x32xf32>
    %58 = arith.divf %56, %57 : vector<1x32xf32>
    %59 = vector.extract_strided_slice %48 {offsets = [0, 32], sizes = [1, 32], strides = [1, 1]} : vector<1x96xf32> to vector<1x32xf32>
    %60 = vector.extract_strided_slice %50 {offsets = [0, 32], sizes = [1, 32], strides = [1, 1]} : vector<1x96xf32> to vector<1x32xf32>
    %61 = arith.addf %59, %60 : vector<1x32xf32>
    %62 = arith.negf %61 : vector<1x32xf32>
    %63 = math.exp %62 : vector<1x32xf32>
    %cst_46 = arith.constant 1.000000e+00 : f32
    %64 = vector.broadcast %cst_46 : f32 to vector<1x32xf32>
    %65 = arith.addf %64, %63 : vector<1x32xf32>
    %66 = arith.divf %64, %65 : vector<1x32xf32>
    %67 = vector.extract_strided_slice %48 {offsets = [0, 64], sizes = [1, 32], strides = [1, 1]} : vector<1x96xf32> to vector<1x32xf32>
    %68 = vector.extract_strided_slice %50 {offsets = [0, 64], sizes = [1, 32], strides = [1, 1]} : vector<1x96xf32> to vector<1x32xf32>
    %69 = arith.mulf %58, %68 : vector<1x32xf32>
    %70 = arith.addf %67, %69 : vector<1x32xf32>
    %71 = math.tanh %70 : vector<1x32xf32>
    %cst_47 = arith.constant 1.000000e+00 : f32
    %72 = vector.broadcast %cst_47 : f32 to vector<1x32xf32>
    %73 = arith.subf %72, %66 : vector<1x32xf32>
    %74 = arith.mulf %73, %71 : vector<1x32xf32>
    %75 = arith.mulf %66, %47 : vector<1x32xf32>
    %76 = arith.addf %74, %75 : vector<1x32xf32>
    %c0_48 = arith.constant 0 : index
    %c0_49 = arith.constant 0 : index
    %77 = vector.load %arg22[%c0_48, %c0_49] : memref<8x32xf32, #tpu.memory_space<vmem>>, vector<1x32xf32>
    tpu.vector_store %arg22[%c0_48, %c0_49], %76 {strides = array<i32>} : memref<8x32xf32, #tpu.memory_space<vmem>>, vector<1x32xf32>,
    %78 = vector.extract_strided_slice %37 {offsets = [1, 0], sizes = [1, 96], strides = [1, 1]} : vector<8x96xf32> to vector<1x96xf32>
    %cst_50 = arith.constant dense<0.000000e+00> : vector<1x96xf32>
    %79 = tpu.matmul %76, %43, %cst_50 {dimension_numbers = #tpu.dot_dimension_numbers<[1], [0], [0], [1], [0, 0, 1, 1], [], []>} : vector<1x32xf32>, vector<32x96xf32>, vector<1x96xf32> -> vector<1x96xf32>
    %80 = arith.addf %79, %44 : vector<1x96xf32>
    %81 = vector.extract_strided_slice %78 {offsets = [0, 0], sizes = [1, 32], strides = [1, 1]} : vector<1x96xf32> to vector<1x32xf32>
    %82 = vector.extract_strided_slice %80 {offsets = [0, 0], sizes = [1, 32], strides = [1, 1]} : vector<1x96xf32> to vector<1x32xf32>
    %83 = arith.addf %81, %82 : vector<1x32xf32>
    %84 = arith.negf %83 : vector<1x32xf32>
    %85 = math.exp %84 : vector<1x32xf32>
    %cst_51 = arith.constant 1.000000e+00 : f32
    %86 = vector.broadcast %cst_51 : f32 to vector<1x32xf32>
    %87 = arith.addf %86, %85 : vector<1x32xf32>
    %88 = arith.divf %86, %87 : vector<1x32xf32>
    %89 = vector.extract_strided_slice %78 {offsets = [0, 32], sizes = [1, 32], strides = [1, 1]} : vector<1x96xf32> to vector<1x32xf32>
    %90 = vector.extract_strided_slice %80 {offsets = [0, 32], sizes = [1, 32], strides = [1, 1]} : vector<1x96xf32> to vector<1x32xf32>
    %91 = arith.addf %89, %90 : vector<1x32xf32>
    %92 = arith.negf %91 : vector<1x32xf32>
    %93 = math.exp %92 : vector<1x32xf32>
    %cst_52 = arith.constant 1.000000e+00 : f32
    %94 = vector.broadcast %cst_52 : f32 to vector<1x32xf32>
    %95 = arith.addf %94, %93 : vector<1x32xf32>
    %96 = arith.divf %94, %95 : vector<1x32xf32>
    %97 = vector.extract_strided_slice %78 {offsets = [0, 64], sizes = [1, 32], strides = [1, 1]} : vector<1x96xf32> to vector<1x32xf32>
    %98 = vector.extract_strided_slice %80 {offsets = [0, 64], sizes = [1, 32], strides = [1, 1]} : vector<1x96xf32> to vector<1x32xf32>
    %99 = arith.mulf %88, %98 : vector<1x32xf32>
    %100 = arith.addf %97, %99 : vector<1x32xf32>
    %101 = math.tanh %100 : vector<1x32xf32>
    %cst_53 = arith.constant 1.000000e+00 : f32
    %102 = vector.broadcast %cst_53 : f32 to vector<1x32xf32>
    %103 = arith.subf %102, %96 : vector<1x32xf32>
    %104 = arith.mulf %103, %101 : vector<1x32xf32>
    %105 = arith.mulf %96, %76 : vector<1x32xf32>
    %106 = arith.addf %104, %105 : vector<1x32xf32>
    %c1_54 = arith.constant 1 : index
    %c0_55 = arith.constant 0 : index
    %107 = vector.load %arg22[%c1_54, %c0_55] : memref<8x32xf32, #tpu.memory_space<vmem>>, vector<1x32xf32>
    tpu.vector_store %arg22[%c1_54, %c0_55], %106 {strides = array<i32>} : memref<8x32xf32, #tpu.memory_space<vmem>>, vector<1x32xf32>,
    %108 = vector.extract_strided_slice %37 {offsets = [2, 0], sizes = [1, 96], strides = [1, 1]} : vector<8x96xf32> to vector<1x96xf32>
    %cst_56 = arith.constant dense<0.000000e+00> : vector<1x96xf32>
    %109 = tpu.matmul %106, %43, %cst_56 {dimension_numbers = #tpu.dot_dimension_numbers<[1], [0], [0], [1], [0, 0, 1, 1], [], []>} : vector<1x32xf32>, vector<32x96xf32>, vector<1x96xf32> -> vector<1x96xf32>
    %110 = arith.addf %109, %44 : vector<1x96xf32>
    %111 = vector.extract_strided_slice %108 {offsets = [0, 0], sizes = [1, 32], strides = [1, 1]} : vector<1x96xf32> to vector<1x32xf32>
    %112 = vector.extract_strided_slice %110 {offsets = [0, 0], sizes = [1, 32], strides = [1, 1]} : vector<1x96xf32> to vector<1x32xf32>
    %113 = arith.addf %111, %112 : vector<1x32xf32>
    %114 = arith.negf %113 : vector<1x32xf32>
    %115 = math.exp %114 : vector<1x32xf32>
    %cst_57 = arith.constant 1.000000e+00 : f32
    %116 = vector.broadcast %cst_57 : f32 to vector<1x32xf32>
    %117 = arith.addf %116, %115 : vector<1x32xf32>
    %118 = arith.divf %116, %117 : vector<1x32xf32>
    %119 = vector.extract_strided_slice %108 {offsets = [0, 32], sizes = [1, 32], strides = [1, 1]} : vector<1x96xf32> to vector<1x32xf32>
    %120 = vector.extract_strided_slice %110 {offsets = [0, 32], sizes = [1, 32], strides = [1, 1]} : vector<1x96xf32> to vector<1x32xf32>
    %121 = arith.addf %119, %120 : vector<1x32xf32>
    %122 = arith.negf %121 : vector<1x32xf32>
    %123 = math.exp %122 : vector<1x32xf32>
    %cst_58 = arith.constant 1.000000e+00 : f32
    %124 = vector.broadcast %cst_58 : f32 to vector<1x32xf32>
    %125 = arith.addf %124, %123 : vector<1x32xf32>
    %126 = arith.divf %124, %125 : vector<1x32xf32>
    %127 = vector.extract_strided_slice %108 {offsets = [0, 64], sizes = [1, 32], strides = [1, 1]} : vector<1x96xf32> to vector<1x32xf32>
    %128 = vector.extract_strided_slice %110 {offsets = [0, 64], sizes = [1, 32], strides = [1, 1]} : vector<1x96xf32> to vector<1x32xf32>
    %129 = arith.mulf %118, %128 : vector<1x32xf32>
    %130 = arith.addf %127, %129 : vector<1x32xf32>
    %131 = math.tanh %130 : vector<1x32xf32>
    %cst_59 = arith.constant 1.000000e+00 : f32
    %132 = vector.broadcast %cst_59 : f32 to vector<1x32xf32>
    %133 = arith.subf %132, %126 : vector<1x32xf32>
    %134 = arith.mulf %133, %131 : vector<1x32xf32>
    %135 = arith.mulf %126, %106 : vector<1x32xf32>
    %136 = arith.addf %134, %135 : vector<1x32xf32>
    %c2_60 = arith.constant 2 : index
    %c0_61 = arith.constant 0 : index
    %137 = vector.load %arg22[%c2_60, %c0_61] : memref<8x32xf32, #tpu.memory_space<vmem>>, vector<1x32xf32>
    tpu.vector_store %arg22[%c2_60, %c0_61], %136 {strides = array<i32>} : memref<8x32xf32, #tpu.memory_space<vmem>>, vector<1x32xf32>,
    %138 = vector.extract_strided_slice %37 {offsets = [3, 0], sizes = [1, 96], strides = [1, 1]} : vector<8x96xf32> to vector<1x96xf32>
    %cst_62 = arith.constant dense<0.000000e+00> : vector<1x96xf32>
    %139 = tpu.matmul %136, %43, %cst_62 {dimension_numbers = #tpu.dot_dimension_numbers<[1], [0], [0], [1], [0, 0, 1, 1], [], []>} : vector<1x32xf32>, vector<32x96xf32>, vector<1x96xf32> -> vector<1x96xf32>
    %140 = arith.addf %139, %44 : vector<1x96xf32>
    %141 = vector.extract_strided_slice %138 {offsets = [0, 0], sizes = [1, 32], strides = [1, 1]} : vector<1x96xf32> to vector<1x32xf32>
    %142 = vector.extract_strided_slice %140 {offsets = [0, 0], sizes = [1, 32], strides = [1, 1]} : vector<1x96xf32> to vector<1x32xf32>
    %143 = arith.addf %141, %142 : vector<1x32xf32>
    %144 = arith.negf %143 : vector<1x32xf32>
    %145 = math.exp %144 : vector<1x32xf32>
    %cst_63 = arith.constant 1.000000e+00 : f32
    %146 = vector.broadcast %cst_63 : f32 to vector<1x32xf32>
    %147 = arith.addf %146, %145 : vector<1x32xf32>
    %148 = arith.divf %146, %147 : vector<1x32xf32>
    %149 = vector.extract_strided_slice %138 {offsets = [0, 32], sizes = [1, 32], strides = [1, 1]} : vector<1x96xf32> to vector<1x32xf32>
    %150 = vector.extract_strided_slice %140 {offsets = [0, 32], sizes = [1, 32], strides = [1, 1]} : vector<1x96xf32> to vector<1x32xf32>
    %151 = arith.addf %149, %150 : vector<1x32xf32>
    %152 = arith.negf %151 : vector<1x32xf32>
    %153 = math.exp %152 : vector<1x32xf32>
    %cst_64 = arith.constant 1.000000e+00 : f32
    %154 = vector.broadcast %cst_64 : f32 to vector<1x32xf32>
    %155 = arith.addf %154, %153 : vector<1x32xf32>
    %156 = arith.divf %154, %155 : vector<1x32xf32>
    %157 = vector.extract_strided_slice %138 {offsets = [0, 64], sizes = [1, 32], strides = [1, 1]} : vector<1x96xf32> to vector<1x32xf32>
    %158 = vector.extract_strided_slice %140 {offsets = [0, 64], sizes = [1, 32], strides = [1, 1]} : vector<1x96xf32> to vector<1x32xf32>
    %159 = arith.mulf %148, %158 : vector<1x32xf32>
    %160 = arith.addf %157, %159 : vector<1x32xf32>
    %161 = math.tanh %160 : vector<1x32xf32>
    %cst_65 = arith.constant 1.000000e+00 : f32
    %162 = vector.broadcast %cst_65 : f32 to vector<1x32xf32>
    %163 = arith.subf %162, %156 : vector<1x32xf32>
    %164 = arith.mulf %163, %161 : vector<1x32xf32>
    %165 = arith.mulf %156, %136 : vector<1x32xf32>
    %166 = arith.addf %164, %165 : vector<1x32xf32>
    %c3_66 = arith.constant 3 : index
    %c0_67 = arith.constant 0 : index
    %167 = vector.load %arg22[%c3_66, %c0_67] : memref<8x32xf32, #tpu.memory_space<vmem>>, vector<1x32xf32>
    tpu.vector_store %arg22[%c3_66, %c0_67], %166 {strides = array<i32>} : memref<8x32xf32, #tpu.memory_space<vmem>>, vector<1x32xf32>,
    %168 = vector.extract_strided_slice %37 {offsets = [4, 0], sizes = [1, 96], strides = [1, 1]} : vector<8x96xf32> to vector<1x96xf32>
    %cst_68 = arith.constant dense<0.000000e+00> : vector<1x96xf32>
    %169 = tpu.matmul %166, %43, %cst_68 {dimension_numbers = #tpu.dot_dimension_numbers<[1], [0], [0], [1], [0, 0, 1, 1], [], []>} : vector<1x32xf32>, vector<32x96xf32>, vector<1x96xf32> -> vector<1x96xf32>
    %170 = arith.addf %169, %44 : vector<1x96xf32>
    %171 = vector.extract_strided_slice %168 {offsets = [0, 0], sizes = [1, 32], strides = [1, 1]} : vector<1x96xf32> to vector<1x32xf32>
    %172 = vector.extract_strided_slice %170 {offsets = [0, 0], sizes = [1, 32], strides = [1, 1]} : vector<1x96xf32> to vector<1x32xf32>
    %173 = arith.addf %171, %172 : vector<1x32xf32>
    %174 = arith.negf %173 : vector<1x32xf32>
    %175 = math.exp %174 : vector<1x32xf32>
    %cst_69 = arith.constant 1.000000e+00 : f32
    %176 = vector.broadcast %cst_69 : f32 to vector<1x32xf32>
    %177 = arith.addf %176, %175 : vector<1x32xf32>
    %178 = arith.divf %176, %177 : vector<1x32xf32>
    %179 = vector.extract_strided_slice %168 {offsets = [0, 32], sizes = [1, 32], strides = [1, 1]} : vector<1x96xf32> to vector<1x32xf32>
    %180 = vector.extract_strided_slice %170 {offsets = [0, 32], sizes = [1, 32], strides = [1, 1]} : vector<1x96xf32> to vector<1x32xf32>
    %181 = arith.addf %179, %180 : vector<1x32xf32>
    %182 = arith.negf %181 : vector<1x32xf32>
    %183 = math.exp %182 : vector<1x32xf32>
    %cst_70 = arith.constant 1.000000e+00 : f32
    %184 = vector.broadcast %cst_70 : f32 to vector<1x32xf32>
    %185 = arith.addf %184, %183 : vector<1x32xf32>
    %186 = arith.divf %184, %185 : vector<1x32xf32>
    %187 = vector.extract_strided_slice %168 {offsets = [0, 64], sizes = [1, 32], strides = [1, 1]} : vector<1x96xf32> to vector<1x32xf32>
    %188 = vector.extract_strided_slice %170 {offsets = [0, 64], sizes = [1, 32], strides = [1, 1]} : vector<1x96xf32> to vector<1x32xf32>
    %189 = arith.mulf %178, %188 : vector<1x32xf32>
    %190 = arith.addf %187, %189 : vector<1x32xf32>
    %191 = math.tanh %190 : vector<1x32xf32>
    %cst_71 = arith.constant 1.000000e+00 : f32
    %192 = vector.broadcast %cst_71 : f32 to vector<1x32xf32>
    %193 = arith.subf %192, %186 : vector<1x32xf32>
    %194 = arith.mulf %193, %191 : vector<1x32xf32>
    %195 = arith.mulf %186, %166 : vector<1x32xf32>
    %196 = arith.addf %194, %195 : vector<1x32xf32>
    %c4_72 = arith.constant 4 : index
    %c0_73 = arith.constant 0 : index
    %197 = vector.load %arg22[%c4_72, %c0_73] : memref<8x32xf32, #tpu.memory_space<vmem>>, vector<1x32xf32>
    tpu.vector_store %arg22[%c4_72, %c0_73], %196 {strides = array<i32>} : memref<8x32xf32, #tpu.memory_space<vmem>>, vector<1x32xf32>,
    %198 = vector.extract_strided_slice %37 {offsets = [5, 0], sizes = [1, 96], strides = [1, 1]} : vector<8x96xf32> to vector<1x96xf32>
    %cst_74 = arith.constant dense<0.000000e+00> : vector<1x96xf32>
    %199 = tpu.matmul %196, %43, %cst_74 {dimension_numbers = #tpu.dot_dimension_numbers<[1], [0], [0], [1], [0, 0, 1, 1], [], []>} : vector<1x32xf32>, vector<32x96xf32>, vector<1x96xf32> -> vector<1x96xf32>
    %200 = arith.addf %199, %44 : vector<1x96xf32>
    %201 = vector.extract_strided_slice %198 {offsets = [0, 0], sizes = [1, 32], strides = [1, 1]} : vector<1x96xf32> to vector<1x32xf32>
    %202 = vector.extract_strided_slice %200 {offsets = [0, 0], sizes = [1, 32], strides = [1, 1]} : vector<1x96xf32> to vector<1x32xf32>
    %203 = arith.addf %201, %202 : vector<1x32xf32>
    %204 = arith.negf %203 : vector<1x32xf32>
    %205 = math.exp %204 : vector<1x32xf32>
    %cst_75 = arith.constant 1.000000e+00 : f32
    %206 = vector.broadcast %cst_75 : f32 to vector<1x32xf32>
    %207 = arith.addf %206, %205 : vector<1x32xf32>
    %208 = arith.divf %206, %207 : vector<1x32xf32>
    %209 = vector.extract_strided_slice %198 {offsets = [0, 32], sizes = [1, 32], strides = [1, 1]} : vector<1x96xf32> to vector<1x32xf32>
    %210 = vector.extract_strided_slice %200 {offsets = [0, 32], sizes = [1, 32], strides = [1, 1]} : vector<1x96xf32> to vector<1x32xf32>
    %211 = arith.addf %209, %210 : vector<1x32xf32>
    %212 = arith.negf %211 : vector<1x32xf32>
    %213 = math.exp %212 : vector<1x32xf32>
    %cst_76 = arith.constant 1.000000e+00 : f32
    %214 = vector.broadcast %cst_76 : f32 to vector<1x32xf32>
    %215 = arith.addf %214, %213 : vector<1x32xf32>
    %216 = arith.divf %214, %215 : vector<1x32xf32>
    %217 = vector.extract_strided_slice %198 {offsets = [0, 64], sizes = [1, 32], strides = [1, 1]} : vector<1x96xf32> to vector<1x32xf32>
    %218 = vector.extract_strided_slice %200 {offsets = [0, 64], sizes = [1, 32], strides = [1, 1]} : vector<1x96xf32> to vector<1x32xf32>
    %219 = arith.mulf %208, %218 : vector<1x32xf32>
    %220 = arith.addf %217, %219 : vector<1x32xf32>
    %221 = math.tanh %220 : vector<1x32xf32>
    %cst_77 = arith.constant 1.000000e+00 : f32
    %222 = vector.broadcast %cst_77 : f32 to vector<1x32xf32>
    %223 = arith.subf %222, %216 : vector<1x32xf32>
    %224 = arith.mulf %223, %221 : vector<1x32xf32>
    %225 = arith.mulf %216, %196 : vector<1x32xf32>
    %226 = arith.addf %224, %225 : vector<1x32xf32>
    %c5_78 = arith.constant 5 : index
    %c0_79 = arith.constant 0 : index
    %227 = vector.load %arg22[%c5_78, %c0_79] : memref<8x32xf32, #tpu.memory_space<vmem>>, vector<1x32xf32>
    tpu.vector_store %arg22[%c5_78, %c0_79], %226 {strides = array<i32>} : memref<8x32xf32, #tpu.memory_space<vmem>>, vector<1x32xf32>,
    %228 = vector.extract_strided_slice %37 {offsets = [6, 0], sizes = [1, 96], strides = [1, 1]} : vector<8x96xf32> to vector<1x96xf32>
    %cst_80 = arith.constant dense<0.000000e+00> : vector<1x96xf32>
    %229 = tpu.matmul %226, %43, %cst_80 {dimension_numbers = #tpu.dot_dimension_numbers<[1], [0], [0], [1], [0, 0, 1, 1], [], []>} : vector<1x32xf32>, vector<32x96xf32>, vector<1x96xf32> -> vector<1x96xf32>
    %230 = arith.addf %229, %44 : vector<1x96xf32>
    %231 = vector.extract_strided_slice %228 {offsets = [0, 0], sizes = [1, 32], strides = [1, 1]} : vector<1x96xf32> to vector<1x32xf32>
    %232 = vector.extract_strided_slice %230 {offsets = [0, 0], sizes = [1, 32], strides = [1, 1]} : vector<1x96xf32> to vector<1x32xf32>
    %233 = arith.addf %231, %232 : vector<1x32xf32>
    %234 = arith.negf %233 : vector<1x32xf32>
    %235 = math.exp %234 : vector<1x32xf32>
    %cst_81 = arith.constant 1.000000e+00 : f32
    %236 = vector.broadcast %cst_81 : f32 to vector<1x32xf32>
    %237 = arith.addf %236, %235 : vector<1x32xf32>
    %238 = arith.divf %236, %237 : vector<1x32xf32>
    %239 = vector.extract_strided_slice %228 {offsets = [0, 32], sizes = [1, 32], strides = [1, 1]} : vector<1x96xf32> to vector<1x32xf32>
    %240 = vector.extract_strided_slice %230 {offsets = [0, 32], sizes = [1, 32], strides = [1, 1]} : vector<1x96xf32> to vector<1x32xf32>
    %241 = arith.addf %239, %240 : vector<1x32xf32>
    %242 = arith.negf %241 : vector<1x32xf32>
    %243 = math.exp %242 : vector<1x32xf32>
    %cst_82 = arith.constant 1.000000e+00 : f32
    %244 = vector.broadcast %cst_82 : f32 to vector<1x32xf32>
    %245 = arith.addf %244, %243 : vector<1x32xf32>
    %246 = arith.divf %244, %245 : vector<1x32xf32>
    %247 = vector.extract_strided_slice %228 {offsets = [0, 64], sizes = [1, 32], strides = [1, 1]} : vector<1x96xf32> to vector<1x32xf32>
    %248 = vector.extract_strided_slice %230 {offsets = [0, 64], sizes = [1, 32], strides = [1, 1]} : vector<1x96xf32> to vector<1x32xf32>
    %249 = arith.mulf %238, %248 : vector<1x32xf32>
    %250 = arith.addf %247, %249 : vector<1x32xf32>
    %251 = math.tanh %250 : vector<1x32xf32>
    %cst_83 = arith.constant 1.000000e+00 : f32
    %252 = vector.broadcast %cst_83 : f32 to vector<1x32xf32>
    %253 = arith.subf %252, %246 : vector<1x32xf32>
    %254 = arith.mulf %253, %251 : vector<1x32xf32>
    %255 = arith.mulf %246, %226 : vector<1x32xf32>
    %256 = arith.addf %254, %255 : vector<1x32xf32>
    %c6_84 = arith.constant 6 : index
    %c0_85 = arith.constant 0 : index
    %257 = vector.load %arg22[%c6_84, %c0_85] : memref<8x32xf32, #tpu.memory_space<vmem>>, vector<1x32xf32>
    tpu.vector_store %arg22[%c6_84, %c0_85], %256 {strides = array<i32>} : memref<8x32xf32, #tpu.memory_space<vmem>>, vector<1x32xf32>,
    %258 = vector.extract_strided_slice %37 {offsets = [7, 0], sizes = [1, 96], strides = [1, 1]} : vector<8x96xf32> to vector<1x96xf32>
    %cst_86 = arith.constant dense<0.000000e+00> : vector<1x96xf32>
    %259 = tpu.matmul %256, %43, %cst_86 {dimension_numbers = #tpu.dot_dimension_numbers<[1], [0], [0], [1], [0, 0, 1, 1], [], []>} : vector<1x32xf32>, vector<32x96xf32>, vector<1x96xf32> -> vector<1x96xf32>
    %260 = arith.addf %259, %44 : vector<1x96xf32>
    %261 = vector.extract_strided_slice %258 {offsets = [0, 0], sizes = [1, 32], strides = [1, 1]} : vector<1x96xf32> to vector<1x32xf32>
    %262 = vector.extract_strided_slice %260 {offsets = [0, 0], sizes = [1, 32], strides = [1, 1]} : vector<1x96xf32> to vector<1x32xf32>
    %263 = arith.addf %261, %262 : vector<1x32xf32>
    %264 = arith.negf %263 : vector<1x32xf32>
    %265 = math.exp %264 : vector<1x32xf32>
    %cst_87 = arith.constant 1.000000e+00 : f32
    %266 = vector.broadcast %cst_87 : f32 to vector<1x32xf32>
    %267 = arith.addf %266, %265 : vector<1x32xf32>
    %268 = arith.divf %266, %267 : vector<1x32xf32>
    %269 = vector.extract_strided_slice %258 {offsets = [0, 32], sizes = [1, 32], strides = [1, 1]} : vector<1x96xf32> to vector<1x32xf32>
    %270 = vector.extract_strided_slice %260 {offsets = [0, 32], sizes = [1, 32], strides = [1, 1]} : vector<1x96xf32> to vector<1x32xf32>
    %271 = arith.addf %269, %270 : vector<1x32xf32>
    %272 = arith.negf %271 : vector<1x32xf32>
    %273 = math.exp %272 : vector<1x32xf32>
    %cst_88 = arith.constant 1.000000e+00 : f32
    %274 = vector.broadcast %cst_88 : f32 to vector<1x32xf32>
    %275 = arith.addf %274, %273 : vector<1x32xf32>
    %276 = arith.divf %274, %275 : vector<1x32xf32>
    %277 = vector.extract_strided_slice %258 {offsets = [0, 64], sizes = [1, 32], strides = [1, 1]} : vector<1x96xf32> to vector<1x32xf32>
    %278 = vector.extract_strided_slice %260 {offsets = [0, 64], sizes = [1, 32], strides = [1, 1]} : vector<1x96xf32> to vector<1x32xf32>
    %279 = arith.mulf %268, %278 : vector<1x32xf32>
    %280 = arith.addf %277, %279 : vector<1x32xf32>
    %281 = math.tanh %280 : vector<1x32xf32>
    %cst_89 = arith.constant 1.000000e+00 : f32
    %282 = vector.broadcast %cst_89 : f32 to vector<1x32xf32>
    %283 = arith.subf %282, %276 : vector<1x32xf32>
    %284 = arith.mulf %283, %281 : vector<1x32xf32>
    %285 = arith.mulf %276, %256 : vector<1x32xf32>
    %286 = arith.addf %284, %285 : vector<1x32xf32>
    %c7_90 = arith.constant 7 : index
    %c0_91 = arith.constant 0 : index
    %287 = vector.load %arg22[%c7_90, %c0_91] : memref<8x32xf32, #tpu.memory_space<vmem>>, vector<1x32xf32>
    tpu.vector_store %arg22[%c7_90, %c0_91], %286 {strides = array<i32>} : memref<8x32xf32, #tpu.memory_space<vmem>>, vector<1x32xf32>,
    %cst_92 = arith.constant 0.000000e+00 : f32
    %288 = vector.broadcast %cst_92 : f32 to vector<1x32xf32>
    %289 = vector.extract_strided_slice %42 {offsets = [7, 0], sizes = [1, 96], strides = [1, 1]} : vector<8x96xf32> to vector<1x96xf32>
    %cst_93 = arith.constant dense<0.000000e+00> : vector<1x96xf32>
    %290 = tpu.matmul %288, %45, %cst_93 {dimension_numbers = #tpu.dot_dimension_numbers<[1], [0], [0], [1], [0, 0, 1, 1], [], []>} : vector<1x32xf32>, vector<32x96xf32>, vector<1x96xf32> -> vector<1x96xf32>
    %291 = arith.addf %290, %46 : vector<1x96xf32>
    %292 = vector.extract_strided_slice %289 {offsets = [0, 0], sizes = [1, 32], strides = [1, 1]} : vector<1x96xf32> to vector<1x32xf32>
    %293 = vector.extract_strided_slice %291 {offsets = [0, 0], sizes = [1, 32], strides = [1, 1]} : vector<1x96xf32> to vector<1x32xf32>
    %294 = arith.addf %292, %293 : vector<1x32xf32>
    %295 = arith.negf %294 : vector<1x32xf32>
    %296 = math.exp %295 : vector<1x32xf32>
    %cst_94 = arith.constant 1.000000e+00 : f32
    %297 = vector.broadcast %cst_94 : f32 to vector<1x32xf32>
    %298 = arith.addf %297, %296 : vector<1x32xf32>
    %299 = arith.divf %297, %298 : vector<1x32xf32>
    %300 = vector.extract_strided_slice %289 {offsets = [0, 32], sizes = [1, 32], strides = [1, 1]} : vector<1x96xf32> to vector<1x32xf32>
    %301 = vector.extract_strided_slice %291 {offsets = [0, 32], sizes = [1, 32], strides = [1, 1]} : vector<1x96xf32> to vector<1x32xf32>
    %302 = arith.addf %300, %301 : vector<1x32xf32>
    %303 = arith.negf %302 : vector<1x32xf32>
    %304 = math.exp %303 : vector<1x32xf32>
    %cst_95 = arith.constant 1.000000e+00 : f32
    %305 = vector.broadcast %cst_95 : f32 to vector<1x32xf32>
    %306 = arith.addf %305, %304 : vector<1x32xf32>
    %307 = arith.divf %305, %306 : vector<1x32xf32>
    %308 = vector.extract_strided_slice %289 {offsets = [0, 64], sizes = [1, 32], strides = [1, 1]} : vector<1x96xf32> to vector<1x32xf32>
    %309 = vector.extract_strided_slice %291 {offsets = [0, 64], sizes = [1, 32], strides = [1, 1]} : vector<1x96xf32> to vector<1x32xf32>
    %310 = arith.mulf %299, %309 : vector<1x32xf32>
    %311 = arith.addf %308, %310 : vector<1x32xf32>
    %312 = math.tanh %311 : vector<1x32xf32>
    %cst_96 = arith.constant 1.000000e+00 : f32
    %313 = vector.broadcast %cst_96 : f32 to vector<1x32xf32>
    %314 = arith.subf %313, %307 : vector<1x32xf32>
    %315 = arith.mulf %314, %312 : vector<1x32xf32>
    %316 = arith.mulf %307, %288 : vector<1x32xf32>
    %317 = arith.addf %315, %316 : vector<1x32xf32>
    %c7_97 = arith.constant 7 : index
    %c0_98 = arith.constant 0 : index
    %318 = vector.load %arg23[%c7_97, %c0_98] : memref<8x32xf32, #tpu.memory_space<vmem>>, vector<1x32xf32>
    tpu.vector_store %arg23[%c7_97, %c0_98], %317 {strides = array<i32>} : memref<8x32xf32, #tpu.memory_space<vmem>>, vector<1x32xf32>,
    %319 = vector.extract_strided_slice %42 {offsets = [6, 0], sizes = [1, 96], strides = [1, 1]} : vector<8x96xf32> to vector<1x96xf32>
    %cst_99 = arith.constant dense<0.000000e+00> : vector<1x96xf32>
    %320 = tpu.matmul %317, %45, %cst_99 {dimension_numbers = #tpu.dot_dimension_numbers<[1], [0], [0], [1], [0, 0, 1, 1], [], []>} : vector<1x32xf32>, vector<32x96xf32>, vector<1x96xf32> -> vector<1x96xf32>
    %321 = arith.addf %320, %46 : vector<1x96xf32>
    %322 = vector.extract_strided_slice %319 {offsets = [0, 0], sizes = [1, 32], strides = [1, 1]} : vector<1x96xf32> to vector<1x32xf32>
    %323 = vector.extract_strided_slice %321 {offsets = [0, 0], sizes = [1, 32], strides = [1, 1]} : vector<1x96xf32> to vector<1x32xf32>
    %324 = arith.addf %322, %323 : vector<1x32xf32>
    %325 = arith.negf %324 : vector<1x32xf32>
    %326 = math.exp %325 : vector<1x32xf32>
    %cst_100 = arith.constant 1.000000e+00 : f32
    %327 = vector.broadcast %cst_100 : f32 to vector<1x32xf32>
    %328 = arith.addf %327, %326 : vector<1x32xf32>
    %329 = arith.divf %327, %328 : vector<1x32xf32>
    %330 = vector.extract_strided_slice %319 {offsets = [0, 32], sizes = [1, 32], strides = [1, 1]} : vector<1x96xf32> to vector<1x32xf32>
    %331 = vector.extract_strided_slice %321 {offsets = [0, 32], sizes = [1, 32], strides = [1, 1]} : vector<1x96xf32> to vector<1x32xf32>
    %332 = arith.addf %330, %331 : vector<1x32xf32>
    %333 = arith.negf %332 : vector<1x32xf32>
    %334 = math.exp %333 : vector<1x32xf32>
    %cst_101 = arith.constant 1.000000e+00 : f32
    %335 = vector.broadcast %cst_101 : f32 to vector<1x32xf32>
    %336 = arith.addf %335, %334 : vector<1x32xf32>
    %337 = arith.divf %335, %336 : vector<1x32xf32>
    %338 = vector.extract_strided_slice %319 {offsets = [0, 64], sizes = [1, 32], strides = [1, 1]} : vector<1x96xf32> to vector<1x32xf32>
    %339 = vector.extract_strided_slice %321 {offsets = [0, 64], sizes = [1, 32], strides = [1, 1]} : vector<1x96xf32> to vector<1x32xf32>
    %340 = arith.mulf %329, %339 : vector<1x32xf32>
    %341 = arith.addf %338, %340 : vector<1x32xf32>
    %342 = math.tanh %341 : vector<1x32xf32>
    %cst_102 = arith.constant 1.000000e+00 : f32
    %343 = vector.broadcast %cst_102 : f32 to vector<1x32xf32>
    %344 = arith.subf %343, %337 : vector<1x32xf32>
    %345 = arith.mulf %344, %342 : vector<1x32xf32>
    %346 = arith.mulf %337, %317 : vector<1x32xf32>
    %347 = arith.addf %345, %346 : vector<1x32xf32>
    %c6_103 = arith.constant 6 : index
    %c0_104 = arith.constant 0 : index
    %348 = vector.load %arg23[%c6_103, %c0_104] : memref<8x32xf32, #tpu.memory_space<vmem>>, vector<1x32xf32>
    tpu.vector_store %arg23[%c6_103, %c0_104], %347 {strides = array<i32>} : memref<8x32xf32, #tpu.memory_space<vmem>>, vector<1x32xf32>,
    %349 = vector.extract_strided_slice %42 {offsets = [5, 0], sizes = [1, 96], strides = [1, 1]} : vector<8x96xf32> to vector<1x96xf32>
    %cst_105 = arith.constant dense<0.000000e+00> : vector<1x96xf32>
    %350 = tpu.matmul %347, %45, %cst_105 {dimension_numbers = #tpu.dot_dimension_numbers<[1], [0], [0], [1], [0, 0, 1, 1], [], []>} : vector<1x32xf32>, vector<32x96xf32>, vector<1x96xf32> -> vector<1x96xf32>
    %351 = arith.addf %350, %46 : vector<1x96xf32>
    %352 = vector.extract_strided_slice %349 {offsets = [0, 0], sizes = [1, 32], strides = [1, 1]} : vector<1x96xf32> to vector<1x32xf32>
    %353 = vector.extract_strided_slice %351 {offsets = [0, 0], sizes = [1, 32], strides = [1, 1]} : vector<1x96xf32> to vector<1x32xf32>
    %354 = arith.addf %352, %353 : vector<1x32xf32>
    %355 = arith.negf %354 : vector<1x32xf32>
    %356 = math.exp %355 : vector<1x32xf32>
    %cst_106 = arith.constant 1.000000e+00 : f32
    %357 = vector.broadcast %cst_106 : f32 to vector<1x32xf32>
    %358 = arith.addf %357, %356 : vector<1x32xf32>
    %359 = arith.divf %357, %358 : vector<1x32xf32>
    %360 = vector.extract_strided_slice %349 {offsets = [0, 32], sizes = [1, 32], strides = [1, 1]} : vector<1x96xf32> to vector<1x32xf32>
    %361 = vector.extract_strided_slice %351 {offsets = [0, 32], sizes = [1, 32], strides = [1, 1]} : vector<1x96xf32> to vector<1x32xf32>
    %362 = arith.addf %360, %361 : vector<1x32xf32>
    %363 = arith.negf %362 : vector<1x32xf32>
    %364 = math.exp %363 : vector<1x32xf32>
    %cst_107 = arith.constant 1.000000e+00 : f32
    %365 = vector.broadcast %cst_107 : f32 to vector<1x32xf32>
    %366 = arith.addf %365, %364 : vector<1x32xf32>
    %367 = arith.divf %365, %366 : vector<1x32xf32>
    %368 = vector.extract_strided_slice %349 {offsets = [0, 64], sizes = [1, 32], strides = [1, 1]} : vector<1x96xf32> to vector<1x32xf32>
    %369 = vector.extract_strided_slice %351 {offsets = [0, 64], sizes = [1, 32], strides = [1, 1]} : vector<1x96xf32> to vector<1x32xf32>
    %370 = arith.mulf %359, %369 : vector<1x32xf32>
    %371 = arith.addf %368, %370 : vector<1x32xf32>
    %372 = math.tanh %371 : vector<1x32xf32>
    %cst_108 = arith.constant 1.000000e+00 : f32
    %373 = vector.broadcast %cst_108 : f32 to vector<1x32xf32>
    %374 = arith.subf %373, %367 : vector<1x32xf32>
    %375 = arith.mulf %374, %372 : vector<1x32xf32>
    %376 = arith.mulf %367, %347 : vector<1x32xf32>
    %377 = arith.addf %375, %376 : vector<1x32xf32>
    %c5_109 = arith.constant 5 : index
    %c0_110 = arith.constant 0 : index
    %378 = vector.load %arg23[%c5_109, %c0_110] : memref<8x32xf32, #tpu.memory_space<vmem>>, vector<1x32xf32>
    tpu.vector_store %arg23[%c5_109, %c0_110], %377 {strides = array<i32>} : memref<8x32xf32, #tpu.memory_space<vmem>>, vector<1x32xf32>,
    %379 = vector.extract_strided_slice %42 {offsets = [4, 0], sizes = [1, 96], strides = [1, 1]} : vector<8x96xf32> to vector<1x96xf32>
    %cst_111 = arith.constant dense<0.000000e+00> : vector<1x96xf32>
    %380 = tpu.matmul %377, %45, %cst_111 {dimension_numbers = #tpu.dot_dimension_numbers<[1], [0], [0], [1], [0, 0, 1, 1], [], []>} : vector<1x32xf32>, vector<32x96xf32>, vector<1x96xf32> -> vector<1x96xf32>
    %381 = arith.addf %380, %46 : vector<1x96xf32>
    %382 = vector.extract_strided_slice %379 {offsets = [0, 0], sizes = [1, 32], strides = [1, 1]} : vector<1x96xf32> to vector<1x32xf32>
    %383 = vector.extract_strided_slice %381 {offsets = [0, 0], sizes = [1, 32], strides = [1, 1]} : vector<1x96xf32> to vector<1x32xf32>
    %384 = arith.addf %382, %383 : vector<1x32xf32>
    %385 = arith.negf %384 : vector<1x32xf32>
    %386 = math.exp %385 : vector<1x32xf32>
    %cst_112 = arith.constant 1.000000e+00 : f32
    %387 = vector.broadcast %cst_112 : f32 to vector<1x32xf32>
    %388 = arith.addf %387, %386 : vector<1x32xf32>
    %389 = arith.divf %387, %388 : vector<1x32xf32>
    %390 = vector.extract_strided_slice %379 {offsets = [0, 32], sizes = [1, 32], strides = [1, 1]} : vector<1x96xf32> to vector<1x32xf32>
    %391 = vector.extract_strided_slice %381 {offsets = [0, 32], sizes = [1, 32], strides = [1, 1]} : vector<1x96xf32> to vector<1x32xf32>
    %392 = arith.addf %390, %391 : vector<1x32xf32>
    %393 = arith.negf %392 : vector<1x32xf32>
    %394 = math.exp %393 : vector<1x32xf32>
    %cst_113 = arith.constant 1.000000e+00 : f32
    %395 = vector.broadcast %cst_113 : f32 to vector<1x32xf32>
    %396 = arith.addf %395, %394 : vector<1x32xf32>
    %397 = arith.divf %395, %396 : vector<1x32xf32>
    %398 = vector.extract_strided_slice %379 {offsets = [0, 64], sizes = [1, 32], strides = [1, 1]} : vector<1x96xf32> to vector<1x32xf32>
    %399 = vector.extract_strided_slice %381 {offsets = [0, 64], sizes = [1, 32], strides = [1, 1]} : vector<1x96xf32> to vector<1x32xf32>
    %400 = arith.mulf %389, %399 : vector<1x32xf32>
    %401 = arith.addf %398, %400 : vector<1x32xf32>
    %402 = math.tanh %401 : vector<1x32xf32>
    %cst_114 = arith.constant 1.000000e+00 : f32
    %403 = vector.broadcast %cst_114 : f32 to vector<1x32xf32>
    %404 = arith.subf %403, %397 : vector<1x32xf32>
    %405 = arith.mulf %404, %402 : vector<1x32xf32>
    %406 = arith.mulf %397, %377 : vector<1x32xf32>
    %407 = arith.addf %405, %406 : vector<1x32xf32>
    %c4_115 = arith.constant 4 : index
    %c0_116 = arith.constant 0 : index
    %408 = vector.load %arg23[%c4_115, %c0_116] : memref<8x32xf32, #tpu.memory_space<vmem>>, vector<1x32xf32>
    tpu.vector_store %arg23[%c4_115, %c0_116], %407 {strides = array<i32>} : memref<8x32xf32, #tpu.memory_space<vmem>>, vector<1x32xf32>,
    %409 = vector.extract_strided_slice %42 {offsets = [3, 0], sizes = [1, 96], strides = [1, 1]} : vector<8x96xf32> to vector<1x96xf32>
    %cst_117 = arith.constant dense<0.000000e+00> : vector<1x96xf32>
    %410 = tpu.matmul %407, %45, %cst_117 {dimension_numbers = #tpu.dot_dimension_numbers<[1], [0], [0], [1], [0, 0, 1, 1], [], []>} : vector<1x32xf32>, vector<32x96xf32>, vector<1x96xf32> -> vector<1x96xf32>
    %411 = arith.addf %410, %46 : vector<1x96xf32>
    %412 = vector.extract_strided_slice %409 {offsets = [0, 0], sizes = [1, 32], strides = [1, 1]} : vector<1x96xf32> to vector<1x32xf32>
    %413 = vector.extract_strided_slice %411 {offsets = [0, 0], sizes = [1, 32], strides = [1, 1]} : vector<1x96xf32> to vector<1x32xf32>
    %414 = arith.addf %412, %413 : vector<1x32xf32>
    %415 = arith.negf %414 : vector<1x32xf32>
    %416 = math.exp %415 : vector<1x32xf32>
    %cst_118 = arith.constant 1.000000e+00 : f32
    %417 = vector.broadcast %cst_118 : f32 to vector<1x32xf32>
    %418 = arith.addf %417, %416 : vector<1x32xf32>
    %419 = arith.divf %417, %418 : vector<1x32xf32>
    %420 = vector.extract_strided_slice %409 {offsets = [0, 32], sizes = [1, 32], strides = [1, 1]} : vector<1x96xf32> to vector<1x32xf32>
    %421 = vector.extract_strided_slice %411 {offsets = [0, 32], sizes = [1, 32], strides = [1, 1]} : vector<1x96xf32> to vector<1x32xf32>
    %422 = arith.addf %420, %421 : vector<1x32xf32>
    %423 = arith.negf %422 : vector<1x32xf32>
    %424 = math.exp %423 : vector<1x32xf32>
    %cst_119 = arith.constant 1.000000e+00 : f32
    %425 = vector.broadcast %cst_119 : f32 to vector<1x32xf32>
    %426 = arith.addf %425, %424 : vector<1x32xf32>
    %427 = arith.divf %425, %426 : vector<1x32xf32>
    %428 = vector.extract_strided_slice %409 {offsets = [0, 64], sizes = [1, 32], strides = [1, 1]} : vector<1x96xf32> to vector<1x32xf32>
    %429 = vector.extract_strided_slice %411 {offsets = [0, 64], sizes = [1, 32], strides = [1, 1]} : vector<1x96xf32> to vector<1x32xf32>
    %430 = arith.mulf %419, %429 : vector<1x32xf32>
    %431 = arith.addf %428, %430 : vector<1x32xf32>
    %432 = math.tanh %431 : vector<1x32xf32>
    %cst_120 = arith.constant 1.000000e+00 : f32
    %433 = vector.broadcast %cst_120 : f32 to vector<1x32xf32>
    %434 = arith.subf %433, %427 : vector<1x32xf32>
    %435 = arith.mulf %434, %432 : vector<1x32xf32>
    %436 = arith.mulf %427, %407 : vector<1x32xf32>
    %437 = arith.addf %435, %436 : vector<1x32xf32>
    %c3_121 = arith.constant 3 : index
    %c0_122 = arith.constant 0 : index
    %438 = vector.load %arg23[%c3_121, %c0_122] : memref<8x32xf32, #tpu.memory_space<vmem>>, vector<1x32xf32>
    tpu.vector_store %arg23[%c3_121, %c0_122], %437 {strides = array<i32>} : memref<8x32xf32, #tpu.memory_space<vmem>>, vector<1x32xf32>,
    %439 = vector.extract_strided_slice %42 {offsets = [2, 0], sizes = [1, 96], strides = [1, 1]} : vector<8x96xf32> to vector<1x96xf32>
    %cst_123 = arith.constant dense<0.000000e+00> : vector<1x96xf32>
    %440 = tpu.matmul %437, %45, %cst_123 {dimension_numbers = #tpu.dot_dimension_numbers<[1], [0], [0], [1], [0, 0, 1, 1], [], []>} : vector<1x32xf32>, vector<32x96xf32>, vector<1x96xf32> -> vector<1x96xf32>
    %441 = arith.addf %440, %46 : vector<1x96xf32>
    %442 = vector.extract_strided_slice %439 {offsets = [0, 0], sizes = [1, 32], strides = [1, 1]} : vector<1x96xf32> to vector<1x32xf32>
    %443 = vector.extract_strided_slice %441 {offsets = [0, 0], sizes = [1, 32], strides = [1, 1]} : vector<1x96xf32> to vector<1x32xf32>
    %444 = arith.addf %442, %443 : vector<1x32xf32>
    %445 = arith.negf %444 : vector<1x32xf32>
    %446 = math.exp %445 : vector<1x32xf32>
    %cst_124 = arith.constant 1.000000e+00 : f32
    %447 = vector.broadcast %cst_124 : f32 to vector<1x32xf32>
    %448 = arith.addf %447, %446 : vector<1x32xf32>
    %449 = arith.divf %447, %448 : vector<1x32xf32>
    %450 = vector.extract_strided_slice %439 {offsets = [0, 32], sizes = [1, 32], strides = [1, 1]} : vector<1x96xf32> to vector<1x32xf32>
    %451 = vector.extract_strided_slice %441 {offsets = [0, 32], sizes = [1, 32], strides = [1, 1]} : vector<1x96xf32> to vector<1x32xf32>
    %452 = arith.addf %450, %451 : vector<1x32xf32>
    %453 = arith.negf %452 : vector<1x32xf32>
    %454 = math.exp %453 : vector<1x32xf32>
    %cst_125 = arith.constant 1.000000e+00 : f32
    %455 = vector.broadcast %cst_125 : f32 to vector<1x32xf32>
    %456 = arith.addf %455, %454 : vector<1x32xf32>
    %457 = arith.divf %455, %456 : vector<1x32xf32>
    %458 = vector.extract_strided_slice %439 {offsets = [0, 64], sizes = [1, 32], strides = [1, 1]} : vector<1x96xf32> to vector<1x32xf32>
    %459 = vector.extract_strided_slice %441 {offsets = [0, 64], sizes = [1, 32], strides = [1, 1]} : vector<1x96xf32> to vector<1x32xf32>
    %460 = arith.mulf %449, %459 : vector<1x32xf32>
    %461 = arith.addf %458, %460 : vector<1x32xf32>
    %462 = math.tanh %461 : vector<1x32xf32>
    %cst_126 = arith.constant 1.000000e+00 : f32
    %463 = vector.broadcast %cst_126 : f32 to vector<1x32xf32>
    %464 = arith.subf %463, %457 : vector<1x32xf32>
    %465 = arith.mulf %464, %462 : vector<1x32xf32>
    %466 = arith.mulf %457, %437 : vector<1x32xf32>
    %467 = arith.addf %465, %466 : vector<1x32xf32>
    %c2_127 = arith.constant 2 : index
    %c0_128 = arith.constant 0 : index
    %468 = vector.load %arg23[%c2_127, %c0_128] : memref<8x32xf32, #tpu.memory_space<vmem>>, vector<1x32xf32>
    tpu.vector_store %arg23[%c2_127, %c0_128], %467 {strides = array<i32>} : memref<8x32xf32, #tpu.memory_space<vmem>>, vector<1x32xf32>,
    %469 = vector.extract_strided_slice %42 {offsets = [1, 0], sizes = [1, 96], strides = [1, 1]} : vector<8x96xf32> to vector<1x96xf32>
    %cst_129 = arith.constant dense<0.000000e+00> : vector<1x96xf32>
    %470 = tpu.matmul %467, %45, %cst_129 {dimension_numbers = #tpu.dot_dimension_numbers<[1], [0], [0], [1], [0, 0, 1, 1], [], []>} : vector<1x32xf32>, vector<32x96xf32>, vector<1x96xf32> -> vector<1x96xf32>
    %471 = arith.addf %470, %46 : vector<1x96xf32>
    %472 = vector.extract_strided_slice %469 {offsets = [0, 0], sizes = [1, 32], strides = [1, 1]} : vector<1x96xf32> to vector<1x32xf32>
    %473 = vector.extract_strided_slice %471 {offsets = [0, 0], sizes = [1, 32], strides = [1, 1]} : vector<1x96xf32> to vector<1x32xf32>
    %474 = arith.addf %472, %473 : vector<1x32xf32>
    %475 = arith.negf %474 : vector<1x32xf32>
    %476 = math.exp %475 : vector<1x32xf32>
    %cst_130 = arith.constant 1.000000e+00 : f32
    %477 = vector.broadcast %cst_130 : f32 to vector<1x32xf32>
    %478 = arith.addf %477, %476 : vector<1x32xf32>
    %479 = arith.divf %477, %478 : vector<1x32xf32>
    %480 = vector.extract_strided_slice %469 {offsets = [0, 32], sizes = [1, 32], strides = [1, 1]} : vector<1x96xf32> to vector<1x32xf32>
    %481 = vector.extract_strided_slice %471 {offsets = [0, 32], sizes = [1, 32], strides = [1, 1]} : vector<1x96xf32> to vector<1x32xf32>
    %482 = arith.addf %480, %481 : vector<1x32xf32>
    %483 = arith.negf %482 : vector<1x32xf32>
    %484 = math.exp %483 : vector<1x32xf32>
    %cst_131 = arith.constant 1.000000e+00 : f32
    %485 = vector.broadcast %cst_131 : f32 to vector<1x32xf32>
    %486 = arith.addf %485, %484 : vector<1x32xf32>
    %487 = arith.divf %485, %486 : vector<1x32xf32>
    %488 = vector.extract_strided_slice %469 {offsets = [0, 64], sizes = [1, 32], strides = [1, 1]} : vector<1x96xf32> to vector<1x32xf32>
    %489 = vector.extract_strided_slice %471 {offsets = [0, 64], sizes = [1, 32], strides = [1, 1]} : vector<1x96xf32> to vector<1x32xf32>
    %490 = arith.mulf %479, %489 : vector<1x32xf32>
    %491 = arith.addf %488, %490 : vector<1x32xf32>
    %492 = math.tanh %491 : vector<1x32xf32>
    %cst_132 = arith.constant 1.000000e+00 : f32
    %493 = vector.broadcast %cst_132 : f32 to vector<1x32xf32>
    %494 = arith.subf %493, %487 : vector<1x32xf32>
    %495 = arith.mulf %494, %492 : vector<1x32xf32>
    %496 = arith.mulf %487, %467 : vector<1x32xf32>
    %497 = arith.addf %495, %496 : vector<1x32xf32>
    %c1_133 = arith.constant 1 : index
    %c0_134 = arith.constant 0 : index
    %498 = vector.load %arg23[%c1_133, %c0_134] : memref<8x32xf32, #tpu.memory_space<vmem>>, vector<1x32xf32>
    tpu.vector_store %arg23[%c1_133, %c0_134], %497 {strides = array<i32>} : memref<8x32xf32, #tpu.memory_space<vmem>>, vector<1x32xf32>,
    %499 = vector.extract_strided_slice %42 {offsets = [0, 0], sizes = [1, 96], strides = [1, 1]} : vector<8x96xf32> to vector<1x96xf32>
    %cst_135 = arith.constant dense<0.000000e+00> : vector<1x96xf32>
    %500 = tpu.matmul %497, %45, %cst_135 {dimension_numbers = #tpu.dot_dimension_numbers<[1], [0], [0], [1], [0, 0, 1, 1], [], []>} : vector<1x32xf32>, vector<32x96xf32>, vector<1x96xf32> -> vector<1x96xf32>
    %501 = arith.addf %500, %46 : vector<1x96xf32>
    %502 = vector.extract_strided_slice %499 {offsets = [0, 0], sizes = [1, 32], strides = [1, 1]} : vector<1x96xf32> to vector<1x32xf32>
    %503 = vector.extract_strided_slice %501 {offsets = [0, 0], sizes = [1, 32], strides = [1, 1]} : vector<1x96xf32> to vector<1x32xf32>
    %504 = arith.addf %502, %503 : vector<1x32xf32>
    %505 = arith.negf %504 : vector<1x32xf32>
    %506 = math.exp %505 : vector<1x32xf32>
    %cst_136 = arith.constant 1.000000e+00 : f32
    %507 = vector.broadcast %cst_136 : f32 to vector<1x32xf32>
    %508 = arith.addf %507, %506 : vector<1x32xf32>
    %509 = arith.divf %507, %508 : vector<1x32xf32>
    %510 = vector.extract_strided_slice %499 {offsets = [0, 32], sizes = [1, 32], strides = [1, 1]} : vector<1x96xf32> to vector<1x32xf32>
    %511 = vector.extract_strided_slice %501 {offsets = [0, 32], sizes = [1, 32], strides = [1, 1]} : vector<1x96xf32> to vector<1x32xf32>
    %512 = arith.addf %510, %511 : vector<1x32xf32>
    %513 = arith.negf %512 : vector<1x32xf32>
    %514 = math.exp %513 : vector<1x32xf32>
    %cst_137 = arith.constant 1.000000e+00 : f32
    %515 = vector.broadcast %cst_137 : f32 to vector<1x32xf32>
    %516 = arith.addf %515, %514 : vector<1x32xf32>
    %517 = arith.divf %515, %516 : vector<1x32xf32>
    %518 = vector.extract_strided_slice %499 {offsets = [0, 64], sizes = [1, 32], strides = [1, 1]} : vector<1x96xf32> to vector<1x32xf32>
    %519 = vector.extract_strided_slice %501 {offsets = [0, 64], sizes = [1, 32], strides = [1, 1]} : vector<1x96xf32> to vector<1x32xf32>
    %520 = arith.mulf %509, %519 : vector<1x32xf32>
    %521 = arith.addf %518, %520 : vector<1x32xf32>
    %522 = math.tanh %521 : vector<1x32xf32>
    %cst_138 = arith.constant 1.000000e+00 : f32
    %523 = vector.broadcast %cst_138 : f32 to vector<1x32xf32>
    %524 = arith.subf %523, %517 : vector<1x32xf32>
    %525 = arith.mulf %524, %522 : vector<1x32xf32>
    %526 = arith.mulf %517, %497 : vector<1x32xf32>
    %527 = arith.addf %525, %526 : vector<1x32xf32>
    %c0_139 = arith.constant 0 : index
    %c0_140 = arith.constant 0 : index
    %528 = vector.load %arg23[%c0_139, %c0_140] : memref<8x32xf32, #tpu.memory_space<vmem>>, vector<1x32xf32>
    tpu.vector_store %arg23[%c0_139, %c0_140], %527 {strides = array<i32>} : memref<8x32xf32, #tpu.memory_space<vmem>>, vector<1x32xf32>,
    %c0_141 = arith.constant 0 : index
    %c0_142 = arith.constant 0 : index
    %529 = vector.load %arg22[%c0_141, %c0_142] : memref<8x32xf32, #tpu.memory_space<vmem>>, vector<8x32xf32>
    %c0_143 = arith.constant 0 : index
    %c0_144 = arith.constant 0 : index
    %530 = vector.load %arg23[%c0_143, %c0_144] : memref<8x32xf32, #tpu.memory_space<vmem>>, vector<8x32xf32>
    %531 = arith.addf %529, %530 : vector<8x32xf32>
    %c0_145 = arith.constant 0 : index
    %c0_146 = arith.constant 0 : index
    %532 = vector.load %arg10[%c0_145, %c0_146] : memref<32x96xf32, #tpu.memory_space<vmem>>, vector<32x96xf32>
    %c0_147 = arith.constant 0 : index
    %c0_148 = arith.constant 0 : index
    %533 = vector.load %arg11[%c0_147, %c0_148] : memref<32x96xf32, #tpu.memory_space<vmem>>, vector<32x96xf32>
    %c0_149 = arith.constant 0 : index
    %c0_150 = arith.constant 0 : index
    %534 = vector.load %arg12[%c0_149, %c0_150] : memref<1x96xf32, #tpu.memory_space<vmem>>, vector<1x96xf32>
    %c0_151 = arith.constant 0 : index
    %c0_152 = arith.constant 0 : index
    %535 = vector.load %arg13[%c0_151, %c0_152] : memref<1x96xf32, #tpu.memory_space<vmem>>, vector<1x96xf32>
    %c0_153 = arith.constant 0 : index
    %c0_154 = arith.constant 0 : index
    %536 = vector.load %arg14[%c0_153, %c0_154] : memref<32x32xf32, #tpu.memory_space<vmem>>, vector<32x32xf32>
    %c0_155 = arith.constant 0 : index
    %c0_156 = arith.constant 0 : index
    %537 = vector.load %arg15[%c0_155, %c0_156] : memref<32x32xf32, #tpu.memory_space<vmem>>, vector<32x32xf32>
    %c0_157 = arith.constant 0 : index
    %c0_158 = arith.constant 0 : index
    %538 = vector.load %arg16[%c0_157, %c0_158] : memref<1x32xf32, #tpu.memory_space<vmem>>, vector<1x32xf32>
    %c0_159 = arith.constant 0 : index
    %c0_160 = arith.constant 0 : index
    %539 = vector.load %arg17[%c0_159, %c0_160] : memref<32x128xf32, #tpu.memory_space<vmem>>, vector<32x128xf32>
    %c0_161 = arith.constant 0 : index
    %c0_162 = arith.constant 0 : index
    %540 = vector.load %arg18[%c0_161, %c0_162] : memref<1x128xf32, #tpu.memory_space<vmem>>, vector<1x128xf32>
    %541 = tpu.iota {dimensions = array<i32: 1>} : vector<1x128xi32>
    %c1_i32 = arith.constant 1 : i32
    %c0_163 = arith.constant 0 : index
    %542 = memref.load %arg24[%c0_163] : memref<1xi32, #tpu.memory_space<smem>>
    memref.store %c1_i32, %arg24[%c0_163] : memref<1xi32, #tpu.memory_space<smem>>
    %c0_164 = arith.constant 0 : index
    %543 = memref.load %arg24[%c0_164] : memref<1xi32, #tpu.memory_space<smem>>
    %544 = arith.index_cast %543 : i32 to index
    %c0_165 = arith.constant 0 : index
    %545 = vector.load %arg1[%544, %c0_165] : memref<128x32xf32, #tpu.memory_space<vmem>>, vector<1x32xf32>
    %cst_166 = arith.constant dense<0.000000e+00> : vector<1x96xf32>
    %546 = tpu.matmul %545, %532, %cst_166 {dimension_numbers = #tpu.dot_dimension_numbers<[1], [0], [0], [1], [0, 0, 1, 1], [], []>} : vector<1x32xf32>, vector<32x96xf32>, vector<1x96xf32> -> vector<1x96xf32>
    %547 = arith.addf %546, %534 : vector<1x96xf32>
    %cst_167 = arith.constant dense<0.000000e+00> : vector<1x96xf32>
    %548 = tpu.matmul %286, %533, %cst_167 {dimension_numbers = #tpu.dot_dimension_numbers<[1], [0], [0], [1], [0, 0, 1, 1], [], []>} : vector<1x32xf32>, vector<32x96xf32>, vector<1x96xf32> -> vector<1x96xf32>
    %549 = arith.addf %548, %535 : vector<1x96xf32>
    %550 = vector.extract_strided_slice %547 {offsets = [0, 0], sizes = [1, 32], strides = [1, 1]} : vector<1x96xf32> to vector<1x32xf32>
    %551 = vector.extract_strided_slice %549 {offsets = [0, 0], sizes = [1, 32], strides = [1, 1]} : vector<1x96xf32> to vector<1x32xf32>
    %552 = arith.addf %550, %551 : vector<1x32xf32>
    %553 = arith.negf %552 : vector<1x32xf32>
    %554 = math.exp %553 : vector<1x32xf32>
    %cst_168 = arith.constant 1.000000e+00 : f32
    %555 = vector.broadcast %cst_168 : f32 to vector<1x32xf32>
    %556 = arith.addf %555, %554 : vector<1x32xf32>
    %557 = arith.divf %555, %556 : vector<1x32xf32>
    %558 = vector.extract_strided_slice %547 {offsets = [0, 32], sizes = [1, 32], strides = [1, 1]} : vector<1x96xf32> to vector<1x32xf32>
    %559 = vector.extract_strided_slice %549 {offsets = [0, 32], sizes = [1, 32], strides = [1, 1]} : vector<1x96xf32> to vector<1x32xf32>
    %560 = arith.addf %558, %559 : vector<1x32xf32>
    %561 = arith.negf %560 : vector<1x32xf32>
    %562 = math.exp %561 : vector<1x32xf32>
    %cst_169 = arith.constant 1.000000e+00 : f32
    %563 = vector.broadcast %cst_169 : f32 to vector<1x32xf32>
    %564 = arith.addf %563, %562 : vector<1x32xf32>
    %565 = arith.divf %563, %564 : vector<1x32xf32>
    %566 = vector.extract_strided_slice %547 {offsets = [0, 64], sizes = [1, 32], strides = [1, 1]} : vector<1x96xf32> to vector<1x32xf32>
    %567 = vector.extract_strided_slice %549 {offsets = [0, 64], sizes = [1, 32], strides = [1, 1]} : vector<1x96xf32> to vector<1x32xf32>
    %568 = arith.mulf %557, %567 : vector<1x32xf32>
    %569 = arith.addf %566, %568 : vector<1x32xf32>
    %570 = math.tanh %569 : vector<1x32xf32>
    %cst_170 = arith.constant 1.000000e+00 : f32
    %571 = vector.broadcast %cst_170 : f32 to vector<1x32xf32>
    %572 = arith.subf %571, %565 : vector<1x32xf32>
    %573 = arith.mulf %572, %570 : vector<1x32xf32>
    %574 = arith.mulf %565, %286 : vector<1x32xf32>
    %575 = arith.addf %573, %574 : vector<1x32xf32>
    %cst_171 = arith.constant dense<0.000000e+00> : vector<1x8xf32>
    %576 = tpu.matmul %575, %531, %cst_171 {dimension_numbers = #tpu.dot_dimension_numbers<[1], [1], [0], [0], [0, 0, 1, 0], [], []>} : vector<1x32xf32>, vector<8x32xf32>, vector<1x8xf32> -> vector<1x8xf32>
    %cst_172 = arith.constant dense<0xFF800000> : vector<1xf32>
    %577 = vector.multi_reduction <maximumf>, %576, %cst_172 [1] : vector<1x8xf32> to vector<1xf32>
    %cst_173 = arith.constant 0xFF800000 : f32
    %578 = vector.broadcast %cst_173 : f32 to vector<1xf32>
    %579 = arith.maximumf %578, %577 : vector<1xf32>
    %580 = vector.shape_cast %579 : vector<1xf32> to vector<1x1xf32>
    %581 = vector.broadcast %580 : vector<1x1xf32> to vector<1x8xf32>
    %582 = arith.subf %576, %581 : vector<1x8xf32>
    %583 = math.exp %582 : vector<1x8xf32>
    %cst_174 = arith.constant dense<0.000000e+00> : vector<1xf32>
    %584 = vector.multi_reduction <add>, %583, %cst_174 [1] : vector<1x8xf32> to vector<1xf32>
    %585 = vector.shape_cast %584 : vector<1xf32> to vector<1x1xf32>
    %586 = vector.broadcast %585 : vector<1x1xf32> to vector<1x8xf32>
    %587 = arith.divf %583, %586 : vector<1x8xf32>
    %cst_175 = arith.constant dense<0.000000e+00> : vector<1x32xf32>
    %588 = tpu.matmul %587, %531, %cst_175 {dimension_numbers = #tpu.dot_dimension_numbers<[1], [0], [0], [1], [0, 0, 1, 1], [], []>} : vector<1x8xf32>, vector<8x32xf32>, vector<1x32xf32> -> vector<1x32xf32>
    %cst_176 = arith.constant dense<0.000000e+00> : vector<1x32xf32>
    %589 = tpu.matmul %575, %536, %cst_176 {dimension_numbers = #tpu.dot_dimension_numbers<[1], [0], [0], [1], [0, 0, 1, 1], [], []>} : vector<1x32xf32>, vector<32x32xf32>, vector<1x32xf32> -> vector<1x32xf32>
    %cst_177 = arith.constant dense<0.000000e+00> : vector<1x32xf32>
    %590 = tpu.matmul %588, %537, %cst_177 {dimension_numbers = #tpu.dot_dimension_numbers<[1], [0], [0], [1], [0, 0, 1, 1], [], []>} : vector<1x32xf32>, vector<32x32xf32>, vector<1x32xf32> -> vector<1x32xf32>
    %591 = arith.addf %589, %590 : vector<1x32xf32>
    %592 = arith.addf %591, %538 : vector<1x32xf32>
    %593 = math.tanh %592 : vector<1x32xf32>
    %cst_178 = arith.constant dense<0.000000e+00> : vector<1x128xf32>
    %594 = tpu.matmul %593, %539, %cst_178 {dimension_numbers = #tpu.dot_dimension_numbers<[1], [0], [0], [1], [0, 0, 1, 1], [], []>} : vector<1x32xf32>, vector<32x128xf32>, vector<1x128xf32> -> vector<1x128xf32>
    %595 = arith.addf %594, %540 : vector<1x128xf32>
    %cst_179 = arith.constant dense<0xFF800000> : vector<1xf32>
    %596 = vector.multi_reduction <maximumf>, %595, %cst_179 [1] : vector<1x128xf32> to vector<1xf32>
    %597 = vector.shape_cast %596 : vector<1xf32> to vector<1x1xf32>
    %598 = vector.broadcast %597 : vector<1x1xf32> to vector<1x128xf32>
    %599 = arith.cmpf oeq, %595, %598 : vector<1x128xf32>
    %c128_i32 = arith.constant 128 : i32
    %600 = vector.broadcast %c128_i32 : i32 to vector<1x128xi32>
    %601 = arith.select %599, %541, %600 : vector<1x128xi1>, vector<1x128xi32>
    %cst_180 = arith.constant dense<2147483647> : vector<1xi32>
    %602 = vector.multi_reduction <minsi>, %601, %cst_180 [1] : vector<1x128xi32> to vector<1xi32>
    %603 = vector.shape_cast %602 : vector<1xi32> to vector<1x1xi32>
    %604 = vector.broadcast %597 : vector<1x1xf32> to vector<1x128xf32>
    %605 = arith.subf %595, %604 : vector<1x128xf32>
    %606 = math.exp %605 : vector<1x128xf32>
    %cst_181 = arith.constant dense<0.000000e+00> : vector<1xf32>
    %607 = vector.multi_reduction <add>, %606, %cst_181 [1] : vector<1x128xf32> to vector<1xf32>
    %608 = vector.shape_cast %607 : vector<1xf32> to vector<1x1xf32>
    %609 = tpu.reciprocal %608 {approx = true} : vector<1x1xf32> -> vector<1x1xf32>
    %610 = vector.extract %603[0, 0] : i32 from vector<1x1xi32>
    %c0_182 = arith.constant 0 : index
    %611 = memref.load %arg24[%c0_182] : memref<1xi32, #tpu.memory_space<smem>>
    memref.store %610, %arg24[%c0_182] : memref<1xi32, #tpu.memory_space<smem>>
    %c0_183 = arith.constant 0 : index
    %612 = memref.load %arg19[%c0_183] : memref<10xi32, #tpu.memory_space<smem>>
    memref.store %610, %arg19[%c0_183] : memref<10xi32, #tpu.memory_space<smem>>
    %613 = vector.extract %609[0, 0] : f32 from vector<1x1xf32>
    %c0_184 = arith.constant 0 : index
    %614 = memref.load %arg20[%c0_184] : memref<10xf32, #tpu.memory_space<smem>>
    memref.store %613, %arg20[%c0_184] : memref<10xf32, #tpu.memory_space<smem>>
    %c0_185 = arith.constant 0 : index
    %615 = memref.load %arg24[%c0_185] : memref<1xi32, #tpu.memory_space<smem>>
    %616 = arith.index_cast %615 : i32 to index
    %c0_186 = arith.constant 0 : index
    %617 = vector.load %arg1[%616, %c0_186] : memref<128x32xf32, #tpu.memory_space<vmem>>, vector<1x32xf32>
    %cst_187 = arith.constant dense<0.000000e+00> : vector<1x96xf32>
    %618 = tpu.matmul %617, %532, %cst_187 {dimension_numbers = #tpu.dot_dimension_numbers<[1], [0], [0], [1], [0, 0, 1, 1], [], []>} : vector<1x32xf32>, vector<32x96xf32>, vector<1x96xf32> -> vector<1x96xf32>
    %619 = arith.addf %618, %534 : vector<1x96xf32>
    %cst_188 = arith.constant dense<0.000000e+00> : vector<1x96xf32>
    %620 = tpu.matmul %575, %533, %cst_188 {dimension_numbers = #tpu.dot_dimension_numbers<[1], [0], [0], [1], [0, 0, 1, 1], [], []>} : vector<1x32xf32>, vector<32x96xf32>, vector<1x96xf32> -> vector<1x96xf32>
    %621 = arith.addf %620, %535 : vector<1x96xf32>
    %622 = vector.extract_strided_slice %619 {offsets = [0, 0], sizes = [1, 32], strides = [1, 1]} : vector<1x96xf32> to vector<1x32xf32>
    %623 = vector.extract_strided_slice %621 {offsets = [0, 0], sizes = [1, 32], strides = [1, 1]} : vector<1x96xf32> to vector<1x32xf32>
    %624 = arith.addf %622, %623 : vector<1x32xf32>
    %625 = arith.negf %624 : vector<1x32xf32>
    %626 = math.exp %625 : vector<1x32xf32>
    %cst_189 = arith.constant 1.000000e+00 : f32
    %627 = vector.broadcast %cst_189 : f32 to vector<1x32xf32>
    %628 = arith.addf %627, %626 : vector<1x32xf32>
    %629 = arith.divf %627, %628 : vector<1x32xf32>
    %630 = vector.extract_strided_slice %619 {offsets = [0, 32], sizes = [1, 32], strides = [1, 1]} : vector<1x96xf32> to vector<1x32xf32>
    %631 = vector.extract_strided_slice %621 {offsets = [0, 32], sizes = [1, 32], strides = [1, 1]} : vector<1x96xf32> to vector<1x32xf32>
    %632 = arith.addf %630, %631 : vector<1x32xf32>
    %633 = arith.negf %632 : vector<1x32xf32>
    %634 = math.exp %633 : vector<1x32xf32>
    %cst_190 = arith.constant 1.000000e+00 : f32
    %635 = vector.broadcast %cst_190 : f32 to vector<1x32xf32>
    %636 = arith.addf %635, %634 : vector<1x32xf32>
    %637 = arith.divf %635, %636 : vector<1x32xf32>
    %638 = vector.extract_strided_slice %619 {offsets = [0, 64], sizes = [1, 32], strides = [1, 1]} : vector<1x96xf32> to vector<1x32xf32>
    %639 = vector.extract_strided_slice %621 {offsets = [0, 64], sizes = [1, 32], strides = [1, 1]} : vector<1x96xf32> to vector<1x32xf32>
    %640 = arith.mulf %629, %639 : vector<1x32xf32>
    %641 = arith.addf %638, %640 : vector<1x32xf32>
    %642 = math.tanh %641 : vector<1x32xf32>
    %cst_191 = arith.constant 1.000000e+00 : f32
    %643 = vector.broadcast %cst_191 : f32 to vector<1x32xf32>
    %644 = arith.subf %643, %637 : vector<1x32xf32>
    %645 = arith.mulf %644, %642 : vector<1x32xf32>
    %646 = arith.mulf %637, %575 : vector<1x32xf32>
    %647 = arith.addf %645, %646 : vector<1x32xf32>
    %cst_192 = arith.constant dense<0.000000e+00> : vector<1x8xf32>
    %648 = tpu.matmul %647, %531, %cst_192 {dimension_numbers = #tpu.dot_dimension_numbers<[1], [1], [0], [0], [0, 0, 1, 0], [], []>} : vector<1x32xf32>, vector<8x32xf32>, vector<1x8xf32> -> vector<1x8xf32>
    %cst_193 = arith.constant dense<0xFF800000> : vector<1xf32>
    %649 = vector.multi_reduction <maximumf>, %648, %cst_193 [1] : vector<1x8xf32> to vector<1xf32>
    %cst_194 = arith.constant 0xFF800000 : f32
    %650 = vector.broadcast %cst_194 : f32 to vector<1xf32>
    %651 = arith.maximumf %650, %649 : vector<1xf32>
    %652 = vector.shape_cast %651 : vector<1xf32> to vector<1x1xf32>
    %653 = vector.broadcast %652 : vector<1x1xf32> to vector<1x8xf32>
    %654 = arith.subf %648, %653 : vector<1x8xf32>
    %655 = math.exp %654 : vector<1x8xf32>
    %cst_195 = arith.constant dense<0.000000e+00> : vector<1xf32>
    %656 = vector.multi_reduction <add>, %655, %cst_195 [1] : vector<1x8xf32> to vector<1xf32>
    %657 = vector.shape_cast %656 : vector<1xf32> to vector<1x1xf32>
    %658 = vector.broadcast %657 : vector<1x1xf32> to vector<1x8xf32>
    %659 = arith.divf %655, %658 : vector<1x8xf32>
    %cst_196 = arith.constant dense<0.000000e+00> : vector<1x32xf32>
    %660 = tpu.matmul %659, %531, %cst_196 {dimension_numbers = #tpu.dot_dimension_numbers<[1], [0], [0], [1], [0, 0, 1, 1], [], []>} : vector<1x8xf32>, vector<8x32xf32>, vector<1x32xf32> -> vector<1x32xf32>
    %cst_197 = arith.constant dense<0.000000e+00> : vector<1x32xf32>
    %661 = tpu.matmul %647, %536, %cst_197 {dimension_numbers = #tpu.dot_dimension_numbers<[1], [0], [0], [1], [0, 0, 1, 1], [], []>} : vector<1x32xf32>, vector<32x32xf32>, vector<1x32xf32> -> vector<1x32xf32>
    %cst_198 = arith.constant dense<0.000000e+00> : vector<1x32xf32>
    %662 = tpu.matmul %660, %537, %cst_198 {dimension_numbers = #tpu.dot_dimension_numbers<[1], [0], [0], [1], [0, 0, 1, 1], [], []>} : vector<1x32xf32>, vector<32x32xf32>, vector<1x32xf32> -> vector<1x32xf32>
    %663 = arith.addf %661, %662 : vector<1x32xf32>
    %664 = arith.addf %663, %538 : vector<1x32xf32>
    %665 = math.tanh %664 : vector<1x32xf32>
    %cst_199 = arith.constant dense<0.000000e+00> : vector<1x128xf32>
    %666 = tpu.matmul %665, %539, %cst_199 {dimension_numbers = #tpu.dot_dimension_numbers<[1], [0], [0], [1], [0, 0, 1, 1], [], []>} : vector<1x32xf32>, vector<32x128xf32>, vector<1x128xf32> -> vector<1x128xf32>
    %667 = arith.addf %666, %540 : vector<1x128xf32>
    %cst_200 = arith.constant dense<0xFF800000> : vector<1xf32>
    %668 = vector.multi_reduction <maximumf>, %667, %cst_200 [1] : vector<1x128xf32> to vector<1xf32>
    %669 = vector.shape_cast %668 : vector<1xf32> to vector<1x1xf32>
    %670 = vector.broadcast %669 : vector<1x1xf32> to vector<1x128xf32>
    %671 = arith.cmpf oeq, %667, %670 : vector<1x128xf32>
    %c128_i32_201 = arith.constant 128 : i32
    %672 = vector.broadcast %c128_i32_201 : i32 to vector<1x128xi32>
    %673 = arith.select %671, %541, %672 : vector<1x128xi1>, vector<1x128xi32>
    %cst_202 = arith.constant dense<2147483647> : vector<1xi32>
    %674 = vector.multi_reduction <minsi>, %673, %cst_202 [1] : vector<1x128xi32> to vector<1xi32>
    %675 = vector.shape_cast %674 : vector<1xi32> to vector<1x1xi32>
    %676 = vector.broadcast %669 : vector<1x1xf32> to vector<1x128xf32>
    %677 = arith.subf %667, %676 : vector<1x128xf32>
    %678 = math.exp %677 : vector<1x128xf32>
    %cst_203 = arith.constant dense<0.000000e+00> : vector<1xf32>
    %679 = vector.multi_reduction <add>, %678, %cst_203 [1] : vector<1x128xf32> to vector<1xf32>
    %680 = vector.shape_cast %679 : vector<1xf32> to vector<1x1xf32>
    %681 = tpu.reciprocal %680 {approx = true} : vector<1x1xf32> -> vector<1x1xf32>
    %682 = vector.extract %675[0, 0] : i32 from vector<1x1xi32>
    %c0_204 = arith.constant 0 : index
    %683 = memref.load %arg24[%c0_204] : memref<1xi32, #tpu.memory_space<smem>>
    memref.store %682, %arg24[%c0_204] : memref<1xi32, #tpu.memory_space<smem>>
    %c1_205 = arith.constant 1 : index
    %684 = memref.load %arg19[%c1_205] : memref<10xi32, #tpu.memory_space<smem>>
    memref.store %682, %arg19[%c1_205] : memref<10xi32, #tpu.memory_space<smem>>
    %685 = vector.extract %681[0, 0] : f32 from vector<1x1xf32>
    %c1_206 = arith.constant 1 : index
    %686 = memref.load %arg20[%c1_206] : memref<10xf32, #tpu.memory_space<smem>>
    memref.store %685, %arg20[%c1_206] : memref<10xf32, #tpu.memory_space<smem>>
    %c0_207 = arith.constant 0 : index
    %687 = memref.load %arg24[%c0_207] : memref<1xi32, #tpu.memory_space<smem>>
    %688 = arith.index_cast %687 : i32 to index
    %c0_208 = arith.constant 0 : index
    %689 = vector.load %arg1[%688, %c0_208] : memref<128x32xf32, #tpu.memory_space<vmem>>, vector<1x32xf32>
    %cst_209 = arith.constant dense<0.000000e+00> : vector<1x96xf32>
    %690 = tpu.matmul %689, %532, %cst_209 {dimension_numbers = #tpu.dot_dimension_numbers<[1], [0], [0], [1], [0, 0, 1, 1], [], []>} : vector<1x32xf32>, vector<32x96xf32>, vector<1x96xf32> -> vector<1x96xf32>
    %691 = arith.addf %690, %534 : vector<1x96xf32>
    %cst_210 = arith.constant dense<0.000000e+00> : vector<1x96xf32>
    %692 = tpu.matmul %647, %533, %cst_210 {dimension_numbers = #tpu.dot_dimension_numbers<[1], [0], [0], [1], [0, 0, 1, 1], [], []>} : vector<1x32xf32>, vector<32x96xf32>, vector<1x96xf32> -> vector<1x96xf32>
    %693 = arith.addf %692, %535 : vector<1x96xf32>
    %694 = vector.extract_strided_slice %691 {offsets = [0, 0], sizes = [1, 32], strides = [1, 1]} : vector<1x96xf32> to vector<1x32xf32>
    %695 = vector.extract_strided_slice %693 {offsets = [0, 0], sizes = [1, 32], strides = [1, 1]} : vector<1x96xf32> to vector<1x32xf32>
    %696 = arith.addf %694, %695 : vector<1x32xf32>
    %697 = arith.negf %696 : vector<1x32xf32>
    %698 = math.exp %697 : vector<1x32xf32>
    %cst_211 = arith.constant 1.000000e+00 : f32
    %699 = vector.broadcast %cst_211 : f32 to vector<1x32xf32>
    %700 = arith.addf %699, %698 : vector<1x32xf32>
    %701 = arith.divf %699, %700 : vector<1x32xf32>
    %702 = vector.extract_strided_slice %691 {offsets = [0, 32], sizes = [1, 32], strides = [1, 1]} : vector<1x96xf32> to vector<1x32xf32>
    %703 = vector.extract_strided_slice %693 {offsets = [0, 32], sizes = [1, 32], strides = [1, 1]} : vector<1x96xf32> to vector<1x32xf32>
    %704 = arith.addf %702, %703 : vector<1x32xf32>
    %705 = arith.negf %704 : vector<1x32xf32>
    %706 = math.exp %705 : vector<1x32xf32>
    %cst_212 = arith.constant 1.000000e+00 : f32
    %707 = vector.broadcast %cst_212 : f32 to vector<1x32xf32>
    %708 = arith.addf %707, %706 : vector<1x32xf32>
    %709 = arith.divf %707, %708 : vector<1x32xf32>
    %710 = vector.extract_strided_slice %691 {offsets = [0, 64], sizes = [1, 32], strides = [1, 1]} : vector<1x96xf32> to vector<1x32xf32>
    %711 = vector.extract_strided_slice %693 {offsets = [0, 64], sizes = [1, 32], strides = [1, 1]} : vector<1x96xf32> to vector<1x32xf32>
    %712 = arith.mulf %701, %711 : vector<1x32xf32>
    %713 = arith.addf %710, %712 : vector<1x32xf32>
    %714 = math.tanh %713 : vector<1x32xf32>
    %cst_213 = arith.constant 1.000000e+00 : f32
    %715 = vector.broadcast %cst_213 : f32 to vector<1x32xf32>
    %716 = arith.subf %715, %709 : vector<1x32xf32>
    %717 = arith.mulf %716, %714 : vector<1x32xf32>
    %718 = arith.mulf %709, %647 : vector<1x32xf32>
    %719 = arith.addf %717, %718 : vector<1x32xf32>
    %cst_214 = arith.constant dense<0.000000e+00> : vector<1x8xf32>
    %720 = tpu.matmul %719, %531, %cst_214 {dimension_numbers = #tpu.dot_dimension_numbers<[1], [1], [0], [0], [0, 0, 1, 0], [], []>} : vector<1x32xf32>, vector<8x32xf32>, vector<1x8xf32> -> vector<1x8xf32>
    %cst_215 = arith.constant dense<0xFF800000> : vector<1xf32>
    %721 = vector.multi_reduction <maximumf>, %720, %cst_215 [1] : vector<1x8xf32> to vector<1xf32>
    %cst_216 = arith.constant 0xFF800000 : f32
    %722 = vector.broadcast %cst_216 : f32 to vector<1xf32>
    %723 = arith.maximumf %722, %721 : vector<1xf32>
    %724 = vector.shape_cast %723 : vector<1xf32> to vector<1x1xf32>
    %725 = vector.broadcast %724 : vector<1x1xf32> to vector<1x8xf32>
    %726 = arith.subf %720, %725 : vector<1x8xf32>
    %727 = math.exp %726 : vector<1x8xf32>
    %cst_217 = arith.constant dense<0.000000e+00> : vector<1xf32>
    %728 = vector.multi_reduction <add>, %727, %cst_217 [1] : vector<1x8xf32> to vector<1xf32>
    %729 = vector.shape_cast %728 : vector<1xf32> to vector<1x1xf32>
    %730 = vector.broadcast %729 : vector<1x1xf32> to vector<1x8xf32>
    %731 = arith.divf %727, %730 : vector<1x8xf32>
    %cst_218 = arith.constant dense<0.000000e+00> : vector<1x32xf32>
    %732 = tpu.matmul %731, %531, %cst_218 {dimension_numbers = #tpu.dot_dimension_numbers<[1], [0], [0], [1], [0, 0, 1, 1], [], []>} : vector<1x8xf32>, vector<8x32xf32>, vector<1x32xf32> -> vector<1x32xf32>
    %cst_219 = arith.constant dense<0.000000e+00> : vector<1x32xf32>
    %733 = tpu.matmul %719, %536, %cst_219 {dimension_numbers = #tpu.dot_dimension_numbers<[1], [0], [0], [1], [0, 0, 1, 1], [], []>} : vector<1x32xf32>, vector<32x32xf32>, vector<1x32xf32> -> vector<1x32xf32>
    %cst_220 = arith.constant dense<0.000000e+00> : vector<1x32xf32>
    %734 = tpu.matmul %732, %537, %cst_220 {dimension_numbers = #tpu.dot_dimension_numbers<[1], [0], [0], [1], [0, 0, 1, 1], [], []>} : vector<1x32xf32>, vector<32x32xf32>, vector<1x32xf32> -> vector<1x32xf32>
    %735 = arith.addf %733, %734 : vector<1x32xf32>
    %736 = arith.addf %735, %538 : vector<1x32xf32>
    %737 = math.tanh %736 : vector<1x32xf32>
    %cst_221 = arith.constant dense<0.000000e+00> : vector<1x128xf32>
    %738 = tpu.matmul %737, %539, %cst_221 {dimension_numbers = #tpu.dot_dimension_numbers<[1], [0], [0], [1], [0, 0, 1, 1], [], []>} : vector<1x32xf32>, vector<32x128xf32>, vector<1x128xf32> -> vector<1x128xf32>
    %739 = arith.addf %738, %540 : vector<1x128xf32>
    %cst_222 = arith.constant dense<0xFF800000> : vector<1xf32>
    %740 = vector.multi_reduction <maximumf>, %739, %cst_222 [1] : vector<1x128xf32> to vector<1xf32>
    %741 = vector.shape_cast %740 : vector<1xf32> to vector<1x1xf32>
    %742 = vector.broadcast %741 : vector<1x1xf32> to vector<1x128xf32>
    %743 = arith.cmpf oeq, %739, %742 : vector<1x128xf32>
    %c128_i32_223 = arith.constant 128 : i32
    %744 = vector.broadcast %c128_i32_223 : i32 to vector<1x128xi32>
    %745 = arith.select %743, %541, %744 : vector<1x128xi1>, vector<1x128xi32>
    %cst_224 = arith.constant dense<2147483647> : vector<1xi32>
    %746 = vector.multi_reduction <minsi>, %745, %cst_224 [1] : vector<1x128xi32> to vector<1xi32>
    %747 = vector.shape_cast %746 : vector<1xi32> to vector<1x1xi32>
    %748 = vector.broadcast %741 : vector<1x1xf32> to vector<1x128xf32>
    %749 = arith.subf %739, %748 : vector<1x128xf32>
    %750 = math.exp %749 : vector<1x128xf32>
    %cst_225 = arith.constant dense<0.000000e+00> : vector<1xf32>
    %751 = vector.multi_reduction <add>, %750, %cst_225 [1] : vector<1x128xf32> to vector<1xf32>
    %752 = vector.shape_cast %751 : vector<1xf32> to vector<1x1xf32>
    %753 = tpu.reciprocal %752 {approx = true} : vector<1x1xf32> -> vector<1x1xf32>
    %754 = vector.extract %747[0, 0] : i32 from vector<1x1xi32>
    %c0_226 = arith.constant 0 : index
    %755 = memref.load %arg24[%c0_226] : memref<1xi32, #tpu.memory_space<smem>>
    memref.store %754, %arg24[%c0_226] : memref<1xi32, #tpu.memory_space<smem>>
    %c2_227 = arith.constant 2 : index
    %756 = memref.load %arg19[%c2_227] : memref<10xi32, #tpu.memory_space<smem>>
    memref.store %754, %arg19[%c2_227] : memref<10xi32, #tpu.memory_space<smem>>
    %757 = vector.extract %753[0, 0] : f32 from vector<1x1xf32>
    %c2_228 = arith.constant 2 : index
    %758 = memref.load %arg20[%c2_228] : memref<10xf32, #tpu.memory_space<smem>>
    memref.store %757, %arg20[%c2_228] : memref<10xf32, #tpu.memory_space<smem>>
    %c0_229 = arith.constant 0 : index
    %759 = memref.load %arg24[%c0_229] : memref<1xi32, #tpu.memory_space<smem>>
    %760 = arith.index_cast %759 : i32 to index
    %c0_230 = arith.constant 0 : index
    %761 = vector.load %arg1[%760, %c0_230] : memref<128x32xf32, #tpu.memory_space<vmem>>, vector<1x32xf32>
    %cst_231 = arith.constant dense<0.000000e+00> : vector<1x96xf32>
    %762 = tpu.matmul %761, %532, %cst_231 {dimension_numbers = #tpu.dot_dimension_numbers<[1], [0], [0], [1], [0, 0, 1, 1], [], []>} : vector<1x32xf32>, vector<32x96xf32>, vector<1x96xf32> -> vector<1x96xf32>
    %763 = arith.addf %762, %534 : vector<1x96xf32>
    %cst_232 = arith.constant dense<0.000000e+00> : vector<1x96xf32>
    %764 = tpu.matmul %719, %533, %cst_232 {dimension_numbers = #tpu.dot_dimension_numbers<[1], [0], [0], [1], [0, 0, 1, 1], [], []>} : vector<1x32xf32>, vector<32x96xf32>, vector<1x96xf32> -> vector<1x96xf32>
    %765 = arith.addf %764, %535 : vector<1x96xf32>
    %766 = vector.extract_strided_slice %763 {offsets = [0, 0], sizes = [1, 32], strides = [1, 1]} : vector<1x96xf32> to vector<1x32xf32>
    %767 = vector.extract_strided_slice %765 {offsets = [0, 0], sizes = [1, 32], strides = [1, 1]} : vector<1x96xf32> to vector<1x32xf32>
    %768 = arith.addf %766, %767 : vector<1x32xf32>
    %769 = arith.negf %768 : vector<1x32xf32>
    %770 = math.exp %769 : vector<1x32xf32>
    %cst_233 = arith.constant 1.000000e+00 : f32
    %771 = vector.broadcast %cst_233 : f32 to vector<1x32xf32>
    %772 = arith.addf %771, %770 : vector<1x32xf32>
    %773 = arith.divf %771, %772 : vector<1x32xf32>
    %774 = vector.extract_strided_slice %763 {offsets = [0, 32], sizes = [1, 32], strides = [1, 1]} : vector<1x96xf32> to vector<1x32xf32>
    %775 = vector.extract_strided_slice %765 {offsets = [0, 32], sizes = [1, 32], strides = [1, 1]} : vector<1x96xf32> to vector<1x32xf32>
    %776 = arith.addf %774, %775 : vector<1x32xf32>
    %777 = arith.negf %776 : vector<1x32xf32>
    %778 = math.exp %777 : vector<1x32xf32>
    %cst_234 = arith.constant 1.000000e+00 : f32
    %779 = vector.broadcast %cst_234 : f32 to vector<1x32xf32>
    %780 = arith.addf %779, %778 : vector<1x32xf32>
    %781 = arith.divf %779, %780 : vector<1x32xf32>
    %782 = vector.extract_strided_slice %763 {offsets = [0, 64], sizes = [1, 32], strides = [1, 1]} : vector<1x96xf32> to vector<1x32xf32>
    %783 = vector.extract_strided_slice %765 {offsets = [0, 64], sizes = [1, 32], strides = [1, 1]} : vector<1x96xf32> to vector<1x32xf32>
    %784 = arith.mulf %773, %783 : vector<1x32xf32>
    %785 = arith.addf %782, %784 : vector<1x32xf32>
    %786 = math.tanh %785 : vector<1x32xf32>
    %cst_235 = arith.constant 1.000000e+00 : f32
    %787 = vector.broadcast %cst_235 : f32 to vector<1x32xf32>
    %788 = arith.subf %787, %781 : vector<1x32xf32>
    %789 = arith.mulf %788, %786 : vector<1x32xf32>
    %790 = arith.mulf %781, %719 : vector<1x32xf32>
    %791 = arith.addf %789, %790 : vector<1x32xf32>
    %cst_236 = arith.constant dense<0.000000e+00> : vector<1x8xf32>
    %792 = tpu.matmul %791, %531, %cst_236 {dimension_numbers = #tpu.dot_dimension_numbers<[1], [1], [0], [0], [0, 0, 1, 0], [], []>} : vector<1x32xf32>, vector<8x32xf32>, vector<1x8xf32> -> vector<1x8xf32>
    %cst_237 = arith.constant dense<0xFF800000> : vector<1xf32>
    %793 = vector.multi_reduction <maximumf>, %792, %cst_237 [1] : vector<1x8xf32> to vector<1xf32>
    %cst_238 = arith.constant 0xFF800000 : f32
    %794 = vector.broadcast %cst_238 : f32 to vector<1xf32>
    %795 = arith.maximumf %794, %793 : vector<1xf32>
    %796 = vector.shape_cast %795 : vector<1xf32> to vector<1x1xf32>
    %797 = vector.broadcast %796 : vector<1x1xf32> to vector<1x8xf32>
    %798 = arith.subf %792, %797 : vector<1x8xf32>
    %799 = math.exp %798 : vector<1x8xf32>
    %cst_239 = arith.constant dense<0.000000e+00> : vector<1xf32>
    %800 = vector.multi_reduction <add>, %799, %cst_239 [1] : vector<1x8xf32> to vector<1xf32>
    %801 = vector.shape_cast %800 : vector<1xf32> to vector<1x1xf32>
    %802 = vector.broadcast %801 : vector<1x1xf32> to vector<1x8xf32>
    %803 = arith.divf %799, %802 : vector<1x8xf32>
    %cst_240 = arith.constant dense<0.000000e+00> : vector<1x32xf32>
    %804 = tpu.matmul %803, %531, %cst_240 {dimension_numbers = #tpu.dot_dimension_numbers<[1], [0], [0], [1], [0, 0, 1, 1], [], []>} : vector<1x8xf32>, vector<8x32xf32>, vector<1x32xf32> -> vector<1x32xf32>
    %cst_241 = arith.constant dense<0.000000e+00> : vector<1x32xf32>
    %805 = tpu.matmul %791, %536, %cst_241 {dimension_numbers = #tpu.dot_dimension_numbers<[1], [0], [0], [1], [0, 0, 1, 1], [], []>} : vector<1x32xf32>, vector<32x32xf32>, vector<1x32xf32> -> vector<1x32xf32>
    %cst_242 = arith.constant dense<0.000000e+00> : vector<1x32xf32>
    %806 = tpu.matmul %804, %537, %cst_242 {dimension_numbers = #tpu.dot_dimension_numbers<[1], [0], [0], [1], [0, 0, 1, 1], [], []>} : vector<1x32xf32>, vector<32x32xf32>, vector<1x32xf32> -> vector<1x32xf32>
    %807 = arith.addf %805, %806 : vector<1x32xf32>
    %808 = arith.addf %807, %538 : vector<1x32xf32>
    %809 = math.tanh %808 : vector<1x32xf32>
    %cst_243 = arith.constant dense<0.000000e+00> : vector<1x128xf32>
    %810 = tpu.matmul %809, %539, %cst_243 {dimension_numbers = #tpu.dot_dimension_numbers<[1], [0], [0], [1], [0, 0, 1, 1], [], []>} : vector<1x32xf32>, vector<32x128xf32>, vector<1x128xf32> -> vector<1x128xf32>
    %811 = arith.addf %810, %540 : vector<1x128xf32>
    %cst_244 = arith.constant dense<0xFF800000> : vector<1xf32>
    %812 = vector.multi_reduction <maximumf>, %811, %cst_244 [1] : vector<1x128xf32> to vector<1xf32>
    %813 = vector.shape_cast %812 : vector<1xf32> to vector<1x1xf32>
    %814 = vector.broadcast %813 : vector<1x1xf32> to vector<1x128xf32>
    %815 = arith.cmpf oeq, %811, %814 : vector<1x128xf32>
    %c128_i32_245 = arith.constant 128 : i32
    %816 = vector.broadcast %c128_i32_245 : i32 to vector<1x128xi32>
    %817 = arith.select %815, %541, %816 : vector<1x128xi1>, vector<1x128xi32>
    %cst_246 = arith.constant dense<2147483647> : vector<1xi32>
    %818 = vector.multi_reduction <minsi>, %817, %cst_246 [1] : vector<1x128xi32> to vector<1xi32>
    %819 = vector.shape_cast %818 : vector<1xi32> to vector<1x1xi32>
    %820 = vector.broadcast %813 : vector<1x1xf32> to vector<1x128xf32>
    %821 = arith.subf %811, %820 : vector<1x128xf32>
    %822 = math.exp %821 : vector<1x128xf32>
    %cst_247 = arith.constant dense<0.000000e+00> : vector<1xf32>
    %823 = vector.multi_reduction <add>, %822, %cst_247 [1] : vector<1x128xf32> to vector<1xf32>
    %824 = vector.shape_cast %823 : vector<1xf32> to vector<1x1xf32>
    %825 = tpu.reciprocal %824 {approx = true} : vector<1x1xf32> -> vector<1x1xf32>
    %826 = vector.extract %819[0, 0] : i32 from vector<1x1xi32>
    %c0_248 = arith.constant 0 : index
    %827 = memref.load %arg24[%c0_248] : memref<1xi32, #tpu.memory_space<smem>>
    memref.store %826, %arg24[%c0_248] : memref<1xi32, #tpu.memory_space<smem>>
    %c3_249 = arith.constant 3 : index
    %828 = memref.load %arg19[%c3_249] : memref<10xi32, #tpu.memory_space<smem>>
    memref.store %826, %arg19[%c3_249] : memref<10xi32, #tpu.memory_space<smem>>
    %829 = vector.extract %825[0, 0] : f32 from vector<1x1xf32>
    %c3_250 = arith.constant 3 : index
    %830 = memref.load %arg20[%c3_250] : memref<10xf32, #tpu.memory_space<smem>>
    memref.store %829, %arg20[%c3_250] : memref<10xf32, #tpu.memory_space<smem>>
    %c0_251 = arith.constant 0 : index
    %831 = memref.load %arg24[%c0_251] : memref<1xi32, #tpu.memory_space<smem>>
    %832 = arith.index_cast %831 : i32 to index
    %c0_252 = arith.constant 0 : index
    %833 = vector.load %arg1[%832, %c0_252] : memref<128x32xf32, #tpu.memory_space<vmem>>, vector<1x32xf32>
    %cst_253 = arith.constant dense<0.000000e+00> : vector<1x96xf32>
    %834 = tpu.matmul %833, %532, %cst_253 {dimension_numbers = #tpu.dot_dimension_numbers<[1], [0], [0], [1], [0, 0, 1, 1], [], []>} : vector<1x32xf32>, vector<32x96xf32>, vector<1x96xf32> -> vector<1x96xf32>
    %835 = arith.addf %834, %534 : vector<1x96xf32>
    %cst_254 = arith.constant dense<0.000000e+00> : vector<1x96xf32>
    %836 = tpu.matmul %791, %533, %cst_254 {dimension_numbers = #tpu.dot_dimension_numbers<[1], [0], [0], [1], [0, 0, 1, 1], [], []>} : vector<1x32xf32>, vector<32x96xf32>, vector<1x96xf32> -> vector<1x96xf32>
    %837 = arith.addf %836, %535 : vector<1x96xf32>
    %838 = vector.extract_strided_slice %835 {offsets = [0, 0], sizes = [1, 32], strides = [1, 1]} : vector<1x96xf32> to vector<1x32xf32>
    %839 = vector.extract_strided_slice %837 {offsets = [0, 0], sizes = [1, 32], strides = [1, 1]} : vector<1x96xf32> to vector<1x32xf32>
    %840 = arith.addf %838, %839 : vector<1x32xf32>
    %841 = arith.negf %840 : vector<1x32xf32>
    %842 = math.exp %841 : vector<1x32xf32>
    %cst_255 = arith.constant 1.000000e+00 : f32
    %843 = vector.broadcast %cst_255 : f32 to vector<1x32xf32>
    %844 = arith.addf %843, %842 : vector<1x32xf32>
    %845 = arith.divf %843, %844 : vector<1x32xf32>
    %846 = vector.extract_strided_slice %835 {offsets = [0, 32], sizes = [1, 32], strides = [1, 1]} : vector<1x96xf32> to vector<1x32xf32>
    %847 = vector.extract_strided_slice %837 {offsets = [0, 32], sizes = [1, 32], strides = [1, 1]} : vector<1x96xf32> to vector<1x32xf32>
    %848 = arith.addf %846, %847 : vector<1x32xf32>
    %849 = arith.negf %848 : vector<1x32xf32>
    %850 = math.exp %849 : vector<1x32xf32>
    %cst_256 = arith.constant 1.000000e+00 : f32
    %851 = vector.broadcast %cst_256 : f32 to vector<1x32xf32>
    %852 = arith.addf %851, %850 : vector<1x32xf32>
    %853 = arith.divf %851, %852 : vector<1x32xf32>
    %854 = vector.extract_strided_slice %835 {offsets = [0, 64], sizes = [1, 32], strides = [1, 1]} : vector<1x96xf32> to vector<1x32xf32>
    %855 = vector.extract_strided_slice %837 {offsets = [0, 64], sizes = [1, 32], strides = [1, 1]} : vector<1x96xf32> to vector<1x32xf32>
    %856 = arith.mulf %845, %855 : vector<1x32xf32>
    %857 = arith.addf %854, %856 : vector<1x32xf32>
    %858 = math.tanh %857 : vector<1x32xf32>
    %cst_257 = arith.constant 1.000000e+00 : f32
    %859 = vector.broadcast %cst_257 : f32 to vector<1x32xf32>
    %860 = arith.subf %859, %853 : vector<1x32xf32>
    %861 = arith.mulf %860, %858 : vector<1x32xf32>
    %862 = arith.mulf %853, %791 : vector<1x32xf32>
    %863 = arith.addf %861, %862 : vector<1x32xf32>
    %cst_258 = arith.constant dense<0.000000e+00> : vector<1x8xf32>
    %864 = tpu.matmul %863, %531, %cst_258 {dimension_numbers = #tpu.dot_dimension_numbers<[1], [1], [0], [0], [0, 0, 1, 0], [], []>} : vector<1x32xf32>, vector<8x32xf32>, vector<1x8xf32> -> vector<1x8xf32>
    %cst_259 = arith.constant dense<0xFF800000> : vector<1xf32>
    %865 = vector.multi_reduction <maximumf>, %864, %cst_259 [1] : vector<1x8xf32> to vector<1xf32>
    %cst_260 = arith.constant 0xFF800000 : f32
    %866 = vector.broadcast %cst_260 : f32 to vector<1xf32>
    %867 = arith.maximumf %866, %865 : vector<1xf32>
    %868 = vector.shape_cast %867 : vector<1xf32> to vector<1x1xf32>
    %869 = vector.broadcast %868 : vector<1x1xf32> to vector<1x8xf32>
    %870 = arith.subf %864, %869 : vector<1x8xf32>
    %871 = math.exp %870 : vector<1x8xf32>
    %cst_261 = arith.constant dense<0.000000e+00> : vector<1xf32>
    %872 = vector.multi_reduction <add>, %871, %cst_261 [1] : vector<1x8xf32> to vector<1xf32>
    %873 = vector.shape_cast %872 : vector<1xf32> to vector<1x1xf32>
    %874 = vector.broadcast %873 : vector<1x1xf32> to vector<1x8xf32>
    %875 = arith.divf %871, %874 : vector<1x8xf32>
    %cst_262 = arith.constant dense<0.000000e+00> : vector<1x32xf32>
    %876 = tpu.matmul %875, %531, %cst_262 {dimension_numbers = #tpu.dot_dimension_numbers<[1], [0], [0], [1], [0, 0, 1, 1], [], []>} : vector<1x8xf32>, vector<8x32xf32>, vector<1x32xf32> -> vector<1x32xf32>
    %cst_263 = arith.constant dense<0.000000e+00> : vector<1x32xf32>
    %877 = tpu.matmul %863, %536, %cst_263 {dimension_numbers = #tpu.dot_dimension_numbers<[1], [0], [0], [1], [0, 0, 1, 1], [], []>} : vector<1x32xf32>, vector<32x32xf32>, vector<1x32xf32> -> vector<1x32xf32>
    %cst_264 = arith.constant dense<0.000000e+00> : vector<1x32xf32>
    %878 = tpu.matmul %876, %537, %cst_264 {dimension_numbers = #tpu.dot_dimension_numbers<[1], [0], [0], [1], [0, 0, 1, 1], [], []>} : vector<1x32xf32>, vector<32x32xf32>, vector<1x32xf32> -> vector<1x32xf32>
    %879 = arith.addf %877, %878 : vector<1x32xf32>
    %880 = arith.addf %879, %538 : vector<1x32xf32>
    %881 = math.tanh %880 : vector<1x32xf32>
    %cst_265 = arith.constant dense<0.000000e+00> : vector<1x128xf32>
    %882 = tpu.matmul %881, %539, %cst_265 {dimension_numbers = #tpu.dot_dimension_numbers<[1], [0], [0], [1], [0, 0, 1, 1], [], []>} : vector<1x32xf32>, vector<32x128xf32>, vector<1x128xf32> -> vector<1x128xf32>
    %883 = arith.addf %882, %540 : vector<1x128xf32>
    %cst_266 = arith.constant dense<0xFF800000> : vector<1xf32>
    %884 = vector.multi_reduction <maximumf>, %883, %cst_266 [1] : vector<1x128xf32> to vector<1xf32>
    %885 = vector.shape_cast %884 : vector<1xf32> to vector<1x1xf32>
    %886 = vector.broadcast %885 : vector<1x1xf32> to vector<1x128xf32>
    %887 = arith.cmpf oeq, %883, %886 : vector<1x128xf32>
    %c128_i32_267 = arith.constant 128 : i32
    %888 = vector.broadcast %c128_i32_267 : i32 to vector<1x128xi32>
    %889 = arith.select %887, %541, %888 : vector<1x128xi1>, vector<1x128xi32>
    %cst_268 = arith.constant dense<2147483647> : vector<1xi32>
    %890 = vector.multi_reduction <minsi>, %889, %cst_268 [1] : vector<1x128xi32> to vector<1xi32>
    %891 = vector.shape_cast %890 : vector<1xi32> to vector<1x1xi32>
    %892 = vector.broadcast %885 : vector<1x1xf32> to vector<1x128xf32>
    %893 = arith.subf %883, %892 : vector<1x128xf32>
    %894 = math.exp %893 : vector<1x128xf32>
    %cst_269 = arith.constant dense<0.000000e+00> : vector<1xf32>
    %895 = vector.multi_reduction <add>, %894, %cst_269 [1] : vector<1x128xf32> to vector<1xf32>
    %896 = vector.shape_cast %895 : vector<1xf32> to vector<1x1xf32>
    %897 = tpu.reciprocal %896 {approx = true} : vector<1x1xf32> -> vector<1x1xf32>
    %898 = vector.extract %891[0, 0] : i32 from vector<1x1xi32>
    %c0_270 = arith.constant 0 : index
    %899 = memref.load %arg24[%c0_270] : memref<1xi32, #tpu.memory_space<smem>>
    memref.store %898, %arg24[%c0_270] : memref<1xi32, #tpu.memory_space<smem>>
    %c4_271 = arith.constant 4 : index
    %900 = memref.load %arg19[%c4_271] : memref<10xi32, #tpu.memory_space<smem>>
    memref.store %898, %arg19[%c4_271] : memref<10xi32, #tpu.memory_space<smem>>
    %901 = vector.extract %897[0, 0] : f32 from vector<1x1xf32>
    %c4_272 = arith.constant 4 : index
    %902 = memref.load %arg20[%c4_272] : memref<10xf32, #tpu.memory_space<smem>>
    memref.store %901, %arg20[%c4_272] : memref<10xf32, #tpu.memory_space<smem>>
    %c0_273 = arith.constant 0 : index
    %903 = memref.load %arg24[%c0_273] : memref<1xi32, #tpu.memory_space<smem>>
    %904 = arith.index_cast %903 : i32 to index
    %c0_274 = arith.constant 0 : index
    %905 = vector.load %arg1[%904, %c0_274] : memref<128x32xf32, #tpu.memory_space<vmem>>, vector<1x32xf32>
    %cst_275 = arith.constant dense<0.000000e+00> : vector<1x96xf32>
    %906 = tpu.matmul %905, %532, %cst_275 {dimension_numbers = #tpu.dot_dimension_numbers<[1], [0], [0], [1], [0, 0, 1, 1], [], []>} : vector<1x32xf32>, vector<32x96xf32>, vector<1x96xf32> -> vector<1x96xf32>
    %907 = arith.addf %906, %534 : vector<1x96xf32>
    %cst_276 = arith.constant dense<0.000000e+00> : vector<1x96xf32>
    %908 = tpu.matmul %863, %533, %cst_276 {dimension_numbers = #tpu.dot_dimension_numbers<[1], [0], [0], [1], [0, 0, 1, 1], [], []>} : vector<1x32xf32>, vector<32x96xf32>, vector<1x96xf32> -> vector<1x96xf32>
    %909 = arith.addf %908, %535 : vector<1x96xf32>
    %910 = vector.extract_strided_slice %907 {offsets = [0, 0], sizes = [1, 32], strides = [1, 1]} : vector<1x96xf32> to vector<1x32xf32>
    %911 = vector.extract_strided_slice %909 {offsets = [0, 0], sizes = [1, 32], strides = [1, 1]} : vector<1x96xf32> to vector<1x32xf32>
    %912 = arith.addf %910, %911 : vector<1x32xf32>
    %913 = arith.negf %912 : vector<1x32xf32>
    %914 = math.exp %913 : vector<1x32xf32>
    %cst_277 = arith.constant 1.000000e+00 : f32
    %915 = vector.broadcast %cst_277 : f32 to vector<1x32xf32>
    %916 = arith.addf %915, %914 : vector<1x32xf32>
    %917 = arith.divf %915, %916 : vector<1x32xf32>
    %918 = vector.extract_strided_slice %907 {offsets = [0, 32], sizes = [1, 32], strides = [1, 1]} : vector<1x96xf32> to vector<1x32xf32>
    %919 = vector.extract_strided_slice %909 {offsets = [0, 32], sizes = [1, 32], strides = [1, 1]} : vector<1x96xf32> to vector<1x32xf32>
    %920 = arith.addf %918, %919 : vector<1x32xf32>
    %921 = arith.negf %920 : vector<1x32xf32>
    %922 = math.exp %921 : vector<1x32xf32>
    %cst_278 = arith.constant 1.000000e+00 : f32
    %923 = vector.broadcast %cst_278 : f32 to vector<1x32xf32>
    %924 = arith.addf %923, %922 : vector<1x32xf32>
    %925 = arith.divf %923, %924 : vector<1x32xf32>
    %926 = vector.extract_strided_slice %907 {offsets = [0, 64], sizes = [1, 32], strides = [1, 1]} : vector<1x96xf32> to vector<1x32xf32>
    %927 = vector.extract_strided_slice %909 {offsets = [0, 64], sizes = [1, 32], strides = [1, 1]} : vector<1x96xf32> to vector<1x32xf32>
    %928 = arith.mulf %917, %927 : vector<1x32xf32>
    %929 = arith.addf %926, %928 : vector<1x32xf32>
    %930 = math.tanh %929 : vector<1x32xf32>
    %cst_279 = arith.constant 1.000000e+00 : f32
    %931 = vector.broadcast %cst_279 : f32 to vector<1x32xf32>
    %932 = arith.subf %931, %925 : vector<1x32xf32>
    %933 = arith.mulf %932, %930 : vector<1x32xf32>
    %934 = arith.mulf %925, %863 : vector<1x32xf32>
    %935 = arith.addf %933, %934 : vector<1x32xf32>
    %cst_280 = arith.constant dense<0.000000e+00> : vector<1x8xf32>
    %936 = tpu.matmul %935, %531, %cst_280 {dimension_numbers = #tpu.dot_dimension_numbers<[1], [1], [0], [0], [0, 0, 1, 0], [], []>} : vector<1x32xf32>, vector<8x32xf32>, vector<1x8xf32> -> vector<1x8xf32>
    %cst_281 = arith.constant dense<0xFF800000> : vector<1xf32>
    %937 = vector.multi_reduction <maximumf>, %936, %cst_281 [1] : vector<1x8xf32> to vector<1xf32>
    %cst_282 = arith.constant 0xFF800000 : f32
    %938 = vector.broadcast %cst_282 : f32 to vector<1xf32>
    %939 = arith.maximumf %938, %937 : vector<1xf32>
    %940 = vector.shape_cast %939 : vector<1xf32> to vector<1x1xf32>
    %941 = vector.broadcast %940 : vector<1x1xf32> to vector<1x8xf32>
    %942 = arith.subf %936, %941 : vector<1x8xf32>
    %943 = math.exp %942 : vector<1x8xf32>
    %cst_283 = arith.constant dense<0.000000e+00> : vector<1xf32>
    %944 = vector.multi_reduction <add>, %943, %cst_283 [1] : vector<1x8xf32> to vector<1xf32>
    %945 = vector.shape_cast %944 : vector<1xf32> to vector<1x1xf32>
    %946 = vector.broadcast %945 : vector<1x1xf32> to vector<1x8xf32>
    %947 = arith.divf %943, %946 : vector<1x8xf32>
    %cst_284 = arith.constant dense<0.000000e+00> : vector<1x32xf32>
    %948 = tpu.matmul %947, %531, %cst_284 {dimension_numbers = #tpu.dot_dimension_numbers<[1], [0], [0], [1], [0, 0, 1, 1], [], []>} : vector<1x8xf32>, vector<8x32xf32>, vector<1x32xf32> -> vector<1x32xf32>
    %cst_285 = arith.constant dense<0.000000e+00> : vector<1x32xf32>
    %949 = tpu.matmul %935, %536, %cst_285 {dimension_numbers = #tpu.dot_dimension_numbers<[1], [0], [0], [1], [0, 0, 1, 1], [], []>} : vector<1x32xf32>, vector<32x32xf32>, vector<1x32xf32> -> vector<1x32xf32>
    %cst_286 = arith.constant dense<0.000000e+00> : vector<1x32xf32>
    %950 = tpu.matmul %948, %537, %cst_286 {dimension_numbers = #tpu.dot_dimension_numbers<[1], [0], [0], [1], [0, 0, 1, 1], [], []>} : vector<1x32xf32>, vector<32x32xf32>, vector<1x32xf32> -> vector<1x32xf32>
    %951 = arith.addf %949, %950 : vector<1x32xf32>
    %952 = arith.addf %951, %538 : vector<1x32xf32>
    %953 = math.tanh %952 : vector<1x32xf32>
    %cst_287 = arith.constant dense<0.000000e+00> : vector<1x128xf32>
    %954 = tpu.matmul %953, %539, %cst_287 {dimension_numbers = #tpu.dot_dimension_numbers<[1], [0], [0], [1], [0, 0, 1, 1], [], []>} : vector<1x32xf32>, vector<32x128xf32>, vector<1x128xf32> -> vector<1x128xf32>
    %955 = arith.addf %954, %540 : vector<1x128xf32>
    %cst_288 = arith.constant dense<0xFF800000> : vector<1xf32>
    %956 = vector.multi_reduction <maximumf>, %955, %cst_288 [1] : vector<1x128xf32> to vector<1xf32>
    %957 = vector.shape_cast %956 : vector<1xf32> to vector<1x1xf32>
    %958 = vector.broadcast %957 : vector<1x1xf32> to vector<1x128xf32>
    %959 = arith.cmpf oeq, %955, %958 : vector<1x128xf32>
    %c128_i32_289 = arith.constant 128 : i32
    %960 = vector.broadcast %c128_i32_289 : i32 to vector<1x128xi32>
    %961 = arith.select %959, %541, %960 : vector<1x128xi1>, vector<1x128xi32>
    %cst_290 = arith.constant dense<2147483647> : vector<1xi32>
    %962 = vector.multi_reduction <minsi>, %961, %cst_290 [1] : vector<1x128xi32> to vector<1xi32>
    %963 = vector.shape_cast %962 : vector<1xi32> to vector<1x1xi32>
    %964 = vector.broadcast %957 : vector<1x1xf32> to vector<1x128xf32>
    %965 = arith.subf %955, %964 : vector<1x128xf32>
    %966 = math.exp %965 : vector<1x128xf32>
    %cst_291 = arith.constant dense<0.000000e+00> : vector<1xf32>
    %967 = vector.multi_reduction <add>, %966, %cst_291 [1] : vector<1x128xf32> to vector<1xf32>
    %968 = vector.shape_cast %967 : vector<1xf32> to vector<1x1xf32>
    %969 = tpu.reciprocal %968 {approx = true} : vector<1x1xf32> -> vector<1x1xf32>
    %970 = vector.extract %963[0, 0] : i32 from vector<1x1xi32>
    %c0_292 = arith.constant 0 : index
    %971 = memref.load %arg24[%c0_292] : memref<1xi32, #tpu.memory_space<smem>>
    memref.store %970, %arg24[%c0_292] : memref<1xi32, #tpu.memory_space<smem>>
    %c5_293 = arith.constant 5 : index
    %972 = memref.load %arg19[%c5_293] : memref<10xi32, #tpu.memory_space<smem>>
    memref.store %970, %arg19[%c5_293] : memref<10xi32, #tpu.memory_space<smem>>
    %973 = vector.extract %969[0, 0] : f32 from vector<1x1xf32>
    %c5_294 = arith.constant 5 : index
    %974 = memref.load %arg20[%c5_294] : memref<10xf32, #tpu.memory_space<smem>>
    memref.store %973, %arg20[%c5_294] : memref<10xf32, #tpu.memory_space<smem>>
    %c0_295 = arith.constant 0 : index
    %975 = memref.load %arg24[%c0_295] : memref<1xi32, #tpu.memory_space<smem>>
    %976 = arith.index_cast %975 : i32 to index
    %c0_296 = arith.constant 0 : index
    %977 = vector.load %arg1[%976, %c0_296] : memref<128x32xf32, #tpu.memory_space<vmem>>, vector<1x32xf32>
    %cst_297 = arith.constant dense<0.000000e+00> : vector<1x96xf32>
    %978 = tpu.matmul %977, %532, %cst_297 {dimension_numbers = #tpu.dot_dimension_numbers<[1], [0], [0], [1], [0, 0, 1, 1], [], []>} : vector<1x32xf32>, vector<32x96xf32>, vector<1x96xf32> -> vector<1x96xf32>
    %979 = arith.addf %978, %534 : vector<1x96xf32>
    %cst_298 = arith.constant dense<0.000000e+00> : vector<1x96xf32>
    %980 = tpu.matmul %935, %533, %cst_298 {dimension_numbers = #tpu.dot_dimension_numbers<[1], [0], [0], [1], [0, 0, 1, 1], [], []>} : vector<1x32xf32>, vector<32x96xf32>, vector<1x96xf32> -> vector<1x96xf32>
    %981 = arith.addf %980, %535 : vector<1x96xf32>
    %982 = vector.extract_strided_slice %979 {offsets = [0, 0], sizes = [1, 32], strides = [1, 1]} : vector<1x96xf32> to vector<1x32xf32>
    %983 = vector.extract_strided_slice %981 {offsets = [0, 0], sizes = [1, 32], strides = [1, 1]} : vector<1x96xf32> to vector<1x32xf32>
    %984 = arith.addf %982, %983 : vector<1x32xf32>
    %985 = arith.negf %984 : vector<1x32xf32>
    %986 = math.exp %985 : vector<1x32xf32>
    %cst_299 = arith.constant 1.000000e+00 : f32
    %987 = vector.broadcast %cst_299 : f32 to vector<1x32xf32>
    %988 = arith.addf %987, %986 : vector<1x32xf32>
    %989 = arith.divf %987, %988 : vector<1x32xf32>
    %990 = vector.extract_strided_slice %979 {offsets = [0, 32], sizes = [1, 32], strides = [1, 1]} : vector<1x96xf32> to vector<1x32xf32>
    %991 = vector.extract_strided_slice %981 {offsets = [0, 32], sizes = [1, 32], strides = [1, 1]} : vector<1x96xf32> to vector<1x32xf32>
    %992 = arith.addf %990, %991 : vector<1x32xf32>
    %993 = arith.negf %992 : vector<1x32xf32>
    %994 = math.exp %993 : vector<1x32xf32>
    %cst_300 = arith.constant 1.000000e+00 : f32
    %995 = vector.broadcast %cst_300 : f32 to vector<1x32xf32>
    %996 = arith.addf %995, %994 : vector<1x32xf32>
    %997 = arith.divf %995, %996 : vector<1x32xf32>
    %998 = vector.extract_strided_slice %979 {offsets = [0, 64], sizes = [1, 32], strides = [1, 1]} : vector<1x96xf32> to vector<1x32xf32>
    %999 = vector.extract_strided_slice %981 {offsets = [0, 64], sizes = [1, 32], strides = [1, 1]} : vector<1x96xf32> to vector<1x32xf32>
    %1000 = arith.mulf %989, %999 : vector<1x32xf32>
    %1001 = arith.addf %998, %1000 : vector<1x32xf32>
    %1002 = math.tanh %1001 : vector<1x32xf32>
    %cst_301 = arith.constant 1.000000e+00 : f32
    %1003 = vector.broadcast %cst_301 : f32 to vector<1x32xf32>
    %1004 = arith.subf %1003, %997 : vector<1x32xf32>
    %1005 = arith.mulf %1004, %1002 : vector<1x32xf32>
    %1006 = arith.mulf %997, %935 : vector<1x32xf32>
    %1007 = arith.addf %1005, %1006 : vector<1x32xf32>
    %cst_302 = arith.constant dense<0.000000e+00> : vector<1x8xf32>
    %1008 = tpu.matmul %1007, %531, %cst_302 {dimension_numbers = #tpu.dot_dimension_numbers<[1], [1], [0], [0], [0, 0, 1, 0], [], []>} : vector<1x32xf32>, vector<8x32xf32>, vector<1x8xf32> -> vector<1x8xf32>
    %cst_303 = arith.constant dense<0xFF800000> : vector<1xf32>
    %1009 = vector.multi_reduction <maximumf>, %1008, %cst_303 [1] : vector<1x8xf32> to vector<1xf32>
    %cst_304 = arith.constant 0xFF800000 : f32
    %1010 = vector.broadcast %cst_304 : f32 to vector<1xf32>
    %1011 = arith.maximumf %1010, %1009 : vector<1xf32>
    %1012 = vector.shape_cast %1011 : vector<1xf32> to vector<1x1xf32>
    %1013 = vector.broadcast %1012 : vector<1x1xf32> to vector<1x8xf32>
    %1014 = arith.subf %1008, %1013 : vector<1x8xf32>
    %1015 = math.exp %1014 : vector<1x8xf32>
    %cst_305 = arith.constant dense<0.000000e+00> : vector<1xf32>
    %1016 = vector.multi_reduction <add>, %1015, %cst_305 [1] : vector<1x8xf32> to vector<1xf32>
    %1017 = vector.shape_cast %1016 : vector<1xf32> to vector<1x1xf32>
    %1018 = vector.broadcast %1017 : vector<1x1xf32> to vector<1x8xf32>
    %1019 = arith.divf %1015, %1018 : vector<1x8xf32>
    %cst_306 = arith.constant dense<0.000000e+00> : vector<1x32xf32>
    %1020 = tpu.matmul %1019, %531, %cst_306 {dimension_numbers = #tpu.dot_dimension_numbers<[1], [0], [0], [1], [0, 0, 1, 1], [], []>} : vector<1x8xf32>, vector<8x32xf32>, vector<1x32xf32> -> vector<1x32xf32>
    %cst_307 = arith.constant dense<0.000000e+00> : vector<1x32xf32>
    %1021 = tpu.matmul %1007, %536, %cst_307 {dimension_numbers = #tpu.dot_dimension_numbers<[1], [0], [0], [1], [0, 0, 1, 1], [], []>} : vector<1x32xf32>, vector<32x32xf32>, vector<1x32xf32> -> vector<1x32xf32>
    %cst_308 = arith.constant dense<0.000000e+00> : vector<1x32xf32>
    %1022 = tpu.matmul %1020, %537, %cst_308 {dimension_numbers = #tpu.dot_dimension_numbers<[1], [0], [0], [1], [0, 0, 1, 1], [], []>} : vector<1x32xf32>, vector<32x32xf32>, vector<1x32xf32> -> vector<1x32xf32>
    %1023 = arith.addf %1021, %1022 : vector<1x32xf32>
    %1024 = arith.addf %1023, %538 : vector<1x32xf32>
    %1025 = math.tanh %1024 : vector<1x32xf32>
    %cst_309 = arith.constant dense<0.000000e+00> : vector<1x128xf32>
    %1026 = tpu.matmul %1025, %539, %cst_309 {dimension_numbers = #tpu.dot_dimension_numbers<[1], [0], [0], [1], [0, 0, 1, 1], [], []>} : vector<1x32xf32>, vector<32x128xf32>, vector<1x128xf32> -> vector<1x128xf32>
    %1027 = arith.addf %1026, %540 : vector<1x128xf32>
    %cst_310 = arith.constant dense<0xFF800000> : vector<1xf32>
    %1028 = vector.multi_reduction <maximumf>, %1027, %cst_310 [1] : vector<1x128xf32> to vector<1xf32>
    %1029 = vector.shape_cast %1028 : vector<1xf32> to vector<1x1xf32>
    %1030 = vector.broadcast %1029 : vector<1x1xf32> to vector<1x128xf32>
    %1031 = arith.cmpf oeq, %1027, %1030 : vector<1x128xf32>
    %c128_i32_311 = arith.constant 128 : i32
    %1032 = vector.broadcast %c128_i32_311 : i32 to vector<1x128xi32>
    %1033 = arith.select %1031, %541, %1032 : vector<1x128xi1>, vector<1x128xi32>
    %cst_312 = arith.constant dense<2147483647> : vector<1xi32>
    %1034 = vector.multi_reduction <minsi>, %1033, %cst_312 [1] : vector<1x128xi32> to vector<1xi32>
    %1035 = vector.shape_cast %1034 : vector<1xi32> to vector<1x1xi32>
    %1036 = vector.broadcast %1029 : vector<1x1xf32> to vector<1x128xf32>
    %1037 = arith.subf %1027, %1036 : vector<1x128xf32>
    %1038 = math.exp %1037 : vector<1x128xf32>
    %cst_313 = arith.constant dense<0.000000e+00> : vector<1xf32>
    %1039 = vector.multi_reduction <add>, %1038, %cst_313 [1] : vector<1x128xf32> to vector<1xf32>
    %1040 = vector.shape_cast %1039 : vector<1xf32> to vector<1x1xf32>
    %1041 = tpu.reciprocal %1040 {approx = true} : vector<1x1xf32> -> vector<1x1xf32>
    %1042 = vector.extract %1035[0, 0] : i32 from vector<1x1xi32>
    %c0_314 = arith.constant 0 : index
    %1043 = memref.load %arg24[%c0_314] : memref<1xi32, #tpu.memory_space<smem>>
    memref.store %1042, %arg24[%c0_314] : memref<1xi32, #tpu.memory_space<smem>>
    %c6_315 = arith.constant 6 : index
    %1044 = memref.load %arg19[%c6_315] : memref<10xi32, #tpu.memory_space<smem>>
    memref.store %1042, %arg19[%c6_315] : memref<10xi32, #tpu.memory_space<smem>>
    %1045 = vector.extract %1041[0, 0] : f32 from vector<1x1xf32>
    %c6_316 = arith.constant 6 : index
    %1046 = memref.load %arg20[%c6_316] : memref<10xf32, #tpu.memory_space<smem>>
    memref.store %1045, %arg20[%c6_316] : memref<10xf32, #tpu.memory_space<smem>>
    %c0_317 = arith.constant 0 : index
    %1047 = memref.load %arg24[%c0_317] : memref<1xi32, #tpu.memory_space<smem>>
    %1048 = arith.index_cast %1047 : i32 to index
    %c0_318 = arith.constant 0 : index
    %1049 = vector.load %arg1[%1048, %c0_318] : memref<128x32xf32, #tpu.memory_space<vmem>>, vector<1x32xf32>
    %cst_319 = arith.constant dense<0.000000e+00> : vector<1x96xf32>
    %1050 = tpu.matmul %1049, %532, %cst_319 {dimension_numbers = #tpu.dot_dimension_numbers<[1], [0], [0], [1], [0, 0, 1, 1], [], []>} : vector<1x32xf32>, vector<32x96xf32>, vector<1x96xf32> -> vector<1x96xf32>
    %1051 = arith.addf %1050, %534 : vector<1x96xf32>
    %cst_320 = arith.constant dense<0.000000e+00> : vector<1x96xf32>
    %1052 = tpu.matmul %1007, %533, %cst_320 {dimension_numbers = #tpu.dot_dimension_numbers<[1], [0], [0], [1], [0, 0, 1, 1], [], []>} : vector<1x32xf32>, vector<32x96xf32>, vector<1x96xf32> -> vector<1x96xf32>
    %1053 = arith.addf %1052, %535 : vector<1x96xf32>
    %1054 = vector.extract_strided_slice %1051 {offsets = [0, 0], sizes = [1, 32], strides = [1, 1]} : vector<1x96xf32> to vector<1x32xf32>
    %1055 = vector.extract_strided_slice %1053 {offsets = [0, 0], sizes = [1, 32], strides = [1, 1]} : vector<1x96xf32> to vector<1x32xf32>
    %1056 = arith.addf %1054, %1055 : vector<1x32xf32>
    %1057 = arith.negf %1056 : vector<1x32xf32>
    %1058 = math.exp %1057 : vector<1x32xf32>
    %cst_321 = arith.constant 1.000000e+00 : f32
    %1059 = vector.broadcast %cst_321 : f32 to vector<1x32xf32>
    %1060 = arith.addf %1059, %1058 : vector<1x32xf32>
    %1061 = arith.divf %1059, %1060 : vector<1x32xf32>
    %1062 = vector.extract_strided_slice %1051 {offsets = [0, 32], sizes = [1, 32], strides = [1, 1]} : vector<1x96xf32> to vector<1x32xf32>
    %1063 = vector.extract_strided_slice %1053 {offsets = [0, 32], sizes = [1, 32], strides = [1, 1]} : vector<1x96xf32> to vector<1x32xf32>
    %1064 = arith.addf %1062, %1063 : vector<1x32xf32>
    %1065 = arith.negf %1064 : vector<1x32xf32>
    %1066 = math.exp %1065 : vector<1x32xf32>
    %cst_322 = arith.constant 1.000000e+00 : f32
    %1067 = vector.broadcast %cst_322 : f32 to vector<1x32xf32>
    %1068 = arith.addf %1067, %1066 : vector<1x32xf32>
    %1069 = arith.divf %1067, %1068 : vector<1x32xf32>
    %1070 = vector.extract_strided_slice %1051 {offsets = [0, 64], sizes = [1, 32], strides = [1, 1]} : vector<1x96xf32> to vector<1x32xf32>
    %1071 = vector.extract_strided_slice %1053 {offsets = [0, 64], sizes = [1, 32], strides = [1, 1]} : vector<1x96xf32> to vector<1x32xf32>
    %1072 = arith.mulf %1061, %1071 : vector<1x32xf32>
    %1073 = arith.addf %1070, %1072 : vector<1x32xf32>
    %1074 = math.tanh %1073 : vector<1x32xf32>
    %cst_323 = arith.constant 1.000000e+00 : f32
    %1075 = vector.broadcast %cst_323 : f32 to vector<1x32xf32>
    %1076 = arith.subf %1075, %1069 : vector<1x32xf32>
    %1077 = arith.mulf %1076, %1074 : vector<1x32xf32>
    %1078 = arith.mulf %1069, %1007 : vector<1x32xf32>
    %1079 = arith.addf %1077, %1078 : vector<1x32xf32>
    %cst_324 = arith.constant dense<0.000000e+00> : vector<1x8xf32>
    %1080 = tpu.matmul %1079, %531, %cst_324 {dimension_numbers = #tpu.dot_dimension_numbers<[1], [1], [0], [0], [0, 0, 1, 0], [], []>} : vector<1x32xf32>, vector<8x32xf32>, vector<1x8xf32> -> vector<1x8xf32>
    %cst_325 = arith.constant dense<0xFF800000> : vector<1xf32>
    %1081 = vector.multi_reduction <maximumf>, %1080, %cst_325 [1] : vector<1x8xf32> to vector<1xf32>
    %cst_326 = arith.constant 0xFF800000 : f32
    %1082 = vector.broadcast %cst_326 : f32 to vector<1xf32>
    %1083 = arith.maximumf %1082, %1081 : vector<1xf32>
    %1084 = vector.shape_cast %1083 : vector<1xf32> to vector<1x1xf32>
    %1085 = vector.broadcast %1084 : vector<1x1xf32> to vector<1x8xf32>
    %1086 = arith.subf %1080, %1085 : vector<1x8xf32>
    %1087 = math.exp %1086 : vector<1x8xf32>
    %cst_327 = arith.constant dense<0.000000e+00> : vector<1xf32>
    %1088 = vector.multi_reduction <add>, %1087, %cst_327 [1] : vector<1x8xf32> to vector<1xf32>
    %1089 = vector.shape_cast %1088 : vector<1xf32> to vector<1x1xf32>
    %1090 = vector.broadcast %1089 : vector<1x1xf32> to vector<1x8xf32>
    %1091 = arith.divf %1087, %1090 : vector<1x8xf32>
    %cst_328 = arith.constant dense<0.000000e+00> : vector<1x32xf32>
    %1092 = tpu.matmul %1091, %531, %cst_328 {dimension_numbers = #tpu.dot_dimension_numbers<[1], [0], [0], [1], [0, 0, 1, 1], [], []>} : vector<1x8xf32>, vector<8x32xf32>, vector<1x32xf32> -> vector<1x32xf32>
    %cst_329 = arith.constant dense<0.000000e+00> : vector<1x32xf32>
    %1093 = tpu.matmul %1079, %536, %cst_329 {dimension_numbers = #tpu.dot_dimension_numbers<[1], [0], [0], [1], [0, 0, 1, 1], [], []>} : vector<1x32xf32>, vector<32x32xf32>, vector<1x32xf32> -> vector<1x32xf32>
    %cst_330 = arith.constant dense<0.000000e+00> : vector<1x32xf32>
    %1094 = tpu.matmul %1092, %537, %cst_330 {dimension_numbers = #tpu.dot_dimension_numbers<[1], [0], [0], [1], [0, 0, 1, 1], [], []>} : vector<1x32xf32>, vector<32x32xf32>, vector<1x32xf32> -> vector<1x32xf32>
    %1095 = arith.addf %1093, %1094 : vector<1x32xf32>
    %1096 = arith.addf %1095, %538 : vector<1x32xf32>
    %1097 = math.tanh %1096 : vector<1x32xf32>
    %cst_331 = arith.constant dense<0.000000e+00> : vector<1x128xf32>
    %1098 = tpu.matmul %1097, %539, %cst_331 {dimension_numbers = #tpu.dot_dimension_numbers<[1], [0], [0], [1], [0, 0, 1, 1], [], []>} : vector<1x32xf32>, vector<32x128xf32>, vector<1x128xf32> -> vector<1x128xf32>
    %1099 = arith.addf %1098, %540 : vector<1x128xf32>
    %cst_332 = arith.constant dense<0xFF800000> : vector<1xf32>
    %1100 = vector.multi_reduction <maximumf>, %1099, %cst_332 [1] : vector<1x128xf32> to vector<1xf32>
    %1101 = vector.shape_cast %1100 : vector<1xf32> to vector<1x1xf32>
    %1102 = vector.broadcast %1101 : vector<1x1xf32> to vector<1x128xf32>
    %1103 = arith.cmpf oeq, %1099, %1102 : vector<1x128xf32>
    %c128_i32_333 = arith.constant 128 : i32
    %1104 = vector.broadcast %c128_i32_333 : i32 to vector<1x128xi32>
    %1105 = arith.select %1103, %541, %1104 : vector<1x128xi1>, vector<1x128xi32>
    %cst_334 = arith.constant dense<2147483647> : vector<1xi32>
    %1106 = vector.multi_reduction <minsi>, %1105, %cst_334 [1] : vector<1x128xi32> to vector<1xi32>
    %1107 = vector.shape_cast %1106 : vector<1xi32> to vector<1x1xi32>
    %1108 = vector.broadcast %1101 : vector<1x1xf32> to vector<1x128xf32>
    %1109 = arith.subf %1099, %1108 : vector<1x128xf32>
    %1110 = math.exp %1109 : vector<1x128xf32>
    %cst_335 = arith.constant dense<0.000000e+00> : vector<1xf32>
    %1111 = vector.multi_reduction <add>, %1110, %cst_335 [1] : vector<1x128xf32> to vector<1xf32>
    %1112 = vector.shape_cast %1111 : vector<1xf32> to vector<1x1xf32>
    %1113 = tpu.reciprocal %1112 {approx = true} : vector<1x1xf32> -> vector<1x1xf32>
    %1114 = vector.extract %1107[0, 0] : i32 from vector<1x1xi32>
    %c0_336 = arith.constant 0 : index
    %1115 = memref.load %arg24[%c0_336] : memref<1xi32, #tpu.memory_space<smem>>
    memref.store %1114, %arg24[%c0_336] : memref<1xi32, #tpu.memory_space<smem>>
    %c7_337 = arith.constant 7 : index
    %1116 = memref.load %arg19[%c7_337] : memref<10xi32, #tpu.memory_space<smem>>
    memref.store %1114, %arg19[%c7_337] : memref<10xi32, #tpu.memory_space<smem>>
    %1117 = vector.extract %1113[0, 0] : f32 from vector<1x1xf32>
    %c7_338 = arith.constant 7 : index
    %1118 = memref.load %arg20[%c7_338] : memref<10xf32, #tpu.memory_space<smem>>
    memref.store %1117, %arg20[%c7_338] : memref<10xf32, #tpu.memory_space<smem>>
    %c0_339 = arith.constant 0 : index
    %1119 = memref.load %arg24[%c0_339] : memref<1xi32, #tpu.memory_space<smem>>
    %1120 = arith.index_cast %1119 : i32 to index
    %c0_340 = arith.constant 0 : index
    %1121 = vector.load %arg1[%1120, %c0_340] : memref<128x32xf32, #tpu.memory_space<vmem>>, vector<1x32xf32>
    %cst_341 = arith.constant dense<0.000000e+00> : vector<1x96xf32>
    %1122 = tpu.matmul %1121, %532, %cst_341 {dimension_numbers = #tpu.dot_dimension_numbers<[1], [0], [0], [1], [0, 0, 1, 1], [], []>} : vector<1x32xf32>, vector<32x96xf32>, vector<1x96xf32> -> vector<1x96xf32>
    %1123 = arith.addf %1122, %534 : vector<1x96xf32>
    %cst_342 = arith.constant dense<0.000000e+00> : vector<1x96xf32>
    %1124 = tpu.matmul %1079, %533, %cst_342 {dimension_numbers = #tpu.dot_dimension_numbers<[1], [0], [0], [1], [0, 0, 1, 1], [], []>} : vector<1x32xf32>, vector<32x96xf32>, vector<1x96xf32> -> vector<1x96xf32>
    %1125 = arith.addf %1124, %535 : vector<1x96xf32>
    %1126 = vector.extract_strided_slice %1123 {offsets = [0, 0], sizes = [1, 32], strides = [1, 1]} : vector<1x96xf32> to vector<1x32xf32>
    %1127 = vector.extract_strided_slice %1125 {offsets = [0, 0], sizes = [1, 32], strides = [1, 1]} : vector<1x96xf32> to vector<1x32xf32>
    %1128 = arith.addf %1126, %1127 : vector<1x32xf32>
    %1129 = arith.negf %1128 : vector<1x32xf32>
    %1130 = math.exp %1129 : vector<1x32xf32>
    %cst_343 = arith.constant 1.000000e+00 : f32
    %1131 = vector.broadcast %cst_343 : f32 to vector<1x32xf32>
    %1132 = arith.addf %1131, %1130 : vector<1x32xf32>
    %1133 = arith.divf %1131, %1132 : vector<1x32xf32>
    %1134 = vector.extract_strided_slice %1123 {offsets = [0, 32], sizes = [1, 32], strides = [1, 1]} : vector<1x96xf32> to vector<1x32xf32>
    %1135 = vector.extract_strided_slice %1125 {offsets = [0, 32], sizes = [1, 32], strides = [1, 1]} : vector<1x96xf32> to vector<1x32xf32>
    %1136 = arith.addf %1134, %1135 : vector<1x32xf32>
    %1137 = arith.negf %1136 : vector<1x32xf32>
    %1138 = math.exp %1137 : vector<1x32xf32>
    %cst_344 = arith.constant 1.000000e+00 : f32
    %1139 = vector.broadcast %cst_344 : f32 to vector<1x32xf32>
    %1140 = arith.addf %1139, %1138 : vector<1x32xf32>
    %1141 = arith.divf %1139, %1140 : vector<1x32xf32>
    %1142 = vector.extract_strided_slice %1123 {offsets = [0, 64], sizes = [1, 32], strides = [1, 1]} : vector<1x96xf32> to vector<1x32xf32>
    %1143 = vector.extract_strided_slice %1125 {offsets = [0, 64], sizes = [1, 32], strides = [1, 1]} : vector<1x96xf32> to vector<1x32xf32>
    %1144 = arith.mulf %1133, %1143 : vector<1x32xf32>
    %1145 = arith.addf %1142, %1144 : vector<1x32xf32>
    %1146 = math.tanh %1145 : vector<1x32xf32>
    %cst_345 = arith.constant 1.000000e+00 : f32
    %1147 = vector.broadcast %cst_345 : f32 to vector<1x32xf32>
    %1148 = arith.subf %1147, %1141 : vector<1x32xf32>
    %1149 = arith.mulf %1148, %1146 : vector<1x32xf32>
    %1150 = arith.mulf %1141, %1079 : vector<1x32xf32>
    %1151 = arith.addf %1149, %1150 : vector<1x32xf32>
    %cst_346 = arith.constant dense<0.000000e+00> : vector<1x8xf32>
    %1152 = tpu.matmul %1151, %531, %cst_346 {dimension_numbers = #tpu.dot_dimension_numbers<[1], [1], [0], [0], [0, 0, 1, 0], [], []>} : vector<1x32xf32>, vector<8x32xf32>, vector<1x8xf32> -> vector<1x8xf32>
    %cst_347 = arith.constant dense<0xFF800000> : vector<1xf32>
    %1153 = vector.multi_reduction <maximumf>, %1152, %cst_347 [1] : vector<1x8xf32> to vector<1xf32>
    %cst_348 = arith.constant 0xFF800000 : f32
    %1154 = vector.broadcast %cst_348 : f32 to vector<1xf32>
    %1155 = arith.maximumf %1154, %1153 : vector<1xf32>
    %1156 = vector.shape_cast %1155 : vector<1xf32> to vector<1x1xf32>
    %1157 = vector.broadcast %1156 : vector<1x1xf32> to vector<1x8xf32>
    %1158 = arith.subf %1152, %1157 : vector<1x8xf32>
    %1159 = math.exp %1158 : vector<1x8xf32>
    %cst_349 = arith.constant dense<0.000000e+00> : vector<1xf32>
    %1160 = vector.multi_reduction <add>, %1159, %cst_349 [1] : vector<1x8xf32> to vector<1xf32>
    %1161 = vector.shape_cast %1160 : vector<1xf32> to vector<1x1xf32>
    %1162 = vector.broadcast %1161 : vector<1x1xf32> to vector<1x8xf32>
    %1163 = arith.divf %1159, %1162 : vector<1x8xf32>
    %cst_350 = arith.constant dense<0.000000e+00> : vector<1x32xf32>
    %1164 = tpu.matmul %1163, %531, %cst_350 {dimension_numbers = #tpu.dot_dimension_numbers<[1], [0], [0], [1], [0, 0, 1, 1], [], []>} : vector<1x8xf32>, vector<8x32xf32>, vector<1x32xf32> -> vector<1x32xf32>
    %cst_351 = arith.constant dense<0.000000e+00> : vector<1x32xf32>
    %1165 = tpu.matmul %1151, %536, %cst_351 {dimension_numbers = #tpu.dot_dimension_numbers<[1], [0], [0], [1], [0, 0, 1, 1], [], []>} : vector<1x32xf32>, vector<32x32xf32>, vector<1x32xf32> -> vector<1x32xf32>
    %cst_352 = arith.constant dense<0.000000e+00> : vector<1x32xf32>
    %1166 = tpu.matmul %1164, %537, %cst_352 {dimension_numbers = #tpu.dot_dimension_numbers<[1], [0], [0], [1], [0, 0, 1, 1], [], []>} : vector<1x32xf32>, vector<32x32xf32>, vector<1x32xf32> -> vector<1x32xf32>
    %1167 = arith.addf %1165, %1166 : vector<1x32xf32>
    %1168 = arith.addf %1167, %538 : vector<1x32xf32>
    %1169 = math.tanh %1168 : vector<1x32xf32>
    %cst_353 = arith.constant dense<0.000000e+00> : vector<1x128xf32>
    %1170 = tpu.matmul %1169, %539, %cst_353 {dimension_numbers = #tpu.dot_dimension_numbers<[1], [0], [0], [1], [0, 0, 1, 1], [], []>} : vector<1x32xf32>, vector<32x128xf32>, vector<1x128xf32> -> vector<1x128xf32>
    %1171 = arith.addf %1170, %540 : vector<1x128xf32>
    %cst_354 = arith.constant dense<0xFF800000> : vector<1xf32>
    %1172 = vector.multi_reduction <maximumf>, %1171, %cst_354 [1] : vector<1x128xf32> to vector<1xf32>
    %1173 = vector.shape_cast %1172 : vector<1xf32> to vector<1x1xf32>
    %1174 = vector.broadcast %1173 : vector<1x1xf32> to vector<1x128xf32>
    %1175 = arith.cmpf oeq, %1171, %1174 : vector<1x128xf32>
    %c128_i32_355 = arith.constant 128 : i32
    %1176 = vector.broadcast %c128_i32_355 : i32 to vector<1x128xi32>
    %1177 = arith.select %1175, %541, %1176 : vector<1x128xi1>, vector<1x128xi32>
    %cst_356 = arith.constant dense<2147483647> : vector<1xi32>
    %1178 = vector.multi_reduction <minsi>, %1177, %cst_356 [1] : vector<1x128xi32> to vector<1xi32>
    %1179 = vector.shape_cast %1178 : vector<1xi32> to vector<1x1xi32>
    %1180 = vector.broadcast %1173 : vector<1x1xf32> to vector<1x128xf32>
    %1181 = arith.subf %1171, %1180 : vector<1x128xf32>
    %1182 = math.exp %1181 : vector<1x128xf32>
    %cst_357 = arith.constant dense<0.000000e+00> : vector<1xf32>
    %1183 = vector.multi_reduction <add>, %1182, %cst_357 [1] : vector<1x128xf32> to vector<1xf32>
    %1184 = vector.shape_cast %1183 : vector<1xf32> to vector<1x1xf32>
    %1185 = tpu.reciprocal %1184 {approx = true} : vector<1x1xf32> -> vector<1x1xf32>
    %1186 = vector.extract %1179[0, 0] : i32 from vector<1x1xi32>
    %c0_358 = arith.constant 0 : index
    %1187 = memref.load %arg24[%c0_358] : memref<1xi32, #tpu.memory_space<smem>>
    memref.store %1186, %arg24[%c0_358] : memref<1xi32, #tpu.memory_space<smem>>
    %c8 = arith.constant 8 : index
    %1188 = memref.load %arg19[%c8] : memref<10xi32, #tpu.memory_space<smem>>
    memref.store %1186, %arg19[%c8] : memref<10xi32, #tpu.memory_space<smem>>
    %1189 = vector.extract %1185[0, 0] : f32 from vector<1x1xf32>
    %c8_359 = arith.constant 8 : index
    %1190 = memref.load %arg20[%c8_359] : memref<10xf32, #tpu.memory_space<smem>>
    memref.store %1189, %arg20[%c8_359] : memref<10xf32, #tpu.memory_space<smem>>
    %c0_360 = arith.constant 0 : index
    %1191 = memref.load %arg24[%c0_360] : memref<1xi32, #tpu.memory_space<smem>>
    %1192 = arith.index_cast %1191 : i32 to index
    %c0_361 = arith.constant 0 : index
    %1193 = vector.load %arg1[%1192, %c0_361] : memref<128x32xf32, #tpu.memory_space<vmem>>, vector<1x32xf32>
    %cst_362 = arith.constant dense<0.000000e+00> : vector<1x96xf32>
    %1194 = tpu.matmul %1193, %532, %cst_362 {dimension_numbers = #tpu.dot_dimension_numbers<[1], [0], [0], [1], [0, 0, 1, 1], [], []>} : vector<1x32xf32>, vector<32x96xf32>, vector<1x96xf32> -> vector<1x96xf32>
    %1195 = arith.addf %1194, %534 : vector<1x96xf32>
    %cst_363 = arith.constant dense<0.000000e+00> : vector<1x96xf32>
    %1196 = tpu.matmul %1151, %533, %cst_363 {dimension_numbers = #tpu.dot_dimension_numbers<[1], [0], [0], [1], [0, 0, 1, 1], [], []>} : vector<1x32xf32>, vector<32x96xf32>, vector<1x96xf32> -> vector<1x96xf32>
    %1197 = arith.addf %1196, %535 : vector<1x96xf32>
    %1198 = vector.extract_strided_slice %1195 {offsets = [0, 0], sizes = [1, 32], strides = [1, 1]} : vector<1x96xf32> to vector<1x32xf32>
    %1199 = vector.extract_strided_slice %1197 {offsets = [0, 0], sizes = [1, 32], strides = [1, 1]} : vector<1x96xf32> to vector<1x32xf32>
    %1200 = arith.addf %1198, %1199 : vector<1x32xf32>
    %1201 = arith.negf %1200 : vector<1x32xf32>
    %1202 = math.exp %1201 : vector<1x32xf32>
    %cst_364 = arith.constant 1.000000e+00 : f32
    %1203 = vector.broadcast %cst_364 : f32 to vector<1x32xf32>
    %1204 = arith.addf %1203, %1202 : vector<1x32xf32>
    %1205 = arith.divf %1203, %1204 : vector<1x32xf32>
    %1206 = vector.extract_strided_slice %1195 {offsets = [0, 32], sizes = [1, 32], strides = [1, 1]} : vector<1x96xf32> to vector<1x32xf32>
    %1207 = vector.extract_strided_slice %1197 {offsets = [0, 32], sizes = [1, 32], strides = [1, 1]} : vector<1x96xf32> to vector<1x32xf32>
    %1208 = arith.addf %1206, %1207 : vector<1x32xf32>
    %1209 = arith.negf %1208 : vector<1x32xf32>
    %1210 = math.exp %1209 : vector<1x32xf32>
    %cst_365 = arith.constant 1.000000e+00 : f32
    %1211 = vector.broadcast %cst_365 : f32 to vector<1x32xf32>
    %1212 = arith.addf %1211, %1210 : vector<1x32xf32>
    %1213 = arith.divf %1211, %1212 : vector<1x32xf32>
    %1214 = vector.extract_strided_slice %1195 {offsets = [0, 64], sizes = [1, 32], strides = [1, 1]} : vector<1x96xf32> to vector<1x32xf32>
    %1215 = vector.extract_strided_slice %1197 {offsets = [0, 64], sizes = [1, 32], strides = [1, 1]} : vector<1x96xf32> to vector<1x32xf32>
    %1216 = arith.mulf %1205, %1215 : vector<1x32xf32>
    %1217 = arith.addf %1214, %1216 : vector<1x32xf32>
    %1218 = math.tanh %1217 : vector<1x32xf32>
    %cst_366 = arith.constant 1.000000e+00 : f32
    %1219 = vector.broadcast %cst_366 : f32 to vector<1x32xf32>
    %1220 = arith.subf %1219, %1213 : vector<1x32xf32>
    %1221 = arith.mulf %1220, %1218 : vector<1x32xf32>
    %1222 = arith.mulf %1213, %1151 : vector<1x32xf32>
    %1223 = arith.addf %1221, %1222 : vector<1x32xf32>
    %cst_367 = arith.constant dense<0.000000e+00> : vector<1x8xf32>
    %1224 = tpu.matmul %1223, %531, %cst_367 {dimension_numbers = #tpu.dot_dimension_numbers<[1], [1], [0], [0], [0, 0, 1, 0], [], []>} : vector<1x32xf32>, vector<8x32xf32>, vector<1x8xf32> -> vector<1x8xf32>
    %cst_368 = arith.constant dense<0xFF800000> : vector<1xf32>
    %1225 = vector.multi_reduction <maximumf>, %1224, %cst_368 [1] : vector<1x8xf32> to vector<1xf32>
    %cst_369 = arith.constant 0xFF800000 : f32
    %1226 = vector.broadcast %cst_369 : f32 to vector<1xf32>
    %1227 = arith.maximumf %1226, %1225 : vector<1xf32>
    %1228 = vector.shape_cast %1227 : vector<1xf32> to vector<1x1xf32>
    %1229 = vector.broadcast %1228 : vector<1x1xf32> to vector<1x8xf32>
    %1230 = arith.subf %1224, %1229 : vector<1x8xf32>
    %1231 = math.exp %1230 : vector<1x8xf32>
    %cst_370 = arith.constant dense<0.000000e+00> : vector<1xf32>
    %1232 = vector.multi_reduction <add>, %1231, %cst_370 [1] : vector<1x8xf32> to vector<1xf32>
    %1233 = vector.shape_cast %1232 : vector<1xf32> to vector<1x1xf32>
    %1234 = vector.broadcast %1233 : vector<1x1xf32> to vector<1x8xf32>
    %1235 = arith.divf %1231, %1234 : vector<1x8xf32>
    %cst_371 = arith.constant dense<0.000000e+00> : vector<1x32xf32>
    %1236 = tpu.matmul %1235, %531, %cst_371 {dimension_numbers = #tpu.dot_dimension_numbers<[1], [0], [0], [1], [0, 0, 1, 1], [], []>} : vector<1x8xf32>, vector<8x32xf32>, vector<1x32xf32> -> vector<1x32xf32>
    %cst_372 = arith.constant dense<0.000000e+00> : vector<1x32xf32>
    %1237 = tpu.matmul %1223, %536, %cst_372 {dimension_numbers = #tpu.dot_dimension_numbers<[1], [0], [0], [1], [0, 0, 1, 1], [], []>} : vector<1x32xf32>, vector<32x32xf32>, vector<1x32xf32> -> vector<1x32xf32>
    %cst_373 = arith.constant dense<0.000000e+00> : vector<1x32xf32>
    %1238 = tpu.matmul %1236, %537, %cst_373 {dimension_numbers = #tpu.dot_dimension_numbers<[1], [0], [0], [1], [0, 0, 1, 1], [], []>} : vector<1x32xf32>, vector<32x32xf32>, vector<1x32xf32> -> vector<1x32xf32>
    %1239 = arith.addf %1237, %1238 : vector<1x32xf32>
    %1240 = arith.addf %1239, %538 : vector<1x32xf32>
    %1241 = math.tanh %1240 : vector<1x32xf32>
    %cst_374 = arith.constant dense<0.000000e+00> : vector<1x128xf32>
    %1242 = tpu.matmul %1241, %539, %cst_374 {dimension_numbers = #tpu.dot_dimension_numbers<[1], [0], [0], [1], [0, 0, 1, 1], [], []>} : vector<1x32xf32>, vector<32x128xf32>, vector<1x128xf32> -> vector<1x128xf32>
    %1243 = arith.addf %1242, %540 : vector<1x128xf32>
    %cst_375 = arith.constant dense<0xFF800000> : vector<1xf32>
    %1244 = vector.multi_reduction <maximumf>, %1243, %cst_375 [1] : vector<1x128xf32> to vector<1xf32>
    %1245 = vector.shape_cast %1244 : vector<1xf32> to vector<1x1xf32>
    %1246 = vector.broadcast %1245 : vector<1x1xf32> to vector<1x128xf32>
    %1247 = arith.cmpf oeq, %1243, %1246 : vector<1x128xf32>
    %c128_i32_376 = arith.constant 128 : i32
    %1248 = vector.broadcast %c128_i32_376 : i32 to vector<1x128xi32>
    %1249 = arith.select %1247, %541, %1248 : vector<1x128xi1>, vector<1x128xi32>
    %cst_377 = arith.constant dense<2147483647> : vector<1xi32>
    %1250 = vector.multi_reduction <minsi>, %1249, %cst_377 [1] : vector<1x128xi32> to vector<1xi32>
    %1251 = vector.shape_cast %1250 : vector<1xi32> to vector<1x1xi32>
    %1252 = vector.broadcast %1245 : vector<1x1xf32> to vector<1x128xf32>
    %1253 = arith.subf %1243, %1252 : vector<1x128xf32>
    %1254 = math.exp %1253 : vector<1x128xf32>
    %cst_378 = arith.constant dense<0.000000e+00> : vector<1xf32>
    %1255 = vector.multi_reduction <add>, %1254, %cst_378 [1] : vector<1x128xf32> to vector<1xf32>
    %1256 = vector.shape_cast %1255 : vector<1xf32> to vector<1x1xf32>
    %1257 = tpu.reciprocal %1256 {approx = true} : vector<1x1xf32> -> vector<1x1xf32>
    %1258 = vector.extract %1251[0, 0] : i32 from vector<1x1xi32>
    %c0_379 = arith.constant 0 : index
    %1259 = memref.load %arg24[%c0_379] : memref<1xi32, #tpu.memory_space<smem>>
    memref.store %1258, %arg24[%c0_379] : memref<1xi32, #tpu.memory_space<smem>>
    %c9 = arith.constant 9 : index
    %1260 = memref.load %arg19[%c9] : memref<10xi32, #tpu.memory_space<smem>>
    memref.store %1258, %arg19[%c9] : memref<10xi32, #tpu.memory_space<smem>>
    %1261 = vector.extract %1257[0, 0] : f32 from vector<1x1xf32>
    %c9_380 = arith.constant 9 : index
    %1262 = memref.load %arg20[%c9_380] : memref<10xf32, #tpu.memory_space<smem>>
    memref.store %1261, %arg20[%c9_380] : memref<10xf32, #tpu.memory_space<smem>>
    return
  }
}

</mosaic_0001>

<bundles_post_ra>
// kernel: tpu_custom_call.1
= control target key start
LH: loop header
LB: loop body
LE: loop exit
PB: predicated region body
PF: predicated region fallthrough
CT: control target
= control target key end

     0   :  { %s11730_s0 = inlined_call_operand.hbm [shape: s32[8], index: 0, kind: input, shape index: {}]   ;;  %s11731_s1 = inlined_call_operand.vmem [shape: f32[128,32], index: 1, kind: input, shape index: {}]   ;;  %s11732_s2 = inlined_call_operand.vmem [shape: f32[32,96], index: 2, kind: input, shape index: {}]   ;;  %s11733_s3 = inlined_call_operand.vmem [shape: f32[32,96], index: 3, kind: input, shape index: {}]   ;;  %s11734_s4 = inlined_call_operand.vmem [shape: f32[1,96], index: 4, kind: input, shape index: {}]   ;;  %s11735_s5 = inlined_call_operand.vmem [shape: f32[1,96], index: 5, kind: input, shape index: {}]   ;;  %s11736_s6 = inlined_call_operand.vmem [shape: f32[32,96], index: 6, kind: input, shape index: {}]   ;;  %s11737_s7 = inlined_call_operand.vmem [shape: f32[32,96], index: 7, kind: input, shape index: {}]   ;;  %s11738_s8 = inlined_call_operand.vmem [shape: f32[1,96], index: 8, kind: input, shape index: {}]   ;;  %s11739_s9 = inlined_call_operand.vmem [shape: f32[1,96], index: 9, kind: input, shape index: {}]   ;;  %s11740_s10 = inlined_call_operand.vmem [shape: f32[32,96], index: 10, kind: input, shape index: {}]   ;;  %s11741_s11 = inlined_call_operand.hbm [shape: f32[32,96], index: 11, kind: input, shape index: {}]   ;;  %s11742_s12 = inlined_call_operand.vmem [shape: f32[1,96], index: 12, kind: input, shape index: {}]   ;;  %s11743_s13 = inlined_call_operand.vmem [shape: f32[1,96], index: 13, kind: input, shape index: {}]   ;;  %s11744_s14 = inlined_call_operand.hbm [shape: f32[32,32], index: 14, kind: input, shape index: {}]   ;;  %s11745_s15 = inlined_call_operand.hbm [shape: f32[32,32], index: 15, kind: input, shape index: {}]   ;;  %s11746_s16 = inlined_call_operand.vmem [shape: f32[1,32], index: 16, kind: input, shape index: {}]   ;;  %s11747_s17 = inlined_call_operand.hbm [shape: f32[32,128], index: 17, kind: input, shape index: {}]   ;;  %s11748_s18 = inlined_call_operand.vmem [shape: f32[1,128], index: 18, kind: input, shape index: {}]   ;;  %s11749_s19 = inlined_call_operand.hbm [shape: s32[10], index: 19, kind: output, shape index: {0}]   ;;  %s11750_s20 = inlined_call_operand.hbm [shape: f32[10], index: 20, kind: output, shape index: {1}]  }
   0x1   :  { %11754 = sst [smem:[#allocation25_spill]] %s11730_s0 }
   0x2   :  { %11755 = sst [smem:[#allocation26_spill]] %s11731_s1 }
   0x3   :  { %11756 = sst [smem:[#allocation27_spill]] %s11732_s2 }
   0x4   :  { %11757 = sst [smem:[#allocation28_spill]] %s11733_s3 }
   0x5   :  { %11758 = sst [smem:[#allocation29_spill]] %s11734_s4 }
   0x6   :  { %26 = vsyncpa [#allocation8], 0 }
   0x7   :  { %27 = vsyncpa [#allocation7], 0 }
   0x8   :  { %28 = vsyncpa [#allocation12], 0 }
   0x9   :  { %29 = vsyncpa [#allocation15], 0 }
   0xa   :  { %30 = vsyncpa [#allocation9], 0 }
   0xb   :  { %31 = vsyncpa [#allocation18], 0  ;;  %s9844_s1 = smov [#allocation11]   ;;  %s9845_s23 = smov [#allocation10]  }
   0xc   :  { %s81_s22 = sshll.u32 %s9844_s1, 4  ;;  %s65_s24 = sshll.u32 %s9845_s23, 4  ;;  %s82_s22 = int_to_ptr.vmem [resolvable:$true] %s81_s22  ;;  %s66_s24 = int_to_ptr.vmem [resolvable:$true] %s65_s24 }
   0xd   :  { %s9736_s2 = scalar_lea.vmem %s82_s22, 512  ;;  %p9741_p1 = scmp.lt.s32.totalorder %s82_s22, %s82_s22 }
   0xe   :  { %p9737_p0 = scmp.ne.s32.totalorder %s82_s22, %s9736_s2  ;;  %p9742_p2 = scmp.lt.s32.totalorder %s9736_s2, %s9736_s2 }
  0x10   :  { %p9743_p3 = por %p9742_p2, %p9741_p1 }
  0x12   :  { %p9744_p4 = pnand %p9743_p3, %p9737_p0 }
  0x14   :  { %9747 = shalt.err (!%p9744_p4)
}
  0x15   :  { %s9846_s25 = smov 128   ;;  %s9847_s3 = smov 8  }
  0x16   :  { %87 = dma.hbm_to_vmem [thread:$0]  %s11744_s14, 512, %s82_s22, [#allocation12], %s9846_s25, %s9846_s25, %s9847_s3  }
  0x17   :  { %s9848_s28 = smov [#allocation6]   ;;  %s11759_s30 = sld [smem:[#allocation25_spill]] }
  0x18   :  { %s9764_s0 = scalar_lea.vmem %s66_s24, 512  ;;  %p9769_p6 = scmp.lt.s32.totalorder %s66_s24, %s66_s24 }
  0x19   :  { %p9765_p5 = scmp.ne.s32.totalorder %s66_s24, %s9764_s0  ;;  %p9770_p7 = scmp.lt.s32.totalorder %s9764_s0, %s9764_s0 }
  0x1b   :  { %p9771_p8 = por %p9770_p7, %p9769_p6 }
  0x1d   :  { %39 = dma.hbm_to_smem %s11759_s30, 16, %s9848_s28, [#allocation8]  }
  0x1e   :  { %p9772_p9 = pnand %p9771_p8, %p9765_p5 }
  0x20   :  { %9775 = shalt.err (!%p9772_p9)
}
  0x21   :  { %71 = dma.hbm_to_vmem [thread:$0]  %s11741_s11, 512, %s66_s24, [#allocation7], %s9846_s25, %s9846_s25, %s9847_s3  }
  0x22   :  { %s9849_s14 = smov [#allocation13]   ;;  %s9850_s23 = smov [#allocation14]  }
  0x23   :  { %s93_s22 = sshll.u32 %s9849_s14, 4  ;;  %s107_s2 = sshll.u32 %s9850_s23, 4  ;;  %s94_s22 = int_to_ptr.vmem [resolvable:$true] %s93_s22  ;;  %s108_s2 = int_to_ptr.vmem [resolvable:$true] %s107_s2 }
  0x24   :  { %s9784_s26 = scalar_lea.vmem %s94_s22, 512  ;;  %p9789_p11 = scmp.lt.s32.totalorder %s94_s22, %s94_s22 }
  0x25   :  { %p9785_p10 = scmp.ne.s32.totalorder %s94_s22, %s9784_s26  ;;  %p9790_p12 = scmp.lt.s32.totalorder %s9784_s26, %s9784_s26 }
  0x27   :  { %p9791_p13 = por %p9790_p12, %p9789_p11 }
  0x29   :  { %p9792_p0 = pnand %p9791_p13, %p9785_p10 }
  0x2b   :  { %9795 = shalt.err (!%p9792_p0)
}
  0x2c   :  { %99 = dma.hbm_to_vmem [thread:$0]  %s11745_s15, 512, %s94_s22, [#allocation12], %s9846_s25, %s9846_s25, %s9847_s3  }
  0x2d   :  { %s9804_s11 = scalar_lea.vmem %s108_s2, 512  ;;  %p9809_p2 = scmp.lt.s32.totalorder %s108_s2, %s108_s2 }
  0x2e   :  { %p9805_p1 = scmp.ne.s32.totalorder %s108_s2, %s9804_s11  ;;  %p9810_p3 = scmp.lt.s32.totalorder %s9804_s11, %s9804_s11 }
  0x30   :  { %p9811_p4 = por %p9810_p3, %p9809_p2 }
  0x32   :  { %p9812_p5 = pnand %p9811_p4, %p9805_p1 }
  0x34   :  { %9815 = shalt.err (!%p9812_p5)
}
  0x35   :  { %113 = dma.hbm_to_vmem [thread:$0]  %s11747_s17, 512, %s108_s2, [#allocation15], %s9846_s25, %s9846_s25, %s9847_s3  }
  0x36   :  { %9832 = dma.done.wait [#allocation8], 16  }
  0x37   :  { %9833 = vsyncadd [#allocation8], 4294967280 }
  0x38   :  { %9834 = dma.done.wait [#allocation7], 512  }
  0x39   :  { %9835 = vsyncadd [#allocation7], 4294966784 }
  0x3a   :  { %9836 = dma.done.wait [#allocation12], 1024  }
  0x3b   :  { %9837 = vsyncadd [#allocation12], 4294966272 }
  0x3c   :  { %9838 = dma.done.wait [#allocation15], 512  }
  0x3d   :  { %9839 = vsyncadd [#allocation15], 4294966784 }
  0x3e   :  { %131 = sfence }
  0x3f   :  { %s11760_s30 = sld [smem:[#allocation27_spill]]  ;;  %v9851_v1 = vmov 0.0   ;;  %vm9852_vm0 = vmmov 0   ;;  %vm135_vm1 = vcmask 253952   ;;  %vm177_vm2 = vcmask 261120   ;;  %v254_v35 = vld [vmem:[%s11736_s6 + $0x18] sm:$0xff] }
  0x40   :  { %8522 = vmatprep.subr.mxu0 %v9851_v1  ;;  %8530 = vmatprep.mubr.msk.f32.mxu0 %vm9852_vm0, %v9851_v1  ;;  %s132_s17 = sld [smem:[#allocation6]]  ;;  %v10088_v20 = vld [vmem:[%s11735_s5] sm:$0x1]  ;;  %v253_v36 = vld [vmem:[%s11736_s6 + $0x10] sm:$0xff]  ;;  %v252_v37 = vld [vmem:[%s11736_s6 + $0x8] sm:$0xff]  ;;  %vm552_vm3 = vcmask 254977  }
  0x41   :  { %s8010_s25 = sld [smem:[#allocation6 + $0x1]]  ;;  %8533 = vmatprep.subr.mxu1 %v9851_v1  ;;  %8541 = vmatprep.mubr.msk.f32.mxu1 %vm9852_vm0, %v9851_v1  ;;  %v251_v38 = vld [vmem:[%s11736_s6] sm:$0xff]  ;;  %vm774_vm4 = vcmask 257027   ;;  %vm663_vm5 = vcmask 256002   ;;  %vm996_vm6 = vcmask 259077   ;;  %vm885_vm7 = vcmask 258052  }
  0x42   :  { %s8011_s14 = sld [smem:[#allocation6 + $0x2]]  ;;  %8534 = vmatpush3.msra.mxu1 %v254_v35  ;;  %vm1218_vm8 = vcmask 261127   ;;  %vm1107_vm9 = vcmask 260102   ;;  %vm2377_vm10 = vcmask 57344   ;;  %vm2389_vm11 = vcmask 64512   ;;  %s9856_s6 = smov [#allocation17]  }
  0x43   :  { %s8012_s22 = sld [smem:[#allocation6 + $0x3]]  ;;  %8535 = vmatprep.subr.mxu1 %v9851_v1  ;;  %vm2681_vm12 = vcmask 1040384  }
  0x44   :  { %s8013_s26 = sld [smem:[#allocation6 + $0x4]]  ;;  %8536 = vmatpush3.msra.mxu1 %v253_v36 }
  0x45   :  { %v169_v0 = vld [vmem:[%s11760_s30 + $0x18] sm:$0xff]  ;;  %v168_v2 = vld [vmem:[%s11760_s30 + $0x10] sm:$0xff]  ;;  %v167_v3 = vld [vmem:[%s11760_s30 + $0x8] sm:$0xff]  ;;  %s8014_s27 = sld [smem:[#allocation6 + $0x5]]  ;;  %8537 = vmatprep.subr.mxu1 %v9851_v1 }
  0x46   :  { %8523 = vmatpush3.msra.mxu0 %v169_v0  ;;  %v166_v4 = vld [vmem:[%s11760_s30] sm:$0xff]  ;;  %s11761_s24 = sld [smem:[#allocation26_spill]]  ;;  %8538 = vmatpush3.msra.mxu1 %v252_v37 }
  0x47   :  { %8524 = vmatprep.subr.mxu0 %v9851_v1  ;;  %s8015_s15 = sld [smem:[#allocation6 + $0x6]]  ;;  %8539 = vmatprep.subr.mxu1 %v9851_v1 }
  0x48   :  { %8525 = vmatpush3.msra.mxu0 %v168_v2  ;;  %s8016_s3 = sld [smem:[#allocation6 + $0x7]]  ;;  %8540 = vmatpush3.msra.mxu1 %v251_v38 }
  0x49   :  { %8526 = vmatprep.subr.mxu0 %v9851_v1  ;;  %s11762_s2 = sld [smem:[#allocation28_spill]]  ;;  %8555 = vmatprep.subr.mxu1 %v9851_v1 }
  0x4a   :  { %8527 = vmatpush3.msra.mxu0 %v167_v3 }
  0x4b   :  { %8528 = vmatprep.subr.mxu0 %v9851_v1 }
  0x4c   :  { %s133_s4 = scalar_lea.vmem %s11761_s24, %s132_s17  ;;  %8529 = vmatpush3.msra.mxu0 %v166_v4  ;;  %s138_s21 = scalar_lea.vmem %s11761_s24, %s8010_s25 }
  0x4d   :  { %v134_v5 = vld [vmem:[%s133_s4] sm:$0x1]  ;;  %8544 = vmatprep.subr.mxu0 %v9851_v1  ;;  %s142_s23 = scalar_lea.vmem %s11761_s24, %s8011_s14  ;;  %s146_s28 = scalar_lea.vmem %s11761_s24, %s8012_s22 }
  0x4e   :  { %136 = vst.msk [vmem:[#allocation2] sm:$0x1] %vm135_vm1, %v134_v5  ;;  %v139_v6 = vld [vmem:[%s138_s21] sm:$0x1]  ;;  %s150_s4 = scalar_lea.vmem %s11761_s24, %s8013_s26  ;;  %s154_s14 = scalar_lea.vmem %s11761_s24, %s8014_s27 }
  0x4f   :  { %140 = vst.msk [vmem:[#allocation2 + $0x1] sm:$0x1] %vm135_vm1, %v139_v6  ;;  %v143_v7 = vld [vmem:[%s142_s23] sm:$0x1]  ;;  %s158_s22 = scalar_lea.vmem %s11761_s24, %s8015_s15  ;;  %s162_s26 = scalar_lea.vmem %s11761_s24, %s8016_s3  ;;  %v10046_v13 = vld [vmem:[%s11762_s2 + $0x18] sm:$0xff]  ;;  %v10052_v15 = vld [vmem:[%s11762_s2 + $0x10] sm:$0xff] }
  0x50   :  { %144 = vst.msk [vmem:[#allocation2 + $0x2] sm:$0x1] %vm135_vm1, %v143_v7  ;;  %v147_v8 = vld [vmem:[%s146_s28] sm:$0x1]  ;;  %v10061_v16 = vld [vmem:[%s11762_s2 + $0x8] sm:$0xff]  ;;  %s9854_s3 = smov 96  }
  0x51   :  { %148 = vst.msk [vmem:[#allocation2 + $0x3] sm:$0x1] %vm135_vm1, %v147_v8  ;;  %v151_v9 = vld [vmem:[%s150_s4] sm:$0x1] }
  0x52   :  { %152 = vst.msk [vmem:[#allocation2 + $0x4] sm:$0x1] %vm135_vm1, %v151_v9  ;;  %v155_v10 = vld [vmem:[%s154_s14] sm:$0x1]  ;;  %s9853_s14 = smov 64  }
  0x53   :  { %156 = vst.msk [vmem:[#allocation2 + $0x5] sm:$0x1] %vm135_vm1, %v155_v10  ;;  %v159_v11 = vld [vmem:[%s158_s22] sm:$0x1]  ;;  %s11763_s22 = sld [smem:[#allocation29_spill]] }
  0x54   :  { %160 = vst.msk [vmem:[#allocation2 + $0x6] sm:$0x1] %vm135_vm1, %v159_v11  ;;  %v163_v12 = vld [vmem:[%s162_s26] sm:$0x1] }
  0x55   :  { %164 = vst.msk [vmem:[#allocation2 + $0x7] sm:$0x1] %vm135_vm1, %v163_v12  ;;  %v10068_v17 = vld [vmem:[%s11762_s2] sm:$0xff]  ;;  %s9855_s2 = smov [#allocation16]  }
  0x59   :  { %v8017_v24 = vld [vmem:[%s11763_s22] ss:$0 sm:$0xff] }
  0x5c   :  { %v165_v14 = vld [vmem:[#allocation2] sm:$0xff] }
  0x5d   :  { %8531 = vmatmul.mubr.msk.f32.vlgmr.msra.gmra.mxu0 %vm177_vm2, %v165_v14  ;;  %8542 = vmatmul.mubr.msk.f32.vlgmr.msra.gmra.mxu1 %vm177_vm2, %v165_v14 }
  0x5e   :  { %8545 = vmatpush3.msra.mxu0 %v10046_v13  ;;  %8552 = vmatprep.mubr.msk.f32.mxu0 %vm9852_vm0, %v9851_v1 }
  0x5f   :  { %8546 = vmatprep.subr.mxu0 %v9851_v1  ;;  %8556 = vmatpush3.msra.mxu1 %v10046_v13 }
  0x60   :  { %8547 = vmatpush3.msra.mxu0 %v10052_v15  ;;  %8557 = vmatprep.subr.mxu1 %v9851_v1 }
  0x61   :  { %8548 = vmatprep.subr.mxu0 %v9851_v1  ;;  %8563 = vmatprep.mubr.msk.f32.mxu1 %vm9852_vm0, %v9851_v1 }
  0x62   :  { %8549 = vmatpush3.msra.mxu0 %v10061_v16  ;;  %8558 = vmatpush3.msra.mxu1 %v10052_v15 }
  0x63   :  { %8550 = vmatprep.subr.mxu0 %v9851_v1  ;;  %8559 = vmatprep.subr.mxu1 %v9851_v1 }
  0x64   :  { %8551 = vmatpush3.msra.mxu0 %v10068_v17  ;;  %8560 = vmatpush3.msra.mxu1 %v10061_v16 }
  0x65   :  { %8553 = vmatmul.mubr.f32.vlgmr.msra.gmra.mxu0 %v9851_v1  ;;  %8566 = vmatprep.subr.mxu0 %v9851_v1 }
  0x66   :  { %8567 = vmatpush3.msra.mxu0 %v10046_v13  ;;  %8574 = vmatprep.mubr.msk.f32.mxu0 %vm9852_vm0, %v9851_v1 }
  0x67   :  { %8568 = vmatprep.subr.mxu0 %v9851_v1  ;;  %8561 = vmatprep.subr.mxu1 %v9851_v1 }
  0x68   :  { %8569 = vmatpush3.msra.mxu0 %v10052_v15  ;;  %8562 = vmatpush3.msra.mxu1 %v10068_v17 }
  0x69   :  { %8570 = vmatprep.subr.mxu0 %v9851_v1  ;;  %8577 = vmatprep.subr.mxu1 %v9851_v1 }
  0x6a   :  { %8571 = vmatpush3.msra.mxu0 %v10061_v16 }
  0x6b   :  { %8572 = vmatprep.subr.mxu0 %v9851_v1 }
  0x6c   :  { %8573 = vmatpush3.msra.mxu0 %v10068_v17 }
  0x6d   :  { %8588 = vmatprep.subr.mxu0 %v9851_v1 }
 0x11d   :  { %v247_v18 = vpop.f32.mrf.mxu0  ;;  %v10129_v45 = vpop.f32.mrf.mxu1 }
 0x11e   :  { %v10095_v25 = vadd.f32 %v8017_v24, %v247_v18 }
 0x11f   :  { %v8532_v19 = vpop.f32.mrf.mxu0  ;;  %v8543_v46 = vpop.f32.mrf.mxu1 }
 0x125   :  { %v411_v21 = vpop.f32.mrf.mxu0 }
 0x126   :  { %v412_v22 = vadd.f32 %v411_v21, %v10088_v20 }
 0x127   :  { %v8554_v23 = vpop.f32.mrf.mxu0 }
 0x128   :  { %423 = vrot.lane.b32.xlu0 %v412_v22, %s9853_s14  ;;  %v415_v26 = vadd.f32 %v412_v22, %v10095_v25 }
 0x12a   :  { %v8021_v27 = vmul.f32 -1.442695, %v415_v26 }
 0x12c   :  { %9423 = vpow2.f32 %v8021_v27 }
 0x139   :  { %v9424_v28 = vpop.eup %9423 }
 0x13a   :  { %v419_v29 = vadd.f32 1.0, %v9424_v28 }
 0x13c   :  { %9425 = vrcp.f32 %v419_v29 }
 0x149   :  { %v9426_v30 = vpop.eup %9425 }
 0x14a   :  { %v433_v40 = vsub.f32 1.0, %v9426_v30  ;;  %v439_v42 = vmul.f32 0.0, %v9426_v30 }
 0x19a   :  { %v424_v31 = vpop.permute.xlu0 %423 }
 0x19b   :  { %v426_v32 = vmul.f32 %v9426_v30, %v424_v31 }
 0x19d   :  { %428 = vrot.lane.b32.xlu0 %v426_v32, %s9853_s14 }
 0x20f   :  { %v429_v33 = vpop.permute.xlu0 %428 }
 0x210   :  { %v431_v34 = vadd.f32 %v429_v33, %v10095_v25 }
 0x212   :  { %9427 = vtanh.f32 %v431_v34 }
 0x21f   :  { %v9428_v39 = vpop.eup %9427 }
 0x220   :  { %435 = vrot.lane.b32.xlu1 %v9428_v39, %s9854_s3 }
 0x292   :  { %v436_v41 = vpop.permute.xlu1 %435 }
 0x293   :  { %v438_v43 = vmul.f32 %v436_v41, %v433_v40 }
 0x295   :  { %v440_v44 = vadd.f32 %v439_v42, %v438_v43 }
 0x297   :  { %442 = vrot.lane.b32.xlu1 %v440_v44, %s9854_s3  ;;  %v544_v62 = vrot.slane %v440_v44, 7 }
 0x309   :  { %v443_v47 = vpop.permute.xlu1 %442 }
 0x30a   :  { %445 = vst.msk [vmem:[#allocation3] sm:$0x1] %vm135_vm1, %v443_v47  ;;  %8564 = vmatmul.mubr.msk.f32.vlgmr.msra.gmra.mxu1 %vm177_vm2, %v443_v47 }
 0x30b   :  { %8578 = vmatpush3.msra.mxu1 %v10046_v13  ;;  %8585 = vmatprep.mubr.msk.f32.mxu1 %vm9852_vm0, %v9851_v1 }
 0x30c   :  { %8579 = vmatprep.subr.mxu1 %v9851_v1 }
 0x30d   :  { %8580 = vmatpush3.msra.mxu1 %v10052_v15 }
 0x30e   :  { %8581 = vmatprep.subr.mxu1 %v9851_v1 }
 0x30f   :  { %8582 = vmatpush3.msra.mxu1 %v10061_v16 }
 0x310   :  { %8583 = vmatprep.subr.mxu1 %v9851_v1 }
 0x311   :  { %8584 = vmatpush3.msra.mxu1 %v10068_v17 }
 0x312   :  { %8599 = vmatprep.subr.mxu1 %v9851_v1 }
 0x3ca   :  { %v514_v48 = vpop.f32.mrf.mxu1 }
 0x3cb   :  { %v515_v49 = vadd.f32 %v514_v48, %v10088_v20 }
 0x3cc   :  { %v8565_v50 = vpop.f32.mrf.mxu1 }
 0x3cd   :  { %v519_v51 = vrot.slane %v515_v49, 7 }
 0x3cf   :  { %528 = vrot.lane.b32.xlu0 %v519_v51, %s9853_s14  ;;  %v521_v52 = vadd.f32 %v519_v51, %v10095_v25 }
 0x3d1   :  { %v8023_v53 = vmul.f32 -1.442695, %v521_v52 }
 0x3d3   :  { %9429 = vpow2.f32 %v8023_v53 }
 0x3e0   :  { %v9430_v54 = vpop.eup %9429 }
 0x3e1   :  { %v525_v55 = vadd.f32 1.0, %v9430_v54 }
 0x3e3   :  { %9431 = vrcp.f32 %v525_v55 }
 0x3f0   :  { %v9432_v56 = vpop.eup %9431 }
 0x3f1   :  { %v538_v63 = vsub.f32 1.0, %v9432_v56  ;;  %v546_v3 = vmul.f32 %v9432_v56, %v544_v62 }
 0x441   :  { %v529_v57 = vpop.permute.xlu0 %528 }
 0x442   :  { %v531_v58 = vmul.f32 %v9432_v56, %v529_v57 }
 0x444   :  { %533 = vrot.lane.b32.xlu1 %v531_v58, %s9853_s14 }
 0x4b6   :  { %v534_v59 = vpop.permute.xlu1 %533 }
 0x4b7   :  { %v536_v60 = vadd.f32 %v534_v59, %v10095_v25 }
 0x4b9   :  { %9433 = vtanh.f32 %v536_v60 }
 0x4c6   :  { %v9434_v61 = vpop.eup %9433 }
 0x4c7   :  { %540 = vrot.lane.b32.xlu0 %v9434_v61, %s9854_s3 }
 0x539   :  { %v541_v0 = vpop.permute.xlu0 %540 }
 0x53a   :  { %v543_v2 = vmul.f32 %v541_v0, %v538_v63 }
 0x53c   :  { %v10149_v4 = vadd.f32 %v546_v3, %v543_v2 }
 0x53e   :  { %v554_v5 = vrot.slane %v10149_v4, 1  ;;  %v655_v28 = vrot.slane %v10149_v4, 7 }
 0x540   :  { %555 = vrot.lane.b32.xlu1 %v554_v5, %s9854_s3 }
 0x5b2   :  { %v556_v6 = vpop.permute.xlu1 %555 }
 0x5b3   :  { %8575 = vmatmul.mubr.msk.f32.vlgmr.msra.gmra.mxu0 %vm177_vm2, %v556_v6 }
 0x5b4   :  { %8589 = vmatpush3.msra.mxu0 %v10046_v13  ;;  %8596 = vmatprep.mubr.msk.f32.mxu0 %vm9852_vm0, %v9851_v1 }
 0x5b5   :  { %8590 = vmatprep.subr.mxu0 %v9851_v1 }
 0x5b6   :  { %8591 = vmatpush3.msra.mxu0 %v10052_v15 }
 0x5b7   :  { %8592 = vmatprep.subr.mxu0 %v9851_v1 }
 0x5b8   :  { %8593 = vmatpush3.msra.mxu0 %v10061_v16 }
 0x5b9   :  { %8594 = vmatprep.subr.mxu0 %v9851_v1 }
 0x5ba   :  { %8595 = vmatpush3.msra.mxu0 %v10068_v17 }
 0x5bb   :  { %8610 = vmatprep.subr.mxu0 %v9851_v1 }
 0x673   :  { %v625_v7 = vpop.f32.mrf.mxu0 }
 0x674   :  { %v626_v8 = vadd.f32 %v625_v7, %v10088_v20 }
 0x675   :  { %v8576_v9 = vpop.f32.mrf.mxu0 }
 0x676   :  { %v630_v10 = vrot.slane %v626_v8, 6 }
 0x678   :  { %639 = vrot.lane.b32.xlu0 %v630_v10, %s9853_s14  ;;  %v632_v11 = vadd.f32 %v630_v10, %v10095_v25 }
 0x67a   :  { %v8025_v12 = vmul.f32 -1.442695, %v632_v11 }
 0x67c   :  { %9435 = vpow2.f32 %v8025_v12 }
 0x689   :  { %v9436_v14 = vpop.eup %9435 }
 0x68a   :  { %v636_v18 = vadd.f32 1.0, %v9436_v14 }
 0x68c   :  { %9437 = vrcp.f32 %v636_v18 }
 0x699   :  { %v9438_v19 = vpop.eup %9437 }
 0x69a   :  { %v649_v27 = vsub.f32 1.0, %v9438_v19  ;;  %v657_v30 = vmul.f32 %v9438_v19, %v655_v28 }
 0x6ea   :  { %v640_v21 = vpop.permute.xlu0 %639 }
 0x6eb   :  { %v642_v22 = vmul.f32 %v9438_v19, %v640_v21 }
 0x6ed   :  { %644 = vrot.lane.b32.xlu1 %v642_v22, %s9853_s14 }
 0x75f   :  { %v645_v23 = vpop.permute.xlu1 %644 }
 0x760   :  { %v647_v24 = vadd.f32 %v645_v23, %v10095_v25 }
 0x762   :  { %9439 = vtanh.f32 %v647_v24 }
 0x76f   :  { %v9440_v26 = vpop.eup %9439 }
 0x770   :  { %651 = vrot.lane.b32.xlu0 %v9440_v26, %s9854_s3 }
 0x7e2   :  { %v652_v29 = vpop.permute.xlu0 %651 }
 0x7e3   :  { %v654_v31 = vmul.f32 %v652_v29, %v649_v27 }
 0x7e5   :  { %v10171_v32 = vadd.f32 %v657_v30, %v654_v31 }
 0x7e7   :  { %v665_v33 = vrot.slane %v10171_v32, 2  ;;  %v766_v51 = vrot.slane %v10171_v32, 7 }
 0x7e9   :  { %666 = vrot.lane.b32.xlu1 %v665_v33, %s9854_s3 }
 0x85b   :  { %v667_v34 = vpop.permute.xlu1 %666 }
 0x85c   :  { %8586 = vmatmul.mubr.msk.f32.vlgmr.msra.gmra.mxu1 %vm177_vm2, %v667_v34 }
 0x85d   :  { %8600 = vmatpush3.msra.mxu1 %v10046_v13  ;;  %8607 = vmatprep.mubr.msk.f32.mxu1 %vm9852_vm0, %v9851_v1 }
 0x85e   :  { %8601 = vmatprep.subr.mxu1 %v9851_v1 }
 0x85f   :  { %8602 = vmatpush3.msra.mxu1 %v10052_v15 }
 0x860   :  { %8603 = vmatprep.subr.mxu1 %v9851_v1 }
 0x861   :  { %8604 = vmatpush3.msra.mxu1 %v10061_v16 }
 0x862   :  { %8605 = vmatprep.subr.mxu1 %v9851_v1 }
 0x863   :  { %8606 = vmatpush3.msra.mxu1 %v10068_v17 }
 0x864   :  { %8621 = vmatprep.subr.mxu1 %v9851_v1 }
 0x91c   :  { %v736_v35 = vpop.f32.mrf.mxu1 }
 0x91d   :  { %v737_v36 = vadd.f32 %v736_v35, %v10088_v20 }
 0x91e   :  { %v8587_v37 = vpop.f32.mrf.mxu1 }
 0x91f   :  { %v741_v38 = vrot.slane %v737_v36, 5 }
 0x921   :  { %750 = vrot.lane.b32.xlu0 %v741_v38, %s9853_s14  ;;  %v743_v39 = vadd.f32 %v741_v38, %v10095_v25 }
 0x923   :  { %v8027_v40 = vmul.f32 -1.442695, %v743_v39 }
 0x925   :  { %9441 = vpow2.f32 %v8027_v40 }
 0x932   :  { %v9442_v41 = vpop.eup %9441 }
 0x933   :  { %v747_v42 = vadd.f32 1.0, %v9442_v41 }
 0x935   :  { %9443 = vrcp.f32 %v747_v42  ;;  %v10244_v42 = vld [vmem:[%s11737_s7 + $0x18] sm:$0xff] }
 0x942   :  { %v9444_v43 = vpop.eup %9443 }
 0x943   :  { %v760_v50 = vsub.f32 1.0, %v9444_v43  ;;  %v768_v53 = vmul.f32 %v9444_v43, %v766_v51 }
 0x993   :  { %v751_v44 = vpop.permute.xlu0 %750 }
 0x994   :  { %v753_v46 = vmul.f32 %v9444_v43, %v751_v44  ;;  %v10250_v44 = vld [vmem:[%s11737_s7 + $0x10] sm:$0xff] }
 0x996   :  { %755 = vrot.lane.b32.xlu1 %v753_v46, %s9853_s14  ;;  %v10259_v46 = vld [vmem:[%s11737_s7 + $0x8] sm:$0xff] }
 0xa08   :  { %v756_v47 = vpop.permute.xlu1 %755 }
 0xa09   :  { %v758_v48 = vadd.f32 %v756_v47, %v10095_v25  ;;  %v10266_v47 = vld [vmem:[%s11737_s7] sm:$0xff] }
 0xa0b   :  { %9445 = vtanh.f32 %v758_v48 }
 0xa18   :  { %v9446_v49 = vpop.eup %9445 }
 0xa19   :  { %762 = vrot.lane.b32.xlu0 %v9446_v49, %s9854_s3 }
 0xa8b   :  { %v763_v52 = vpop.permute.xlu0 %762 }
 0xa8c   :  { %v765_v54 = vmul.f32 %v763_v52, %v760_v50  ;;  %v10288_v52 = vld [vmem:[%s11739_s9] sm:$0x1] }
 0xa8e   :  { %v10193_v55 = vadd.f32 %v768_v53, %v765_v54 }
 0xa90   :  { %v776_v56 = vrot.slane %v10193_v55, 3  ;;  %v877_v11 = vrot.slane %v10193_v55, 7 }
 0xa92   :  { %777 = vrot.lane.b32.xlu1 %v776_v56, %s9854_s3 }
 0xb04   :  { %v778_v57 = vpop.permute.xlu1 %777 }
 0xb05   :  { %8597 = vmatmul.mubr.msk.f32.vlgmr.msra.gmra.mxu0 %vm177_vm2, %v778_v57 }
 0xb06   :  { %8611 = vmatpush3.msra.mxu0 %v10046_v13  ;;  %8618 = vmatprep.mubr.msk.f32.mxu0 %vm9852_vm0, %v9851_v1 }
 0xb07   :  { %8612 = vmatprep.subr.mxu0 %v9851_v1 }
 0xb08   :  { %8613 = vmatpush3.msra.mxu0 %v10052_v15 }
 0xb09   :  { %8614 = vmatprep.subr.mxu0 %v9851_v1 }
 0xb0a   :  { %8615 = vmatpush3.msra.mxu0 %v10061_v16 }
 0xb0b   :  { %8616 = vmatprep.subr.mxu0 %v9851_v1 }
 0xb0c   :  { %8617 = vmatpush3.msra.mxu0 %v10068_v17 }
 0xb0d   :  { %8632 = vmatprep.subr.mxu0 %v9851_v1 }
 0xbc5   :  { %v847_v58 = vpop.f32.mrf.mxu0 }
 0xbc6   :  { %v848_v59 = vadd.f32 %v847_v58, %v10088_v20 }
 0xbc7   :  { %v8598_v60 = vpop.f32.mrf.mxu0 }
 0xbc8   :  { %v852_v61 = vrot.slane %v848_v59, 4 }
 0xbca   :  { %861 = vrot.lane.b32.xlu0 %v852_v61, %s9853_s14  ;;  %v854_v62 = vadd.f32 %v852_v61, %v10095_v25 }
 0xbcc   :  { %v8029_v63 = vmul.f32 -1.442695, %v854_v62 }
 0xbce   :  { %9447 = vpow2.f32 %v8029_v63 }
 0xbdb   :  { %v9448_v0 = vpop.eup %9447 }
 0xbdc   :  { %v858_v2 = vadd.f32 1.0, %v9448_v0 }
 0xbde   :  { %9449 = vrcp.f32 %v858_v2 }
 0xbeb   :  { %v9450_v3 = vpop.eup %9449 }
 0xbec   :  { %v871_v10 = vsub.f32 1.0, %v9450_v3  ;;  %v879_v14 = vmul.f32 %v9450_v3, %v877_v11 }
 0xc3c   :  { %v862_v5 = vpop.permute.xlu0 %861 }
 0xc3d   :  { %v864_v6 = vmul.f32 %v9450_v3, %v862_v5 }
 0xc3f   :  { %866 = vrot.lane.b32.xlu1 %v864_v6, %s9853_s14 }
 0xcb1   :  { %v867_v7 = vpop.permute.xlu1 %866 }
 0xcb2   :  { %v869_v8 = vadd.f32 %v867_v7, %v10095_v25 }
 0xcb4   :  { %9451 = vtanh.f32 %v869_v8 }
 0xcc1   :  { %v9452_v9 = vpop.eup %9451 }
 0xcc2   :  { %873 = vrot.lane.b32.xlu0 %v9452_v9, %s9854_s3 }
 0xd34   :  { %v874_v12 = vpop.permute.xlu0 %873 }
 0xd35   :  { %v876_v18 = vmul.f32 %v874_v12, %v871_v10 }
 0xd37   :  { %v10215_v19 = vadd.f32 %v879_v14, %v876_v18 }
 0xd39   :  { %v887_v21 = vrot.slane %v10215_v19, 4  ;;  %v988_v36 = vrot.slane %v10215_v19, 7 }
 0xd3b   :  { %888 = vrot.lane.b32.xlu1 %v887_v21, %s9854_s3 }
 0xdad   :  { %v889_v22 = vpop.permute.xlu1 %888 }
 0xdae   :  { %8608 = vmatmul.mubr.msk.f32.vlgmr.msra.gmra.mxu1 %vm177_vm2, %v889_v22 }
 0xdaf   :  { %8622 = vmatpush3.msra.mxu1 %v10046_v13  ;;  %8629 = vmatprep.mubr.msk.f32.mxu1 %vm9852_vm0, %v9851_v1 }
 0xdb0   :  { %8623 = vmatprep.subr.mxu1 %v9851_v1 }
 0xdb1   :  { %8624 = vmatpush3.msra.mxu1 %v10052_v15 }
 0xdb2   :  { %8625 = vmatprep.subr.mxu1 %v9851_v1 }
 0xdb3   :  { %8626 = vmatpush3.msra.mxu1 %v10061_v16 }
 0xdb4   :  { %8627 = vmatprep.subr.mxu1 %v9851_v1 }
 0xdb5   :  { %8628 = vmatpush3.msra.mxu1 %v10068_v17 }
 0xdb6   :  { %8643 = vmatprep.subr.mxu1 %v9851_v1 }
 0xe6e   :  { %v958_v23 = vpop.f32.mrf.mxu1 }
 0xe6f   :  { %v959_v13 = vadd.f32 %v958_v23, %v10088_v20 }
 0xe70   :  { %v8609_v24 = vpop.f32.mrf.mxu1 }
 0xe71   :  { %v963_v26 = vrot.slane %v959_v13, 3 }
 0xe73   :  { %972 = vrot.lane.b32.xlu0 %v963_v26, %s9853_s14  ;;  %v965_v27 = vadd.f32 %v963_v26, %v10095_v25 }
 0xe75   :  { %v8031_v15 = vmul.f32 -1.442695, %v965_v27 }
 0xe77   :  { %9453 = vpow2.f32 %v8031_v15 }
 0xe84   :  { %v9454_v28 = vpop.eup %9453 }
 0xe85   :  { %v969_v29 = vadd.f32 1.0, %v9454_v28 }
 0xe87   :  { %9455 = vrcp.f32 %v969_v29 }
 0xe94   :  { %v9456_v16 = vpop.eup %9455 }
 0xe95   :  { %v982_v35 = vsub.f32 1.0, %v9456_v16  ;;  %v990_v38 = vmul.f32 %v9456_v16, %v988_v36 }
 0xee5   :  { %v973_v30 = vpop.permute.xlu0 %972 }
 0xee6   :  { %v975_v31 = vmul.f32 %v9456_v16, %v973_v30 }
 0xee8   :  { %977 = vrot.lane.b32.xlu1 %v975_v31, %s9853_s14 }
 0xf5a   :  { %v978_v17 = vpop.permute.xlu1 %977 }
 0xf5b   :  { %v980_v33 = vadd.f32 %v978_v17, %v10095_v25 }
 0xf5d   :  { %9457 = vtanh.f32 %v980_v33 }
 0xf6a   :  { %v9458_v34 = vpop.eup %9457 }
 0xf6b   :  { %984 = vrot.lane.b32.xlu0 %v9458_v34, %s9854_s3 }
 0xfdd   :  { %v985_v37 = vpop.permute.xlu0 %984 }
 0xfde   :  { %v987_v39 = vmul.f32 %v985_v37, %v982_v35 }
 0xfe0   :  { %v10237_v40 = vadd.f32 %v990_v38, %v987_v39 }
 0xfe2   :  { %v998_v41 = vrot.slane %v10237_v40, 5  ;;  %v1099_v23 = vrot.slane %v10237_v40, 7 }
 0xfe4   :  { %999 = vrot.lane.b32.xlu1 %v998_v41, %s9854_s3 }
0x1056   :  { %v1000_v43 = vpop.permute.xlu1 %999 }
0x1057   :  { %8619 = vmatmul.mubr.msk.f32.vlgmr.msra.gmra.mxu0 %vm177_vm2, %v1000_v43 }
0x1058   :  { %8633 = vmatpush3.msra.mxu0 %v10244_v42  ;;  %8640 = vmatprep.mubr.msk.f32.mxu0 %vm9852_vm0, %v9851_v1 }
0x1059   :  { %8634 = vmatprep.subr.mxu0 %v9851_v1 }
0x105a   :  { %8635 = vmatpush3.msra.mxu0 %v10250_v44 }
0x105b   :  { %8636 = vmatprep.subr.mxu0 %v9851_v1 }
0x105c   :  { %8637 = vmatpush3.msra.mxu0 %v10259_v46 }
0x105d   :  { %8638 = vmatprep.subr.mxu0 %v9851_v1 }
0x105e   :  { %8639 = vmatpush3.msra.mxu0 %v10266_v47 }
0x105f   :  { %8641 = vmatmul.mubr.f32.vlgmr.msra.gmra.mxu0 %v9851_v1  ;;  %8654 = vmatprep.subr.mxu0 %v9851_v1 }
0x1060   :  { %8655 = vmatpush3.msra.mxu0 %v10244_v42  ;;  %8662 = vmatprep.mubr.msk.f32.mxu0 %vm9852_vm0, %v9851_v1 }
0x1061   :  { %8656 = vmatprep.subr.mxu0 %v9851_v1 }
0x1062   :  { %8657 = vmatpush3.msra.mxu0 %v10250_v44 }
0x1063   :  { %8658 = vmatprep.subr.mxu0 %v9851_v1 }
0x1064   :  { %8659 = vmatpush3.msra.mxu0 %v10259_v46 }
0x1065   :  { %8660 = vmatprep.subr.mxu0 %v9851_v1 }
0x1066   :  { %8661 = vmatpush3.msra.mxu0 %v10266_v47 }
0x1067   :  { %8676 = vmatprep.subr.mxu0 %v9851_v1 }
0x1117   :  { %v1069_v48 = vpop.f32.mrf.mxu0 }
0x1118   :  { %v1070_v49 = vadd.f32 %v1069_v48, %v10088_v20  ;;  %v8019_v20 = vld [vmem:[%s11738_s8] ss:$0 sm:$0xff] }
0x1119   :  { %v8620_v50 = vpop.f32.mrf.mxu0  ;;  %v10297_v60 = vadd.f32 %v8019_v20, %v10129_v45 }
0x111a   :  { %v1074_v51 = vrot.slane %v1070_v49, 2 }
0x111c   :  { %1083 = vrot.lane.b32.xlu0 %v1074_v51, %s9853_s14  ;;  %v1076_v58 = vadd.f32 %v1074_v51, %v10095_v25 }
0x111e   :  { %v8033_v59 = vmul.f32 -1.442695, %v1076_v58 }
0x111f   :  { %v1286_v53 = vpop.f32.mrf.mxu0 }
0x1120   :  { %v1287_v54 = vadd.f32 %v1286_v53, %v10288_v52  ;;  %9459 = vpow2.f32 %v8033_v59 }
0x1121   :  { %v8642_v56 = vpop.f32.mrf.mxu0 }
0x1122   :  { %v1291_v57 = vrot.slane %v1287_v54, 1 }
0x1124   :  { %1300 = vrot.lane.b32.xlu1 %v1291_v57, %s9853_s14  ;;  %v1293_v61 = vadd.f32 %v1291_v57, %v10297_v60 }
0x1126   :  { %v8036_v62 = vmul.f32 -1.442695, %v1293_v61 }
0x1128   :  { %9461 = vpow2.f32 %v8036_v62 }
0x112d   :  { %v9460_v63 = vpop.eup %9459 }
0x112e   :  { %v1080_v0 = vadd.f32 1.0, %v9460_v63 }
0x1130   :  { %9463 = vrcp.f32 %v1080_v0 }
0x1135   :  { %v9462_v2 = vpop.eup %9461 }
0x1136   :  { %v1297_v3 = vadd.f32 1.0, %v9462_v2 }
0x1138   :  { %9465 = vrcp.f32 %v1297_v3 }
0x113d   :  { %v9464_v5 = vpop.eup %9463 }
0x113e   :  { %v1093_v22 = vsub.f32 1.0, %v9464_v5  ;;  %v1101_v24 = vmul.f32 %v9464_v5, %v1099_v23 }
0x1145   :  { %v9466_v8 = vpop.eup %9465 }
0x1146   :  { %v1310_v28 = vsub.f32 1.0, %v9466_v8  ;;  %v1316_v16 = vmul.f32 0.0, %v9466_v8 }
0x118e   :  { %v1084_v6 = vpop.permute.xlu0 %1083 }
0x118f   :  { %v1086_v7 = vmul.f32 %v9464_v5, %v1084_v6 }
0x1191   :  { %1088 = vrot.lane.b32.xlu0 %v1086_v7, %s9853_s14 }
0x1196   :  { %v1301_v9 = vpop.permute.xlu1 %1300 }
0x1197   :  { %v1303_v45 = vmul.f32 %v9466_v8, %v1301_v9 }
0x1199   :  { %1305 = vrot.lane.b32.xlu1 %v1303_v45, %s9853_s14 }
0x1203   :  { %v1089_v10 = vpop.permute.xlu0 %1088 }
0x1204   :  { %v1091_v11 = vadd.f32 %v1089_v10, %v10095_v25 }
0x1206   :  { %9467 = vtanh.f32 %v1091_v11 }
0x120b   :  { %v1306_v12 = vpop.permute.xlu1 %1305 }
0x120c   :  { %v1308_v14 = vadd.f32 %v1306_v12, %v10297_v60 }
0x120e   :  { %9469 = vtanh.f32 %v1308_v14 }
0x1213   :  { %v9468_v18 = vpop.eup %9467 }
0x1214   :  { %1095 = vrot.lane.b32.xlu0 %v9468_v18, %s9854_s3 }
0x121b   :  { %v9470_v21 = vpop.eup %9469 }
0x121c   :  { %1312 = vrot.lane.b32.xlu1 %v9470_v21, %s9854_s3 }
0x1286   :  { %v1096_v13 = vpop.permute.xlu0 %1095 }
0x1287   :  { %v1098_v26 = vmul.f32 %v1096_v13, %v1093_v22 }
0x1289   :  { %v10307_v27 = vadd.f32 %v1101_v24, %v1098_v26 }
0x128b   :  { %v1109_v15 = vrot.slane %v10307_v27, 6 }
0x128d   :  { %1110 = vrot.lane.b32.xlu0 %v1109_v15, %s9854_s3 }
0x128e   :  { %v1313_v29 = vpop.permute.xlu1 %1312 }
0x128f   :  { %v1315_v30 = vmul.f32 %v1313_v29, %v1310_v28 }
0x1291   :  { %v10311_v31 = vadd.f32 %v1316_v16, %v1315_v30 }
0x1293   :  { %v1323_v17 = vrot.slane %v10311_v31, 7  ;;  %v1424_v59 = vrot.slane %v10311_v31, 1 }
0x1295   :  { %1324 = vrot.lane.b32.xlu1 %v1323_v17, %s9854_s3 }
0x12ff   :  { %v1111_v33 = vpop.permute.xlu0 %1110 }
0x1300   :  { %8630 = vmatmul.mubr.msk.f32.vlgmr.msra.gmra.mxu1 %vm177_vm2, %v1111_v33 }
0x1301   :  { %8644 = vmatpush3.msra.mxu1 %v10244_v42  ;;  %8651 = vmatprep.mubr.msk.f32.mxu1 %vm9852_vm0, %v9851_v1 }
0x1302   :  { %8645 = vmatprep.subr.mxu1 %v9851_v1 }
0x1303   :  { %8646 = vmatpush3.msra.mxu1 %v10250_v44 }
0x1304   :  { %8647 = vmatprep.subr.mxu1 %v9851_v1 }
0x1305   :  { %8648 = vmatpush3.msra.mxu1 %v10259_v46 }
0x1306   :  { %8649 = vmatprep.subr.mxu1 %v9851_v1 }
0x1307   :  { %8650 = vmatpush3.msra.mxu1 %v10266_v47  ;;  %v1325_v34 = vpop.permute.xlu1 %1324 }
0x1308   :  { %8652 = vmatmul.mubr.msk.f32.vlgmr.msra.gmra.mxu1 %vm177_vm2, %v1325_v34  ;;  %8665 = vmatprep.subr.mxu1 %v9851_v1 }
0x1309   :  { %8666 = vmatpush3.msra.mxu1 %v10244_v42  ;;  %8673 = vmatprep.mubr.msk.f32.mxu1 %vm9852_vm0, %v9851_v1 }
0x130a   :  { %8667 = vmatprep.subr.mxu1 %v9851_v1 }
0x130b   :  { %8668 = vmatpush3.msra.mxu1 %v10250_v44 }
0x130c   :  { %8669 = vmatprep.subr.mxu1 %v9851_v1 }
0x130d   :  { %8670 = vmatpush3.msra.mxu1 %v10259_v46 }
0x130e   :  { %8671 = vmatprep.subr.mxu1 %v9851_v1 }
0x130f   :  { %8672 = vmatpush3.msra.mxu1 %v10266_v47 }
0x1310   :  { %8687 = vmatprep.subr.mxu1 %v9851_v1 }
0x13c0   :  { %v10337_v35 = vpop.f32.mrf.mxu1 }
0x13c2   :  { %v8631_v36 = vpop.f32.mrf.mxu1 }
0x13c8   :  { %v1394_v37 = vpop.f32.mrf.mxu1 }
0x13c9   :  { %v1395_v38 = vadd.f32 %v1394_v37, %v10288_v52 }
0x13ca   :  { %v8653_v39 = vpop.f32.mrf.mxu1 }
0x13cb   :  { %v1399_v41 = vrot.slane %v1395_v38, 2 }
0x13cd   :  { %1408 = vrot.lane.b32.xlu0 %v1399_v41, %s9853_s14  ;;  %v1401_v43 = vadd.f32 %v1399_v41, %v10297_v60 }
0x13cf   :  { %v8038_v48 = vmul.f32 -1.442695, %v1401_v43 }
0x13d1   :  { %9471 = vpow2.f32 %v8038_v48 }
0x13de   :  { %v9472_v49 = vpop.eup %9471 }
0x13df   :  { %v1405_v50 = vadd.f32 1.0, %v9472_v49 }
0x13e1   :  { %9473 = vrcp.f32 %v1405_v50 }
0x13ee   :  { %v9474_v51 = vpop.eup %9473 }
0x13ef   :  { %v1418_v20 = vsub.f32 1.0, %v9474_v51  ;;  %v1426_v62 = vmul.f32 %v9474_v51, %v1424_v59 }
0x143f   :  { %v1409_v53 = vpop.permute.xlu0 %1408 }
0x1440   :  { %v1411_v54 = vmul.f32 %v9474_v51, %v1409_v53 }
0x1442   :  { %1413 = vrot.lane.b32.xlu1 %v1411_v54, %s9853_s14 }
0x14b4   :  { %v1414_v56 = vpop.permute.xlu1 %1413 }
0x14b5   :  { %v1416_v57 = vadd.f32 %v1414_v56, %v10297_v60 }
0x14b7   :  { %9475 = vtanh.f32 %v1416_v57 }
0x14c4   :  { %v9476_v58 = vpop.eup %9475 }
0x14c5   :  { %1420 = vrot.lane.b32.xlu0 %v9476_v58, %s9854_s3 }
0x1537   :  { %v1421_v61 = vpop.permute.xlu0 %1420 }
0x1538   :  { %v1423_v63 = vmul.f32 %v1421_v61, %v1418_v20 }
0x153a   :  { %v10346_v0 = vadd.f32 %v1426_v62, %v1423_v63 }
0x153c   :  { %v1433_v2 = vrot.slane %v10346_v0, 6  ;;  %v1534_v24 = vrot.slane %v10346_v0, 1 }
0x153e   :  { %1434 = vrot.lane.b32.xlu1 %v1433_v2, %s9854_s3 }
0x15b0   :  { %v1435_v3 = vpop.permute.xlu1 %1434 }
0x15b1   :  { %8663 = vmatmul.mubr.msk.f32.vlgmr.msra.gmra.mxu0 %vm177_vm2, %v1435_v3 }
0x15b2   :  { %8677 = vmatpush3.msra.mxu0 %v10244_v42  ;;  %8684 = vmatprep.mubr.msk.f32.mxu0 %vm9852_vm0, %v9851_v1 }
0x15b3   :  { %8678 = vmatprep.subr.mxu0 %v9851_v1 }
0x15b4   :  { %8679 = vmatpush3.msra.mxu0 %v10250_v44 }
0x15b5   :  { %8680 = vmatprep.subr.mxu0 %v9851_v1 }
0x15b6   :  { %8681 = vmatpush3.msra.mxu0 %v10259_v46 }
0x15b7   :  { %8682 = vmatprep.subr.mxu0 %v9851_v1 }
0x15b8   :  { %8683 = vmatpush3.msra.mxu0 %v10266_v47 }
0x15b9   :  { %8698 = vmatprep.subr.mxu0 %v9851_v1 }
0x1671   :  { %v1504_v5 = vpop.f32.mrf.mxu0 }
0x1672   :  { %v1505_v6 = vadd.f32 %v1504_v5, %v10288_v52 }
0x1673   :  { %v8664_v7 = vpop.f32.mrf.mxu0 }
0x1674   :  { %v1509_v8 = vrot.slane %v1505_v6, 3 }
0x1676   :  { %1518 = vrot.lane.b32.xlu0 %v1509_v8, %s9853_s14  ;;  %v1511_v9 = vadd.f32 %v1509_v8, %v10297_v60 }
0x1678   :  { %v8040_v45 = vmul.f32 -1.442695, %v1511_v9 }
0x167a   :  { %9477 = vpow2.f32 %v8040_v45 }
0x1687   :  { %v9478_v10 = vpop.eup %9477 }
0x1688   :  { %v1515_v11 = vadd.f32 1.0, %v9478_v10 }
0x168a   :  { %9479 = vrcp.f32 %v1515_v11 }
0x1697   :  { %v9480_v12 = vpop.eup %9479 }
0x1698   :  { %v1528_v13 = vsub.f32 1.0, %v9480_v12  ;;  %v1536_v15 = vmul.f32 %v9480_v12, %v1534_v24 }
0x16e8   :  { %v1519_v14 = vpop.permute.xlu0 %1518 }
0x16e9   :  { %v1521_v18 = vmul.f32 %v9480_v12, %v1519_v14 }
0x16eb   :  { %1523 = vrot.lane.b32.xlu1 %v1521_v18, %s9853_s14 }
0x175d   :  { %v1524_v21 = vpop.permute.xlu1 %1523 }
0x175e   :  { %v1526_v22 = vadd.f32 %v1524_v21, %v10297_v60 }
0x1760   :  { %9481 = vtanh.f32 %v1526_v22 }
0x176d   :  { %v9482_v23 = vpop.eup %9481 }
0x176e   :  { %1530 = vrot.lane.b32.xlu0 %v9482_v23, %s9854_s3 }
0x17e0   :  { %v1531_v26 = vpop.permute.xlu0 %1530 }
0x17e1   :  { %v1533_v28 = vmul.f32 %v1531_v26, %v1528_v13 }
0x17e3   :  { %v10368_v29 = vadd.f32 %v1536_v15, %v1533_v28 }
0x17e5   :  { %v1543_v16 = vrot.slane %v10368_v29, 5  ;;  %v1644_v56 = vrot.slane %v10368_v29, 1 }
0x17e7   :  { %1544 = vrot.lane.b32.xlu1 %v1543_v16, %s9854_s3 }
0x1859   :  { %v1545_v30 = vpop.permute.xlu1 %1544 }
0x185a   :  { %8674 = vmatmul.mubr.msk.f32.vlgmr.msra.gmra.mxu1 %vm177_vm2, %v1545_v30 }
0x185b   :  { %8688 = vmatpush3.msra.mxu1 %v10244_v42  ;;  %8695 = vmatprep.mubr.msk.f32.mxu1 %vm9852_vm0, %v9851_v1 }
0x185c   :  { %8689 = vmatprep.subr.mxu1 %v9851_v1 }
0x185d   :  { %8690 = vmatpush3.msra.mxu1 %v10250_v44 }
0x185e   :  { %8691 = vmatprep.subr.mxu1 %v9851_v1 }
0x185f   :  { %8692 = vmatpush3.msra.mxu1 %v10259_v46 }
0x1860   :  { %8693 = vmatprep.subr.mxu1 %v9851_v1 }
0x1861   :  { %8694 = vmatpush3.msra.mxu1 %v10266_v47 }
0x1862   :  { %8709 = vmatprep.subr.mxu1 %v9851_v1 }
0x191a   :  { %v1614_v17 = vpop.f32.mrf.mxu1 }
0x191b   :  { %v1615_v33 = vadd.f32 %v1614_v17, %v10288_v52 }
0x191c   :  { %v8675_v34 = vpop.f32.mrf.mxu1 }
0x191d   :  { %v1619_v36 = vrot.slane %v1615_v33, 4 }
0x191f   :  { %1628 = vrot.lane.b32.xlu0 %v1619_v36, %s9853_s14  ;;  %v1621_v37 = vadd.f32 %v1619_v36, %v10297_v60 }
0x1921   :  { %v8042_v38 = vmul.f32 -1.442695, %v1621_v37 }
0x1923   :  { %9483 = vpow2.f32 %v8042_v38 }
0x1930   :  { %v9484_v39 = vpop.eup %9483 }
0x1931   :  { %v1625_v41 = vadd.f32 1.0, %v9484_v39 }
0x1933   :  { %9485 = vrcp.f32 %v1625_v41 }
0x1940   :  { %v9486_v43 = vpop.eup %9485 }
0x1941   :  { %v1638_v54 = vsub.f32 1.0, %v9486_v43  ;;  %v1646_v58 = vmul.f32 %v9486_v43, %v1644_v56 }
0x1991   :  { %v1629_v48 = vpop.permute.xlu0 %1628 }
0x1992   :  { %v1631_v49 = vmul.f32 %v9486_v43, %v1629_v48 }
0x1994   :  { %1633 = vrot.lane.b32.xlu1 %v1631_v49, %s9853_s14 }
0x1a06   :  { %v1634_v50 = vpop.permute.xlu1 %1633 }
0x1a07   :  { %v1636_v51 = vadd.f32 %v1634_v50, %v10297_v60 }
0x1a09   :  { %9487 = vtanh.f32 %v1636_v51 }
0x1a16   :  { %v9488_v53 = vpop.eup %9487 }
0x1a17   :  { %1640 = vrot.lane.b32.xlu0 %v9488_v53, %s9854_s3 }
0x1a89   :  { %v1641_v57 = vpop.permute.xlu0 %1640 }
0x1a8a   :  { %v1643_v20 = vmul.f32 %v1641_v57, %v1638_v54  ;;  %v9679_v54 = vld [vmem:[%s11735_s5] sm:$0x1] }
0x1a8b   :  { %v1181_v56 = vadd.f32 %v9679_v54, %v10337_v35 }
0x1a8c   :  { %v10390_v59 = vadd.f32 %v1646_v58, %v1643_v20 }
0x1a8d   :  { %v1185_v58 = vrot.slane %v1181_v56, 1  ;;  %v10507_v56 = vld [vmem:[#allocation10 + $0x10] sm:$0xff] }
0x1a8e   :  { %v1653_v61 = vrot.slane %v10390_v59, 4  ;;  %v1754_v22 = vrot.slane %v10390_v59, 1 }
0x1a8f   :  { %v1187_v20 = vadd.f32 %v1185_v58, %v10095_v25 }
0x1a90   :  { %1654 = vrot.lane.b32.xlu1 %v1653_v61, %s9854_s3 }
0x1a91   :  { %v8035_v61 = vmul.f32 -1.442695, %v1187_v20 }
0x1b02   :  { %v1655_v62 = vpop.permute.xlu1 %1654 }
0x1b03   :  { %8685 = vmatmul.mubr.msk.f32.vlgmr.msra.gmra.mxu0 %vm177_vm2, %v1655_v62 }
0x1b04   :  { %8699 = vmatpush3.msra.mxu0 %v10244_v42  ;;  %8706 = vmatprep.mubr.msk.f32.mxu0 %vm9852_vm0, %v9851_v1 }
0x1b05   :  { %8700 = vmatprep.subr.mxu0 %v9851_v1 }
0x1b06   :  { %8701 = vmatpush3.msra.mxu0 %v10250_v44 }
0x1b07   :  { %8702 = vmatprep.subr.mxu0 %v9851_v1 }
0x1b08   :  { %8703 = vmatpush3.msra.mxu0 %v10259_v46 }
0x1b09   :  { %8704 = vmatprep.subr.mxu0 %v9851_v1 }
0x1b0a   :  { %8705 = vmatpush3.msra.mxu0 %v10266_v47 }
0x1b0b   :  { %8720 = vmatprep.subr.mxu0 %v9851_v1 }
0x1bc3   :  { %v1724_v63 = vpop.f32.mrf.mxu0 }
0x1bc4   :  { %v1725_v2 = vadd.f32 %v1724_v63, %v10288_v52 }
0x1bc5   :  { %v8686_v3 = vpop.f32.mrf.mxu0 }
0x1bc6   :  { %v1729_v5 = vrot.slane %v1725_v2, 5 }
0x1bc8   :  { %1738 = vrot.lane.b32.xlu0 %v1729_v5, %s9853_s14  ;;  %v1731_v6 = vadd.f32 %v1729_v5, %v10297_v60 }
0x1bca   :  { %v8044_v7 = vmul.f32 -1.442695, %v1731_v6 }
0x1bcc   :  { %9489 = vpow2.f32 %v8044_v7 }
0x1bd9   :  { %v9490_v8 = vpop.eup %9489 }
0x1bda   :  { %v1735_v9 = vadd.f32 1.0, %v9490_v8 }
0x1bdc   :  { %9491 = vrcp.f32 %v1735_v9 }
0x1be9   :  { %v9492_v45 = vpop.eup %9491 }
0x1bea   :  { %v1748_v21 = vsub.f32 1.0, %v9492_v45  ;;  %v1756_v13 = vmul.f32 %v9492_v45, %v1754_v22 }
0x1c3a   :  { %v1739_v10 = vpop.permute.xlu0 %1738 }
0x1c3b   :  { %v1741_v11 = vmul.f32 %v9492_v45, %v1739_v10 }
0x1c3d   :  { %1743 = vrot.lane.b32.xlu1 %v1741_v11, %s9853_s14 }
0x1caf   :  { %v1744_v12 = vpop.permute.xlu1 %1743 }
0x1cb0   :  { %v1746_v14 = vadd.f32 %v1744_v12, %v10297_v60 }
0x1cb2   :  { %9493 = vtanh.f32 %v1746_v14  ;;  %v1210_v14 = vrot.slane %v10307_v27, 7 }
0x1cbf   :  { %v9494_v18 = vpop.eup %9493 }
0x1cc0   :  { %1750 = vrot.lane.b32.xlu0 %v9494_v18, %s9854_s3 }
0x1d32   :  { %v1751_v23 = vpop.permute.xlu0 %1750 }
0x1d33   :  { %v1753_v24 = vmul.f32 %v1751_v23, %v1748_v21 }
0x1d35   :  { %v10412_v26 = vadd.f32 %v1756_v13, %v1753_v24 }
0x1d37   :  { %v1763_v15 = vrot.slane %v10412_v26, 3  ;;  %v1864_v48 = vrot.slane %v10412_v26, 1 }
0x1d39   :  { %1764 = vrot.lane.b32.xlu1 %v1763_v15, %s9854_s3 }
0x1dab   :  { %v1765_v28 = vpop.permute.xlu1 %1764 }
0x1dac   :  { %8696 = vmatmul.mubr.msk.f32.vlgmr.msra.gmra.mxu1 %vm177_vm2, %v1765_v28 }
0x1dad   :  { %8710 = vmatpush3.msra.mxu1 %v10244_v42  ;;  %8717 = vmatprep.mubr.msk.f32.mxu1 %vm9852_vm0, %v9851_v1 }
0x1dae   :  { %8711 = vmatprep.subr.mxu1 %v9851_v1 }
0x1daf   :  { %8712 = vmatpush3.msra.mxu1 %v10250_v44 }
0x1db0   :  { %8713 = vmatprep.subr.mxu1 %v9851_v1 }
0x1db1   :  { %8714 = vmatpush3.msra.mxu1 %v10259_v46 }
0x1db2   :  { %8715 = vmatprep.subr.mxu1 %v9851_v1 }
0x1db3   :  { %8716 = vmatpush3.msra.mxu1 %v10266_v47 }
0x1db4   :  { %8731 = vmatprep.subr.mxu1 %v9851_v1 }
0x1e6c   :  { %v1834_v16 = vpop.f32.mrf.mxu1 }
0x1e6d   :  { %v1835_v42 = vadd.f32 %v1834_v16, %v10288_v52 }
0x1e6e   :  { %v8697_v30 = vpop.f32.mrf.mxu1 }
0x1e6f   :  { %v1839_v17 = vrot.slane %v1835_v42, 6 }
0x1e71   :  { %1848 = vrot.lane.b32.xlu0 %v1839_v17, %s9853_s14  ;;  %v1841_v33 = vadd.f32 %v1839_v17, %v10297_v60 }
0x1e73   :  { %v8046_v44 = vmul.f32 -1.442695, %v1841_v33 }
0x1e75   :  { %9495 = vpow2.f32 %v8046_v44 }
0x1e82   :  { %v9496_v34 = vpop.eup %9495 }
0x1e83   :  { %v1845_v36 = vadd.f32 1.0, %v9496_v34  ;;  %v10466_v34 = vld [vmem:[%s11740_s10 + $0x18] sm:$0xff] }
0x1e85   :  { %9497 = vrcp.f32 %v1845_v36  ;;  %v10473_v36 = vld [vmem:[%s11740_s10 + $0x10] sm:$0xff] }
0x1e92   :  { %v9498_v46 = vpop.eup %9497 }
0x1e93   :  { %v1858_v43 = vsub.f32 1.0, %v9498_v46  ;;  %v1866_v50 = vmul.f32 %v9498_v46, %v1864_v48  ;;  %v8141_v48 = vld [vmem:[%s11761_s24 + $0x1] sm:$0x1] }
0x1ee3   :  { %v1849_v37 = vpop.permute.xlu0 %1848 }
0x1ee4   :  { %v1851_v38 = vmul.f32 %v9498_v46, %v1849_v37  ;;  %v10480_v46 = vld [vmem:[%s11740_s10 + $0x8] sm:$0xff] }
0x1ee6   :  { %1853 = vrot.lane.b32.xlu1 %v1851_v38, %s9853_s14 }
0x1f58   :  { %v1854_v47 = vpop.permute.xlu1 %1853 }
0x1f59   :  { %v1856_v39 = vadd.f32 %v1854_v47, %v10297_v60 }
0x1f5b   :  { %9499 = vtanh.f32 %v1856_v39  ;;  %v10488_v39 = vld [vmem:[%s11740_s10] sm:$0xff] }
0x1f5c   :  { %9501 = vpow2.f32 %v8035_v61 }
0x1f68   :  { %v9500_v41 = vpop.eup %9499 }
0x1f69   :  { %1860 = vrot.lane.b32.xlu0 %v9500_v41, %s9854_s3  ;;  %v9502_v62 = vpop.eup %9501 }
0x1f6a   :  { %v1191_v63 = vadd.f32 1.0, %v9502_v62 }
0x1f6c   :  { %9503 = vrcp.f32 %v1191_v63 }
0x1f79   :  { %v9504_v35 = vpop.eup %9503 }
0x1f7a   :  { %v1204_v12 = vsub.f32 1.0, %v9504_v35  ;;  %v1212_v21 = vmul.f32 %v9504_v35, %v1210_v14 }
0x1fdb   :  { %v1861_v49 = vpop.permute.xlu0 %1860 }
0x1fdc   :  { %v1863_v51 = vmul.f32 %v1861_v49, %v1858_v43 }
0x1fde   :  { %v10434_v53 = vadd.f32 %v1866_v50, %v1863_v51  ;;  %v10504_v51 = vld [vmem:[#allocation10 + $0x18] sm:$0xff] }
0x1fe0   :  { %v1873_v57 = vrot.slane %v10434_v53, 2  ;;  %v1974_v38 = vrot.slane %v10434_v53, 1 }
0x1fe2   :  { %1874 = vrot.lane.b32.xlu1 %v1873_v57, %s9854_s3  ;;  %v10513_v57 = vld [vmem:[#allocation10 + $0x8] sm:$0xff] }
0x1fe6   :  { %1194 = vrot.lane.b32.xlu1 %v1185_v58, %s9853_s14  ;;  %v10517_v58 = vld [vmem:[#allocation10] sm:$0xff] }
0x2054   :  { %v1875_v2 = vpop.permute.xlu1 %1874 }
0x2055   :  { %8707 = vmatmul.mubr.msk.f32.vlgmr.msra.gmra.mxu0 %vm177_vm2, %v1875_v2 }
0x2056   :  { %8728 = vmatprep.mubr.msk.f32.mxu0 %vm9852_vm0, %v9851_v1  ;;  %8721 = vmatpush3.msra.mxu0 %v10466_v34 }
0x2057   :  { %8722 = vmatprep.subr.mxu0 %v9851_v1 }
0x2058   :  { %v1195_v3 = vpop.permute.xlu1 %1194  ;;  %8723 = vmatpush3.msra.mxu0 %v10473_v36 }
0x2059   :  { %v1197_v5 = vmul.f32 %v9504_v35, %v1195_v3  ;;  %8724 = vmatprep.subr.mxu0 %v9851_v1  ;;  %v10531_v3 = vld [vmem:[%s11743_s13] sm:$0x1] }
0x205a   :  { %8725 = vmatpush3.msra.mxu0 %v10480_v46 }
0x205b   :  { %1199 = vrot.lane.b32.xlu1 %v1197_v5, %s9853_s14  ;;  %8726 = vmatprep.subr.mxu0 %v9851_v1 }
0x205c   :  { %8727 = vmatpush3.msra.mxu0 %v10488_v39 }
0x205d   :  { %8729 = vmatmul.mubr.msk.f32.vlgmr.msra.gmra.mxu0 %vm177_vm2, %v8141_v48  ;;  %8752 = vmatprep.subr.mxu0 %v9851_v1 }
0x205e   :  { %8760 = vmatprep.mubr.msk.f32.mxu0 %vm9852_vm0, %v9851_v1 }
0x20cd   :  { %v1200_v6 = vpop.permute.xlu1 %1199 }
0x20ce   :  { %v1202_v7 = vadd.f32 %v1200_v6, %v10095_v25 }
0x20d0   :  { %9505 = vtanh.f32 %v1202_v7 }
0x20dd   :  { %v9506_v8 = vpop.eup %9505 }
0x20de   :  { %1206 = vrot.lane.b32.xlu1 %v9506_v8, %s9854_s3 }
0x2115   :  { %v1944_v9 = vpop.f32.mrf.mxu0 }
0x2116   :  { %v1945_v45 = vadd.f32 %v1944_v9, %v10288_v52 }
0x2117   :  { %v8708_v10 = vpop.f32.mrf.mxu0 }
0x2118   :  { %v1949_v11 = vrot.slane %v1945_v45, 7 }
0x211a   :  { %1958 = vrot.lane.b32.xlu0 %v1949_v11, %s9853_s14  ;;  %v1951_v13 = vadd.f32 %v1949_v11, %v10297_v60 }
0x211c   :  { %v8048_v24 = vmul.f32 -1.442695, %v1951_v13 }
0x211d   :  { %v2193_v61 = vpop.f32.mrf.mxu0 }
0x211e   :  { %9507 = vpow2.f32 %v8048_v24 }
0x211f   :  { %v8730_v62 = vpop.f32.mrf.mxu0 }
0x212b   :  { %v9508_v15 = vpop.eup %9507 }
0x212c   :  { %v1955_v28 = vadd.f32 1.0, %v9508_v15 }
0x212e   :  { %9509 = vrcp.f32 %v1955_v28 }
0x213b   :  { %v9510_v16 = vpop.eup %9509 }
0x213c   :  { %v1968_v37 = vsub.f32 1.0, %v9510_v16  ;;  %v1976_v41 = vmul.f32 %v9510_v16, %v1974_v38 }
0x2150   :  { %v1207_v18 = vpop.permute.xlu1 %1206 }
0x2151   :  { %v1209_v22 = vmul.f32 %v1207_v18, %v1204_v12 }
0x2153   :  { %v10453_v23 = vadd.f32 %v1212_v21, %v1209_v22 }
0x2155   :  { %v2197_v25 = vrot.slane %v10453_v23, 7 }
0x2157   :  { %2198 = vrot.lane.b32.xlu1 %v2197_v25, %s9854_s3 }
0x218c   :  { %v1959_v42 = vpop.permute.xlu0 %1958 }
0x218d   :  { %v1961_v30 = vmul.f32 %v9510_v16, %v1959_v42 }
0x218f   :  { %1963 = vrot.lane.b32.xlu0 %v1961_v30, %s9853_s14 }
0x21c9   :  { %v2199_v20 = vpop.permute.xlu1 %2198 }
0x2201   :  { %v1964_v17 = vpop.permute.xlu0 %1963 }
0x2202   :  { %v1966_v33 = vadd.f32 %v1964_v17, %v10297_v60 }
0x2204   :  { %9511 = vtanh.f32 %v1966_v33 }
0x2211   :  { %v9512_v44 = vpop.eup %9511 }
0x2212   :  { %1970 = vrot.lane.b32.xlu0 %v9512_v44, %s9854_s3 }
0x2284   :  { %v1971_v47 = vpop.permute.xlu0 %1970 }
0x2285   :  { %v1973_v43 = vmul.f32 %v1971_v47, %v1968_v37 }
0x2287   :  { %v10496_v49 = vadd.f32 %v1976_v41, %v1973_v43 }
0x2289   :  { %v1983_v50 = vrot.slane %v10496_v49, 1 }
0x228b   :  { %1984 = vrot.lane.b32.xlu0 %v1983_v50, %s9854_s3 }
0x22fd   :  { %v1985_v54 = vpop.permute.xlu0 %1984 }
0x22fe   :  { %8718 = vmatmul.mubr.msk.f32.vlgmr.msra.gmra.mxu1 %vm177_vm2, %v1985_v54 }
0x22ff   :  { %8732 = vmatpush3.msra.mxu1 %v10504_v51  ;;  %8739 = vmatprep.mubr.msk.f32.mxu1 %vm9852_vm0, %v9851_v1 }
0x2300   :  { %8733 = vmatprep.subr.mxu1 %v9851_v1 }
0x2301   :  { %8734 = vmatpush3.msra.mxu1 %v10507_v56 }
0x2302   :  { %8735 = vmatprep.subr.mxu1 %v9851_v1 }
0x2303   :  { %8736 = vmatpush3.msra.mxu1 %v10513_v57 }
0x2304   :  { %8737 = vmatprep.subr.mxu1 %v9851_v1 }
0x2305   :  { %8738 = vmatpush3.msra.mxu1 %v10517_v58 }
0x2306   :  { %8740 = vmatmul.mubr.msk.f32.vlgmr.msra.gmra.mxu1 %vm177_vm2, %v2199_v20  ;;  %8742 = vmatprep.subr.mxu1 %v9851_v1 }
0x2307   :  { %8744 = vmatprep.mubr.msk.f32.mxu1 %vm9852_vm0, %v9851_v1 }
0x23be   :  { %v2054_v63 = vpop.f32.mrf.mxu1 }
0x23bf   :  { %v2055_v2 = vadd.f32 %v2054_v63, %v10288_v52  ;;  %v10539_v52 = vld [vmem:[%s11742_s12] sm:$0x1] }
0x23c0   :  { %v8719_v35 = vpop.f32.mrf.mxu1  ;;  %v2194_v45 = vadd.f32 %v2193_v61, %v10539_v52 }
0x23c1   :  { %2066 = vrot.lane.b32.xlu0 %v2055_v2, %s9853_s14  ;;  %v2058_v8 = vadd.f32 %v2055_v2, %v10297_v60 }
0x23c3   :  { %v8050_v9 = vmul.f32 -1.442695, %v2058_v8 }
0x23c5   :  { %9513 = vpow2.f32 %v8050_v9 }
0x23c6   :  { %v2268_v5 = vpop.f32.mrf.mxu1 }
0x23c7   :  { %v2269_v6 = vadd.f32 %v2268_v5, %v10531_v3 }
0x23c8   :  { %v8741_v7 = vpop.f32.mrf.mxu1 }
0x23c9   :  { %2280 = vrot.lane.b32.xlu1 %v2269_v6, %s9853_s14  ;;  %v2272_v10 = vadd.f32 %v2269_v6, %v2194_v45 }
0x23cb   :  { %v8053_v11 = vmul.f32 -1.442695, %v2272_v10 }
0x23cd   :  { %9515 = vpow2.f32 %v8053_v11 }
0x23d2   :  { %v9514_v12 = vpop.eup %9513 }
0x23d3   :  { %v2062_v14 = vadd.f32 1.0, %v9514_v12  ;;  %v10608_v12 = vld [vmem:[#allocation13 + $0x18] sm:$0xff] }
0x23d4   :  { %8753 = vmatpush3.msra.mxu0 %v10608_v12 }
0x23d5   :  { %9517 = vrcp.f32 %v2062_v14  ;;  %v10610_v14 = vld [vmem:[#allocation13 + $0x10] sm:$0xff]  ;;  %8754 = vmatprep.subr.mxu0 %v9851_v1 }
0x23d6   :  { %8755 = vmatpush3.msra.mxu0 %v10610_v14 }
0x23d7   :  { %8756 = vmatprep.subr.mxu0 %v9851_v1 }
0x23da   :  { %v9516_v18 = vpop.eup %9515 }
0x23db   :  { %v2276_v21 = vadd.f32 1.0, %v9516_v18  ;;  %v10614_v18 = vld [vmem:[#allocation13 + $0x8] sm:$0xff] }
0x23dc   :  { %8757 = vmatpush3.msra.mxu0 %v10614_v18 }
0x23dd   :  { %9519 = vrcp.f32 %v2276_v21  ;;  %8758 = vmatprep.subr.mxu0 %v9851_v1 }
0x23e2   :  { %v9518_v22 = vpop.eup %9517 }
0x23ea   :  { %v9520_v15 = vpop.eup %9519 }
0x2433   :  { %v2067_v13 = vpop.permute.xlu0 %2066 }
0x2434   :  { %v2069_v24 = vmul.f32 %v9518_v22, %v2067_v13 }
0x2436   :  { %2071 = vrot.lane.b32.xlu0 %v2069_v24, %s9853_s14  ;;  %v10620_v24 = vld [vmem:[#allocation11 + $0x18] sm:$0xff] }
0x243b   :  { %v2281_v28 = vpop.permute.xlu1 %2280 }
0x243c   :  { %v2283_v16 = vmul.f32 %v9520_v15, %v2281_v28  ;;  %v10629_v28 = vld [vmem:[#allocation11 + $0x8] sm:$0xff] }
0x243e   :  { %2285 = vrot.lane.b32.xlu1 %v2283_v16, %s9853_s14  ;;  %v10633_v16 = vld [vmem:[#allocation11] sm:$0xff] }
0x24a8   :  { %v2072_v42 = vpop.permute.xlu0 %2071 }
0x24a9   :  { %v2074_v30 = vadd.f32 %v2072_v42, %v10297_v60  ;;  %v10651_v42 = vld [vmem:[#allocation13] sm:$0xff] }
0x24aa   :  { %8759 = vmatpush3.msra.mxu0 %v10651_v42 }
0x24ab   :  { %9521 = vtanh.f32 %v2074_v30  ;;  %8774 = vmatprep.subr.mxu0 %v9851_v1 }
0x24b0   :  { %v2286_v17 = vpop.permute.xlu1 %2285 }
0x24b1   :  { %v2288_v33 = vadd.f32 %v2286_v17, %v2194_v45 }
0x24b3   :  { %9523 = vtanh.f32 %v2288_v33 }
0x24b8   :  { %v9522_v44 = vpop.eup %9521 }
0x24b9   :  { %2078 = vrot.lane.b32.xlu0 %v9522_v44, %s9854_s3 }
0x24bd   :  { %549 = vrot.lane.b32.xlu0 %v10149_v4, %s9854_s3  ;;  %v2076_v4 = vsub.f32 1.0, %v9518_v22 }
0x24c0   :  { %v9524_v37 = vpop.eup %9523 }
0x24c1   :  { %2292 = vrot.lane.b32.xlu1 %v9524_v37, %s9854_s3  ;;  %771 = vrot.lane.b32.xlu0 %v10193_v55, %s9854_s3  ;;  %v2083_v55 = vmul.f32 %v9518_v22, %v1983_v50  ;;  %v10658_v37 = vld [vmem:[#allocation14 + $0x18] sm:$0xff] }
0x24c5   :  { %660 = vrot.lane.b32.xlu1 %v10171_v32, %s9854_s3  ;;  %993 = vrot.lane.b32.xlu0 %v10237_v40, %s9854_s3 }
0x24c9   :  { %882 = vrot.lane.b32.xlu1 %v10215_v19, %s9854_s3  ;;  %1215 = vrot.lane.b32.xlu0 %v10453_v23, %s9854_s3 }
0x24cd   :  { %1104 = vrot.lane.b32.xlu1 %v10307_v27, %s9854_s3  ;;  %1429 = vrot.lane.b32.xlu0 %v10346_v0, %s9854_s3  ;;  %v2290_v27 = vsub.f32 1.0, %v9520_v15 }
0x24d1   :  { %1319 = vrot.lane.b32.xlu1 %v10311_v31, %s9854_s3  ;;  %1649 = vrot.lane.b32.xlu0 %v10390_v59, %s9854_s3 }
0x24d5   :  { %1539 = vrot.lane.b32.xlu1 %v10368_v29, %s9854_s3  ;;  %1869 = vrot.lane.b32.xlu0 %v10434_v53, %s9854_s3  ;;  %v2297_v29 = vmul.f32 %v9520_v15, %v2197_v25  ;;  %v10623_v15 = vld [vmem:[#allocation11 + $0x10] sm:$0xff] }
0x24d9   :  { %1759 = vrot.lane.b32.xlu1 %v10412_v26, %s9854_s3 }
0x24dd   :  { %1979 = vrot.lane.b32.xlu1 %v10496_v49, %s9854_s3 }
0x252b   :  { %v2079_v32 = vpop.permute.xlu0 %2078 }
0x252c   :  { %v2081_v19 = vmul.f32 %v2079_v32, %v2076_v4  ;;  %v10660_v4 = vld [vmem:[#allocation14 + $0x10] sm:$0xff]  ;;  %v10664_v32 = vld [vmem:[#allocation14 + $0x8] sm:$0xff] }
0x252e   :  { %v2084_v40 = vadd.f32 %v2083_v55, %v2081_v19  ;;  %v10668_v55 = vld [vmem:[#allocation14] sm:$0xff]  ;;  %v10677_v19 = vld [vmem:[%s11746_s16] sm:$0x1] }
0x252f   :  { %v550_v60 = vpop.permute.xlu0 %549 }
0x2530   :  { %2086 = vrot.lane.b32.xlu0 %v2084_v40, %s9854_s3  ;;  %553 = vst.msk [vmem:[#allocation3] sm:$0x2] %vm552_vm3, %v550_v60 }
0x2533   :  { %v2293_v31 = vpop.permute.xlu1 %2292  ;;  %v772_v0 = vpop.permute.xlu0 %771 }
0x2534   :  { %v2295_v59 = vmul.f32 %v2293_v31, %v2290_v27  ;;  %775 = vst.msk [vmem:[#allocation3] sm:$0x8] %vm774_vm4, %v772_v0 }
0x2536   :  { %v10582_v26 = vadd.f32 %v2297_v29, %v2295_v59  ;;  %v10706_v29 = vld [vmem:[%s11748_s18] sm:$0x1] }
0x2537   :  { %v661_v53 = vpop.permute.xlu1 %660  ;;  %v994_v38 = vpop.permute.xlu0 %993 }
0x2538   :  { %664 = vst.msk [vmem:[#allocation3] sm:$0x4] %vm663_vm5, %v661_v53  ;;  %2300 = vrot.lane.b32.xlu1 %v10582_v26, %s9854_s3 }
0x2539   :  { %997 = vst.msk [vmem:[#allocation3] sm:$0x20] %vm996_vm6, %v994_v38 }
0x253b   :  { %v883_v23 = vpop.permute.xlu1 %882  ;;  %v1216_v25 = vpop.permute.xlu0 %1215 }
0x253c   :  { %886 = vst.msk [vmem:[#allocation3] sm:$0x10] %vm885_vm7, %v883_v23 }
0x253d   :  { %1219 = vst.msk [vmem:[#allocation3] sm:$0x80] %vm1218_vm8, %v1216_v25 }
0x253f   :  { %v1105_v47 = vpop.permute.xlu1 %1104  ;;  %v1430_v41 = vpop.permute.xlu0 %1429 }
0x2540   :  { %1108 = vst.msk [vmem:[#allocation3] sm:$0x40] %vm1107_vm9, %v1105_v47  ;;  %1432 = vst.msk [vmem:[#allocation4] sm:$0x40] %vm1107_vm9, %v1430_v41  ;;  %v2117_v41 = vlaneseq }
0x2543   :  { %v1320_v43 = vpop.permute.xlu1 %1319  ;;  %v1650_v48 = vpop.permute.xlu0 %1649 }
0x2544   :  { %1322 = vst.msk [vmem:[#allocation4] sm:$0x80] %vm1218_vm8, %v1320_v43  ;;  %v10713_v43 = vand.u32 127, %v2117_v41 }
0x2545   :  { %1652 = vst.msk [vmem:[#allocation4] sm:$0x10] %vm885_vm7, %v1650_v48 }
0x2547   :  { %v1540_v49 = vpop.permute.xlu1 %1539  ;;  %v1870_v50 = vpop.permute.xlu0 %1869  ;;  %v2090_v62 = vld [vmem:[#allocation3] sm:$0xff] }
0x2548   :  { %1542 = vst.msk [vmem:[#allocation4] sm:$0x20] %vm996_vm6, %v1540_v49 }
0x2549   :  { %1872 = vst.msk [vmem:[#allocation4] sm:$0x4] %vm663_vm5, %v1870_v50 }
0x254b   :  { %v1760_v54 = vpop.permute.xlu1 %1759 }
0x254c   :  { %1762 = vst.msk [vmem:[#allocation4] sm:$0x8] %vm774_vm4, %v1760_v54 }
0x254f   :  { %v1980_v20 = vpop.permute.xlu1 %1979 }
0x2550   :  { %1982 = vst.msk [vmem:[#allocation4] sm:$0x2] %vm552_vm3, %v1980_v20 }
0x25a2   :  { %v2087_v61 = vpop.permute.xlu0 %2086 }
0x25a3   :  { %2089 = vst.msk [vmem:[#allocation4] sm:$0x1] %vm135_vm1, %v2087_v61 }
0x25aa   :  { %v2091_v63 = vld [vmem:[#allocation4] sm:$0xff]  ;;  %v10598_v35 = vpop.permute.xlu1 %2300 }
0x25ab   :  { %v10593_v2 = vadd.f32 %v2091_v63, %v2090_v62 }
0x25ad   :  { %8743 = vmatpush3.xpose.msk.msra.mxu1 %vm177_vm2, %v10593_v2 }
0x25ae   :  { %8747 = vmatprep.subr.mxu1 %v9851_v1 }
0x25b0   :  { %8745 = vmatmul.mubr.msk.f32.vlgmr.msra.gmra.mxu1 %vm177_vm2, %v10598_v35 }
0x25b1   :  { %8748 = vmatpush3.msra.mxu1 %v10593_v2  ;;  %8749 = vmatprep.mubr.msk.f32.mxu1 %vm9852_vm0, %v9851_v1 }
0x25b2   :  { %8763 = vmatprep.subr.mxu1 %v9851_v1 }
0x2670   :  { %v2373_v5 = vpop.f32.mrf.mxu1 }
0x2671   :  { %v2378_v6 = vsel %vm2377_vm10, %v2373_v5, -inf }
0x2672   :  { %2379 = vmax.xlane.f32.xlu0 %v2378_v6  ;;  %v8746_v7 = vpop.f32.mrf.mxu1 }
0x26fb   :  { %v2380_v8 = vpop.xlane.xlu0 %2379 }
0x26fc   :  { %v2381_v9 = vsub.f32 %v2373_v5, %v2380_v8 }
0x26fe   :  { %v2382_v45 = vmul.f32 1.442695, %v2381_v9 }
0x2700   :  { %9525 = vpow2.f32 %v2382_v45 }
0x270d   :  { %v9526_v10 = vpop.eup %9525 }
0x270e   :  { %v2384_v11 = vsel %vm2377_vm10, %v9526_v10, 0.0 }
0x270f   :  { %2385 = vadd.xlane.f32.xlu1 %v2384_v11 }
0x2798   :  { %v2386_v21 = vpop.xlane.xlu1 %2385 }
0x2799   :  { %9527 = vrcp.f32 %v2386_v21 }
0x27a6   :  { %v9528_v22 = vpop.eup %9527 }
0x27a7   :  { %v2388_v13 = vmul.f32 %v9528_v22, %v9526_v10 }
0x27a9   :  { %8750 = vmatmul.mubr.msk.f32.vlgmr.msra.gmra.mxu1 %vm2389_vm11, %v2388_v13 }
0x27aa   :  { %8764 = vmatpush3.msra.mxu1 %v10620_v24  ;;  %8771 = vmatprep.mubr.msk.f32.mxu1 %vm9852_vm0, %v9851_v1 }
0x27ab   :  { %8765 = vmatprep.subr.mxu1 %v9851_v1 }
0x27ac   :  { %8766 = vmatpush3.msra.mxu1 %v10623_v15 }
0x27ad   :  { %8767 = vmatprep.subr.mxu1 %v9851_v1 }
0x27ae   :  { %8768 = vmatpush3.msra.mxu1 %v10629_v28 }
0x27af   :  { %8769 = vmatprep.subr.mxu1 %v9851_v1 }
0x27b0   :  { %8770 = vmatpush3.msra.mxu1 %v10633_v16 }
0x27b1   :  { %8772 = vmatmul.mubr.msk.f32.vlgmr.msra.gmra.mxu1 %vm177_vm2, %v10598_v35  ;;  %8785 = vmatprep.subr.mxu1 %v9851_v1 }
0x27b2   :  { %8786 = vmatpush3.msra.mxu1 %v10466_v34  ;;  %8793 = vmatprep.mubr.msk.f32.mxu1 %vm9852_vm0, %v9851_v1 }
0x27b3   :  { %8787 = vmatprep.subr.mxu1 %v9851_v1 }
0x27b4   :  { %8788 = vmatpush3.msra.mxu1 %v10473_v36 }
0x27b5   :  { %8789 = vmatprep.subr.mxu1 %v9851_v1 }
0x27b6   :  { %8790 = vmatpush3.msra.mxu1 %v10480_v46 }
0x27b7   :  { %8791 = vmatprep.subr.mxu1 %v9851_v1 }
0x27b8   :  { %8792 = vmatpush3.msra.mxu1 %v10488_v39 }
0x27b9   :  { %8807 = vmatprep.subr.mxu1 %v9851_v1 }
0x2869   :  { %v2459_v30 = vpop.f32.mrf.mxu1 }
0x286a   :  { %8761 = vmatmul.mubr.msk.f32.vlgmr.msra.gmra.mxu0 %vm177_vm2, %v2459_v30 }
0x286b   :  { %v8751_v17 = vpop.f32.mrf.mxu1  ;;  %8782 = vmatprep.mubr.msk.f32.mxu0 %vm9852_vm0, %v9851_v1  ;;  %8775 = vmatpush3.msra.mxu0 %v10658_v37 }
0x286c   :  { %8776 = vmatprep.subr.mxu0 %v9851_v1 }
0x286d   :  { %8777 = vmatpush3.msra.mxu0 %v10660_v4 }
0x286e   :  { %8778 = vmatprep.subr.mxu0 %v9851_v1 }
0x286f   :  { %8779 = vmatpush3.msra.mxu0 %v10664_v32 }
0x2870   :  { %8780 = vmatprep.subr.mxu0 %v9851_v1 }
0x2871   :  { %v2602_v33 = vpop.f32.mrf.mxu1  ;;  %8781 = vmatpush3.msra.mxu0 %v10668_v55 }
0x2872   :  { %8796 = vmatprep.subr.mxu0 %v9851_v1 }
0x2873   :  { %v8773_v44 = vpop.f32.mrf.mxu1 }
0x292a   :  { %v2532_v40 = vpop.f32.mrf.mxu0 }
0x292b   :  { %v2603_v60 = vadd.f32 %v2602_v33, %v2532_v40 }
0x292c   :  { %v8762_v27 = vpop.f32.mrf.mxu0 }
0x292d   :  { %v2606_v31 = vadd.f32 %v2603_v60, %v10677_v19 }
0x292f   :  { %9529 = vtanh.f32 %v2606_v31 }
0x293c   :  { %v9530_v0 = vpop.eup %9529 }
0x293d   :  { %8783 = vmatmul.mubr.msk.f32.vlgmr.msra.gmra.mxu0 %vm177_vm2, %v9530_v0 }
0x293e   :  { %8797 = vmatpush3.msra.mxu0 %v10504_v51  ;;  %8804 = vmatprep.mubr.msk.f32.mxu0 %vm9852_vm0, %v9851_v1 }
0x293f   :  { %8798 = vmatprep.subr.mxu0 %v9851_v1 }
0x2940   :  { %8799 = vmatpush3.msra.mxu0 %v10507_v56 }
0x2941   :  { %8800 = vmatprep.subr.mxu0 %v9851_v1 }
0x2942   :  { %8801 = vmatpush3.msra.mxu0 %v10513_v57 }
0x2943   :  { %8802 = vmatprep.subr.mxu0 %v9851_v1 }
0x2944   :  { %8803 = vmatpush3.msra.mxu0 %v10517_v58 }
0x2945   :  { %8805 = vmatmul.mubr.msk.f32.vlgmr.msra.gmra.mxu0 %vm177_vm2, %v10598_v35  ;;  %8817 = vmatprep.subr.mxu0 %v9851_v1 }
0x2946   :  { %8818 = vmatpush3.msra.mxu0 %v10608_v12  ;;  %8825 = vmatprep.mubr.msk.f32.mxu0 %vm9852_vm0, %v9851_v1 }
0x2947   :  { %8819 = vmatprep.subr.mxu0 %v9851_v1 }
0x2948   :  { %8820 = vmatpush3.msra.mxu0 %v10610_v14 }
0x2949   :  { %8821 = vmatprep.subr.mxu0 %v9851_v1 }
0x294a   :  { %8822 = vmatpush3.msra.mxu0 %v10614_v18 }
0x294b   :  { %8823 = vmatprep.subr.mxu0 %v9851_v1 }
0x294c   :  { %8824 = vmatpush3.msra.mxu0 %v10651_v42 }
0x294d   :  { %8839 = vmatprep.subr.mxu0 %v9851_v1 }
0x29fd   :  { %v2677_v59 = vpop.f32.mrf.mxu0 }
0x29fe   :  { %v10709_v53 = vadd.f32 %v2677_v59, %v10706_v29 }
0x29ff   :  { %v8784_v38 = vpop.f32.mrf.mxu0 }
0x2a00   :  { %v2682_v23 = vsel %vm2681_vm12, %v10709_v53, -inf }
0x2a01   :  { %2683 = vmax.xlane.f32.xlu0 %v2682_v23 }
0x2a05   :  { %v2858_v25 = vpop.f32.mrf.mxu0 }
0x2a06   :  { %v2859_v61 = vadd.f32 %v2858_v25, %v10531_v3 }
0x2a07   :  { %v8806_v47 = vpop.f32.mrf.mxu0 }
0x2a8a   :  { %v10715_v48 = vpop.xlane.xlu0 %2683 }
0x2a8b   :  { %vm2685_vm13 = vcmp.eq.f32.partialorder %v10709_v53, %v10715_v48 }
0x2a8c   :  { %v2686_v49 = vsel %vm2685_vm13, %v10713_v43, 128 }
0x2a8d   :  { %v2687_v50 = vsel %vm2681_vm12, %v2686_v49, 2147483647 }
0x2a8e   :  { %v2689_v54 = vshra.s32 %v2687_v50, 16  ;;  %v2688_v62 = vand.u32 65535, %v2687_v50 }
0x2a90   :  { %v2691_v20 = vcvt.s32.f32 %v2689_v54  ;;  %v2690_v35 = vcvt.s32.f32 %v2688_v62 }
0x2a92   :  { %2692 = vmin.xlane.f32.xlu0 %v2691_v20 }
0x2aa8   :  { %2870 = vrot.lane.b32.xlu0 %v2859_v61, %s9853_s14 }
0x2b1b   :  { %v2693_v63 = vpop.xlane.xlu0 %2692 }
0x2b1c   :  { %vm2694_vm14 = vcmp.eq.f32.partialorder %v2691_v20, %v2693_v63  ;;  %v2699_v6 = vcvt.f32.s32 %v2693_v63 }
0x2b1d   :  { %v2695_v5 = vsel %vm2694_vm14, %v2690_v35, inf }
0x2b1e   :  { %2696 = vmin.xlane.f32.xlu1 %v2695_v5  ;;  %v2700_v9 = vshll.u32 %v2699_v6, 16 }
0x2b1f   :  { %v2871_v40 = vpop.permute.xlu0 %2870 }
0x2ba7   :  { %v2697_v7 = vpop.xlane.xlu1 %2696 }
0x2ba8   :  { %v2698_v8 = vcvt.f32.s32 %v2697_v7 }
0x2baa   :  { %v2701_v45 = vadd.s32 %v2700_v9, %v2698_v8 }
0x2bac   :  { %9370 = vpush %v2701_v45 }
0x2bdd   :  { %s9371_s23 = spop %9370 }
0x2bde   :  { %2712 = sst [smem:[#allocation16]] %s9371_s23  ;;  %s2717_s5 = scalar_lea.vmem %s11761_s24, %s9371_s23 }
0x2bdf   :  { %v2718_v10 = vld [vmem:[%s2717_s5] sm:$0x1] }
0x2be0   :  { %8794 = vmatmul.mubr.msk.f32.vlgmr.msra.gmra.mxu1 %vm177_vm2, %v2718_v10 }
0x2be1   :  { %8808 = vmatpush3.xpose.msk.msra.mxu1 %vm177_vm2, %v10593_v2  ;;  %8809 = vmatprep.mubr.msk.f32.mxu1 %vm9852_vm0, %v9851_v1 }
0x2be2   :  { %8812 = vmatprep.subr.mxu1 %v9851_v1 }
0x2ca0   :  { %v2788_v11 = vpop.f32.mrf.mxu1 }
0x2ca1   :  { %v2789_v21 = vadd.f32 %v2788_v11, %v10539_v52 }
0x2ca2   :  { %v8795_v22 = vpop.f32.mrf.mxu1 }
0x2ca3   :  { %v2862_v13 = vadd.f32 %v2859_v61, %v2789_v21 }
0x2ca5   :  { %v8062_v30 = vmul.f32 -1.442695, %v2862_v13 }
0x2ca7   :  { %9531 = vpow2.f32 %v8062_v30  ;;  %v2702_v30 = vsub.f32 %v10709_v53, %v10715_v48 }
0x2cb4   :  { %v9532_v17 = vpop.eup %9531 }
0x2cb5   :  { %v2866_v33 = vadd.f32 1.0, %v9532_v17  ;;  %v2703_v17 = vmul.f32 1.442695, %v2702_v30 }
0x2cb7   :  { %9533 = vrcp.f32 %v2866_v33 }
0x2cc4   :  { %v9534_v44 = vpop.eup %9533 }
0x2cc5   :  { %v2873_v60 = vmul.f32 %v9534_v44, %v2871_v40  ;;  %v2880_v59 = vsub.f32 1.0, %v9534_v44  ;;  %v2886_v23 = vmul.f32 %v9534_v44, %v10582_v26 }
0x2cc7   :  { %2875 = vrot.lane.b32.xlu1 %v2873_v60, %s9853_s14 }
0x2d39   :  { %v2876_v27 = vpop.permute.xlu1 %2875 }
0x2d3a   :  { %v2878_v31 = vadd.f32 %v2876_v27, %v2789_v21 }
0x2d3c   :  { %9535 = vtanh.f32 %v2878_v31 }
0x2d49   :  { %v9536_v0 = vpop.eup %9535 }
0x2d4a   :  { %2882 = vrot.lane.b32.xlu1 %v9536_v0, %s9854_s3 }
0x2dbc   :  { %v2883_v38 = vpop.permute.xlu1 %2882 }
0x2dbd   :  { %v2885_v25 = vmul.f32 %v2883_v38, %v2880_v59 }
0x2dbf   :  { %v10736_v47 = vadd.f32 %v2886_v23, %v2885_v25 }
0x2dc1   :  { %2889 = vrot.lane.b32.xlu0 %v10736_v47, %s9854_s3 }
0x2e33   :  { %v10740_v41 = vpop.permute.xlu0 %2889 }
0x2e34   :  { %8810 = vmatmul.mubr.msk.f32.vlgmr.msra.gmra.mxu1 %vm177_vm2, %v10740_v41 }
0x2e35   :  { %8813 = vmatpush3.msra.mxu1 %v10593_v2  ;;  %8814 = vmatprep.mubr.msk.f32.mxu1 %vm9852_vm0, %v9851_v1 }
0x2e36   :  { %8828 = vmatprep.subr.mxu1 %v9851_v1 }
0x2ef4   :  { %v2959_v49 = vpop.f32.mrf.mxu1 }
0x2ef5   :  { %v2963_v26 = vsel %vm2377_vm10, %v2959_v49, -inf }
0x2ef6   :  { %2964 = vmax.xlane.f32.xlu1 %v2963_v26  ;;  %v8811_v50 = vpop.f32.mrf.mxu1 }
0x2f7f   :  { %v2965_v54 = vpop.xlane.xlu1 %2964 }
0x2f80   :  { %v2966_v20 = vsub.f32 %v2959_v49, %v2965_v54 }
0x2f82   :  { %v2967_v61 = vmul.f32 1.442695, %v2966_v20 }
0x2f84   :  { %9537 = vpow2.f32 %v2967_v61 }
0x2f91   :  { %v9538_v62 = vpop.eup %9537 }
0x2f92   :  { %v2969_v63 = vsel %vm2377_vm10, %v9538_v62, 0.0 }
0x2f93   :  { %2970 = vadd.xlane.f32.xlu0 %v2969_v63 }
0x301c   :  { %v2971_v35 = vpop.xlane.xlu0 %2970 }
0x301d   :  { %9539 = vrcp.f32 %v2971_v35 }
0x302a   :  { %v9540_v5 = vpop.eup %9539 }
0x302b   :  { %v2973_v6 = vmul.f32 %v9540_v5, %v9538_v62 }
0x302d   :  { %8815 = vmatmul.mubr.msk.f32.vlgmr.msra.gmra.mxu1 %vm2389_vm11, %v2973_v6 }
0x302e   :  { %8829 = vmatpush3.msra.mxu1 %v10620_v24  ;;  %8836 = vmatprep.mubr.msk.f32.mxu1 %vm9852_vm0, %v9851_v1 }
0x302f   :  { %8830 = vmatprep.subr.mxu1 %v9851_v1 }
0x3030   :  { %8831 = vmatpush3.msra.mxu1 %v10623_v15 }
0x3031   :  { %8832 = vmatprep.subr.mxu1 %v9851_v1 }
0x3032   :  { %8833 = vmatpush3.msra.mxu1 %v10629_v28 }
0x3033   :  { %8834 = vmatprep.subr.mxu1 %v9851_v1 }
0x3034   :  { %8835 = vmatpush3.msra.mxu1 %v10633_v16 }
0x3035   :  { %8837 = vmatmul.mubr.msk.f32.vlgmr.msra.gmra.mxu1 %vm177_vm2, %v10740_v41  ;;  %8850 = vmatprep.subr.mxu1 %v9851_v1 }
0x3036   :  { %8851 = vmatpush3.msra.mxu1 %v10466_v34  ;;  %8858 = vmatprep.mubr.msk.f32.mxu1 %vm9852_vm0, %v9851_v1 }
0x3037   :  { %8852 = vmatprep.subr.mxu1 %v9851_v1 }
0x3038   :  { %8853 = vmatpush3.msra.mxu1 %v10473_v36 }
0x3039   :  { %8854 = vmatprep.subr.mxu1 %v9851_v1 }
0x303a   :  { %8855 = vmatpush3.msra.mxu1 %v10480_v46 }
0x303b   :  { %8856 = vmatprep.subr.mxu1 %v9851_v1 }
0x303c   :  { %8857 = vmatpush3.msra.mxu1 %v10488_v39 }
0x303d   :  { %8872 = vmatprep.subr.mxu1 %v9851_v1 }
0x30ed   :  { %v3043_v7 = vpop.f32.mrf.mxu1 }
0x30ee   :  { %8826 = vmatmul.mubr.msk.f32.vlgmr.msra.gmra.mxu0 %vm177_vm2, %v3043_v7 }
0x30ef   :  { %v8816_v8 = vpop.f32.mrf.mxu1  ;;  %8840 = vmatpush3.msra.mxu0 %v10658_v37  ;;  %8847 = vmatprep.mubr.msk.f32.mxu0 %vm9852_vm0, %v9851_v1 }
0x30f0   :  { %8841 = vmatprep.subr.mxu0 %v9851_v1 }
0x30f1   :  { %8842 = vmatpush3.msra.mxu0 %v10660_v4 }
0x30f2   :  { %8843 = vmatprep.subr.mxu0 %v9851_v1 }
0x30f3   :  { %8844 = vmatpush3.msra.mxu0 %v10664_v32 }
0x30f4   :  { %8845 = vmatprep.subr.mxu0 %v9851_v1 }
0x30f5   :  { %v3186_v9 = vpop.f32.mrf.mxu1  ;;  %8846 = vmatpush3.msra.mxu0 %v10668_v55 }
0x30f6   :  { %8861 = vmatprep.subr.mxu0 %v9851_v1 }
0x30f7   :  { %v8838_v45 = vpop.f32.mrf.mxu1 }
0x31ae   :  { %v3116_v10 = vpop.f32.mrf.mxu0 }
0x31af   :  { %v3187_v11 = vadd.f32 %v3186_v9, %v3116_v10 }
0x31b0   :  { %v8827_v21 = vpop.f32.mrf.mxu0 }
0x31b1   :  { %v3190_v22 = vadd.f32 %v3187_v11, %v10677_v19 }
0x31b3   :  { %9541 = vtanh.f32 %v3190_v22 }
0x31b4   :  { %9543 = vpow2.f32 %v2703_v17 }
0x31c0   :  { %v9542_v13 = vpop.eup %9541 }
0x31c1   :  { %8848 = vmatmul.mubr.msk.f32.vlgmr.msra.gmra.mxu0 %vm177_vm2, %v9542_v13  ;;  %v9544_v27 = vpop.eup %9543 }
0x31c2   :  { %8862 = vmatpush3.msra.mxu0 %v10504_v51  ;;  %8869 = vmatprep.mubr.msk.f32.mxu0 %vm9852_vm0, %v9851_v1  ;;  %v2705_v31 = vsel %vm2681_vm12, %v9544_v27, 0.0 }
0x31c3   :  { %8863 = vmatprep.subr.mxu0 %v9851_v1 }
0x31c4   :  { %8864 = vmatpush3.msra.mxu0 %v10507_v56 }
0x31c5   :  { %8865 = vmatprep.subr.mxu0 %v9851_v1 }
0x31c6   :  { %8866 = vmatpush3.msra.mxu0 %v10513_v57 }
0x31c7   :  { %8867 = vmatprep.subr.mxu0 %v9851_v1 }
0x31c8   :  { %8868 = vmatpush3.msra.mxu0 %v10517_v58 }
0x31c9   :  { %8870 = vmatmul.mubr.msk.f32.vlgmr.msra.gmra.mxu0 %vm177_vm2, %v10740_v41  ;;  %8882 = vmatprep.subr.mxu0 %v9851_v1 }
0x31ca   :  { %8883 = vmatpush3.msra.mxu0 %v10608_v12  ;;  %8890 = vmatprep.mubr.msk.f32.mxu0 %vm9852_vm0, %v9851_v1 }
0x31cb   :  { %8884 = vmatprep.subr.mxu0 %v9851_v1 }
0x31cc   :  { %8885 = vmatpush3.msra.mxu0 %v10610_v14 }
0x31cd   :  { %8886 = vmatprep.subr.mxu0 %v9851_v1 }
0x31ce   :  { %8887 = vmatpush3.msra.mxu0 %v10614_v18 }
0x31cf   :  { %8888 = vmatprep.subr.mxu0 %v9851_v1 }
0x31d0   :  { %8889 = vmatpush3.msra.mxu0 %v10651_v42 }
0x31d1   :  { %8904 = vmatprep.subr.mxu0 %v9851_v1 }
0x3281   :  { %v3261_v33 = vpop.f32.mrf.mxu0 }
0x3282   :  { %v10811_v44 = vadd.f32 %v3261_v33, %v10706_v29 }
0x3283   :  { %v8849_v40 = vpop.f32.mrf.mxu0 }
0x3284   :  { %v3265_v60 = vsel %vm2681_vm12, %v10811_v44, -inf }
0x3285   :  { %3266 = vmax.xlane.f32.xlu0 %v3265_v60 }
0x3289   :  { %v3441_v0 = vpop.f32.mrf.mxu0  ;;  %2706 = vadd.xlane.f32.xlu0 %v2705_v31 }
0x328a   :  { %v3442_v38 = vadd.f32 %v3441_v0, %v10531_v3 }
0x328b   :  { %v8871_v59 = vpop.f32.mrf.mxu0 }
0x329f   :  { %3453 = vrot.lane.b32.xlu0 %v3442_v38, %s9853_s14 }
0x330e   :  { %v10818_v53 = vpop.xlane.xlu0 %3266 }
0x330f   :  { %vm3268_vm15 = vcmp.eq.f32.partialorder %v10811_v44, %v10818_v53 }
0x3310   :  { %v3269_v48 = vsel %vm3268_vm15, %v10713_v43, 128 }
0x3311   :  { %v3270_v23 = vsel %vm2681_vm12, %v3269_v48, 2147483647 }
0x3312   :  { %v2707_v25 = vpop.xlane.xlu0 %2706  ;;  %v3272_v41 = vshra.s32 %v3270_v23, 16  ;;  %v3271_v3 = vand.u32 65535, %v3270_v23 }
0x3313   :  { %9545 = vrcp.f32 %v2707_v25 }
0x3314   :  { %v3274_v49 = vcvt.s32.f32 %v3272_v41  ;;  %v3273_v54 = vcvt.s32.f32 %v3271_v3 }
0x3316   :  { %3275 = vmin.xlane.f32.xlu1 %v3274_v49  ;;  %v3454_v13 = vpop.permute.xlu0 %3453 }
0x3320   :  { %v9546_v26 = vpop.eup %9545 }
0x3321   :  { %9372 = vpush %v9546_v26 }
0x3352   :  { %s9373_s26 = spop %9372 }
0x3353   :  { %2715 = sst [smem:[#allocation17]] %s9373_s26 }
0x339f   :  { %v3276_v50 = vpop.xlane.xlu1 %3275 }
0x33a0   :  { %vm3277_vm1 = vcmp.eq.f32.partialorder %v3274_v49, %v3276_v50  ;;  %v3282_v61 = vcvt.f32.s32 %v3276_v50 }
0x33a1   :  { %v3278_v20 = vsel %vm3277_vm1, %v3273_v54, inf }
0x33a2   :  { %3279 = vmin.xlane.f32.xlu1 %v3278_v20  ;;  %v3283_v63 = vshll.u32 %v3282_v61, 16 }
0x342b   :  { %v3280_v62 = vpop.xlane.xlu1 %3279 }
0x342c   :  { %v3281_v35 = vcvt.f32.s32 %v3280_v62 }
0x342e   :  { %v3284_v5 = vadd.s32 %v3283_v63, %v3281_v35 }
0x3430   :  { %9374 = vpush %v3284_v5 }
0x3461   :  { %s9375_s27 = spop %9374 }
0x3462   :  { %3295 = sst [smem:[#allocation16 + $0x1]] %s9375_s27  ;;  %s3300_s15 = scalar_lea.vmem %s11761_s24, %s9375_s27 }
0x3463   :  { %v3301_v6 = vld [vmem:[%s3300_s15] sm:$0x1] }
0x3464   :  { %8859 = vmatmul.mubr.msk.f32.vlgmr.msra.gmra.mxu1 %vm177_vm2, %v3301_v6 }
0x3465   :  { %8873 = vmatpush3.xpose.msk.msra.mxu1 %vm177_vm2, %v10593_v2  ;;  %8874 = vmatprep.mubr.msk.f32.mxu1 %vm9852_vm0, %v9851_v1 }
0x3466   :  { %8877 = vmatprep.subr.mxu1 %v9851_v1 }
0x3524   :  { %v3371_v7 = vpop.f32.mrf.mxu1 }
0x3525   :  { %v3372_v8 = vadd.f32 %v3371_v7, %v10539_v52 }
0x3526   :  { %v8860_v9 = vpop.f32.mrf.mxu1 }
0x3527   :  { %v3445_v45 = vadd.f32 %v3442_v38, %v3372_v8 }
0x3529   :  { %v8071_v10 = vmul.f32 -1.442695, %v3445_v45 }
0x352b   :  { %9547 = vpow2.f32 %v8071_v10 }
0x3538   :  { %v9548_v11 = vpop.eup %9547 }
0x3539   :  { %v3449_v21 = vadd.f32 1.0, %v9548_v11 }
0x353b   :  { %9549 = vrcp.f32 %v3449_v21 }
0x3548   :  { %v9550_v22 = vpop.eup %9549 }
0x3549   :  { %v3456_v30 = vmul.f32 %v9550_v22, %v3454_v13  ;;  %v3463_v60 = vsub.f32 1.0, %v9550_v22  ;;  %v3469_v27 = vmul.f32 %v9550_v22, %v10736_v47 }
0x354b   :  { %3458 = vrot.lane.b32.xlu1 %v3456_v30, %s9853_s14 }
0x35bd   :  { %v3459_v17 = vpop.permute.xlu1 %3458 }
0x35be   :  { %v3461_v33 = vadd.f32 %v3459_v17, %v3372_v8 }
0x35c0   :  { %9551 = vtanh.f32 %v3461_v33 }
0x35cd   :  { %v9552_v40 = vpop.eup %9551 }
0x35ce   :  { %3465 = vrot.lane.b32.xlu1 %v9552_v40, %s9854_s3 }
0x3640   :  { %v3466_v52 = vpop.permute.xlu1 %3465 }
0x3641   :  { %v3468_v31 = vmul.f32 %v3466_v52, %v3463_v60 }
0x3643   :  { %v10837_v0 = vadd.f32 %v3469_v27, %v3468_v31 }
0x3645   :  { %3472 = vrot.lane.b32.xlu0 %v10837_v0, %s9854_s3 }
0x36b7   :  { %v10841_v59 = vpop.permute.xlu0 %3472 }
0x36b8   :  { %8875 = vmatmul.mubr.msk.f32.vlgmr.msra.gmra.mxu1 %vm177_vm2, %v10841_v59 }
0x36b9   :  { %8878 = vmatpush3.msra.mxu1 %v10593_v2  ;;  %8879 = vmatprep.mubr.msk.f32.mxu1 %vm9852_vm0, %v9851_v1 }
0x36ba   :  { %8893 = vmatprep.subr.mxu1 %v9851_v1 }
0x3778   :  { %v3542_v38 = vpop.f32.mrf.mxu1 }
0x3779   :  { %v3546_v47 = vsel %vm2377_vm10, %v3542_v38, -inf }
0x377a   :  { %3547 = vmax.xlane.f32.xlu1 %v3546_v47  ;;  %v8876_v48 = vpop.f32.mrf.mxu1  ;;  %v10942_v47 = vld [vmem:[%s11742_s12] sm:$0x1] }
0x3803   :  { %v3548_v23 = vpop.xlane.xlu1 %3547 }
0x3804   :  { %v3549_v25 = vsub.f32 %v3542_v38, %v3548_v23 }
0x3806   :  { %v3550_v41 = vmul.f32 1.442695, %v3549_v25 }
0x3808   :  { %9553 = vpow2.f32 %v3550_v41 }
0x3815   :  { %v9554_v49 = vpop.eup %9553 }
0x3816   :  { %v3552_v26 = vsel %vm2377_vm10, %v9554_v49, 0.0 }
0x3817   :  { %3553 = vadd.xlane.f32.xlu0 %v3552_v26 }
0x38a0   :  { %v3554_v3 = vpop.xlane.xlu0 %3553 }
0x38a1   :  { %9555 = vrcp.f32 %v3554_v3 }
0x38ae   :  { %v9556_v50 = vpop.eup %9555 }
0x38af   :  { %v3556_v54 = vmul.f32 %v9556_v50, %v9554_v49 }
0x38b1   :  { %8880 = vmatmul.mubr.msk.f32.vlgmr.msra.gmra.mxu1 %vm2389_vm11, %v3556_v54 }
0x38b2   :  { %8894 = vmatpush3.msra.mxu1 %v10620_v24  ;;  %8901 = vmatprep.mubr.msk.f32.mxu1 %vm9852_vm0, %v9851_v1 }
0x38b3   :  { %8895 = vmatprep.subr.mxu1 %v9851_v1 }
0x38b4   :  { %8896 = vmatpush3.msra.mxu1 %v10623_v15 }
0x38b5   :  { %8897 = vmatprep.subr.mxu1 %v9851_v1 }
0x38b6   :  { %8898 = vmatpush3.msra.mxu1 %v10629_v28 }
0x38b7   :  { %8899 = vmatprep.subr.mxu1 %v9851_v1 }
0x38b8   :  { %8900 = vmatpush3.msra.mxu1 %v10633_v16 }
0x38b9   :  { %8902 = vmatmul.mubr.msk.f32.vlgmr.msra.gmra.mxu1 %vm177_vm2, %v10841_v59  ;;  %8915 = vmatprep.subr.mxu1 %v9851_v1 }
0x38ba   :  { %8916 = vmatpush3.msra.mxu1 %v10466_v34  ;;  %8923 = vmatprep.mubr.msk.f32.mxu1 %vm9852_vm0, %v9851_v1 }
0x38bb   :  { %8917 = vmatprep.subr.mxu1 %v9851_v1 }
0x38bc   :  { %8918 = vmatpush3.msra.mxu1 %v10473_v36 }
0x38bd   :  { %8919 = vmatprep.subr.mxu1 %v9851_v1 }
0x38be   :  { %8920 = vmatpush3.msra.mxu1 %v10480_v46 }
0x38bf   :  { %8921 = vmatprep.subr.mxu1 %v9851_v1 }
0x38c0   :  { %8922 = vmatpush3.msra.mxu1 %v10488_v39 }
0x38c1   :  { %8937 = vmatprep.subr.mxu1 %v9851_v1 }
0x3971   :  { %v3626_v20 = vpop.f32.mrf.mxu1 }
0x3972   :  { %8891 = vmatmul.mubr.msk.f32.vlgmr.msra.gmra.mxu0 %vm177_vm2, %v3626_v20 }
0x3973   :  { %v8881_v34 = vpop.f32.mrf.mxu1  ;;  %8905 = vmatpush3.msra.mxu0 %v10658_v37  ;;  %8912 = vmatprep.mubr.msk.f32.mxu0 %vm9852_vm0, %v9851_v1 }
0x3974   :  { %8906 = vmatprep.subr.mxu0 %v9851_v1 }
0x3975   :  { %8907 = vmatpush3.msra.mxu0 %v10660_v4 }
0x3976   :  { %8908 = vmatprep.subr.mxu0 %v9851_v1 }
0x3977   :  { %8909 = vmatpush3.msra.mxu0 %v10664_v32 }
0x3978   :  { %8910 = vmatprep.subr.mxu0 %v9851_v1 }
0x3979   :  { %v3769_v36 = vpop.f32.mrf.mxu1  ;;  %8911 = vmatpush3.msra.mxu0 %v10668_v55 }
0x397a   :  { %8926 = vmatprep.subr.mxu0 %v9851_v1 }
0x397b   :  { %v8903_v46 = vpop.f32.mrf.mxu1 }
0x3a32   :  { %v3699_v39 = vpop.f32.mrf.mxu0 }
0x3a33   :  { %v3770_v61 = vadd.f32 %v3769_v36, %v3699_v39 }
0x3a34   :  { %v8892_v62 = vpop.f32.mrf.mxu0 }
0x3a35   :  { %v3773_v63 = vadd.f32 %v3770_v61, %v10677_v19 }
0x3a37   :  { %9557 = vtanh.f32 %v3773_v63 }
0x3a44   :  { %v9558_v35 = vpop.eup %9557 }
0x3a45   :  { %8913 = vmatmul.mubr.msk.f32.vlgmr.msra.gmra.mxu0 %vm177_vm2, %v9558_v35 }
0x3a46   :  { %8927 = vmatpush3.msra.mxu0 %v10504_v51  ;;  %8934 = vmatprep.mubr.msk.f32.mxu0 %vm9852_vm0, %v9851_v1  ;;  %v3285_v51 = vsub.f32 %v10811_v44, %v10818_v53  ;;  %v10920_v44 = vld [vmem:[%s11743_s13] sm:$0x1] }
0x3a47   :  { %8928 = vmatprep.subr.mxu0 %v9851_v1 }
0x3a48   :  { %8929 = vmatpush3.msra.mxu0 %v10507_v56  ;;  %v3286_v56 = vmul.f32 1.442695, %v3285_v51 }
0x3a49   :  { %8930 = vmatprep.subr.mxu0 %v9851_v1 }
0x3a4a   :  { %8931 = vmatpush3.msra.mxu0 %v10513_v57  ;;  %9559 = vpow2.f32 %v3286_v56 }
0x3a4b   :  { %8932 = vmatprep.subr.mxu0 %v9851_v1 }
0x3a4c   :  { %8933 = vmatpush3.msra.mxu0 %v10517_v58 }
0x3a4d   :  { %8935 = vmatmul.mubr.msk.f32.vlgmr.msra.gmra.mxu0 %vm177_vm2, %v10841_v59  ;;  %8947 = vmatprep.subr.mxu0 %v9851_v1 }
0x3a4e   :  { %8948 = vmatpush3.msra.mxu0 %v10608_v12  ;;  %8955 = vmatprep.mubr.msk.f32.mxu0 %vm9852_vm0, %v9851_v1 }
0x3a4f   :  { %8949 = vmatprep.subr.mxu0 %v9851_v1 }
0x3a50   :  { %8950 = vmatpush3.msra.mxu0 %v10610_v14 }
0x3a51   :  { %8951 = vmatprep.subr.mxu0 %v9851_v1 }
0x3a52   :  { %8952 = vmatpush3.msra.mxu0 %v10614_v18 }
0x3a53   :  { %8953 = vmatprep.subr.mxu0 %v9851_v1 }
0x3a54   :  { %8954 = vmatpush3.msra.mxu0 %v10651_v42 }
0x3a55   :  { %8969 = vmatprep.subr.mxu0 %v9851_v1 }
0x3a57   :  { %v9560_v18 = vpop.eup %9559 }
0x3a58   :  { %v3288_v5 = vsel %vm2681_vm12, %v9560_v18, 0.0 }
0x3b05   :  { %v3844_v57 = vpop.f32.mrf.mxu0 }
0x3b06   :  { %v10912_v58 = vadd.f32 %v3844_v57, %v10706_v29 }
0x3b07   :  { %v8914_v12 = vpop.f32.mrf.mxu0 }
0x3b08   :  { %v3848_v14 = vsel %vm2681_vm12, %v10912_v58, -inf }
0x3b09   :  { %3849 = vmax.xlane.f32.xlu0 %v3848_v14 }
0x3b0d   :  { %v4024_v6 = vpop.f32.mrf.mxu0  ;;  %3289 = vadd.xlane.f32.xlu0 %v3288_v5 }
0x3b0e   :  { %v4025_v53 = vadd.f32 %v10920_v44, %v4024_v6 }
0x3b0f   :  { %v8936_v7 = vpop.f32.mrf.mxu0 }
0x3b23   :  { %4036 = vrot.lane.b32.xlu0 %v4025_v53, %s9853_s14 }
0x3b92   :  { %v10924_v8 = vpop.xlane.xlu0 %3849 }
0x3b93   :  { %vm3851_vm3 = vcmp.eq.f32.partialorder %v10912_v58, %v10924_v8 }
0x3b94   :  { %v3852_v9 = vsel %vm3851_vm3, %v10713_v43, 128 }
0x3b95   :  { %v3853_v45 = vsel %vm2681_vm12, %v3852_v9, 2147483647 }
0x3b96   :  { %v3290_v10 = vpop.xlane.xlu0 %3289  ;;  %v3855_v11 = vshra.s32 %v3853_v45, 16  ;;  %v3854_v13 = vand.u32 65535, %v3853_v45 }
0x3b97   :  { %9561 = vrcp.f32 %v3290_v10 }
0x3b98   :  { %v3857_v21 = vcvt.s32.f32 %v3855_v11  ;;  %v3856_v17 = vcvt.s32.f32 %v3854_v13 }
0x3b9a   :  { %3858 = vmin.xlane.f32.xlu1 %v3857_v21  ;;  %v4037_v50 = vpop.permute.xlu0 %4036 }
0x3ba4   :  { %v9562_v22 = vpop.eup %9561 }
0x3ba5   :  { %9376 = vpush %v9562_v22 }
0x3bd6   :  { %s9377_s25 = spop %9376 }
0x3bd7   :  { %3298 = sst [smem:[#allocation17 + $0x1]] %s9377_s25 }
0x3c23   :  { %v3859_v30 = vpop.xlane.xlu1 %3858 }
0x3c24   :  { %vm3860_vm4 = vcmp.eq.f32.partialorder %v3857_v21, %v3859_v30  ;;  %v3865_v40 = vcvt.f32.s32 %v3859_v30 }
0x3c25   :  { %v3861_v33 = vsel %vm3860_vm4, %v3856_v17, inf  ;;  %v11038_v17 = vld [vmem:[#allocation13 + $0x18] sm:$0xff] }
0x3c26   :  { %3862 = vmin.xlane.f32.xlu1 %v3861_v33  ;;  %v3866_v52 = vshll.u32 %v3865_v40, 16  ;;  %v11044_v33 = vld [vmem:[#allocation13 + $0x10] sm:$0xff]  ;;  %v11048_v40 = vld [vmem:[#allocation13 + $0x8] sm:$0xff] }
0x3caf   :  { %v3863_v60 = vpop.xlane.xlu1 %3862 }
0x3cb0   :  { %v3864_v27 = vcvt.f32.s32 %v3863_v60  ;;  %v3868_v60 = vsub.f32 %v10912_v58, %v10924_v8 }
0x3cb2   :  { %v3867_v31 = vadd.s32 %v3866_v52, %v3864_v27  ;;  %v3869_v52 = vmul.f32 1.442695, %v3868_v60 }
0x3cb4   :  { %9378 = vpush %v3867_v31 }
0x3ce5   :  { %s9379_s11 = spop %9378 }
0x3ce6   :  { %3878 = sst [smem:[#allocation16 + $0x2]] %s9379_s11  ;;  %s3883_s0 = scalar_lea.vmem %s11761_s24, %s9379_s11 }
0x3ce7   :  { %v3884_v59 = vld [vmem:[%s3883_s0] sm:$0x1] }
0x3ce8   :  { %8924 = vmatmul.mubr.msk.f32.vlgmr.msra.gmra.mxu1 %vm177_vm2, %v3884_v59 }
0x3ce9   :  { %8938 = vmatpush3.xpose.msk.msra.mxu1 %vm177_vm2, %v10593_v2  ;;  %8939 = vmatprep.mubr.msk.f32.mxu1 %vm9852_vm0, %v9851_v1 }
0x3cea   :  { %8942 = vmatprep.subr.mxu1 %v9851_v1 }
0x3da8   :  { %v3954_v38 = vpop.f32.mrf.mxu1 }
0x3da9   :  { %v3955_v48 = vadd.f32 %v10942_v47, %v3954_v38 }
0x3daa   :  { %v8925_v23 = vpop.f32.mrf.mxu1 }
0x3dab   :  { %v4028_v25 = vadd.f32 %v4025_v53, %v3955_v48 }
0x3dad   :  { %v8080_v41 = vmul.f32 -1.442695, %v4028_v25 }
0x3daf   :  { %9563 = vpow2.f32 %v8080_v41 }
0x3dbc   :  { %v9564_v49 = vpop.eup %9563 }
0x3dbd   :  { %v4032_v26 = vadd.f32 1.0, %v9564_v49 }
0x3dbf   :  { %9565 = vrcp.f32 %v4032_v26 }
0x3dcc   :  { %v9566_v3 = vpop.eup %9565 }
0x3dcd   :  { %v4039_v54 = vmul.f32 %v9566_v3, %v4037_v50  ;;  %v4046_v46 = vsub.f32 1.0, %v9566_v3  ;;  %v4052_v61 = vmul.f32 %v9566_v3, %v10837_v0 }
0x3dcf   :  { %4041 = vrot.lane.b32.xlu1 %v4039_v54, %s9853_s14 }
0x3e41   :  { %v4042_v20 = vpop.permute.xlu1 %4041 }
0x3e42   :  { %v4044_v34 = vadd.f32 %v4042_v20, %v3955_v48 }
0x3e44   :  { %9567 = vtanh.f32 %v4044_v34 }
0x3e51   :  { %v9568_v36 = vpop.eup %9567 }
0x3e52   :  { %4048 = vrot.lane.b32.xlu1 %v9568_v36, %s9854_s3 }
0x3ec4   :  { %v4049_v39 = vpop.permute.xlu1 %4048 }
0x3ec5   :  { %v4051_v62 = vmul.f32 %v4049_v39, %v4046_v46 }
0x3ec7   :  { %v10948_v63 = vadd.f32 %v4052_v61, %v4051_v62 }
0x3ec9   :  { %4055 = vrot.lane.b32.xlu0 %v10948_v63, %s9854_s3 }
0x3f3b   :  { %v10952_v35 = vpop.permute.xlu0 %4055 }
0x3f3c   :  { %8940 = vmatmul.mubr.msk.f32.vlgmr.msra.gmra.mxu1 %vm177_vm2, %v10952_v35 }
0x3f3d   :  { %8943 = vmatpush3.msra.mxu1 %v10593_v2  ;;  %8944 = vmatprep.mubr.msk.f32.mxu1 %vm9852_vm0, %v9851_v1 }
0x3f3e   :  { %8958 = vmatprep.subr.mxu1 %v9851_v1 }
0x3ffc   :  { %v4125_v51 = vpop.f32.mrf.mxu1 }
0x3ffd   :  { %v4129_v0 = vsel %vm2377_vm10, %v4125_v51, -inf }
0x3ffe   :  { %4130 = vmax.xlane.f32.xlu1 %v4129_v0  ;;  %v8941_v56 = vpop.f32.mrf.mxu1 }
0x4087   :  { %v4131_v57 = vpop.xlane.xlu1 %4130 }
0x4088   :  { %v4132_v12 = vsub.f32 %v4125_v51, %v4131_v57 }
0x408a   :  { %v4133_v14 = vmul.f32 1.442695, %v4132_v12 }
0x408c   :  { %9569 = vpow2.f32 %v4133_v14 }
0x4099   :  { %v9570_v18 = vpop.eup %9569 }
0x409a   :  { %v4135_v5 = vsel %vm2377_vm10, %v9570_v18, 0.0 }
0x409b   :  { %4136 = vadd.xlane.f32.xlu0 %v4135_v5 }
0x4124   :  { %v4137_v6 = vpop.xlane.xlu0 %4136 }
0x4125   :  { %9571 = vrcp.f32 %v4137_v6 }
0x4132   :  { %v9572_v7 = vpop.eup %9571 }
0x4133   :  { %v4139_v53 = vmul.f32 %v9572_v7, %v9570_v18 }
0x4135   :  { %8945 = vmatmul.mubr.msk.f32.vlgmr.msra.gmra.mxu1 %vm2389_vm11, %v4139_v53 }
0x4136   :  { %8959 = vmatpush3.msra.mxu1 %v10620_v24  ;;  %8966 = vmatprep.mubr.msk.f32.mxu1 %vm9852_vm0, %v9851_v1  ;;  %v10978_v24 = vld [vmem:[%s11740_s10 + $0x18] sm:$0xff] }
0x4137   :  { %8960 = vmatprep.subr.mxu1 %v9851_v1 }
0x4138   :  { %8961 = vmatpush3.msra.mxu1 %v10623_v15  ;;  %v10987_v15 = vld [vmem:[%s11740_s10 + $0x10] sm:$0xff] }
0x4139   :  { %8962 = vmatprep.subr.mxu1 %v9851_v1 }
0x413a   :  { %8963 = vmatpush3.msra.mxu1 %v10629_v28  ;;  %v10994_v28 = vld [vmem:[%s11740_s10 + $0x8] sm:$0xff] }
0x413b   :  { %8964 = vmatprep.subr.mxu1 %v9851_v1 }
0x413c   :  { %8965 = vmatpush3.msra.mxu1 %v10633_v16  ;;  %v11001_v16 = vld [vmem:[%s11740_s10] sm:$0xff] }
0x413d   :  { %8967 = vmatmul.mubr.msk.f32.vlgmr.msra.gmra.mxu1 %vm177_vm2, %v10952_v35  ;;  %8980 = vmatprep.subr.mxu1 %v9851_v1 }
0x413e   :  { %8981 = vmatpush3.msra.mxu1 %v10978_v24  ;;  %8988 = vmatprep.mubr.msk.f32.mxu1 %vm9852_vm0, %v9851_v1 }
0x413f   :  { %8982 = vmatprep.subr.mxu1 %v9851_v1 }
0x4140   :  { %8983 = vmatpush3.msra.mxu1 %v10987_v15 }
0x4141   :  { %8984 = vmatprep.subr.mxu1 %v9851_v1 }
0x4142   :  { %8985 = vmatpush3.msra.mxu1 %v10994_v28 }
0x4143   :  { %8986 = vmatprep.subr.mxu1 %v9851_v1 }
0x4144   :  { %8987 = vmatpush3.msra.mxu1 %v11001_v16 }
0x4145   :  { %9002 = vmatprep.subr.mxu1 %v9851_v1 }
0x41f5   :  { %v4209_v9 = vpop.f32.mrf.mxu1 }
0x41f6   :  { %8956 = vmatmul.mubr.msk.f32.vlgmr.msra.gmra.mxu0 %vm177_vm2, %v4209_v9 }
0x41f7   :  { %v8946_v45 = vpop.f32.mrf.mxu1  ;;  %8970 = vmatpush3.msra.mxu0 %v10658_v37  ;;  %8977 = vmatprep.mubr.msk.f32.mxu0 %vm9852_vm0, %v9851_v1 }
0x41f8   :  { %8971 = vmatprep.subr.mxu0 %v9851_v1 }
0x41f9   :  { %8972 = vmatpush3.msra.mxu0 %v10660_v4  ;;  %v11018_v4 = vld [vmem:[#allocation10 + $0x18] sm:$0xff] }
0x41fa   :  { %8973 = vmatprep.subr.mxu0 %v9851_v1 }
0x41fb   :  { %8974 = vmatpush3.msra.mxu0 %v10664_v32  ;;  %v11024_v32 = vld [vmem:[#allocation10 + $0x10] sm:$0xff] }
0x41fc   :  { %8975 = vmatprep.subr.mxu0 %v9851_v1 }
0x41fd   :  { %v4352_v10 = vpop.f32.mrf.mxu1  ;;  %8976 = vmatpush3.msra.mxu0 %v10668_v55  ;;  %v11028_v55 = vld [vmem:[#allocation10 + $0x8] sm:$0xff] }
0x41fe   :  { %8991 = vmatprep.subr.mxu0 %v9851_v1 }
0x41ff   :  { %v8968_v11 = vpop.f32.mrf.mxu1 }
0x42b6   :  { %v4282_v37 = vpop.f32.mrf.mxu0 }
0x42b7   :  { %v4353_v21 = vadd.f32 %v4352_v10, %v4282_v37 }
0x42b8   :  { %v8957_v22 = vpop.f32.mrf.mxu0 }
0x42b9   :  { %v4356_v13 = vadd.f32 %v4353_v21, %v10677_v19  ;;  %v11032_v19 = vld [vmem:[#allocation10] sm:$0xff] }
0x42bb   :  { %9573 = vtanh.f32 %v4356_v13 }
0x42bc   :  { %9575 = vpow2.f32 %v3869_v52 }
0x42c8   :  { %v9574_v30 = vpop.eup %9573 }
0x42c9   :  { %8978 = vmatmul.mubr.msk.f32.vlgmr.msra.gmra.mxu0 %vm177_vm2, %v9574_v30  ;;  %v9576_v48 = vpop.eup %9575 }
0x42ca   :  { %8992 = vmatpush3.msra.mxu0 %v11018_v4  ;;  %8999 = vmatprep.mubr.msk.f32.mxu0 %vm9852_vm0, %v9851_v1  ;;  %v3871_v23 = vsel %vm2681_vm12, %v9576_v48, 0.0 }
0x42cb   :  { %8993 = vmatprep.subr.mxu0 %v9851_v1 }
0x42cc   :  { %8994 = vmatpush3.msra.mxu0 %v11024_v32 }
0x42cd   :  { %8995 = vmatprep.subr.mxu0 %v9851_v1 }
0x42ce   :  { %8996 = vmatpush3.msra.mxu0 %v11028_v55 }
0x42cf   :  { %8997 = vmatprep.subr.mxu0 %v9851_v1 }
0x42d0   :  { %8998 = vmatpush3.msra.mxu0 %v11032_v19 }
0x42d1   :  { %9000 = vmatmul.mubr.msk.f32.vlgmr.msra.gmra.mxu0 %vm177_vm2, %v10952_v35  ;;  %9012 = vmatprep.subr.mxu0 %v9851_v1 }
0x42d2   :  { %9013 = vmatpush3.msra.mxu0 %v11038_v17  ;;  %9020 = vmatprep.mubr.msk.f32.mxu0 %vm9852_vm0, %v9851_v1 }
0x42d3   :  { %9014 = vmatprep.subr.mxu0 %v9851_v1 }
0x42d4   :  { %9015 = vmatpush3.msra.mxu0 %v11044_v33 }
0x42d5   :  { %9016 = vmatprep.subr.mxu0 %v9851_v1 }
0x42d6   :  { %9017 = vmatpush3.msra.mxu0 %v11048_v40 }
0x42d7   :  { %9018 = vmatprep.subr.mxu0 %v9851_v1 }
0x42d8   :  { %9019 = vmatpush3.msra.mxu0 %v10651_v42 }
0x42d9   :  { %9034 = vmatprep.subr.mxu0 %v9851_v1 }
0x4389   :  { %v4427_v27 = vpop.f32.mrf.mxu0 }
0x438a   :  { %v11057_v31 = vadd.f32 %v4427_v27, %v10706_v29 }
0x438b   :  { %v8979_v59 = vpop.f32.mrf.mxu0 }
0x438c   :  { %v4431_v38 = vsel %vm2681_vm12, %v11057_v31, -inf }
0x438d   :  { %4432 = vmax.xlane.f32.xlu0 %v4431_v38 }
0x4391   :  { %v4607_v42 = vpop.f32.mrf.mxu0  ;;  %3872 = vadd.xlane.f32.xlu0 %v3871_v23 }
0x4392   :  { %v4608_v41 = vadd.f32 %v10920_v44, %v4607_v42 }
0x4393   :  { %v9001_v25 = vpop.f32.mrf.mxu0 }
0x43a7   :  { %4619 = vrot.lane.b32.xlu0 %v4608_v41, %s9853_s14 }
0x4416   :  { %v11064_v58 = vpop.xlane.xlu0 %4432 }
0x4417   :  { %vm4434_vm5 = vcmp.eq.f32.partialorder %v11057_v31, %v11064_v58 }
0x4418   :  { %v4435_v29 = vsel %vm4434_vm5, %v10713_v43, 128 }
0x4419   :  { %v4436_v8 = vsel %vm2681_vm12, %v4435_v29, 2147483647  ;;  %v11098_v29 = vld [vmem:[#allocation11 + $0x18] sm:$0xff] }
0x441a   :  { %v3873_v49 = vpop.xlane.xlu0 %3872  ;;  %v4438_v26 = vshra.s32 %v4436_v8, 16  ;;  %v4437_v54 = vand.u32 65535, %v4436_v8  ;;  %v11104_v8 = vld [vmem:[#allocation11 + $0x10] sm:$0xff] }
0x441b   :  { %9577 = vrcp.f32 %v3873_v49  ;;  %v11108_v49 = vld [vmem:[#allocation11 + $0x8] sm:$0xff] }
0x441c   :  { %v4440_v3 = vcvt.s32.f32 %v4438_v26  ;;  %v4439_v34 = vcvt.s32.f32 %v4437_v54  ;;  %v11112_v26 = vld [vmem:[#allocation11] sm:$0xff]  ;;  %v11129_v54 = vld [vmem:[#allocation14 + $0x18] sm:$0xff] }
0x441e   :  { %4441 = vmin.xlane.f32.xlu1 %v4440_v3  ;;  %v4620_v7 = vpop.permute.xlu0 %4619 }
0x4428   :  { %v9578_v50 = vpop.eup %9577 }
0x4429   :  { %9380 = vpush %v9578_v50 }
0x445a   :  { %s9381_s27 = spop %9380 }
0x445b   :  { %3881 = sst [smem:[#allocation17 + $0x2]] %s9381_s27 }
0x44a7   :  { %v4442_v20 = vpop.xlane.xlu1 %4441 }
0x44a8   :  { %vm4443_vm6 = vcmp.eq.f32.partialorder %v4440_v3, %v4442_v20  ;;  %v4448_v46 = vcvt.f32.s32 %v4442_v20  ;;  %v11135_v20 = vld [vmem:[#allocation14 + $0x10] sm:$0xff] }
0x44a9   :  { %v4444_v36 = vsel %vm4443_vm6, %v4439_v34, inf  ;;  %v11139_v34 = vld [vmem:[#allocation14 + $0x8] sm:$0xff] }
0x44aa   :  { %4445 = vmin.xlane.f32.xlu1 %v4444_v36  ;;  %v4449_v61 = vshll.u32 %v4448_v46, 16  ;;  %v11143_v46 = vld [vmem:[#allocation14] sm:$0xff] }
0x4533   :  { %v4446_v39 = vpop.xlane.xlu1 %4445 }
0x4534   :  { %v4447_v62 = vcvt.f32.s32 %v4446_v39 }
0x4536   :  { %v4450_v35 = vadd.s32 %v4449_v61, %v4447_v62 }
0x4538   :  { %9382 = vpush %v4450_v35 }
0x4569   :  { %s9383_s17 = spop %9382 }
0x456a   :  { %4461 = sst [smem:[#allocation16 + $0x3]] %s9383_s17  ;;  %s4466_s28 = scalar_lea.vmem %s11761_s24, %s9383_s17 }
0x456b   :  { %v4467_v51 = vld [vmem:[%s4466_s28] sm:$0x1] }
0x456c   :  { %8989 = vmatmul.mubr.msk.f32.vlgmr.msra.gmra.mxu1 %vm177_vm2, %v4467_v51  ;;  %v11150_v51 = vld [vmem:[%s11746_s16] sm:$0x1] }
0x456d   :  { %9003 = vmatpush3.xpose.msk.msra.mxu1 %vm177_vm2, %v10593_v2  ;;  %9004 = vmatprep.mubr.msk.f32.mxu1 %vm9852_vm0, %v9851_v1 }
0x456e   :  { %9007 = vmatprep.subr.mxu1 %v9851_v1 }
0x462c   :  { %v4537_v0 = vpop.f32.mrf.mxu1 }
0x462d   :  { %v4538_v56 = vadd.f32 %v10942_v47, %v4537_v0 }
0x462e   :  { %v8990_v57 = vpop.f32.mrf.mxu1 }
0x462f   :  { %v4611_v12 = vadd.f32 %v4608_v41, %v4538_v56  ;;  %v11174_v57 = vld [vmem:[#allocation13] sm:$0xff] }
0x4631   :  { %v8089_v14 = vmul.f32 -1.442695, %v4611_v12  ;;  %v4451_v12 = vsub.f32 %v11057_v31, %v11064_v58 }
0x4633   :  { %9579 = vpow2.f32 %v8089_v14  ;;  %v4452_v14 = vmul.f32 1.442695, %v4451_v12 }
0x4640   :  { %v9580_v18 = vpop.eup %9579 }
0x4641   :  { %v4615_v5 = vadd.f32 1.0, %v9580_v18 }
0x4643   :  { %9581 = vrcp.f32 %v4615_v5  ;;  %v11183_v5 = vld [vmem:[%s11748_s18] sm:$0x1] }
0x4650   :  { %v9582_v6 = vpop.eup %9581 }
0x4651   :  { %v4622_v53 = vmul.f32 %v9582_v6, %v4620_v7  ;;  %v4629_v11 = vsub.f32 1.0, %v9582_v6  ;;  %v4635_v21 = vmul.f32 %v9582_v6, %v10948_v63 }
0x4653   :  { %4624 = vrot.lane.b32.xlu1 %v4622_v53, %s9853_s14 }
0x46c5   :  { %v4625_v9 = vpop.permute.xlu1 %4624 }
0x46c6   :  { %v4627_v45 = vadd.f32 %v4625_v9, %v4538_v56 }
0x46c8   :  { %9583 = vtanh.f32 %v4627_v45 }
0x46d5   :  { %v9584_v10 = vpop.eup %9583 }
0x46d6   :  { %4631 = vrot.lane.b32.xlu1 %v9584_v10, %s9854_s3 }
0x4748   :  { %v4632_v37 = vpop.permute.xlu1 %4631 }
0x4749   :  { %v4634_v22 = vmul.f32 %v4632_v37, %v4629_v11 }
0x474b   :  { %v11083_v13 = vadd.f32 %v4635_v21, %v4634_v22 }
0x474d   :  { %4638 = vrot.lane.b32.xlu0 %v11083_v13, %s9854_s3 }
0x47bf   :  { %v11087_v30 = vpop.permute.xlu0 %4638 }
0x47c0   :  { %9005 = vmatmul.mubr.msk.f32.vlgmr.msra.gmra.mxu1 %vm177_vm2, %v11087_v30 }
0x47c1   :  { %9008 = vmatpush3.msra.mxu1 %v10593_v2  ;;  %9009 = vmatprep.mubr.msk.f32.mxu1 %vm9852_vm0, %v9851_v1 }
0x47c2   :  { %9023 = vmatprep.subr.mxu1 %v9851_v1 }
0x4880   :  { %v4708_v60 = vpop.f32.mrf.mxu1 }
0x4881   :  { %v4712_v63 = vsel %vm2377_vm10, %v4708_v60, -inf }
0x4882   :  { %4713 = vmax.xlane.f32.xlu1 %v4712_v63  ;;  %v9006_v52 = vpop.f32.mrf.mxu1 }
0x490b   :  { %v4714_v27 = vpop.xlane.xlu1 %4713 }
0x490c   :  { %v4715_v59 = vsub.f32 %v4708_v60, %v4714_v27 }
0x490e   :  { %v4716_v38 = vmul.f32 1.442695, %v4715_v59 }
0x4910   :  { %9585 = vpow2.f32 %v4716_v38 }
0x491d   :  { %v9586_v48 = vpop.eup %9585 }
0x491e   :  { %v4718_v23 = vsel %vm2377_vm10, %v9586_v48, 0.0 }
0x491f   :  { %4719 = vadd.xlane.f32.xlu0 %v4718_v23 }
0x49a8   :  { %v4720_v42 = vpop.xlane.xlu0 %4719 }
0x49a9   :  { %9587 = vrcp.f32 %v4720_v42 }
0x49b6   :  { %v9588_v25 = vpop.eup %9587 }
0x49b7   :  { %v4722_v41 = vmul.f32 %v9588_v25, %v9586_v48 }
0x49b9   :  { %9010 = vmatmul.mubr.msk.f32.vlgmr.msra.gmra.mxu1 %vm2389_vm11, %v4722_v41 }
0x49ba   :  { %9024 = vmatpush3.msra.mxu1 %v11098_v29  ;;  %9031 = vmatprep.mubr.msk.f32.mxu1 %vm9852_vm0, %v9851_v1 }
0x49bb   :  { %9025 = vmatprep.subr.mxu1 %v9851_v1 }
0x49bc   :  { %9026 = vmatpush3.msra.mxu1 %v11104_v8 }
0x49bd   :  { %9027 = vmatprep.subr.mxu1 %v9851_v1 }
0x49be   :  { %9028 = vmatpush3.msra.mxu1 %v11108_v49 }
0x49bf   :  { %9029 = vmatprep.subr.mxu1 %v9851_v1 }
0x49c0   :  { %9030 = vmatpush3.msra.mxu1 %v11112_v26 }
0x49c1   :  { %9032 = vmatmul.mubr.msk.f32.vlgmr.msra.gmra.mxu1 %vm177_vm2, %v11087_v30  ;;  %9045 = vmatprep.subr.mxu1 %v9851_v1 }
0x49c2   :  { %9046 = vmatpush3.msra.mxu1 %v10978_v24  ;;  %9053 = vmatprep.mubr.msk.f32.mxu1 %vm9852_vm0, %v9851_v1 }
0x49c3   :  { %9047 = vmatprep.subr.mxu1 %v9851_v1 }
0x49c4   :  { %9048 = vmatpush3.msra.mxu1 %v10987_v15 }
0x49c5   :  { %9049 = vmatprep.subr.mxu1 %v9851_v1 }
0x49c6   :  { %9050 = vmatpush3.msra.mxu1 %v10994_v28 }
0x49c7   :  { %9051 = vmatprep.subr.mxu1 %v9851_v1 }
0x49c8   :  { %9052 = vmatpush3.msra.mxu1 %v11001_v16 }
0x49c9   :  { %9067 = vmatprep.subr.mxu1 %v9851_v1 }
0x4a79   :  { %v4792_v3 = vpop.f32.mrf.mxu1 }
0x4a7a   :  { %9021 = vmatmul.mubr.msk.f32.vlgmr.msra.gmra.mxu0 %vm177_vm2, %v4792_v3 }
0x4a7b   :  { %v9011_v50 = vpop.f32.mrf.mxu1  ;;  %9035 = vmatpush3.msra.mxu0 %v11129_v54  ;;  %9042 = vmatprep.mubr.msk.f32.mxu0 %vm9852_vm0, %v9851_v1 }
0x4a7c   :  { %9036 = vmatprep.subr.mxu0 %v9851_v1 }
0x4a7d   :  { %9037 = vmatpush3.msra.mxu0 %v11135_v20 }
0x4a7e   :  { %9038 = vmatprep.subr.mxu0 %v9851_v1 }
0x4a7f   :  { %9039 = vmatpush3.msra.mxu0 %v11139_v34 }
0x4a80   :  { %9040 = vmatprep.subr.mxu0 %v9851_v1 }
0x4a81   :  { %v4935_v36 = vpop.f32.mrf.mxu1  ;;  %9041 = vmatpush3.msra.mxu0 %v11143_v46 }
0x4a82   :  { %9056 = vmatprep.subr.mxu0 %v9851_v1 }
0x4a83   :  { %v9033_v39 = vpop.f32.mrf.mxu1 }
0x4b3a   :  { %v4865_v61 = vpop.f32.mrf.mxu0 }
0x4b3b   :  { %v4936_v62 = vadd.f32 %v4935_v36, %v4865_v61 }
0x4b3c   :  { %v9022_v35 = vpop.f32.mrf.mxu0 }
0x4b3d   :  { %v4939_v0 = vadd.f32 %v11150_v51, %v4936_v62 }
0x4b3f   :  { %9589 = vtanh.f32 %v4939_v0 }
0x4b40   :  { %9591 = vpow2.f32 %v4452_v14 }
0x4b4c   :  { %v9590_v56 = vpop.eup %9589 }
0x4b4d   :  { %9043 = vmatmul.mubr.msk.f32.vlgmr.msra.gmra.mxu0 %vm177_vm2, %v9590_v56  ;;  %v9592_v9 = vpop.eup %9591 }
0x4b4e   :  { %9057 = vmatpush3.msra.mxu0 %v11018_v4  ;;  %9064 = vmatprep.mubr.msk.f32.mxu0 %vm9852_vm0, %v9851_v1  ;;  %v4454_v45 = vsel %vm2681_vm12, %v9592_v9, 0.0 }
0x4b4f   :  { %9058 = vmatprep.subr.mxu0 %v9851_v1 }
0x4b50   :  { %9059 = vmatpush3.msra.mxu0 %v11024_v32 }
0x4b51   :  { %9060 = vmatprep.subr.mxu0 %v9851_v1 }
0x4b52   :  { %9061 = vmatpush3.msra.mxu0 %v11028_v55 }
0x4b53   :  { %9062 = vmatprep.subr.mxu0 %v9851_v1 }
0x4b54   :  { %9063 = vmatpush3.msra.mxu0 %v11032_v19 }
0x4b55   :  { %9065 = vmatmul.mubr.msk.f32.vlgmr.msra.gmra.mxu0 %vm177_vm2, %v11087_v30  ;;  %9077 = vmatprep.subr.mxu0 %v9851_v1 }
0x4b56   :  { %9078 = vmatpush3.msra.mxu0 %v11038_v17  ;;  %9085 = vmatprep.mubr.msk.f32.mxu0 %vm9852_vm0, %v9851_v1 }
0x4b57   :  { %9079 = vmatprep.subr.mxu0 %v9851_v1 }
0x4b58   :  { %9080 = vmatpush3.msra.mxu0 %v11044_v33 }
0x4b59   :  { %9081 = vmatprep.subr.mxu0 %v9851_v1 }
0x4b5a   :  { %9082 = vmatpush3.msra.mxu0 %v11048_v40 }
0x4b5b   :  { %9083 = vmatprep.subr.mxu0 %v9851_v1 }
0x4b5c   :  { %9084 = vmatpush3.msra.mxu0 %v11174_v57 }
0x4b5d   :  { %9099 = vmatprep.subr.mxu0 %v9851_v1 }
0x4c0d   :  { %v5010_v18 = vpop.f32.mrf.mxu0 }
0x4c0e   :  { %v11186_v6 = vadd.f32 %v11183_v5, %v5010_v18 }
0x4c0f   :  { %v9044_v7 = vpop.f32.mrf.mxu0 }
0x4c10   :  { %v5014_v53 = vsel %vm2681_vm12, %v11186_v6, -inf }
0x4c11   :  { %5015 = vmax.xlane.f32.xlu0 %v5014_v53 }
0x4c15   :  { %v5190_v31 = vpop.f32.mrf.mxu0  ;;  %4455 = vadd.xlane.f32.xlu0 %v4454_v45 }
0x4c16   :  { %v5191_v10 = vadd.f32 %v10920_v44, %v5190_v31 }
0x4c17   :  { %v9066_v58 = vpop.f32.mrf.mxu0 }
0x4c2b   :  { %5202 = vrot.lane.b32.xlu0 %v5191_v10, %s9853_s14 }
0x4c9a   :  { %v11193_v11 = vpop.xlane.xlu0 %5015 }
0x4c9b   :  { %vm5017_vm7 = vcmp.eq.f32.partialorder %v11186_v6, %v11193_v11 }
0x4c9c   :  { %v5018_v37 = vsel %vm5017_vm7, %v10713_v43, 128 }
0x4c9d   :  { %v5019_v21 = vsel %vm2681_vm12, %v5018_v37, 2147483647 }
0x4c9e   :  { %v4456_v22 = vpop.xlane.xlu0 %4455  ;;  %v5021_v30 = vshra.s32 %v5019_v21, 16  ;;  %v5020_v52 = vand.u32 65535, %v5019_v21 }
0x4c9f   :  { %9593 = vrcp.f32 %v4456_v22 }
0x4ca0   :  { %v5023_v60 = vcvt.s32.f32 %v5021_v30  ;;  %v5022_v59 = vcvt.s32.f32 %v5020_v52 }
0x4ca2   :  { %5024 = vmin.xlane.f32.xlu1 %v5023_v60  ;;  %v5203_v12 = vpop.permute.xlu0 %5202 }
0x4cac   :  { %v9594_v63 = vpop.eup %9593 }
0x4cad   :  { %9384 = vpush %v9594_v63 }
0x4cde   :  { %s9385_s29 = spop %9384 }
0x4cdf   :  { %4464 = sst [smem:[#allocation17 + $0x3]] %s9385_s29 }
0x4d2b   :  { %v5025_v27 = vpop.xlane.xlu1 %5024 }
0x4d2c   :  { %vm5026_vm8 = vcmp.eq.f32.partialorder %v5023_v60, %v5025_v27  ;;  %v5031_v48 = vcvt.f32.s32 %v5025_v27 }
0x4d2d   :  { %v5027_v38 = vsel %vm5026_vm8, %v5022_v59, inf }
0x4d2e   :  { %5028 = vmin.xlane.f32.xlu1 %v5027_v38  ;;  %v5032_v42 = vshll.u32 %v5031_v48, 16 }
0x4db7   :  { %v5029_v23 = vpop.xlane.xlu1 %5028 }
0x4db8   :  { %v5030_v25 = vcvt.f32.s32 %v5029_v23 }
0x4dba   :  { %v5033_v41 = vadd.s32 %v5032_v42, %v5030_v25 }
0x4dbc   :  { %9386 = vpush %v5033_v41 }
0x4ded   :  { %s9387_s0 = spop %9386 }
0x4dee   :  { %5044 = sst [smem:[#allocation16 + $0x4]] %s9387_s0  ;;  %s5049_s7 = scalar_lea.vmem %s11761_s24, %s9387_s0 }
0x4def   :  { %v5050_v3 = vld [vmem:[%s5049_s7] sm:$0x1] }
0x4df0   :  { %9054 = vmatmul.mubr.msk.f32.vlgmr.msra.gmra.mxu1 %vm177_vm2, %v5050_v3 }
0x4df1   :  { %9068 = vmatpush3.xpose.msk.msra.mxu1 %vm177_vm2, %v10593_v2  ;;  %9069 = vmatprep.mubr.msk.f32.mxu1 %vm9852_vm0, %v9851_v1 }
0x4df2   :  { %9072 = vmatprep.subr.mxu1 %v9851_v1 }
0x4eb0   :  { %v5120_v50 = vpop.f32.mrf.mxu1 }
0x4eb1   :  { %v5121_v36 = vadd.f32 %v10942_v47, %v5120_v50 }
0x4eb2   :  { %v9055_v39 = vpop.f32.mrf.mxu1 }
0x4eb3   :  { %v5194_v61 = vadd.f32 %v5191_v10, %v5121_v36 }
0x4eb5   :  { %v8098_v62 = vmul.f32 -1.442695, %v5194_v61 }
0x4eb7   :  { %9595 = vpow2.f32 %v8098_v62  ;;  %v5034_v62 = vsub.f32 %v11186_v6, %v11193_v11 }
0x4ec4   :  { %v9596_v35 = vpop.eup %9595 }
0x4ec5   :  { %v5198_v0 = vadd.f32 1.0, %v9596_v35  ;;  %v5035_v35 = vmul.f32 1.442695, %v5034_v62 }
0x4ec7   :  { %9597 = vrcp.f32 %v5198_v0 }
0x4ed4   :  { %v9598_v56 = vpop.eup %9597 }
0x4ed5   :  { %v5205_v14 = vmul.f32 %v9598_v56, %v5203_v12  ;;  %v5212_v9 = vsub.f32 1.0, %v9598_v56  ;;  %v5218_v31 = vmul.f32 %v9598_v56, %v11083_v13 }
0x4ed7   :  { %5207 = vrot.lane.b32.xlu1 %v5205_v14, %s9853_s14 }
0x4f49   :  { %v5208_v18 = vpop.permute.xlu1 %5207 }
0x4f4a   :  { %v5210_v7 = vadd.f32 %v5208_v18, %v5121_v36 }
0x4f4c   :  { %9599 = vtanh.f32 %v5210_v7 }
0x4f59   :  { %v9600_v53 = vpop.eup %9599 }
0x4f5a   :  { %5214 = vrot.lane.b32.xlu1 %v9600_v53, %s9854_s3 }
0x4fcc   :  { %v5215_v45 = vpop.permute.xlu1 %5214 }
0x4fcd   :  { %v5217_v58 = vmul.f32 %v5215_v45, %v5212_v9 }
0x4fcf   :  { %v11212_v10 = vadd.f32 %v5218_v31, %v5217_v58 }
0x4fd1   :  { %5221 = vrot.lane.b32.xlu0 %v11212_v10, %s9854_s3 }
0x5043   :  { %v11216_v37 = vpop.permute.xlu0 %5221 }
0x5044   :  { %9070 = vmatmul.mubr.msk.f32.vlgmr.msra.gmra.mxu1 %vm177_vm2, %v11216_v37 }
0x5045   :  { %9073 = vmatpush3.msra.mxu1 %v10593_v2  ;;  %9074 = vmatprep.mubr.msk.f32.mxu1 %vm9852_vm0, %v9851_v1 }
0x5046   :  { %9088 = vmatprep.subr.mxu1 %v9851_v1 }
0x5104   :  { %v5291_v21 = vpop.f32.mrf.mxu1 }
0x5105   :  { %v5295_v13 = vsel %vm2377_vm10, %v5291_v21, -inf }
0x5106   :  { %5296 = vmax.xlane.f32.xlu1 %v5295_v13  ;;  %v9071_v22 = vpop.f32.mrf.mxu1 }
0x518f   :  { %v5297_v30 = vpop.xlane.xlu1 %5296 }
0x5190   :  { %v5298_v60 = vsub.f32 %v5291_v21, %v5297_v30 }
0x5192   :  { %v5299_v63 = vmul.f32 1.442695, %v5298_v60 }
0x5194   :  { %9601 = vpow2.f32 %v5299_v63 }
0x51a1   :  { %v9602_v52 = vpop.eup %9601 }
0x51a2   :  { %v5301_v27 = vsel %vm2377_vm10, %v9602_v52, 0.0 }
0x51a3   :  { %5302 = vadd.xlane.f32.xlu0 %v5301_v27 }
0x522c   :  { %v5303_v59 = vpop.xlane.xlu0 %5302 }
0x522d   :  { %9603 = vrcp.f32 %v5303_v59 }
0x523a   :  { %v9604_v38 = vpop.eup %9603 }
0x523b   :  { %v5305_v48 = vmul.f32 %v9604_v38, %v9602_v52 }
0x523d   :  { %9075 = vmatmul.mubr.msk.f32.vlgmr.msra.gmra.mxu1 %vm2389_vm11, %v5305_v48 }
0x523e   :  { %9089 = vmatpush3.msra.mxu1 %v11098_v29  ;;  %9096 = vmatprep.mubr.msk.f32.mxu1 %vm9852_vm0, %v9851_v1 }
0x523f   :  { %9090 = vmatprep.subr.mxu1 %v9851_v1 }
0x5240   :  { %9091 = vmatpush3.msra.mxu1 %v11104_v8 }
0x5241   :  { %9092 = vmatprep.subr.mxu1 %v9851_v1 }
0x5242   :  { %9093 = vmatpush3.msra.mxu1 %v11108_v49 }
0x5243   :  { %9094 = vmatprep.subr.mxu1 %v9851_v1 }
0x5244   :  { %9095 = vmatpush3.msra.mxu1 %v11112_v26 }
0x5245   :  { %9097 = vmatmul.mubr.msk.f32.vlgmr.msra.gmra.mxu1 %vm177_vm2, %v11216_v37  ;;  %9110 = vmatprep.subr.mxu1 %v9851_v1 }
0x5246   :  { %9111 = vmatpush3.msra.mxu1 %v10978_v24  ;;  %9118 = vmatprep.mubr.msk.f32.mxu1 %vm9852_vm0, %v9851_v1 }
0x5247   :  { %9112 = vmatprep.subr.mxu1 %v9851_v1 }
0x5248   :  { %9113 = vmatpush3.msra.mxu1 %v10987_v15 }
0x5249   :  { %9114 = vmatprep.subr.mxu1 %v9851_v1 }
0x524a   :  { %9115 = vmatpush3.msra.mxu1 %v10994_v28 }
0x524b   :  { %9116 = vmatprep.subr.mxu1 %v9851_v1 }
0x524c   :  { %9117 = vmatpush3.msra.mxu1 %v11001_v16 }
0x524d   :  { %9132 = vmatprep.subr.mxu1 %v9851_v1 }
0x52fd   :  { %v5375_v23 = vpop.f32.mrf.mxu1 }
0x52fe   :  { %9086 = vmatmul.mubr.msk.f32.vlgmr.msra.gmra.mxu0 %vm177_vm2, %v5375_v23 }
0x52ff   :  { %v9076_v42 = vpop.f32.mrf.mxu1  ;;  %9100 = vmatpush3.msra.mxu0 %v11129_v54  ;;  %9107 = vmatprep.mubr.msk.f32.mxu0 %vm9852_vm0, %v9851_v1 }
0x5300   :  { %9101 = vmatprep.subr.mxu0 %v9851_v1 }
0x5301   :  { %9102 = vmatpush3.msra.mxu0 %v11135_v20 }
0x5302   :  { %9103 = vmatprep.subr.mxu0 %v9851_v1 }
0x5303   :  { %9104 = vmatpush3.msra.mxu0 %v11139_v34 }
0x5304   :  { %9105 = vmatprep.subr.mxu0 %v9851_v1 }
0x5305   :  { %v5518_v25 = vpop.f32.mrf.mxu1  ;;  %9106 = vmatpush3.msra.mxu0 %v11143_v46 }
0x5306   :  { %9121 = vmatprep.subr.mxu0 %v9851_v1 }
0x5307   :  { %v9098_v41 = vpop.f32.mrf.mxu1 }
0x53be   :  { %v5448_v3 = vpop.f32.mrf.mxu0 }
0x53bf   :  { %v5519_v50 = vadd.f32 %v5518_v25, %v5448_v3 }
0x53c0   :  { %v9087_v36 = vpop.f32.mrf.mxu0 }
0x53c1   :  { %v5522_v39 = vadd.f32 %v11150_v51, %v5519_v50 }
0x53c3   :  { %9605 = vtanh.f32 %v5522_v39 }
0x53c4   :  { %9607 = vpow2.f32 %v5035_v35 }
0x53d0   :  { %v9606_v61 = vpop.eup %9605 }
0x53d1   :  { %9108 = vmatmul.mubr.msk.f32.vlgmr.msra.gmra.mxu0 %vm177_vm2, %v9606_v61  ;;  %v9608_v18 = vpop.eup %9607 }
0x53d2   :  { %9122 = vmatpush3.msra.mxu0 %v11018_v4  ;;  %9129 = vmatprep.mubr.msk.f32.mxu0 %vm9852_vm0, %v9851_v1  ;;  %v5037_v7 = vsel %vm2681_vm12, %v9608_v18, 0.0 }
0x53d3   :  { %9123 = vmatprep.subr.mxu0 %v9851_v1 }
0x53d4   :  { %9124 = vmatpush3.msra.mxu0 %v11024_v32 }
0x53d5   :  { %9125 = vmatprep.subr.mxu0 %v9851_v1 }
0x53d6   :  { %9126 = vmatpush3.msra.mxu0 %v11028_v55 }
0x53d7   :  { %9127 = vmatprep.subr.mxu0 %v9851_v1 }
0x53d8   :  { %9128 = vmatpush3.msra.mxu0 %v11032_v19 }
0x53d9   :  { %9130 = vmatmul.mubr.msk.f32.vlgmr.msra.gmra.mxu0 %vm177_vm2, %v11216_v37  ;;  %9142 = vmatprep.subr.mxu0 %v9851_v1 }
0x53da   :  { %9143 = vmatpush3.msra.mxu0 %v11038_v17  ;;  %9150 = vmatprep.mubr.msk.f32.mxu0 %vm9852_vm0, %v9851_v1 }
0x53db   :  { %9144 = vmatprep.subr.mxu0 %v9851_v1 }
0x53dc   :  { %9145 = vmatpush3.msra.mxu0 %v11044_v33 }
0x53dd   :  { %9146 = vmatprep.subr.mxu0 %v9851_v1 }
0x53de   :  { %9147 = vmatpush3.msra.mxu0 %v11048_v40 }
0x53df   :  { %9148 = vmatprep.subr.mxu0 %v9851_v1 }
0x53e0   :  { %9149 = vmatpush3.msra.mxu0 %v11174_v57 }
0x53e1   :  { %9164 = vmatprep.subr.mxu0 %v9851_v1 }
0x5491   :  { %v5593_v0 = vpop.f32.mrf.mxu0 }
0x5492   :  { %v11287_v56 = vadd.f32 %v11183_v5, %v5593_v0 }
0x5493   :  { %v9109_v12 = vpop.f32.mrf.mxu0 }
0x5494   :  { %v5597_v14 = vsel %vm2681_vm12, %v11287_v56, -inf }
0x5495   :  { %5598 = vmax.xlane.f32.xlu0 %v5597_v14 }
0x5499   :  { %v5773_v53 = vpop.f32.mrf.mxu0  ;;  %5038 = vadd.xlane.f32.xlu0 %v5037_v7 }
0x549a   :  { %v5774_v45 = vadd.f32 %v10920_v44, %v5773_v53 }
0x549b   :  { %v9131_v9 = vpop.f32.mrf.mxu0 }
0x54af   :  { %5785 = vrot.lane.b32.xlu0 %v5774_v45, %s9853_s14 }
0x551e   :  { %v11294_v6 = vpop.xlane.xlu0 %5598 }
0x551f   :  { %vm5600_vm9 = vcmp.eq.f32.partialorder %v11287_v56, %v11294_v6 }
0x5520   :  { %v5601_v11 = vsel %vm5600_vm9, %v10713_v43, 128 }
0x5521   :  { %v5602_v31 = vsel %vm2681_vm12, %v5601_v11, 2147483647 }
0x5522   :  { %v5039_v58 = vpop.xlane.xlu0 %5038  ;;  %v5604_v37 = vshra.s32 %v5602_v31, 16  ;;  %v5603_v44 = vand.u32 65535, %v5602_v31 }
0x5523   :  { %9609 = vrcp.f32 %v5039_v58 }
0x5524   :  { %v5606_v21 = vcvt.s32.f32 %v5604_v37  ;;  %v5605_v30 = vcvt.s32.f32 %v5603_v44 }
0x5526   :  { %5607 = vmin.xlane.f32.xlu1 %v5606_v21  ;;  %v5786_v61 = vpop.permute.xlu0 %5785 }
0x5530   :  { %v9610_v13 = vpop.eup %9609 }
0x5531   :  { %9388 = vpush %v9610_v13 }
0x5562   :  { %s9389_s22 = spop %9388 }
0x5563   :  { %5047 = sst [smem:[#allocation17 + $0x4]] %s9389_s22 }
0x55af   :  { %v5608_v22 = vpop.xlane.xlu1 %5607 }
0x55b0   :  { %vm5609_vm13 = vcmp.eq.f32.partialorder %v5606_v21, %v5608_v22  ;;  %v5614_v63 = vcvt.f32.s32 %v5608_v22 }
0x55b1   :  { %v5610_v60 = vsel %vm5609_vm13, %v5605_v30, inf }
0x55b2   :  { %5611 = vmin.xlane.f32.xlu1 %v5610_v60  ;;  %v5615_v27 = vshll.u32 %v5614_v63, 16 }
0x563b   :  { %v5612_v52 = vpop.xlane.xlu1 %5611 }
0x563c   :  { %v5613_v59 = vcvt.f32.s32 %v5612_v52 }
0x563e   :  { %v5616_v38 = vadd.s32 %v5615_v27, %v5613_v59 }
0x5640   :  { %9390 = vpush %v5616_v38 }
0x5671   :  { %s9391_s1 = spop %9390 }
0x5672   :  { %5627 = sst [smem:[#allocation16 + $0x5]] %s9391_s1  ;;  %s5632_s9 = scalar_lea.vmem %s11761_s24, %s9391_s1 }
0x5673   :  { %v5633_v48 = vld [vmem:[%s5632_s9] sm:$0x1] }
0x5674   :  { %9119 = vmatmul.mubr.msk.f32.vlgmr.msra.gmra.mxu1 %vm177_vm2, %v5633_v48 }
0x5675   :  { %9133 = vmatpush3.xpose.msk.msra.mxu1 %vm177_vm2, %v10593_v2  ;;  %9134 = vmatprep.mubr.msk.f32.mxu1 %vm9852_vm0, %v9851_v1 }
0x5676   :  { %9137 = vmatprep.subr.mxu1 %v9851_v1 }
0x5734   :  { %v5703_v23 = vpop.f32.mrf.mxu1 }
0x5735   :  { %v5704_v42 = vadd.f32 %v10942_v47, %v5703_v23 }
0x5736   :  { %v9120_v25 = vpop.f32.mrf.mxu1 }
0x5737   :  { %v5777_v41 = vadd.f32 %v5774_v45, %v5704_v42 }
0x5739   :  { %v8107_v3 = vmul.f32 -1.442695, %v5777_v41 }
0x573b   :  { %9611 = vpow2.f32 %v8107_v3 }
0x5748   :  { %v9612_v50 = vpop.eup %9611 }
0x5749   :  { %v5781_v36 = vadd.f32 1.0, %v9612_v50 }
0x574b   :  { %9613 = vrcp.f32 %v5781_v36 }
0x5758   :  { %v9614_v39 = vpop.eup %9613 }
0x5759   :  { %v5788_v62 = vmul.f32 %v9614_v39, %v5786_v61  ;;  %v5795_v14 = vsub.f32 1.0, %v9614_v39  ;;  %v5801_v18 = vmul.f32 %v9614_v39, %v11212_v10 }
0x575b   :  { %5790 = vrot.lane.b32.xlu1 %v5788_v62, %s9853_s14 }
0x57cd   :  { %v5791_v35 = vpop.permute.xlu1 %5790 }
0x57ce   :  { %v5793_v0 = vadd.f32 %v5791_v35, %v5704_v42 }
0x57d0   :  { %9615 = vtanh.f32 %v5793_v0 }
0x57dd   :  { %v9616_v12 = vpop.eup %9615 }
0x57de   :  { %5797 = vrot.lane.b32.xlu1 %v9616_v12, %s9854_s3 }
0x5850   :  { %v5798_v47 = vpop.permute.xlu1 %5797 }
0x5851   :  { %v5800_v7 = vmul.f32 %v5798_v47, %v5795_v14 }
0x5853   :  { %v11313_v53 = vadd.f32 %v5801_v18, %v5800_v7 }
0x5855   :  { %5804 = vrot.lane.b32.xlu0 %v11313_v53, %s9854_s3 }
0x58c7   :  { %v11317_v9 = vpop.permute.xlu0 %5804 }
0x58c8   :  { %9135 = vmatmul.mubr.msk.f32.vlgmr.msra.gmra.mxu1 %vm177_vm2, %v11317_v9 }
0x58c9   :  { %9138 = vmatpush3.msra.mxu1 %v10593_v2  ;;  %9139 = vmatprep.mubr.msk.f32.mxu1 %vm9852_vm0, %v9851_v1 }
0x58ca   :  { %9153 = vmatprep.subr.mxu1 %v9851_v1 }
0x5988   :  { %v5874_v45 = vpop.f32.mrf.mxu1 }
0x5989   :  { %v5878_v10 = vsel %vm2377_vm10, %v5874_v45, -inf }
0x598a   :  { %5879 = vmax.xlane.f32.xlu1 %v5878_v10  ;;  %v9136_v11 = vpop.f32.mrf.mxu1  ;;  %v11418_v10 = vld [vmem:[%s11742_s12] sm:$0x1] }
0x5a13   :  { %v5880_v31 = vpop.xlane.xlu1 %5879 }
0x5a14   :  { %v5881_v58 = vsub.f32 %v5874_v45, %v5880_v31 }
0x5a16   :  { %v5882_v37 = vmul.f32 1.442695, %v5881_v58 }
0x5a18   :  { %9617 = vpow2.f32 %v5882_v37 }
0x5a25   :  { %v9618_v21 = vpop.eup %9617 }
0x5a26   :  { %v5884_v13 = vsel %vm2377_vm10, %v9618_v21, 0.0 }
0x5a27   :  { %5885 = vadd.xlane.f32.xlu0 %v5884_v13 }
0x5ab0   :  { %v5886_v44 = vpop.xlane.xlu0 %5885 }
0x5ab1   :  { %9619 = vrcp.f32 %v5886_v44 }
0x5abe   :  { %v9620_v22 = vpop.eup %9619 }
0x5abf   :  { %v5888_v30 = vmul.f32 %v9620_v22, %v9618_v21 }
0x5ac1   :  { %9140 = vmatmul.mubr.msk.f32.vlgmr.msra.gmra.mxu1 %vm2389_vm11, %v5888_v30 }
0x5ac2   :  { %9154 = vmatpush3.msra.mxu1 %v11098_v29  ;;  %9161 = vmatprep.mubr.msk.f32.mxu1 %vm9852_vm0, %v9851_v1 }
0x5ac3   :  { %9155 = vmatprep.subr.mxu1 %v9851_v1 }
0x5ac4   :  { %9156 = vmatpush3.msra.mxu1 %v11104_v8 }
0x5ac5   :  { %9157 = vmatprep.subr.mxu1 %v9851_v1 }
0x5ac6   :  { %9158 = vmatpush3.msra.mxu1 %v11108_v49 }
0x5ac7   :  { %9159 = vmatprep.subr.mxu1 %v9851_v1 }
0x5ac8   :  { %9160 = vmatpush3.msra.mxu1 %v11112_v26 }
0x5ac9   :  { %9162 = vmatmul.mubr.msk.f32.vlgmr.msra.gmra.mxu1 %vm177_vm2, %v11317_v9  ;;  %9175 = vmatprep.subr.mxu1 %v9851_v1 }
0x5aca   :  { %9176 = vmatpush3.msra.mxu1 %v10978_v24  ;;  %9183 = vmatprep.mubr.msk.f32.mxu1 %vm9852_vm0, %v9851_v1 }
0x5acb   :  { %9177 = vmatprep.subr.mxu1 %v9851_v1 }
0x5acc   :  { %9178 = vmatpush3.msra.mxu1 %v10987_v15 }
0x5acd   :  { %9179 = vmatprep.subr.mxu1 %v9851_v1 }
0x5ace   :  { %9180 = vmatpush3.msra.mxu1 %v10994_v28 }
0x5acf   :  { %9181 = vmatprep.subr.mxu1 %v9851_v1 }
0x5ad0   :  { %9182 = vmatpush3.msra.mxu1 %v11001_v16 }
0x5ad1   :  { %9197 = vmatprep.subr.mxu1 %v9851_v1 }
0x5b81   :  { %v5958_v60 = vpop.f32.mrf.mxu1 }
0x5b82   :  { %9151 = vmatmul.mubr.msk.f32.vlgmr.msra.gmra.mxu0 %vm177_vm2, %v5958_v60 }
0x5b83   :  { %v9141_v24 = vpop.f32.mrf.mxu1  ;;  %9165 = vmatpush3.msra.mxu0 %v11129_v54  ;;  %9172 = vmatprep.mubr.msk.f32.mxu0 %vm9852_vm0, %v9851_v1 }
0x5b84   :  { %9166 = vmatprep.subr.mxu0 %v9851_v1 }
0x5b85   :  { %9167 = vmatpush3.msra.mxu0 %v11135_v20 }
0x5b86   :  { %9168 = vmatprep.subr.mxu0 %v9851_v1 }
0x5b87   :  { %9169 = vmatpush3.msra.mxu0 %v11139_v34 }
0x5b88   :  { %9170 = vmatprep.subr.mxu0 %v9851_v1 }
0x5b89   :  { %v6101_v15 = vpop.f32.mrf.mxu1  ;;  %9171 = vmatpush3.msra.mxu0 %v11143_v46 }
0x5b8a   :  { %9186 = vmatprep.subr.mxu0 %v9851_v1 }
0x5b8b   :  { %v9163_v28 = vpop.f32.mrf.mxu1 }
0x5c42   :  { %v6031_v16 = vpop.f32.mrf.mxu0 }
0x5c43   :  { %v6102_v63 = vadd.f32 %v6101_v15, %v6031_v16 }
0x5c44   :  { %v9152_v52 = vpop.f32.mrf.mxu0 }
0x5c45   :  { %v6105_v27 = vadd.f32 %v11150_v51, %v6102_v63 }
0x5c47   :  { %9621 = vtanh.f32 %v6105_v27 }
0x5c54   :  { %v9622_v59 = vpop.eup %9621 }
0x5c55   :  { %9173 = vmatmul.mubr.msk.f32.vlgmr.msra.gmra.mxu0 %vm177_vm2, %v9622_v59 }
0x5c56   :  { %9187 = vmatpush3.msra.mxu0 %v11018_v4  ;;  %9194 = vmatprep.mubr.msk.f32.mxu0 %vm9852_vm0, %v9851_v1  ;;  %v5617_v4 = vsub.f32 %v11287_v56, %v11294_v6  ;;  %v11396_v56 = vld [vmem:[%s11743_s13] sm:$0x1] }
0x5c57   :  { %9188 = vmatprep.subr.mxu0 %v9851_v1 }
0x5c58   :  { %9189 = vmatpush3.msra.mxu0 %v11024_v32  ;;  %v5618_v32 = vmul.f32 1.442695, %v5617_v4 }
0x5c59   :  { %9190 = vmatprep.subr.mxu0 %v9851_v1 }
0x5c5a   :  { %9191 = vmatpush3.msra.mxu0 %v11028_v55  ;;  %9623 = vpow2.f32 %v5618_v32 }
0x5c5b   :  { %9192 = vmatprep.subr.mxu0 %v9851_v1 }
0x5c5c   :  { %9193 = vmatpush3.msra.mxu0 %v11032_v19 }
0x5c5d   :  { %9195 = vmatmul.mubr.msk.f32.vlgmr.msra.gmra.mxu0 %vm177_vm2, %v11317_v9  ;;  %9207 = vmatprep.subr.mxu0 %v9851_v1 }
0x5c5e   :  { %9208 = vmatpush3.msra.mxu0 %v11038_v17  ;;  %9215 = vmatprep.mubr.msk.f32.mxu0 %vm9852_vm0, %v9851_v1 }
0x5c5f   :  { %9209 = vmatprep.subr.mxu0 %v9851_v1 }
0x5c60   :  { %9210 = vmatpush3.msra.mxu0 %v11044_v33 }
0x5c61   :  { %9211 = vmatprep.subr.mxu0 %v9851_v1 }
0x5c62   :  { %9212 = vmatpush3.msra.mxu0 %v11048_v40 }
0x5c63   :  { %9213 = vmatprep.subr.mxu0 %v9851_v1 }
0x5c64   :  { %9214 = vmatpush3.msra.mxu0 %v11174_v57 }
0x5c65   :  { %9229 = vmatprep.subr.mxu0 %v9851_v1 }
0x5c67   :  { %v9624_v40 = vpop.eup %9623 }
0x5c68   :  { %v5620_v38 = vsel %vm2681_vm12, %v9624_v40, 0.0 }
0x5d15   :  { %v6176_v55 = vpop.f32.mrf.mxu0 }
0x5d16   :  { %v11388_v19 = vadd.f32 %v11183_v5, %v6176_v55 }
0x5d17   :  { %v9174_v17 = vpop.f32.mrf.mxu0 }
0x5d18   :  { %v6180_v33 = vsel %vm2681_vm12, %v11388_v19, -inf }
0x5d19   :  { %6181 = vmax.xlane.f32.xlu0 %v6180_v33 }
0x5d1d   :  { %v6356_v48 = vpop.f32.mrf.mxu0  ;;  %5621 = vadd.xlane.f32.xlu0 %v5620_v38 }
0x5d1e   :  { %v6357_v6 = vadd.f32 %v11396_v56, %v6356_v48 }
0x5d1f   :  { %v9196_v23 = vpop.f32.mrf.mxu0 }
0x5d33   :  { %6368 = vrot.lane.b32.xlu0 %v6357_v6, %s9853_s14 }
0x5da2   :  { %v11400_v42 = vpop.xlane.xlu0 %6181 }
0x5da3   :  { %vm6183_vm14 = vcmp.eq.f32.partialorder %v11388_v19, %v11400_v42 }
0x5da4   :  { %v6184_v25 = vsel %vm6183_vm14, %v10713_v43, 128 }
0x5da5   :  { %v6185_v41 = vsel %vm2681_vm12, %v6184_v25, 2147483647 }
0x5da6   :  { %v5622_v3 = vpop.xlane.xlu0 %5621  ;;  %v6187_v50 = vshra.s32 %v6185_v41, 16  ;;  %v6186_v61 = vand.u32 65535, %v6185_v41 }
0x5da7   :  { %9625 = vrcp.f32 %v5622_v3 }
0x5da8   :  { %v6189_v36 = vcvt.s32.f32 %v6187_v50  ;;  %v6188_v35 = vcvt.s32.f32 %v6186_v61 }
0x5daa   :  { %6190 = vmin.xlane.f32.xlu1 %v6189_v36  ;;  %v6369_v22 = vpop.permute.xlu0 %6368 }
0x5db4   :  { %v9626_v39 = vpop.eup %9625 }
0x5db5   :  { %9392 = vpush %v9626_v39 }
0x5de6   :  { %s9393_s13 = spop %9392 }
0x5de7   :  { %5630 = sst [smem:[#allocation17 + $0x5]] %s9393_s13 }
0x5e33   :  { %v6191_v62 = vpop.xlane.xlu1 %6190 }
0x5e34   :  { %vm6192_vm15 = vcmp.eq.f32.partialorder %v6189_v36, %v6191_v62  ;;  %v6197_v12 = vcvt.f32.s32 %v6191_v62 }
0x5e35   :  { %v6193_v0 = vsel %vm6192_vm15, %v6188_v35, inf  ;;  %v11514_v35 = vld [vmem:[#allocation13 + $0x18] sm:$0xff] }
0x5e36   :  { %6194 = vmin.xlane.f32.xlu1 %v6193_v0  ;;  %v6198_v47 = vshll.u32 %v6197_v12, 16  ;;  %v11520_v0 = vld [vmem:[#allocation13 + $0x10] sm:$0xff]  ;;  %v11524_v12 = vld [vmem:[#allocation13 + $0x8] sm:$0xff] }
0x5ebf   :  { %v6195_v14 = vpop.xlane.xlu1 %6194 }
0x5ec0   :  { %v6196_v18 = vcvt.f32.s32 %v6195_v14  ;;  %v6200_v14 = vsub.f32 %v11388_v19, %v11400_v42 }
0x5ec2   :  { %v6199_v7 = vadd.s32 %v6198_v47, %v6196_v18  ;;  %v6201_v47 = vmul.f32 1.442695, %v6200_v14 }
0x5ec4   :  { %9394 = vpush %v6199_v7 }
0x5ef5   :  { %s9395_s27 = spop %9394 }
0x5ef6   :  { %6210 = sst [smem:[#allocation16 + $0x6]] %s9395_s27  ;;  %s6215_s15 = scalar_lea.vmem %s11761_s24, %s9395_s27 }
0x5ef7   :  { %v6216_v9 = vld [vmem:[%s6215_s15] sm:$0x1] }
0x5ef8   :  { %9184 = vmatmul.mubr.msk.f32.vlgmr.msra.gmra.mxu1 %vm177_vm2, %v6216_v9 }
0x5ef9   :  { %9198 = vmatpush3.xpose.msk.msra.mxu1 %vm177_vm2, %v10593_v2  ;;  %9199 = vmatprep.mubr.msk.f32.mxu1 %vm9852_vm0, %v9851_v1 }
0x5efa   :  { %9202 = vmatprep.subr.mxu1 %v9851_v1 }
0x5fb8   :  { %v6286_v45 = vpop.f32.mrf.mxu1 }
0x5fb9   :  { %v6287_v11 = vadd.f32 %v11418_v10, %v6286_v45 }
0x5fba   :  { %v9185_v31 = vpop.f32.mrf.mxu1 }
0x5fbb   :  { %v6360_v58 = vadd.f32 %v6357_v6, %v6287_v11 }
0x5fbd   :  { %v8116_v37 = vmul.f32 -1.442695, %v6360_v58 }
0x5fbf   :  { %9627 = vpow2.f32 %v8116_v37 }
0x5fcc   :  { %v9628_v21 = vpop.eup %9627 }
0x5fcd   :  { %v6364_v13 = vadd.f32 1.0, %v9628_v21 }
0x5fcf   :  { %9629 = vrcp.f32 %v6364_v13 }
0x5fdc   :  { %v9630_v44 = vpop.eup %9629 }
0x5fdd   :  { %v6371_v30 = vmul.f32 %v9630_v44, %v6369_v22  ;;  %v6378_v28 = vsub.f32 1.0, %v9630_v44  ;;  %v6384_v63 = vmul.f32 %v9630_v44, %v11313_v53 }
0x5fdf   :  { %6373 = vrot.lane.b32.xlu1 %v6371_v30, %s9853_s14 }
0x6051   :  { %v6374_v60 = vpop.permute.xlu1 %6373 }
0x6052   :  { %v6376_v24 = vadd.f32 %v6374_v60, %v6287_v11 }
0x6054   :  { %9631 = vtanh.f32 %v6376_v24 }
0x6061   :  { %v9632_v15 = vpop.eup %9631 }
0x6062   :  { %6380 = vrot.lane.b32.xlu1 %v9632_v15, %s9854_s3 }
0x60d4   :  { %v6381_v16 = vpop.permute.xlu1 %6380 }
0x60d5   :  { %v6383_v52 = vmul.f32 %v6381_v16, %v6378_v28 }
0x60d7   :  { %v11424_v27 = vadd.f32 %v6384_v63, %v6383_v52 }
0x60d9   :  { %6387 = vrot.lane.b32.xlu0 %v11424_v27, %s9854_s3 }
0x614b   :  { %v11428_v59 = vpop.permute.xlu0 %6387 }
0x614c   :  { %9200 = vmatmul.mubr.msk.f32.vlgmr.msra.gmra.mxu1 %vm177_vm2, %v11428_v59 }
0x614d   :  { %9203 = vmatpush3.msra.mxu1 %v10593_v2  ;;  %9204 = vmatprep.mubr.msk.f32.mxu1 %vm9852_vm0, %v9851_v1 }
0x614e   :  { %9218 = vmatprep.subr.mxu1 %v9851_v1 }
0x620c   :  { %v6457_v4 = vpop.f32.mrf.mxu1 }
0x620d   :  { %v6461_v53 = vsel %vm2377_vm10, %v6457_v4, -inf }
0x620e   :  { %6462 = vmax.xlane.f32.xlu1 %v6461_v53  ;;  %v9201_v32 = vpop.f32.mrf.mxu1 }
0x6297   :  { %v6463_v55 = vpop.xlane.xlu1 %6462 }
0x6298   :  { %v6464_v17 = vsub.f32 %v6457_v4, %v6463_v55 }
0x629a   :  { %v6465_v33 = vmul.f32 1.442695, %v6464_v17 }
0x629c   :  { %9633 = vpow2.f32 %v6465_v33 }
0x62a9   :  { %v9634_v40 = vpop.eup %9633 }
0x62aa   :  { %v6467_v38 = vsel %vm2377_vm10, %v9634_v40, 0.0 }
0x62ab   :  { %6468 = vadd.xlane.f32.xlu0 %v6467_v38 }
0x6334   :  { %v6469_v48 = vpop.xlane.xlu0 %6468 }
0x6335   :  { %9635 = vrcp.f32 %v6469_v48 }
0x6342   :  { %v9636_v23 = vpop.eup %9635 }
0x6343   :  { %v6471_v6 = vmul.f32 %v9636_v23, %v9634_v40 }
0x6345   :  { %9205 = vmatmul.mubr.msk.f32.vlgmr.msra.gmra.mxu1 %vm2389_vm11, %v6471_v6 }
0x6346   :  { %9219 = vmatpush3.msra.mxu1 %v11098_v29  ;;  %9226 = vmatprep.mubr.msk.f32.mxu1 %vm9852_vm0, %v9851_v1  ;;  %v11454_v29 = vld [vmem:[%s11740_s10 + $0x18] sm:$0xff] }
0x6347   :  { %9220 = vmatprep.subr.mxu1 %v9851_v1 }
0x6348   :  { %9221 = vmatpush3.msra.mxu1 %v11104_v8  ;;  %v11463_v8 = vld [vmem:[%s11740_s10 + $0x10] sm:$0xff] }
0x6349   :  { %9222 = vmatprep.subr.mxu1 %v9851_v1 }
0x634a   :  { %9223 = vmatpush3.msra.mxu1 %v11108_v49  ;;  %v11470_v49 = vld [vmem:[%s11740_s10 + $0x8] sm:$0xff] }
0x634b   :  { %9224 = vmatprep.subr.mxu1 %v9851_v1 }
0x634c   :  { %9225 = vmatpush3.msra.mxu1 %v11112_v26  ;;  %v11477_v26 = vld [vmem:[%s11740_s10] sm:$0xff] }
0x634d   :  { %9227 = vmatmul.mubr.msk.f32.vlgmr.msra.gmra.mxu1 %vm177_vm2, %v11428_v59  ;;  %9240 = vmatprep.subr.mxu1 %v9851_v1 }
0x634e   :  { %9241 = vmatpush3.msra.mxu1 %v11454_v29  ;;  %9248 = vmatprep.mubr.msk.f32.mxu1 %vm9852_vm0, %v9851_v1 }
0x634f   :  { %9242 = vmatprep.subr.mxu1 %v9851_v1 }
0x6350   :  { %9243 = vmatpush3.msra.mxu1 %v11463_v8 }
0x6351   :  { %9244 = vmatprep.subr.mxu1 %v9851_v1 }
0x6352   :  { %9245 = vmatpush3.msra.mxu1 %v11470_v49 }
0x6353   :  { %9246 = vmatprep.subr.mxu1 %v9851_v1 }
0x6354   :  { %9247 = vmatpush3.msra.mxu1 %v11477_v26 }
0x6355   :  { %9262 = vmatprep.subr.mxu1 %v9851_v1 }
0x6405   :  { %v6541_v25 = vpop.f32.mrf.mxu1 }
0x6406   :  { %9216 = vmatmul.mubr.msk.f32.vlgmr.msra.gmra.mxu0 %vm177_vm2, %v6541_v25 }
0x6407   :  { %v9206_v41 = vpop.f32.mrf.mxu1  ;;  %9230 = vmatpush3.msra.mxu0 %v11129_v54  ;;  %9237 = vmatprep.mubr.msk.f32.mxu0 %vm9852_vm0, %v9851_v1 }
0x6408   :  { %9231 = vmatprep.subr.mxu0 %v9851_v1 }
0x6409   :  { %9232 = vmatpush3.msra.mxu0 %v11135_v20  ;;  %v11494_v20 = vld [vmem:[#allocation10 + $0x18] sm:$0xff] }
0x640a   :  { %9233 = vmatprep.subr.mxu0 %v9851_v1 }
0x640b   :  { %9234 = vmatpush3.msra.mxu0 %v11139_v34  ;;  %v11500_v34 = vld [vmem:[#allocation10 + $0x10] sm:$0xff] }
0x640c   :  { %9235 = vmatprep.subr.mxu0 %v9851_v1 }
0x640d   :  { %v6684_v3 = vpop.f32.mrf.mxu1  ;;  %9236 = vmatpush3.msra.mxu0 %v11143_v46  ;;  %v11504_v46 = vld [vmem:[#allocation10 + $0x8] sm:$0xff] }
0x640e   :  { %9251 = vmatprep.subr.mxu0 %v9851_v1 }
0x640f   :  { %v9228_v50 = vpop.f32.mrf.mxu1 }
0x64c6   :  { %v6614_v54 = vpop.f32.mrf.mxu0 }
0x64c7   :  { %v6685_v36 = vadd.f32 %v6684_v3, %v6614_v54 }
0x64c8   :  { %v9217_v39 = vpop.f32.mrf.mxu0 }
0x64c9   :  { %v6688_v61 = vadd.f32 %v11150_v51, %v6685_v36  ;;  %v11508_v51 = vld [vmem:[#allocation10] sm:$0xff] }
0x64cb   :  { %9637 = vtanh.f32 %v6688_v61 }
0x64cc   :  { %9639 = vpow2.f32 %v6201_v47 }
0x64d8   :  { %v9638_v62 = vpop.eup %9637 }
0x64d9   :  { %9238 = vmatmul.mubr.msk.f32.vlgmr.msra.gmra.mxu0 %vm177_vm2, %v9638_v62  ;;  %v9640_v11 = vpop.eup %9639 }
0x64da   :  { %9252 = vmatpush3.msra.mxu0 %v11494_v20  ;;  %9259 = vmatprep.mubr.msk.f32.mxu0 %vm9852_vm0, %v9851_v1  ;;  %v6203_v31 = vsel %vm2681_vm12, %v9640_v11, 0.0 }
0x64db   :  { %9253 = vmatprep.subr.mxu0 %v9851_v1 }
0x64dc   :  { %9254 = vmatpush3.msra.mxu0 %v11500_v34 }
0x64dd   :  { %9255 = vmatprep.subr.mxu0 %v9851_v1 }
0x64de   :  { %9256 = vmatpush3.msra.mxu0 %v11504_v46 }
0x64df   :  { %9257 = vmatprep.subr.mxu0 %v9851_v1 }
0x64e0   :  { %9258 = vmatpush3.msra.mxu0 %v11508_v51 }
0x64e1   :  { %9260 = vmatmul.mubr.msk.f32.vlgmr.msra.gmra.mxu0 %vm177_vm2, %v11428_v59  ;;  %9272 = vmatprep.subr.mxu0 %v9851_v1 }
0x64e2   :  { %9273 = vmatpush3.msra.mxu0 %v11514_v35  ;;  %9280 = vmatprep.mubr.msk.f32.mxu0 %vm9852_vm0, %v9851_v1 }
0x64e3   :  { %9274 = vmatprep.subr.mxu0 %v9851_v1 }
0x64e4   :  { %9275 = vmatpush3.msra.mxu0 %v11520_v0 }
0x64e5   :  { %9276 = vmatprep.subr.mxu0 %v9851_v1 }
0x64e6   :  { %9277 = vmatpush3.msra.mxu0 %v11524_v12 }
0x64e7   :  { %9278 = vmatprep.subr.mxu0 %v9851_v1 }
0x64e8   :  { %9279 = vmatpush3.msra.mxu0 %v11174_v57 }
0x64e9   :  { %9294 = vmatprep.subr.mxu0 %v9851_v1 }
0x6599   :  { %v6759_v18 = vpop.f32.mrf.mxu0 }
0x659a   :  { %v11533_v7 = vadd.f32 %v11183_v5, %v6759_v18 }
0x659b   :  { %v9239_v9 = vpop.f32.mrf.mxu0 }
0x659c   :  { %v6763_v45 = vsel %vm2681_vm12, %v11533_v7, -inf }
0x659d   :  { %6764 = vmax.xlane.f32.xlu0 %v6763_v45 }
0x65a1   :  { %v6939_v57 = vpop.f32.mrf.mxu0  ;;  %6204 = vadd.xlane.f32.xlu0 %v6203_v31 }
0x65a2   :  { %v6940_v37 = vadd.f32 %v11396_v56, %v6939_v57 }
0x65a3   :  { %v9261_v58 = vpop.f32.mrf.mxu0 }
0x65b7   :  { %6951 = vrot.lane.b32.xlu0 %v6940_v37, %s9853_s14 }
0x6626   :  { %v11540_v19 = vpop.xlane.xlu0 %6764 }
0x6627   :  { %vm6766_vm1 = vcmp.eq.f32.partialorder %v11533_v7, %v11540_v19 }
0x6628   :  { %v6767_v5 = vsel %vm6766_vm1, %v10713_v43, 128 }
0x6629   :  { %v6768_v42 = vsel %vm2681_vm12, %v6767_v5, 2147483647  ;;  %v11574_v5 = vld [vmem:[#allocation11 + $0x18] sm:$0xff] }
0x662a   :  { %v6205_v21 = vpop.xlane.xlu0 %6204  ;;  %v6770_v13 = vshra.s32 %v6768_v42, 16  ;;  %v6769_v30 = vand.u32 65535, %v6768_v42  ;;  %v11580_v42 = vld [vmem:[#allocation11 + $0x10] sm:$0xff] }
0x662b   :  { %9641 = vrcp.f32 %v6205_v21  ;;  %v11584_v21 = vld [vmem:[#allocation11 + $0x8] sm:$0xff] }
0x662c   :  { %v6772_v44 = vcvt.s32.f32 %v6770_v13  ;;  %v6771_v24 = vcvt.s32.f32 %v6769_v30  ;;  %v11588_v13 = vld [vmem:[#allocation11] sm:$0xff] }
0x662d   :  { %v11619_v30 = vld [vmem:[#allocation14] sm:$0xff] }
0x662e   :  { %6773 = vmin.xlane.f32.xlu1 %v6772_v44  ;;  %v6952_v23 = vpop.permute.xlu0 %6951 }
0x6638   :  { %v9642_v22 = vpop.eup %9641 }
0x6639   :  { %9396 = vpush %v9642_v22  ;;  %v11605_v22 = vld [vmem:[#allocation14 + $0x18] sm:$0xff] }
0x666a   :  { %s9397_s10 = spop %9396 }
0x666b   :  { %6213 = sst [smem:[#allocation17 + $0x6]] %s9397_s10 }
0x66b7   :  { %v6774_v60 = vpop.xlane.xlu1 %6773 }
0x66b8   :  { %vm6775_vm3 = vcmp.eq.f32.partialorder %v6772_v44, %v6774_v60  ;;  %v6780_v28 = vcvt.f32.s32 %v6774_v60 }
0x66b9   :  { %v6776_v15 = vsel %vm6775_vm3, %v6771_v24, inf }
0x66ba   :  { %6777 = vmin.xlane.f32.xlu1 %v6776_v15  ;;  %v6781_v63 = vshll.u32 %v6780_v28, 16 }
0x6743   :  { %v6778_v16 = vpop.xlane.xlu1 %6777 }
0x6744   :  { %v6779_v52 = vcvt.f32.s32 %v6778_v16  ;;  %v11626_v16 = vld [vmem:[%s11746_s16] sm:$0x1] }
0x6746   :  { %v6782_v59 = vadd.s32 %v6781_v63, %v6779_v52 }
0x6748   :  { %9398 = vpush %v6782_v59 }
0x6779   :  { %s9399_s7 = spop %9398 }
0x677a   :  { %6793 = sst [smem:[#allocation16 + $0x7]] %s9399_s7  ;;  %s6798_s23 = scalar_lea.vmem %s11761_s24, %s9399_s7 }
0x677b   :  { %v6799_v4 = vld [vmem:[%s6798_s23] sm:$0x1] }
0x677c   :  { %9249 = vmatmul.mubr.msk.f32.vlgmr.msra.gmra.mxu1 %vm177_vm2, %v6799_v4 }
0x677d   :  { %9263 = vmatpush3.xpose.msk.msra.mxu1 %vm177_vm2, %v10593_v2  ;;  %9264 = vmatprep.mubr.msk.f32.mxu1 %vm9852_vm0, %v9851_v1 }
0x677e   :  { %9267 = vmatprep.subr.mxu1 %v9851_v1 }
0x683c   :  { %v6869_v53 = vpop.f32.mrf.mxu1 }
0x683d   :  { %v6870_v32 = vadd.f32 %v11418_v10, %v6869_v53 }
0x683e   :  { %v9250_v55 = vpop.f32.mrf.mxu1 }
0x683f   :  { %v6943_v17 = vadd.f32 %v6940_v37, %v6870_v32 }
0x6841   :  { %v8125_v33 = vmul.f32 -1.442695, %v6943_v17 }
0x6843   :  { %9643 = vpow2.f32 %v8125_v33 }
0x6850   :  { %v9644_v40 = vpop.eup %9643 }
0x6851   :  { %v6947_v38 = vadd.f32 1.0, %v9644_v40 }
0x6853   :  { %9645 = vrcp.f32 %v6947_v38 }
0x6860   :  { %v9646_v48 = vpop.eup %9645 }
0x6861   :  { %v6954_v6 = vmul.f32 %v9646_v48, %v6952_v23  ;;  %v6961_v50 = vsub.f32 1.0, %v9646_v48  ;;  %v6967_v36 = vmul.f32 %v9646_v48, %v11424_v27 }
0x6863   :  { %6956 = vrot.lane.b32.xlu1 %v6954_v6, %s9853_s14 }
0x68d5   :  { %v6957_v25 = vpop.permute.xlu1 %6956 }
0x68d6   :  { %v6959_v41 = vadd.f32 %v6957_v25, %v6870_v32 }
0x68d8   :  { %9647 = vtanh.f32 %v6959_v41 }
0x68e5   :  { %v9648_v3 = vpop.eup %9647 }
0x68e6   :  { %6963 = vrot.lane.b32.xlu1 %v9648_v3, %s9854_s3 }
0x6958   :  { %v6964_v54 = vpop.permute.xlu1 %6963 }
0x6959   :  { %v6966_v39 = vmul.f32 %v6964_v54, %v6961_v50 }
0x695b   :  { %v11559_v61 = vadd.f32 %v6967_v36, %v6966_v39 }
0x695d   :  { %6970 = vrot.lane.b32.xlu0 %v11559_v61, %s9854_s3 }
0x69cf   :  { %v11563_v62 = vpop.permute.xlu0 %6970 }
0x69d0   :  { %9265 = vmatmul.mubr.msk.f32.vlgmr.msra.gmra.mxu1 %vm177_vm2, %v11563_v62 }
0x69d1   :  { %9268 = vmatpush3.msra.mxu1 %v10593_v2  ;;  %9269 = vmatprep.mubr.msk.f32.mxu1 %vm9852_vm0, %v9851_v1 }
0x69d2   :  { %9283 = vmatprep.subr.mxu1 %v9851_v1 }
0x6a90   :  { %v7040_v14 = vpop.f32.mrf.mxu1 }
0x6a91   :  { %v7044_v27 = vsel %vm2377_vm10, %v7040_v14, -inf }
0x6a92   :  { %7045 = vmax.xlane.f32.xlu1 %v7044_v27  ;;  %v9266_v47 = vpop.f32.mrf.mxu1 }
0x6b1b   :  { %v7046_v18 = vpop.xlane.xlu1 %7045 }
0x6b1c   :  { %v7047_v9 = vsub.f32 %v7040_v14, %v7046_v18 }
0x6b1e   :  { %v7048_v45 = vmul.f32 1.442695, %v7047_v9 }
0x6b20   :  { %9649 = vpow2.f32 %v7048_v45 }
0x6b2d   :  { %v9650_v11 = vpop.eup %9649 }
0x6b2e   :  { %v7050_v31 = vsel %vm2377_vm10, %v9650_v11, 0.0 }
0x6b2f   :  { %7051 = vadd.xlane.f32.xlu0 %v7050_v31 }
0x6bb8   :  { %v7052_v57 = vpop.xlane.xlu0 %7051 }
0x6bb9   :  { %9651 = vrcp.f32 %v7052_v57 }
0x6bc6   :  { %v9652_v58 = vpop.eup %9651 }
0x6bc7   :  { %v7054_v37 = vmul.f32 %v9652_v58, %v9650_v11 }
0x6bc9   :  { %9270 = vmatmul.mubr.msk.f32.vlgmr.msra.gmra.mxu1 %vm2389_vm11, %v7054_v37 }
0x6bca   :  { %9284 = vmatpush3.msra.mxu1 %v11574_v5  ;;  %9291 = vmatprep.mubr.msk.f32.mxu1 %vm9852_vm0, %v9851_v1 }
0x6bcb   :  { %9285 = vmatprep.subr.mxu1 %v9851_v1 }
0x6bcc   :  { %9286 = vmatpush3.msra.mxu1 %v11580_v42 }
0x6bcd   :  { %9287 = vmatprep.subr.mxu1 %v9851_v1 }
0x6bce   :  { %9288 = vmatpush3.msra.mxu1 %v11584_v21 }
0x6bcf   :  { %9289 = vmatprep.subr.mxu1 %v9851_v1 }
0x6bd0   :  { %9290 = vmatpush3.msra.mxu1 %v11588_v13 }
0x6bd1   :  { %9292 = vmatmul.mubr.msk.f32.vlgmr.msra.gmra.mxu1 %vm177_vm2, %v11563_v62  ;;  %9305 = vmatprep.subr.mxu1 %v9851_v1 }
0x6bd2   :  { %9306 = vmatpush3.msra.mxu1 %v11454_v29  ;;  %9313 = vmatprep.mubr.msk.f32.mxu1 %vm9852_vm0, %v9851_v1 }
0x6bd3   :  { %9307 = vmatprep.subr.mxu1 %v9851_v1 }
0x6bd4   :  { %9308 = vmatpush3.msra.mxu1 %v11463_v8  ;;  %v11611_v8 = vld [vmem:[#allocation14 + $0x10] sm:$0xff] }
0x6bd5   :  { %9309 = vmatprep.subr.mxu1 %v9851_v1 }
0x6bd6   :  { %9310 = vmatpush3.msra.mxu1 %v11470_v49  ;;  %v11615_v49 = vld [vmem:[#allocation14 + $0x8] sm:$0xff] }
0x6bd7   :  { %9311 = vmatprep.subr.mxu1 %v9851_v1 }
0x6bd8   :  { %9312 = vmatpush3.msra.mxu1 %v11477_v26 }
0x6bd9   :  { %9327 = vmatprep.subr.mxu1 %v9851_v1 }
0x6c89   :  { %v7124_v44 = vpop.f32.mrf.mxu1 }
0x6c8a   :  { %9281 = vmatmul.mubr.msk.f32.vlgmr.msra.gmra.mxu0 %vm177_vm2, %v7124_v44 }
0x6c8b   :  { %v9271_v29 = vpop.f32.mrf.mxu1  ;;  %9295 = vmatpush3.msra.mxu0 %v11605_v22  ;;  %9302 = vmatprep.mubr.msk.f32.mxu0 %vm9852_vm0, %v9851_v1 }
0x6c8c   :  { %9296 = vmatprep.subr.mxu0 %v9851_v1 }
0x6c8d   :  { %9297 = vmatpush3.msra.mxu0 %v11611_v8 }
0x6c8e   :  { %9298 = vmatprep.subr.mxu0 %v9851_v1 }
0x6c8f   :  { %9299 = vmatpush3.msra.mxu0 %v11615_v49 }
0x6c90   :  { %9300 = vmatprep.subr.mxu0 %v9851_v1 }
0x6c91   :  { %v7267_v26 = vpop.f32.mrf.mxu1  ;;  %9301 = vmatpush3.msra.mxu0 %v11619_v30 }
0x6c92   :  { %9316 = vmatprep.subr.mxu0 %v9851_v1 }
0x6c93   :  { %v9293_v60 = vpop.f32.mrf.mxu1 }
0x6d4a   :  { %v7197_v24 = vpop.f32.mrf.mxu0 }
0x6d4b   :  { %v7268_v15 = vadd.f32 %v7267_v26, %v7197_v24 }
0x6d4c   :  { %v9282_v28 = vpop.f32.mrf.mxu0 }
0x6d4d   :  { %v7271_v63 = vadd.f32 %v11626_v16, %v7268_v15 }
0x6d4f   :  { %9653 = vtanh.f32 %v7271_v63 }
0x6d5c   :  { %v9654_v52 = vpop.eup %9653 }
0x6d5d   :  { %9303 = vmatmul.mubr.msk.f32.vlgmr.msra.gmra.mxu0 %vm177_vm2, %v9654_v52 }
0x6d5e   :  { %9317 = vmatpush3.msra.mxu0 %v11494_v20  ;;  %9324 = vmatprep.mubr.msk.f32.mxu0 %vm9852_vm0, %v9851_v1  ;;  %v9726_v20 = vld [vmem:[#allocation13] sm:$0xff] }
0x6d5f   :  { %9318 = vmatprep.subr.mxu0 %v9851_v1 }
0x6d60   :  { %9319 = vmatpush3.msra.mxu0 %v11500_v34  ;;  %v6783_v34 = vsub.f32 %v11533_v7, %v11540_v19 }
0x6d61   :  { %9320 = vmatprep.subr.mxu0 %v9851_v1 }
0x6d62   :  { %9321 = vmatpush3.msra.mxu0 %v11504_v46  ;;  %v6784_v46 = vmul.f32 1.442695, %v6783_v34 }
0x6d63   :  { %9322 = vmatprep.subr.mxu0 %v9851_v1 }
0x6d64   :  { %9323 = vmatpush3.msra.mxu0 %v11508_v51  ;;  %9655 = vpow2.f32 %v6784_v46 }
0x6d65   :  { %9325 = vmatmul.mubr.msk.f32.vlgmr.msra.gmra.mxu0 %vm177_vm2, %v11563_v62  ;;  %9337 = vmatprep.subr.mxu0 %v9851_v1 }
0x6d66   :  { %9338 = vmatpush3.msra.mxu0 %v11514_v35  ;;  %9345 = vmatprep.mubr.msk.f32.mxu0 %vm9852_vm0, %v9851_v1  ;;  %v11656_v35 = vld [vmem:[%s11748_s18] sm:$0x1] }
0x6d67   :  { %9339 = vmatprep.subr.mxu0 %v9851_v1 }
0x6d68   :  { %9340 = vmatpush3.msra.mxu0 %v11520_v0 }
0x6d69   :  { %9341 = vmatprep.subr.mxu0 %v9851_v1 }
0x6d6a   :  { %9342 = vmatpush3.msra.mxu0 %v11524_v12 }
0x6d6b   :  { %9343 = vmatprep.subr.mxu0 %v9851_v1 }
0x6d6c   :  { %9344 = vmatpush3.msra.mxu0 %v9726_v20 }
0x6d6d   :  { %9359 = vmatprep.subr.mxu0 %v9851_v1 }
0x6d71   :  { %v9656_v4 = vpop.eup %9655 }
0x6d72   :  { %v6786_v53 = vsel %vm2681_vm12, %v9656_v4, 0.0 }
0x6e1d   :  { %v7342_v51 = vpop.f32.mrf.mxu0 }
0x6e1e   :  { %v11659_v0 = vadd.f32 %v11656_v35, %v7342_v51 }
0x6e1f   :  { %v9304_v12 = vpop.f32.mrf.mxu0 }
0x6e20   :  { %v7346_v59 = vsel %vm2681_vm12, %v11659_v0, -inf }
0x6e21   :  { %7347 = vmax.xlane.f32.xlu0 %v7346_v59 }
0x6e25   :  { %v7522_v7 = vpop.f32.mrf.mxu0  ;;  %6787 = vadd.xlane.f32.xlu0 %v6786_v53 }
0x6e26   :  { %v7523_v32 = vadd.f32 %v11396_v56, %v7522_v7 }
0x6e27   :  { %v9326_v19 = vpop.f32.mrf.mxu0 }
0x6e3b   :  { %7534 = vrot.lane.b32.xlu0 %v7523_v32, %s9853_s14 }
0x6eaa   :  { %v11666_v55 = vpop.xlane.xlu0 %7347 }
0x6eab   :  { %vm7349_vm4 = vcmp.eq.f32.partialorder %v11659_v0, %v11666_v55 }
0x6eac   :  { %v7350_v17 = vsel %vm7349_vm4, %v10713_v43, 128 }
0x6ead   :  { %v7351_v33 = vsel %vm2681_vm12, %v7350_v17, 2147483647 }
0x6eae   :  { %v6788_v40 = vpop.xlane.xlu0 %6787  ;;  %v7353_v38 = vshra.s32 %v7351_v33, 16  ;;  %v7352_v56 = vand.u32 65535, %v7351_v33 }
0x6eaf   :  { %9657 = vrcp.f32 %v6788_v40 }
0x6eb0   :  { %v7355_v48 = vcvt.s32.f32 %v7353_v38  ;;  %v7354_v25 = vcvt.s32.f32 %v7352_v56 }
0x6eb2   :  { %7356 = vmin.xlane.f32.xlu1 %v7355_v48  ;;  %v7535_v57 = vpop.permute.xlu0 %7534 }
0x6ebc   :  { %v9658_v23 = vpop.eup %9657 }
0x6ebd   :  { %9400 = vpush %v9658_v23 }
0x6eee   :  { %s9401_s18 = spop %9400 }
0x6eef   :  { %6796 = sst [smem:[#allocation17 + $0x7]] %s9401_s18 }
0x6f3b   :  { %v7357_v6 = vpop.xlane.xlu1 %7356 }
0x6f3c   :  { %vm7358_vm5 = vcmp.eq.f32.partialorder %v7355_v48, %v7357_v6  ;;  %v7363_v3 = vcvt.f32.s32 %v7357_v6 }
0x6f3d   :  { %v7359_v41 = vsel %vm7358_vm5, %v7354_v25, inf }
0x6f3e   :  { %7360 = vmin.xlane.f32.xlu1 %v7359_v41  ;;  %v7364_v54 = vshll.u32 %v7363_v3, 16 }
0x6fc7   :  { %v7361_v50 = vpop.xlane.xlu1 %7360 }
0x6fc8   :  { %v7362_v36 = vcvt.f32.s32 %v7361_v50 }
0x6fca   :  { %v7365_v39 = vadd.s32 %v7364_v54, %v7362_v36 }
0x6fcc   :  { %9402 = vpush %v7365_v39 }
0x6ffd   :  { %s9403_s26 = spop %9402 }
0x6ffe   :  { %7376 = sst [smem:[#allocation16 + $0x8]] %s9403_s26  ;;  %s7381_s17 = scalar_lea.vmem %s11761_s24, %s9403_s26 }
0x6fff   :  { %v7382_v62 = vld [vmem:[%s7381_s17] sm:$0x1] }
0x7000   :  { %9314 = vmatmul.mubr.msk.f32.vlgmr.msra.gmra.mxu1 %vm177_vm2, %v7382_v62 }
0x7001   :  { %9328 = vmatpush3.xpose.msk.msra.mxu1 %vm177_vm2, %v10593_v2  ;;  %9329 = vmatprep.mubr.msk.f32.mxu1 %vm9852_vm0, %v9851_v1 }
0x7002   :  { %9332 = vmatprep.subr.mxu1 %v9851_v1 }
0x70c0   :  { %v7452_v14 = vpop.f32.mrf.mxu1 }
0x70c1   :  { %v7453_v27 = vadd.f32 %v11418_v10, %v7452_v14 }
0x70c2   :  { %v9315_v47 = vpop.f32.mrf.mxu1 }
0x70c3   :  { %v7526_v18 = vadd.f32 %v7523_v32, %v7453_v27 }
0x70c5   :  { %v8134_v9 = vmul.f32 -1.442695, %v7526_v18 }
0x70c7   :  { %9659 = vpow2.f32 %v8134_v9 }
0x70d4   :  { %v9660_v45 = vpop.eup %9659 }
0x70d5   :  { %v7530_v11 = vadd.f32 1.0, %v9660_v45 }
0x70d7   :  { %9661 = vrcp.f32 %v7530_v11 }
0x70e4   :  { %v9662_v31 = vpop.eup %9661 }
0x70e5   :  { %v7537_v58 = vmul.f32 %v9662_v31, %v7535_v57  ;;  %v7544_v26 = vsub.f32 1.0, %v9662_v31  ;;  %v7550_v60 = vmul.f32 %v9662_v31, %v11559_v61 }
0x70e7   :  { %7539 = vrot.lane.b32.xlu1 %v7537_v58, %s9853_s14 }
0x7159   :  { %v7540_v37 = vpop.permute.xlu1 %7539 }
0x715a   :  { %v7542_v44 = vadd.f32 %v7540_v37, %v7453_v27 }
0x715c   :  { %9663 = vtanh.f32 %v7542_v44 }
0x7169   :  { %v9664_v29 = vpop.eup %9663 }
0x716a   :  { %7546 = vrot.lane.b32.xlu1 %v9664_v29, %s9854_s3 }
0x71dc   :  { %v7547_v10 = vpop.permute.xlu1 %7546 }
0x71dd   :  { %v7549_v24 = vmul.f32 %v7547_v10, %v7544_v26 }
0x71df   :  { %v7551_v15 = vadd.f32 %v7550_v60, %v7549_v24 }
0x71e1   :  { %7553 = vrot.lane.b32.xlu0 %v7551_v15, %s9854_s3 }
0x7253   :  { %v7554_v28 = vpop.permute.xlu0 %7553 }
0x7254   :  { %9330 = vmatmul.mubr.msk.f32.vlgmr.msra.gmra.mxu1 %vm177_vm2, %v7554_v28 }
0x7255   :  { %9333 = vmatpush3.msra.mxu1 %v10593_v2  ;;  %9334 = vmatprep.mubr.msk.f32.mxu1 %vm9852_vm0, %v9851_v1 }
0x7256   :  { %9348 = vmatprep.subr.mxu1 %v9851_v1 }
0x7314   :  { %v7623_v63 = vpop.f32.mrf.mxu1 }
0x7315   :  { %v7627_v52 = vsel %vm2377_vm10, %v7623_v63, -inf }
0x7316   :  { %7628 = vmax.xlane.f32.xlu1 %v7627_v52  ;;  %v9331_v20 = vpop.f32.mrf.mxu1 }
0x739f   :  { %v7629_v61 = vpop.xlane.xlu1 %7628 }
0x73a0   :  { %v7630_v34 = vsub.f32 %v7623_v63, %v7629_v61 }
0x73a2   :  { %v7631_v46 = vmul.f32 1.442695, %v7630_v34 }
0x73a4   :  { %9665 = vpow2.f32 %v7631_v46 }
0x73b1   :  { %v9666_v51 = vpop.eup %9665 }
0x73b2   :  { %v7633_v12 = vsel %vm2377_vm10, %v9666_v51, 0.0 }
0x73b3   :  { %7634 = vadd.xlane.f32.xlu0 %v7633_v12 }
0x743c   :  { %v7635_v59 = vpop.xlane.xlu0 %7634 }
0x743d   :  { %9667 = vrcp.f32 %v7635_v59 }
0x744a   :  { %v9668_v2 = vpop.eup %9667 }
0x744b   :  { %v7637_v4 = vmul.f32 %v9668_v2, %v9666_v51 }
0x744d   :  { %9335 = vmatmul.mubr.msk.f32.vlgmr.msra.gmra.mxu1 %vm2389_vm11, %v7637_v4 }
0x744e   :  { %9349 = vmatpush3.msra.mxu1 %v11574_v5  ;;  %9356 = vmatprep.mubr.msk.f32.mxu1 %vm9852_vm0, %v9851_v1 }
0x744f   :  { %9350 = vmatprep.subr.mxu1 %v9851_v1 }
0x7450   :  { %9351 = vmatpush3.msra.mxu1 %v11580_v42 }
0x7451   :  { %9352 = vmatprep.subr.mxu1 %v9851_v1 }
0x7452   :  { %9353 = vmatpush3.msra.mxu1 %v11584_v21 }
0x7453   :  { %9354 = vmatprep.subr.mxu1 %v9851_v1 }
0x7454   :  { %9355 = vmatpush3.msra.mxu1 %v11588_v13 }
0x7455   :  { %9357 = vmatmul.mubr.msk.f32.vlgmr.msra.gmra.mxu1 %vm177_vm2, %v7554_v28 }
0x750d   :  { %v7707_v53 = vpop.f32.mrf.mxu1 }
0x750e   :  { %9346 = vmatmul.mubr.msk.f32.vlgmr.msra.gmra.mxu0 %vm177_vm2, %v7707_v53 }
0x750f   :  { %v9336_v5 = vpop.f32.mrf.mxu1  ;;  %9360 = vmatpush3.msra.mxu0 %v11605_v22  ;;  %9367 = vmatprep.mubr.msk.f32.mxu0 %vm9852_vm0, %v9851_v1 }
0x7510   :  { %9361 = vmatprep.subr.mxu0 %v9851_v1 }
0x7511   :  { %9362 = vmatpush3.msra.mxu0 %v11611_v8  ;;  %v7366_v8 = vsub.f32 %v11659_v0, %v11666_v55 }
0x7512   :  { %9363 = vmatprep.subr.mxu0 %v9851_v1 }
0x7513   :  { %9364 = vmatpush3.msra.mxu0 %v11615_v49  ;;  %v7367_v17 = vmul.f32 1.442695, %v7366_v8 }
0x7514   :  { %9365 = vmatprep.subr.mxu0 %v9851_v1 }
0x7515   :  { %v7850_v42 = vpop.f32.mrf.mxu1  ;;  %9366 = vmatpush3.msra.mxu0 %v11619_v30 }
0x7517   :  { %v9358_v21 = vpop.f32.mrf.mxu1 }
0x75ce   :  { %v7780_v13 = vpop.f32.mrf.mxu0 }
0x75cf   :  { %v7851_v7 = vadd.f32 %v7850_v42, %v7780_v13 }
0x75d0   :  { %v9347_v22 = vpop.f32.mrf.mxu0 }
0x75d1   :  { %v7854_v19 = vadd.f32 %v11626_v16, %v7851_v7 }
0x75d3   :  { %9669 = vtanh.f32 %v7854_v19 }
0x75d4   :  { %9671 = vpow2.f32 %v7367_v17 }
0x75e0   :  { %v9670_v32 = vpop.eup %9669 }
0x75e1   :  { %9368 = vmatmul.mubr.msk.f32.vlgmr.msra.gmra.mxu0 %vm177_vm2, %v9670_v32  ;;  %v9672_v40 = vpop.eup %9671 }
0x75e2   :  { %v7369_v38 = vsel %vm2681_vm12, %v9672_v40, 0.0 }
0x76a1   :  { %v7925_v49 = vpop.f32.mrf.mxu0 }
0x76a2   :  { %v7926_v1 = vadd.f32 %v11656_v35, %v7925_v49 }
0x76a3   :  { %v9369_v33 = vpop.f32.mrf.mxu0 }
0x76a4   :  { %v7929_v30 = vsel %vm2681_vm12, %v7926_v1, -inf }
0x76a5   :  { %7930 = vmax.xlane.f32.xlu0 %v7929_v30 }
0x76a9   :  { %7370 = vadd.xlane.f32.xlu0 %v7369_v38 }
0x772e   :  { %v7931_v16 = vpop.xlane.xlu0 %7930 }
0x772f   :  { %vm7932_vm0 = vcmp.eq.f32.partialorder %v7926_v1, %v7931_v16  ;;  %v7949_v48 = vsub.f32 %v7926_v1, %v7931_v16 }
0x7730   :  { %v7933_v23 = vsel %vm7932_vm0, %v10713_v43, 128 }
0x7731   :  { %v7934_v0 = vsel %vm2681_vm12, %v7933_v23, 2147483647  ;;  %v7950_v55 = vmul.f32 1.442695, %v7949_v48 }
0x7732   :  { %v7371_v56 = vpop.xlane.xlu0 %7370  ;;  %v7936_v6 = vshra.s32 %v7934_v0, 16  ;;  %v7935_v50 = vand.u32 65535, %v7934_v0 }
0x7733   :  { %9673 = vpow2.f32 %v7950_v55 }
0x7734   :  { %9675 = vrcp.f32 %v7371_v56  ;;  %v7938_v35 = vcvt.s32.f32 %v7936_v6  ;;  %v7937_v43 = vcvt.s32.f32 %v7935_v50 }
0x7736   :  { %7939 = vmin.xlane.f32.xlu1 %v7938_v35 }
0x7740   :  { %v9674_v25 = vpop.eup %9673 }
0x7741   :  { %v9676_v41 = vpop.eup %9675  ;;  %v7952_v3 = vsel %vm2681_vm12, %v9674_v25, 0.0 }
0x7742   :  { %9404 = vpush %v9676_v41  ;;  %7953 = vadd.xlane.f32.xlu1 %v7952_v3 }
0x7773   :  { %s9405_s24 = spop %9404 }
0x7774   :  { %7379 = sst [smem:[#allocation17 + $0x8]] %s9405_s24 }
0x77bf   :  { %v7940_v54 = vpop.xlane.xlu1 %7939 }
0x77c0   :  { %vm7941_vm2 = vcmp.eq.f32.partialorder %v7938_v35, %v7940_v54  ;;  %v7946_v62 = vcvt.f32.s32 %v7940_v54 }
0x77c1   :  { %v7942_v36 = vsel %vm7941_vm2, %v7937_v43, inf }
0x77c2   :  { %7943 = vmin.xlane.f32.xlu0 %v7942_v36  ;;  %v7947_v27 = vshll.u32 %v7946_v62, 16 }
0x77cb   :  { %v7954_v39 = vpop.xlane.xlu1 %7953 }
0x77cc   :  { %9677 = vrcp.f32 %v7954_v39 }
0x77d9   :  { %v9678_v9 = vpop.eup %9677 }
0x784b   :  { %v7944_v14 = vpop.xlane.xlu0 %7943 }
0x784c   :  { %v7945_v47 = vcvt.f32.s32 %v7944_v14 }
0x784e   :  { %v7948_v18 = vadd.s32 %v7947_v27, %v7945_v47 }
0x7850   :  { %9406 = vpush %v7948_v18 }
0x7851   :  { %9408 = vpush %v9678_v9 }
0x7881   :  { %s9407_s14 = spop %9406 }
0x7882   :  { %7959 = sst [smem:[#allocation16 + $0x9]] %s9407_s14  ;;  %s9409_s3 = spop %9408 }
0x7883   :  { %7962 = sst [smem:[#allocation17 + $0x9]] %s9409_s3 }
0x7884   :  { %7970 = dma.smem_to_hbm %s9855_s2, 16, %s11749_s19, [#allocation9]  }
0x7885   :  { %7978 = dma.smem_to_hbm %s9856_s6, 16, %s11750_s20, [#allocation18]  }
0x7886   :  { %9840 = dma.done.wait [#allocation9], 16  }
0x7887   :  { %9841 = vsyncadd [#allocation9], 4294967280 }
0x7888   :  { %9842 = dma.done.wait [#allocation18], 16  }
0x7889   :  { %9843 = vsyncadd [#allocation18], 4294967280 }
0x788a   :  { %7985 = sfence }
0x788b   :  { %7986 = vsyncpa [#allocation7], 1 }
0x788c   :  { %7987 = vsyncpa [#allocation12], 1 }
0x788d   :  { %7988 = vsyncpa [#allocation15], 1 }
0x788e   :  { %7989 = vsyncpa [#allocation8], 1 }
0x788f   :  { %7990 = vsyncpa [#allocation9], 1 }
0x7890   :  { %7991 = vsyncpa [#allocation18], 1 }

</bundles_post_ra>
